<compile_context>
chip_gen: v7x
topology: tpu7x:2x2x1
jax: 0.10.0
libtpu: 0.0.40
codegen_flags: <defaults>
</compile_context>

<pallas_src>
import jax
import jax.numpy as jnp
from jax.experimental import pallas as pl
from jax.experimental.pallas import tpu as pltpu


# ----------------------------------------------------------------------------
# Pallas kernel: batch_tile images per grid step.
# ----------------------------------------------------------------------------
def _resblock_kernel(x_ref, w1_ref, b1_ref, w2_ref, b2_ref, wb_ref, bb_ref,
                     o_ref, pad2_ref):
    BT, Hp, Wp, Cin = x_ref.shape              # x comes in pre-padded (+1 ring)
    H, W = Hp - 2, Wp - 2
    Cout = w1_ref.shape[1]
    Ho, Wo = H // 2, W // 2
    M = BT * H * W
    Mo = BT * Ho * Wo

    # ---- conv1: 9 accumulating MXU dots (K=Cin), bias, ReLU -----------------
    h1 = None
    for j in range(9):
        dy, dx = divmod(j, 3)
        lhs = x_ref[:, dy:dy + H, dx:dx + W, :].reshape(M, Cin)        # bf16
        p = jnp.dot(lhs, w1_ref[j * Cin:(j + 1) * Cin, :],
                    preferred_element_type=jnp.float32)
        h1 = p if h1 is None else h1 + p
    h1 = jnp.maximum(h1 + b1_ref[...], 0.0)                            # f32

    # ---- stage relu(conv1) into the padded scratch for conv2 ----------------
    # Zero only the 1-pixel halo (interior is fully overwritten).  Done every
    # step -- NOT under program_id()==0 -- so it stays correct when the
    # "parallel" grid is split across TensorCores with private scratch.
    zr = jnp.zeros((BT, 1, Wp, Cout), pad2_ref.dtype)
    zc = jnp.zeros((BT, Hp, 1, Cout), pad2_ref.dtype)
    pad2_ref[:, 0:1, :, :] = zr
    pad2_ref[:, H + 1:H + 2, :, :] = zr
    pad2_ref[:, :, 0:1, :] = zc
    pad2_ref[:, :, W + 1:W + 2, :] = zc
    pad2_ref[:, 1:H + 1, 1:W + 1, :] = (
        h1.reshape(BT, H, W, Cout).astype(pad2_ref.dtype))

    # ---- conv2: 9 accumulating MXU dots (K=Cout); w2 is pre-scaled by 0.25 --
    h2 = None
    for j in range(9):
        dy, dx = divmod(j, 3)
        lhs = pad2_ref[:, dy:dy + H, dx:dx + W, :].reshape(M, Cout)    # bf16
        p = jnp.dot(lhs, w2_ref[j * Cout:(j + 1) * Cout, :],
                    preferred_element_type=jnp.float32)
        h2 = p if h2 is None else h2 + p                               # f32

    # ---- main path 2x2 sum-pool (avg scale folded into w2) ------------------
    # W direction: merge W pairs into the lane dim and add lane slices
    # (vreg-aligned pure VALU adds when Cout % 128 == 0).
    hw = h2.reshape(BT, H, Wo, 2 * Cout)
    hw = hw[..., :Cout] + hw[..., Cout:]
    # H direction: major-dim split + index (whole-tile selects).
    hh = hw.reshape(BT, Ho, 2, Wo, Cout)
    main = (hh[:, :, 0] + hh[:, :, 1]).reshape(Mo, Cout) + b2_ref[...]

    # ---- bypass: 2x2 sum-pool of x (f32) -> 1x1 conv (0.25 folded in wb) ----
    xin = x_ref[:, 1:H + 1, 1:W + 1, :].astype(jnp.float32)   # (BT, H, W, Cin)
    xw = xin.reshape(BT, H, Wo, 2, Cin)
    xw = xw[:, :, :, 0, :] + xw[:, :, :, 1, :]
    xh = xw.reshape(BT, Ho, 2, Wo, Cin)
    xp = (xh[:, :, 0] + xh[:, :, 1]).reshape(Mo, Cin)
    byp = jnp.dot(xp.astype(wb_ref.dtype), wb_ref[...],
                  preferred_element_type=jnp.float32) + bb_ref[...]

    o_ref[...] = (main + byp).reshape(BT, Ho, Wo, Cout).astype(o_ref.dtype)


# ----------------------------------------------------------------------------
# Wrapper
# ----------------------------------------------------------------------------
def first_resblock_discriminator(x_nhwc, params, *, batch_tile=1,
                                 compute_dtype=jnp.bfloat16):
    B, H, W, Cin = x_nhwc.shape
    Cout = params["w1"].shape[-1]
    assert H % 2 == 0 and W % 2 == 0 and B % batch_tile == 0
    BT = batch_tile
    Ho, Wo = H // 2, W // 2

    # bf16 MXU operands; zero-pad once in the wrapper (layout plumbing) so the
    # kernel needs no pad1 scratch / halo handling for conv1 or the bypass.
    xc = x_nhwc.astype(compute_dtype)
    xpad = jnp.pad(xc, ((0, 0), (1, 1), (1, 1), (0, 0)))

    # Weights in im2col-tap layout; fold the 2x2 avg-pool scale (0.25, an
    # exact power of two, so bit-equivalent) into w2 and wb.  f32 biases.
    w1 = params["w1"].reshape(9 * Cin, Cout).astype(compute_dtype)
    w2 = (0.25 * params["w2"]).reshape(9 * Cout, Cout).astype(compute_dtype)
    wb = (0.25 * params["wb"]).astype(compute_dtype)
    b1 = params["b1"].astype(jnp.float32)
    b2 = params["b2"].astype(jnp.float32)
    bb = params["bb"].astype(jnp.float32)

    def const_spec(shape):
        n = len(shape)
        return pl.BlockSpec(shape, lambda b, n=n: (0,) * n)

    return pl.pallas_call(
        _resblock_kernel,
        out_shape=jax.ShapeDtypeStruct((B, Ho, Wo, Cout), jnp.float32),
        grid_spec=pltpu.PrefetchScalarGridSpec(
            num_scalar_prefetch=0,
            grid=(B // BT,),
            in_specs=[
                pl.BlockSpec((BT, H + 2, W + 2, Cin), lambda b: (b, 0, 0, 0)),
                const_spec((9 * Cin, Cout)),     # w1 (tap-major layout)
                const_spec((1, Cout)),           # b1
                const_spec((9 * Cout, Cout)),    # w2 (tap-major, 0.25 folded)
                const_spec((1, Cout)),           # b2
                const_spec((Cin, Cout)),         # bypass 1x1 weight (0.25 folded)
                const_spec((1, Cout)),           # bypass bias
            ],
            out_specs=pl.BlockSpec((BT, Ho, Wo, Cout),
                                   lambda b: (b, 0, 0, 0)),
            scratch_shapes=[
                # only remaining scratch: padded relu(conv1) feature map
                pltpu.VMEM((BT, H + 2, W + 2, Cout), compute_dtype),
            ],
        ),
        compiler_params=pltpu.CompilerParams(
            dimension_semantics=("parallel",),
            # Explicit scoped-VMEM limit (raised vs v5e's 16 MiB default);
            # tune per generation / per batch_tile at realistic shapes.
            vmem_limit_bytes=32 * 1024 * 1024),
    )(xpad, w1, b1, w2, b2, wb, bb)


# ----------------------------------------------------------------------------
# Deterministic parameter setup (glue)
# ----------------------------------------------------------------------------
def _xavier_uniform(key, kh, kw, cin, cout, gain):
    fan_in = cin * kh * kw
    fan_out = cout * kh * kw
    bound = gain * jnp.sqrt(6.0 / (fan_in + fan_out))
    return jax.random.uniform(key, (kh, kw, cin, cout), jnp.float32,
                              minval=-bound, maxval=bound)


def _conv_bias(key, cin, kh, kw, cout):
    bound = 1.0 / jnp.sqrt(cin * kh * kw * 1.0)
    return jax.random.uniform(key, (1, cout), jnp.float32,
                              minval=-bound, maxval=bound)


def _spectral_normalize(w_hwio, n_iter=50):
    # PyTorch spectral_norm divides by the largest singular value of the
    # (cout, cin*kh*kw) reshaped matrix; converged power iteration here.
    kh, kw, cin, cout = w_hwio.shape
    w2d = jnp.transpose(w_hwio, (3, 2, 0, 1)).reshape(cout, -1)
    v = jnp.ones((w2d.shape[1],), jnp.float32) / jnp.sqrt(1.0 * w2d.shape[1])
    u = w2d @ v
    u = u / (jnp.linalg.norm(u) + 1e-12)
    for _ in range(n_iter):
        v = w2d.T @ u
        v = v / (jnp.linalg.norm(v) + 1e-12)
        u = w2d @ v
        u = u / (jnp.linalg.norm(u) + 1e-12)
    sigma = jnp.dot(u, w2d @ v)
    return w_hwio / sigma


def make_params(key, cin, cout):
    ks = jax.random.split(key, 6)
    w1 = _spectral_normalize(_xavier_uniform(ks[0], 3, 3, cin, cout, 1.0))
    w2 = _spectral_normalize(_xavier_uniform(ks[1], 3, 3, cout, cout, 1.0))
    wb = _spectral_normalize(
        _xavier_uniform(ks[2], 1, 1, cin, cout, jnp.sqrt(2.0)))
    return {
        "w1": w1,                                   # (3, 3, cin, cout) HWIO
        "b1": _conv_bias(ks[3], cin, 3, 3, cout),
        "w2": w2,                                   # (3, 3, cout, cout) HWIO
        "b2": _conv_bias(ks[4], cout, 3, 3, cout),
        "wb": wb.reshape(cin, cout),                # 1x1 conv as matrix
        "bb": _conv_bias(ks[5], cin, 1, 1, cout),
    }


# ----------------------------------------------------------------------------
# Reference (same bf16-operand / f32-accumulate numerics as the kernel; this
# matches the f32 PyTorch module to within bf16 operand precision).
# ----------------------------------------------------------------------------
def reference(x_nhwc, params, compute_dtype=jnp.bfloat16):
    dn = ("NHWC", "HWIO", "NHWC")
    B, H, W, Cin = x_nhwc.shape
    Cout = params["w1"].shape[-1]
    xc = x_nhwc.astype(compute_dtype)

    h = jax.lax.conv_general_dilated(
        xc, params["w1"].astype(compute_dtype), (1, 1), "SAME",
        dimension_numbers=dn, preferred_element_type=jnp.float32)
    h = jnp.maximum(h + params["b1"].reshape(1, 1, 1, Cout), 0.0)
    h = jax.lax.conv_general_dilated(
        h.astype(compute_dtype), params["w2"].astype(compute_dtype), (1, 1),
        "SAME", dimension_numbers=dn, preferred_element_type=jnp.float32)
    h = h + params["b2"].reshape(1, 1, 1, Cout)
    main = h.reshape(B, H // 2, 2, W // 2, 2, Cout).mean(axis=(2, 4))

    xp = xc.astype(jnp.float32).reshape(
        B, H // 2, 2, W // 2, 2, Cin).mean(axis=(2, 4))
    byp = jax.lax.dot_general(
        xp.reshape(-1, Cin).astype(compute_dtype),
        params["wb"].astype(compute_dtype),
        (((1,), (0,)), ((), ())), preferred_element_type=jnp.float32)
    byp = byp.reshape(B, H // 2, W // 2, Cout) + params["bb"].reshape(1, 1, 1, Cout)
    return main + byp


if __name__ == "__main__":
    key = jax.random.PRNGKey(0)
    k_param, k_x = jax.random.split(key)

    # Small spatial/batch; Cout=128 keeps conv2 operands, the pad2 scratch and
    # the output block lane-dense (Cout % 128 == 0 recommended in general).
    B, Cin, Cout, H, W = 2, 4, 128, 16, 16
    params = make_params(k_param, Cin, Cout)

    # PyTorch-style NCHW input, converted to NHWC for the kernel.
    x_nchw = jax.random.normal(k_x, (B, Cin, H, W), jnp.float32)
    x_nhwc = jnp.transpose(x_nchw, (0, 2, 3, 1))

    out_nhwc = first_resblock_discriminator(x_nhwc, params, batch_tile=1)
    jax.block_until_ready(out_nhwc)
    out_nchw = jnp.transpose(out_nhwc, (0, 3, 1, 2))

    ref_nchw = jnp.transpose(reference(x_nhwc, params), (0, 3, 1, 2))
    assert out_nchw.shape == (B, Cout, H // 2, W // 2)
    max_err = float(jnp.max(jnp.abs(out_nchw - ref_nchw)))
    assert max_err < 1e-2, max_err

    print("KERNEL_OK")
</pallas_src>

<mosaic_0001>
module attributes {stable_mosaic.version = 11 : i64} {
  func.func @_resblock_kernel(%arg0: i32, %arg1: memref<1x18x18x4xbf16, #tpu.memory_space<vmem>>, %arg2: memref<36x128xbf16, #tpu.memory_space<vmem>>, %arg3: memref<1x128xf32, #tpu.memory_space<vmem>>, %arg4: memref<1152x128xbf16, #tpu.memory_space<vmem>>, %arg5: memref<1x128xf32, #tpu.memory_space<vmem>>, %arg6: memref<4x128xbf16, #tpu.memory_space<vmem>>, %arg7: memref<1x128xf32, #tpu.memory_space<vmem>>, %arg8: memref<1x8x8x128xf32, #tpu.memory_space<vmem>>, %arg9: memref<1x18x18x128xbf16, #tpu.memory_space<vmem>>) attributes {dimension_semantics = [#tpu.dimension_semantics<parallel>], iteration_bounds = array<i64: 2>, scalar_prefetch = 0 : i64, scratch_operands = 1 : i64, tpu.core_type = #tpu.core_type<tc>, window_params = [{transform_indices = @transform_0, window_bounds = array<i64: 1, 18, 18, 4>}, {pipeline_mode = #tpu.pipeline_mode<synchronous>, transform_indices = @transform_1, window_bounds = array<i64: 36, 128>}, {pipeline_mode = #tpu.pipeline_mode<synchronous>, transform_indices = @transform_2, window_bounds = array<i64: 1, 128>}, {pipeline_mode = #tpu.pipeline_mode<synchronous>, transform_indices = @transform_3, window_bounds = array<i64: 1152, 128>}, {pipeline_mode = #tpu.pipeline_mode<synchronous>, transform_indices = @transform_4, window_bounds = array<i64: 1, 128>}, {pipeline_mode = #tpu.pipeline_mode<synchronous>, transform_indices = @transform_5, window_bounds = array<i64: 4, 128>}, {pipeline_mode = #tpu.pipeline_mode<synchronous>, transform_indices = @transform_6, window_bounds = array<i64: 1, 128>}, {transform_indices = @transform_7, window_bounds = array<i64: 1, 8, 8, 128>}]} {
    %c0 = arith.constant 0 : index
    %c0_0 = arith.constant 0 : index
    %c0_1 = arith.constant 0 : index
    %c0_2 = arith.constant 0 : index
    %0 = vector.load %arg1[%c0, %c0_0, %c0_1, %c0_2] : memref<1x18x18x4xbf16, #tpu.memory_space<vmem>>, vector<1x16x16x4xbf16>
    %1 = vector.shape_cast %0 : vector<1x16x16x4xbf16> to vector<256x4xbf16>
    %c0_3 = arith.constant 0 : index
    %c0_4 = arith.constant 0 : index
    %2 = vector.load %arg2[%c0_3, %c0_4] : memref<36x128xbf16, #tpu.memory_space<vmem>>, vector<4x128xbf16>
    %cst = arith.constant dense<0.000000e+00> : vector<256x128xf32>
    %3 = tpu.matmul %1, %2, %cst {dimension_numbers = #tpu.dot_dimension_numbers<[1], [0], [0], [1], [0, 0, 1, 1], [], []>} : vector<256x4xbf16>, vector<4x128xbf16>, vector<256x128xf32> -> vector<256x128xf32>
    %c0_5 = arith.constant 0 : index
    %c0_6 = arith.constant 0 : index
    %c1 = arith.constant 1 : index
    %c0_7 = arith.constant 0 : index
    %4 = vector.load %arg1[%c0_5, %c0_6, %c1, %c0_7] : memref<1x18x18x4xbf16, #tpu.memory_space<vmem>>, vector<1x16x16x4xbf16>
    %5 = vector.shape_cast %4 : vector<1x16x16x4xbf16> to vector<256x4xbf16>
    %c4 = arith.constant 4 : index
    %c0_8 = arith.constant 0 : index
    %6 = vector.load %arg2[%c4, %c0_8] : memref<36x128xbf16, #tpu.memory_space<vmem>>, vector<4x128xbf16>
    %cst_9 = arith.constant dense<0.000000e+00> : vector<256x128xf32>
    %7 = tpu.matmul %5, %6, %cst_9 {dimension_numbers = #tpu.dot_dimension_numbers<[1], [0], [0], [1], [0, 0, 1, 1], [], []>} : vector<256x4xbf16>, vector<4x128xbf16>, vector<256x128xf32> -> vector<256x128xf32>
    %8 = arith.addf %3, %7 : vector<256x128xf32>
    %c0_10 = arith.constant 0 : index
    %c0_11 = arith.constant 0 : index
    %c2 = arith.constant 2 : index
    %c0_12 = arith.constant 0 : index
    %9 = vector.load %arg1[%c0_10, %c0_11, %c2, %c0_12] : memref<1x18x18x4xbf16, #tpu.memory_space<vmem>>, vector<1x16x16x4xbf16>
    %10 = vector.shape_cast %9 : vector<1x16x16x4xbf16> to vector<256x4xbf16>
    %c8 = arith.constant 8 : index
    %c0_13 = arith.constant 0 : index
    %11 = vector.load %arg2[%c8, %c0_13] : memref<36x128xbf16, #tpu.memory_space<vmem>>, vector<4x128xbf16>
    %cst_14 = arith.constant dense<0.000000e+00> : vector<256x128xf32>
    %12 = tpu.matmul %10, %11, %cst_14 {dimension_numbers = #tpu.dot_dimension_numbers<[1], [0], [0], [1], [0, 0, 1, 1], [], []>} : vector<256x4xbf16>, vector<4x128xbf16>, vector<256x128xf32> -> vector<256x128xf32>
    %13 = arith.addf %8, %12 : vector<256x128xf32>
    %c0_15 = arith.constant 0 : index
    %c1_16 = arith.constant 1 : index
    %c0_17 = arith.constant 0 : index
    %c0_18 = arith.constant 0 : index
    %14 = vector.load %arg1[%c0_15, %c1_16, %c0_17, %c0_18] : memref<1x18x18x4xbf16, #tpu.memory_space<vmem>>, vector<1x16x16x4xbf16>
    %15 = vector.shape_cast %14 : vector<1x16x16x4xbf16> to vector<256x4xbf16>
    %c12 = arith.constant 12 : index
    %c0_19 = arith.constant 0 : index
    %16 = vector.load %arg2[%c12, %c0_19] : memref<36x128xbf16, #tpu.memory_space<vmem>>, vector<4x128xbf16>
    %cst_20 = arith.constant dense<0.000000e+00> : vector<256x128xf32>
    %17 = tpu.matmul %15, %16, %cst_20 {dimension_numbers = #tpu.dot_dimension_numbers<[1], [0], [0], [1], [0, 0, 1, 1], [], []>} : vector<256x4xbf16>, vector<4x128xbf16>, vector<256x128xf32> -> vector<256x128xf32>
    %18 = arith.addf %13, %17 : vector<256x128xf32>
    %c0_21 = arith.constant 0 : index
    %c1_22 = arith.constant 1 : index
    %c1_23 = arith.constant 1 : index
    %c0_24 = arith.constant 0 : index
    %19 = vector.load %arg1[%c0_21, %c1_22, %c1_23, %c0_24] : memref<1x18x18x4xbf16, #tpu.memory_space<vmem>>, vector<1x16x16x4xbf16>
    %20 = vector.shape_cast %19 : vector<1x16x16x4xbf16> to vector<256x4xbf16>
    %c16 = arith.constant 16 : index
    %c0_25 = arith.constant 0 : index
    %21 = vector.load %arg2[%c16, %c0_25] : memref<36x128xbf16, #tpu.memory_space<vmem>>, vector<4x128xbf16>
    %cst_26 = arith.constant dense<0.000000e+00> : vector<256x128xf32>
    %22 = tpu.matmul %20, %21, %cst_26 {dimension_numbers = #tpu.dot_dimension_numbers<[1], [0], [0], [1], [0, 0, 1, 1], [], []>} : vector<256x4xbf16>, vector<4x128xbf16>, vector<256x128xf32> -> vector<256x128xf32>
    %23 = arith.addf %18, %22 : vector<256x128xf32>
    %c0_27 = arith.constant 0 : index
    %c1_28 = arith.constant 1 : index
    %c2_29 = arith.constant 2 : index
    %c0_30 = arith.constant 0 : index
    %24 = vector.load %arg1[%c0_27, %c1_28, %c2_29, %c0_30] : memref<1x18x18x4xbf16, #tpu.memory_space<vmem>>, vector<1x16x16x4xbf16>
    %25 = vector.shape_cast %24 : vector<1x16x16x4xbf16> to vector<256x4xbf16>
    %c20 = arith.constant 20 : index
    %c0_31 = arith.constant 0 : index
    %26 = vector.load %arg2[%c20, %c0_31] : memref<36x128xbf16, #tpu.memory_space<vmem>>, vector<4x128xbf16>
    %cst_32 = arith.constant dense<0.000000e+00> : vector<256x128xf32>
    %27 = tpu.matmul %25, %26, %cst_32 {dimension_numbers = #tpu.dot_dimension_numbers<[1], [0], [0], [1], [0, 0, 1, 1], [], []>} : vector<256x4xbf16>, vector<4x128xbf16>, vector<256x128xf32> -> vector<256x128xf32>
    %28 = arith.addf %23, %27 : vector<256x128xf32>
    %c0_33 = arith.constant 0 : index
    %c2_34 = arith.constant 2 : index
    %c0_35 = arith.constant 0 : index
    %c0_36 = arith.constant 0 : index
    %29 = vector.load %arg1[%c0_33, %c2_34, %c0_35, %c0_36] : memref<1x18x18x4xbf16, #tpu.memory_space<vmem>>, vector<1x16x16x4xbf16>
    %30 = vector.shape_cast %29 : vector<1x16x16x4xbf16> to vector<256x4xbf16>
    %c24 = arith.constant 24 : index
    %c0_37 = arith.constant 0 : index
    %31 = vector.load %arg2[%c24, %c0_37] : memref<36x128xbf16, #tpu.memory_space<vmem>>, vector<4x128xbf16>
    %cst_38 = arith.constant dense<0.000000e+00> : vector<256x128xf32>
    %32 = tpu.matmul %30, %31, %cst_38 {dimension_numbers = #tpu.dot_dimension_numbers<[1], [0], [0], [1], [0, 0, 1, 1], [], []>} : vector<256x4xbf16>, vector<4x128xbf16>, vector<256x128xf32> -> vector<256x128xf32>
    %33 = arith.addf %28, %32 : vector<256x128xf32>
    %c0_39 = arith.constant 0 : index
    %c2_40 = arith.constant 2 : index
    %c1_41 = arith.constant 1 : index
    %c0_42 = arith.constant 0 : index
    %34 = vector.load %arg1[%c0_39, %c2_40, %c1_41, %c0_42] : memref<1x18x18x4xbf16, #tpu.memory_space<vmem>>, vector<1x16x16x4xbf16>
    %35 = vector.shape_cast %34 : vector<1x16x16x4xbf16> to vector<256x4xbf16>
    %c28 = arith.constant 28 : index
    %c0_43 = arith.constant 0 : index
    %36 = vector.load %arg2[%c28, %c0_43] : memref<36x128xbf16, #tpu.memory_space<vmem>>, vector<4x128xbf16>
    %cst_44 = arith.constant dense<0.000000e+00> : vector<256x128xf32>
    %37 = tpu.matmul %35, %36, %cst_44 {dimension_numbers = #tpu.dot_dimension_numbers<[1], [0], [0], [1], [0, 0, 1, 1], [], []>} : vector<256x4xbf16>, vector<4x128xbf16>, vector<256x128xf32> -> vector<256x128xf32>
    %38 = arith.addf %33, %37 : vector<256x128xf32>
    %c0_45 = arith.constant 0 : index
    %c2_46 = arith.constant 2 : index
    %c2_47 = arith.constant 2 : index
    %c0_48 = arith.constant 0 : index
    %39 = vector.load %arg1[%c0_45, %c2_46, %c2_47, %c0_48] : memref<1x18x18x4xbf16, #tpu.memory_space<vmem>>, vector<1x16x16x4xbf16>
    %40 = vector.shape_cast %39 : vector<1x16x16x4xbf16> to vector<256x4xbf16>
    %c32 = arith.constant 32 : index
    %c0_49 = arith.constant 0 : index
    %41 = vector.load %arg2[%c32, %c0_49] : memref<36x128xbf16, #tpu.memory_space<vmem>>, vector<4x128xbf16>
    %cst_50 = arith.constant dense<0.000000e+00> : vector<256x128xf32>
    %42 = tpu.matmul %40, %41, %cst_50 {dimension_numbers = #tpu.dot_dimension_numbers<[1], [0], [0], [1], [0, 0, 1, 1], [], []>} : vector<256x4xbf16>, vector<4x128xbf16>, vector<256x128xf32> -> vector<256x128xf32>
    %43 = arith.addf %38, %42 : vector<256x128xf32>
    %c0_51 = arith.constant 0 : index
    %c0_52 = arith.constant 0 : index
    %44 = vector.load %arg3[%c0_51, %c0_52] : memref<1x128xf32, #tpu.memory_space<vmem>>, vector<1x128xf32>
    %45 = vector.broadcast %44 : vector<1x128xf32> to vector<256x128xf32>
    %46 = arith.addf %43, %45 : vector<256x128xf32>
    %cst_53 = arith.constant 0.000000e+00 : f32
    %47 = vector.broadcast %cst_53 : f32 to vector<256x128xf32>
    %48 = arith.maximumf %46, %47 : vector<256x128xf32>
    %cst_54 = arith.constant 0.000000e+00 : bf16
    %49 = vector.broadcast %cst_54 : bf16 to vector<1x1x18x128xbf16>
    %cst_55 = arith.constant 0.000000e+00 : bf16
    %50 = vector.broadcast %cst_55 : bf16 to vector<1x18x1x128xbf16>
    %c0_56 = arith.constant 0 : index
    %c0_57 = arith.constant 0 : index
    %c0_58 = arith.constant 0 : index
    %c0_59 = arith.constant 0 : index
    %51 = vector.load %arg9[%c0_56, %c0_57, %c0_58, %c0_59] : memref<1x18x18x128xbf16, #tpu.memory_space<vmem>>, vector<1x1x18x128xbf16>
    tpu.vector_store %arg9[%c0_56, %c0_57, %c0_58, %c0_59], %49 {strides = array<i32>} : memref<1x18x18x128xbf16, #tpu.memory_space<vmem>>, vector<1x1x18x128xbf16>,
    %c0_60 = arith.constant 0 : index
    %c17 = arith.constant 17 : index
    %c0_61 = arith.constant 0 : index
    %c0_62 = arith.constant 0 : index
    %52 = vector.load %arg9[%c0_60, %c17, %c0_61, %c0_62] : memref<1x18x18x128xbf16, #tpu.memory_space<vmem>>, vector<1x1x18x128xbf16>
    tpu.vector_store %arg9[%c0_60, %c17, %c0_61, %c0_62], %49 {strides = array<i32>} : memref<1x18x18x128xbf16, #tpu.memory_space<vmem>>, vector<1x1x18x128xbf16>,
    %c0_63 = arith.constant 0 : index
    %c0_64 = arith.constant 0 : index
    %c0_65 = arith.constant 0 : index
    %c0_66 = arith.constant 0 : index
    %53 = vector.load %arg9[%c0_63, %c0_64, %c0_65, %c0_66] : memref<1x18x18x128xbf16, #tpu.memory_space<vmem>>, vector<1x18x1x128xbf16>
    tpu.vector_store %arg9[%c0_63, %c0_64, %c0_65, %c0_66], %50 {strides = array<i32>} : memref<1x18x18x128xbf16, #tpu.memory_space<vmem>>, vector<1x18x1x128xbf16>,
    %c0_67 = arith.constant 0 : index
    %c0_68 = arith.constant 0 : index
    %c17_69 = arith.constant 17 : index
    %c0_70 = arith.constant 0 : index
    %54 = vector.load %arg9[%c0_67, %c0_68, %c17_69, %c0_70] : memref<1x18x18x128xbf16, #tpu.memory_space<vmem>>, vector<1x18x1x128xbf16>
    tpu.vector_store %arg9[%c0_67, %c0_68, %c17_69, %c0_70], %50 {strides = array<i32>} : memref<1x18x18x128xbf16, #tpu.memory_space<vmem>>, vector<1x18x1x128xbf16>,
    %55 = vector.shape_cast %48 : vector<256x128xf32> to vector<1x16x16x128xf32>
    %56 = arith.truncf %55 : vector<1x16x16x128xf32> to vector<1x16x16x128xbf16>
    %c0_71 = arith.constant 0 : index
    %c1_72 = arith.constant 1 : index
    %c1_73 = arith.constant 1 : index
    %c0_74 = arith.constant 0 : index
    %57 = vector.load %arg9[%c0_71, %c1_72, %c1_73, %c0_74] : memref<1x18x18x128xbf16, #tpu.memory_space<vmem>>, vector<1x16x16x128xbf16>
    tpu.vector_store %arg9[%c0_71, %c1_72, %c1_73, %c0_74], %56 {strides = array<i32>} : memref<1x18x18x128xbf16, #tpu.memory_space<vmem>>, vector<1x16x16x128xbf16>,
    %c0_75 = arith.constant 0 : index
    %c0_76 = arith.constant 0 : index
    %c0_77 = arith.constant 0 : index
    %c0_78 = arith.constant 0 : index
    %58 = vector.load %arg9[%c0_75, %c0_76, %c0_77, %c0_78] : memref<1x18x18x128xbf16, #tpu.memory_space<vmem>>, vector<1x16x16x128xbf16>
    %59 = vector.shape_cast %58 : vector<1x16x16x128xbf16> to vector<256x128xbf16>
    %c0_79 = arith.constant 0 : index
    %c0_80 = arith.constant 0 : index
    %60 = vector.load %arg4[%c0_79, %c0_80] : memref<1152x128xbf16, #tpu.memory_space<vmem>>, vector<128x128xbf16>
    %cst_81 = arith.constant dense<0.000000e+00> : vector<256x128xf32>
    %61 = tpu.matmul %59, %60, %cst_81 {dimension_numbers = #tpu.dot_dimension_numbers<[1], [0], [0], [1], [0, 0, 1, 1], [], []>} : vector<256x128xbf16>, vector<128x128xbf16>, vector<256x128xf32> -> vector<256x128xf32>
    %c0_82 = arith.constant 0 : index
    %c0_83 = arith.constant 0 : index
    %c1_84 = arith.constant 1 : index
    %c0_85 = arith.constant 0 : index
    %62 = vector.load %arg9[%c0_82, %c0_83, %c1_84, %c0_85] : memref<1x18x18x128xbf16, #tpu.memory_space<vmem>>, vector<1x16x16x128xbf16>
    %63 = vector.shape_cast %62 : vector<1x16x16x128xbf16> to vector<256x128xbf16>
    %c128 = arith.constant 128 : index
    %c0_86 = arith.constant 0 : index
    %64 = vector.load %arg4[%c128, %c0_86] : memref<1152x128xbf16, #tpu.memory_space<vmem>>, vector<128x128xbf16>
    %cst_87 = arith.constant dense<0.000000e+00> : vector<256x128xf32>
    %65 = tpu.matmul %63, %64, %cst_87 {dimension_numbers = #tpu.dot_dimension_numbers<[1], [0], [0], [1], [0, 0, 1, 1], [], []>} : vector<256x128xbf16>, vector<128x128xbf16>, vector<256x128xf32> -> vector<256x128xf32>
    %66 = arith.addf %61, %65 : vector<256x128xf32>
    %c0_88 = arith.constant 0 : index
    %c0_89 = arith.constant 0 : index
    %c2_90 = arith.constant 2 : index
    %c0_91 = arith.constant 0 : index
    %67 = vector.load %arg9[%c0_88, %c0_89, %c2_90, %c0_91] : memref<1x18x18x128xbf16, #tpu.memory_space<vmem>>, vector<1x16x16x128xbf16>
    %68 = vector.shape_cast %67 : vector<1x16x16x128xbf16> to vector<256x128xbf16>
    %c256 = arith.constant 256 : index
    %c0_92 = arith.constant 0 : index
    %69 = vector.load %arg4[%c256, %c0_92] : memref<1152x128xbf16, #tpu.memory_space<vmem>>, vector<128x128xbf16>
    %cst_93 = arith.constant dense<0.000000e+00> : vector<256x128xf32>
    %70 = tpu.matmul %68, %69, %cst_93 {dimension_numbers = #tpu.dot_dimension_numbers<[1], [0], [0], [1], [0, 0, 1, 1], [], []>} : vector<256x128xbf16>, vector<128x128xbf16>, vector<256x128xf32> -> vector<256x128xf32>
    %71 = arith.addf %66, %70 : vector<256x128xf32>
    %c0_94 = arith.constant 0 : index
    %c1_95 = arith.constant 1 : index
    %c0_96 = arith.constant 0 : index
    %c0_97 = arith.constant 0 : index
    %72 = vector.load %arg9[%c0_94, %c1_95, %c0_96, %c0_97] : memref<1x18x18x128xbf16, #tpu.memory_space<vmem>>, vector<1x16x16x128xbf16>
    %73 = vector.shape_cast %72 : vector<1x16x16x128xbf16> to vector<256x128xbf16>
    %c384 = arith.constant 384 : index
    %c0_98 = arith.constant 0 : index
    %74 = vector.load %arg4[%c384, %c0_98] : memref<1152x128xbf16, #tpu.memory_space<vmem>>, vector<128x128xbf16>
    %cst_99 = arith.constant dense<0.000000e+00> : vector<256x128xf32>
    %75 = tpu.matmul %73, %74, %cst_99 {dimension_numbers = #tpu.dot_dimension_numbers<[1], [0], [0], [1], [0, 0, 1, 1], [], []>} : vector<256x128xbf16>, vector<128x128xbf16>, vector<256x128xf32> -> vector<256x128xf32>
    %76 = arith.addf %71, %75 : vector<256x128xf32>
    %c0_100 = arith.constant 0 : index
    %c1_101 = arith.constant 1 : index
    %c1_102 = arith.constant 1 : index
    %c0_103 = arith.constant 0 : index
    %77 = vector.load %arg9[%c0_100, %c1_101, %c1_102, %c0_103] : memref<1x18x18x128xbf16, #tpu.memory_space<vmem>>, vector<1x16x16x128xbf16>
    %78 = vector.shape_cast %77 : vector<1x16x16x128xbf16> to vector<256x128xbf16>
    %c512 = arith.constant 512 : index
    %c0_104 = arith.constant 0 : index
    %79 = vector.load %arg4[%c512, %c0_104] : memref<1152x128xbf16, #tpu.memory_space<vmem>>, vector<128x128xbf16>
    %cst_105 = arith.constant dense<0.000000e+00> : vector<256x128xf32>
    %80 = tpu.matmul %78, %79, %cst_105 {dimension_numbers = #tpu.dot_dimension_numbers<[1], [0], [0], [1], [0, 0, 1, 1], [], []>} : vector<256x128xbf16>, vector<128x128xbf16>, vector<256x128xf32> -> vector<256x128xf32>
    %81 = arith.addf %76, %80 : vector<256x128xf32>
    %c0_106 = arith.constant 0 : index
    %c1_107 = arith.constant 1 : index
    %c2_108 = arith.constant 2 : index
    %c0_109 = arith.constant 0 : index
    %82 = vector.load %arg9[%c0_106, %c1_107, %c2_108, %c0_109] : memref<1x18x18x128xbf16, #tpu.memory_space<vmem>>, vector<1x16x16x128xbf16>
    %83 = vector.shape_cast %82 : vector<1x16x16x128xbf16> to vector<256x128xbf16>
    %c640 = arith.constant 640 : index
    %c0_110 = arith.constant 0 : index
    %84 = vector.load %arg4[%c640, %c0_110] : memref<1152x128xbf16, #tpu.memory_space<vmem>>, vector<128x128xbf16>
    %cst_111 = arith.constant dense<0.000000e+00> : vector<256x128xf32>
    %85 = tpu.matmul %83, %84, %cst_111 {dimension_numbers = #tpu.dot_dimension_numbers<[1], [0], [0], [1], [0, 0, 1, 1], [], []>} : vector<256x128xbf16>, vector<128x128xbf16>, vector<256x128xf32> -> vector<256x128xf32>
    %86 = arith.addf %81, %85 : vector<256x128xf32>
    %c0_112 = arith.constant 0 : index
    %c2_113 = arith.constant 2 : index
    %c0_114 = arith.constant 0 : index
    %c0_115 = arith.constant 0 : index
    %87 = vector.load %arg9[%c0_112, %c2_113, %c0_114, %c0_115] : memref<1x18x18x128xbf16, #tpu.memory_space<vmem>>, vector<1x16x16x128xbf16>
    %88 = vector.shape_cast %87 : vector<1x16x16x128xbf16> to vector<256x128xbf16>
    %c768 = arith.constant 768 : index
    %c0_116 = arith.constant 0 : index
    %89 = vector.load %arg4[%c768, %c0_116] : memref<1152x128xbf16, #tpu.memory_space<vmem>>, vector<128x128xbf16>
    %cst_117 = arith.constant dense<0.000000e+00> : vector<256x128xf32>
    %90 = tpu.matmul %88, %89, %cst_117 {dimension_numbers = #tpu.dot_dimension_numbers<[1], [0], [0], [1], [0, 0, 1, 1], [], []>} : vector<256x128xbf16>, vector<128x128xbf16>, vector<256x128xf32> -> vector<256x128xf32>
    %91 = arith.addf %86, %90 : vector<256x128xf32>
    %c0_118 = arith.constant 0 : index
    %c2_119 = arith.constant 2 : index
    %c1_120 = arith.constant 1 : index
    %c0_121 = arith.constant 0 : index
    %92 = vector.load %arg9[%c0_118, %c2_119, %c1_120, %c0_121] : memref<1x18x18x128xbf16, #tpu.memory_space<vmem>>, vector<1x16x16x128xbf16>
    %93 = vector.shape_cast %92 : vector<1x16x16x128xbf16> to vector<256x128xbf16>
    %c896 = arith.constant 896 : index
    %c0_122 = arith.constant 0 : index
    %94 = vector.load %arg4[%c896, %c0_122] : memref<1152x128xbf16, #tpu.memory_space<vmem>>, vector<128x128xbf16>
    %cst_123 = arith.constant dense<0.000000e+00> : vector<256x128xf32>
    %95 = tpu.matmul %93, %94, %cst_123 {dimension_numbers = #tpu.dot_dimension_numbers<[1], [0], [0], [1], [0, 0, 1, 1], [], []>} : vector<256x128xbf16>, vector<128x128xbf16>, vector<256x128xf32> -> vector<256x128xf32>
    %96 = arith.addf %91, %95 : vector<256x128xf32>
    %c0_124 = arith.constant 0 : index
    %c2_125 = arith.constant 2 : index
    %c2_126 = arith.constant 2 : index
    %c0_127 = arith.constant 0 : index
    %97 = vector.load %arg9[%c0_124, %c2_125, %c2_126, %c0_127] : memref<1x18x18x128xbf16, #tpu.memory_space<vmem>>, vector<1x16x16x128xbf16>
    %98 = vector.shape_cast %97 : vector<1x16x16x128xbf16> to vector<256x128xbf16>
    %c1024 = arith.constant 1024 : index
    %c0_128 = arith.constant 0 : index
    %99 = vector.load %arg4[%c1024, %c0_128] : memref<1152x128xbf16, #tpu.memory_space<vmem>>, vector<128x128xbf16>
    %cst_129 = arith.constant dense<0.000000e+00> : vector<256x128xf32>
    %100 = tpu.matmul %98, %99, %cst_129 {dimension_numbers = #tpu.dot_dimension_numbers<[1], [0], [0], [1], [0, 0, 1, 1], [], []>} : vector<256x128xbf16>, vector<128x128xbf16>, vector<256x128xf32> -> vector<256x128xf32>
    %101 = arith.addf %96, %100 : vector<256x128xf32>
    %102 = vector.shape_cast %101 : vector<256x128xf32> to vector<1x16x8x256xf32>
    %103 = vector.extract_strided_slice %102 {offsets = [0, 0, 0, 0], sizes = [1, 16, 8, 128], strides = [1, 1, 1, 1]} : vector<1x16x8x256xf32> to vector<1x16x8x128xf32>
    %104 = vector.extract_strided_slice %102 {offsets = [0, 0, 0, 128], sizes = [1, 16, 8, 128], strides = [1, 1, 1, 1]} : vector<1x16x8x256xf32> to vector<1x16x8x128xf32>
    %105 = arith.addf %103, %104 : vector<1x16x8x128xf32>
    %106 = vector.shape_cast %105 : vector<1x16x8x128xf32> to vector<1x8x2x8x128xf32>
    %107 = vector.extract_strided_slice %106 {offsets = [0, 0, 0, 0, 0], sizes = [1, 8, 1, 8, 128], strides = [1, 1, 1, 1, 1]} : vector<1x8x2x8x128xf32> to vector<1x8x1x8x128xf32>
    %108 = vector.shape_cast %107 : vector<1x8x1x8x128xf32> to vector<1x8x8x128xf32>
    %109 = vector.extract_strided_slice %106 {offsets = [0, 0, 1, 0, 0], sizes = [1, 8, 1, 8, 128], strides = [1, 1, 1, 1, 1]} : vector<1x8x2x8x128xf32> to vector<1x8x1x8x128xf32>
    %110 = vector.shape_cast %109 : vector<1x8x1x8x128xf32> to vector<1x8x8x128xf32>
    %111 = arith.addf %108, %110 : vector<1x8x8x128xf32>
    %112 = vector.shape_cast %111 : vector<1x8x8x128xf32> to vector<64x128xf32>
    %c0_130 = arith.constant 0 : index
    %c0_131 = arith.constant 0 : index
    %113 = vector.load %arg5[%c0_130, %c0_131] : memref<1x128xf32, #tpu.memory_space<vmem>>, vector<1x128xf32>
    %114 = vector.broadcast %113 : vector<1x128xf32> to vector<64x128xf32>
    %115 = arith.addf %112, %114 : vector<64x128xf32>
    %c0_132 = arith.constant 0 : index
    %c1_133 = arith.constant 1 : index
    %c1_134 = arith.constant 1 : index
    %c0_135 = arith.constant 0 : index
    %116 = vector.load %arg1[%c0_132, %c1_133, %c1_134, %c0_135] : memref<1x18x18x4xbf16, #tpu.memory_space<vmem>>, vector<1x16x16x4xbf16>
    %117 = arith.extf %116 : vector<1x16x16x4xbf16> to vector<1x16x16x4xf32>
    %118 = vector.shape_cast %117 : vector<1x16x16x4xf32> to vector<1x16x8x2x4xf32>
    %119 = vector.extract_strided_slice %118 {offsets = [0, 0, 0, 0, 0], sizes = [1, 16, 8, 1, 4], strides = [1, 1, 1, 1, 1]} : vector<1x16x8x2x4xf32> to vector<1x16x8x1x4xf32>
    %120 = vector.shape_cast %119 : vector<1x16x8x1x4xf32> to vector<1x16x8x4xf32>
    %121 = vector.extract_strided_slice %118 {offsets = [0, 0, 0, 1, 0], sizes = [1, 16, 8, 1, 4], strides = [1, 1, 1, 1, 1]} : vector<1x16x8x2x4xf32> to vector<1x16x8x1x4xf32>
    %122 = vector.shape_cast %121 : vector<1x16x8x1x4xf32> to vector<1x16x8x4xf32>
    %123 = arith.addf %120, %122 : vector<1x16x8x4xf32>
    %124 = vector.shape_cast %123 : vector<1x16x8x4xf32> to vector<1x8x2x8x4xf32>
    %125 = vector.extract_strided_slice %124 {offsets = [0, 0, 0, 0, 0], sizes = [1, 8, 1, 8, 4], strides = [1, 1, 1, 1, 1]} : vector<1x8x2x8x4xf32> to vector<1x8x1x8x4xf32>
    %126 = vector.shape_cast %125 : vector<1x8x1x8x4xf32> to vector<1x8x8x4xf32>
    %127 = vector.extract_strided_slice %124 {offsets = [0, 0, 1, 0, 0], sizes = [1, 8, 1, 8, 4], strides = [1, 1, 1, 1, 1]} : vector<1x8x2x8x4xf32> to vector<1x8x1x8x4xf32>
    %128 = vector.shape_cast %127 : vector<1x8x1x8x4xf32> to vector<1x8x8x4xf32>
    %129 = arith.addf %126, %128 : vector<1x8x8x4xf32>
    %130 = vector.shape_cast %129 : vector<1x8x8x4xf32> to vector<64x4xf32>
    %131 = arith.truncf %130 : vector<64x4xf32> to vector<64x4xbf16>
    %c0_136 = arith.constant 0 : index
    %c0_137 = arith.constant 0 : index
    %132 = vector.load %arg6[%c0_136, %c0_137] : memref<4x128xbf16, #tpu.memory_space<vmem>>, vector<4x128xbf16>
    %cst_138 = arith.constant dense<0.000000e+00> : vector<64x128xf32>
    %133 = tpu.matmul %131, %132, %cst_138 {dimension_numbers = #tpu.dot_dimension_numbers<[1], [0], [0], [1], [0, 0, 1, 1], [], []>} : vector<64x4xbf16>, vector<4x128xbf16>, vector<64x128xf32> -> vector<64x128xf32>
    %c0_139 = arith.constant 0 : index
    %c0_140 = arith.constant 0 : index
    %134 = vector.load %arg7[%c0_139, %c0_140] : memref<1x128xf32, #tpu.memory_space<vmem>>, vector<1x128xf32>
    %135 = vector.broadcast %134 : vector<1x128xf32> to vector<64x128xf32>
    %136 = arith.addf %133, %135 : vector<64x128xf32>
    %137 = arith.addf %115, %136 : vector<64x128xf32>
    %138 = vector.shape_cast %137 : vector<64x128xf32> to vector<1x8x8x128xf32>
    %c0_141 = arith.constant 0 : index
    %c0_142 = arith.constant 0 : index
    %c0_143 = arith.constant 0 : index
    %c0_144 = arith.constant 0 : index
    %139 = vector.load %arg8[%c0_141, %c0_142, %c0_143, %c0_144] : memref<1x8x8x128xf32, #tpu.memory_space<vmem>>, vector<1x8x8x128xf32>
    tpu.vector_store %arg8[%c0_141, %c0_142, %c0_143, %c0_144], %138 {strides = array<i32>} : memref<1x8x8x128xf32, #tpu.memory_space<vmem>>, vector<1x8x8x128xf32>,
    return
  }
  func.func @transform_0(%arg0: i32) -> (i32, i32, i32, i32) {
    %c0_i32 = arith.constant 0 : i32
    %c0_i32_0 = arith.constant 0 : i32
    %c0_i32_1 = arith.constant 0 : i32
    %c0_i32_2 = arith.constant 0 : i32
    return %arg0, %c0_i32, %c0_i32_0, %c0_i32_1 : i32, i32, i32, i32
  }
  func.func @transform_1(%arg0: i32) -> (i32, i32) {
    %c0_i32 = arith.constant 0 : i32
    %c0_i32_0 = arith.constant 0 : i32
    %c0_i32_1 = arith.constant 0 : i32
    return %c0_i32, %c0_i32_0 : i32, i32
  }
  func.func @transform_2(%arg0: i32) -> (i32, i32) {
    %c0_i32 = arith.constant 0 : i32
    %c0_i32_0 = arith.constant 0 : i32
    %c0_i32_1 = arith.constant 0 : i32
    return %c0_i32, %c0_i32_0 : i32, i32
  }
  func.func @transform_3(%arg0: i32) -> (i32, i32) {
    %c0_i32 = arith.constant 0 : i32
    %c0_i32_0 = arith.constant 0 : i32
    %c0_i32_1 = arith.constant 0 : i32
    return %c0_i32, %c0_i32_0 : i32, i32
  }
  func.func @transform_4(%arg0: i32) -> (i32, i32) {
    %c0_i32 = arith.constant 0 : i32
    %c0_i32_0 = arith.constant 0 : i32
    %c0_i32_1 = arith.constant 0 : i32
    return %c0_i32, %c0_i32_0 : i32, i32
  }
  func.func @transform_5(%arg0: i32) -> (i32, i32) {
    %c0_i32 = arith.constant 0 : i32
    %c0_i32_0 = arith.constant 0 : i32
    %c0_i32_1 = arith.constant 0 : i32
    return %c0_i32, %c0_i32_0 : i32, i32
  }
  func.func @transform_6(%arg0: i32) -> (i32, i32) {
    %c0_i32 = arith.constant 0 : i32
    %c0_i32_0 = arith.constant 0 : i32
    %c0_i32_1 = arith.constant 0 : i32
    return %c0_i32, %c0_i32_0 : i32, i32
  }
  func.func @transform_7(%arg0: i32) -> (i32, i32, i32, i32) {
    %c0_i32 = arith.constant 0 : i32
    %c0_i32_0 = arith.constant 0 : i32
    %c0_i32_1 = arith.constant 0 : i32
    %c0_i32_2 = arith.constant 0 : i32
    return %arg0, %c0_i32, %c0_i32_0, %c0_i32_1 : i32, i32, i32, i32
  }
}

</mosaic_0001>

<bundles_post_ra>
// kernel: tpu_custom_call.1
= control target key start
LH: loop header
LB: loop body
LE: loop exit
PB: predicated region body
PF: predicated region fallthrough
CT: control target
= control target key end

     0   :  { %12 = vsyncpa [#allocation4], 0  ;;  %s21611_s0 = inlined_call_operand.vmem [shape: bf16[2,18,18,4], index: 0, kind: input, shape index: {}]   ;;  %s21612_s1 = inlined_call_operand.vmem [shape: bf16[36,128], index: 1, kind: input, shape index: {}]   ;;  %s21613_s2 = inlined_call_operand.vmem [shape: f32[1,128], index: 2, kind: input, shape index: {}]   ;;  %s21614_s3 = inlined_call_operand.hbm [shape: bf16[1152,128], index: 3, kind: input, shape index: {}]   ;;  %s21615_s4 = inlined_call_operand.vmem [shape: f32[1,128], index: 4, kind: input, shape index: {}]   ;;  %s21616_s5 = inlined_call_operand.vmem [shape: bf16[4,128], index: 5, kind: input, shape index: {}]   ;;  %s21617_s6 = inlined_call_operand.vmem [shape: f32[1,128], index: 6, kind: input, shape index: {}]   ;;  %s21618_s7 = inlined_call_operand.hbm [shape: f32[2,8,8,128], index: 7, kind: output, shape index: {}]  }
   0x1   :  { %13 = vsyncpa [#allocation5], 0 }
   0x2   :  { %15 = vsyncpa [#allocation5 + $0x1], 0  ;;  %s16419_s24 = smov 0   ;;  %s16421_s25 = smov 0  }
   0x3   :  { %s16423_s26 = smov 0   ;;  %s16425_s27 = smov 0  }
   0x4 LB: > { %s16440_s28 = sadd.s32 4294967295, %s16368_s27   ;;  %s13250_s29 = sadd.s32 4294967294, %s16368_s27   ;;  %s16368_s27 = sphi %s16425_s27, %s22259_s27   ;;  %s16364_s26 = sphi %s16423_s26, %s22258_s26   ;;  %s16360_s25 = sphi %s16421_s25, %s22257_s25   ;;  %s16356_s24 = sphi %s16419_s24, %s22256_s24  }
   0x5   : > { %s16444_s30 = sadd.s32 1, %s16368_s27   ;;  %s180_s8 = sadd.s32 1, %s16364_s26 }
   0x6   : > { %s177_s9 = ssub.s32 %s16368_s27, %s16444_s30  ;;  %p190_p0 = scmp.ne.s32.totalorder %s16364_s26, %s16360_s25 }
   0x7   : > { %p178_p1 = scmp.eq.s32.totalorder %s177_s9, 0  ;;  %p191_p2 = scmp.eq.s32.totalorder %s16440_s28, 1 }
   0x8   : > { %p196_p3 = scmp.ne.s32.totalorder %s16360_s25, %s16356_s24  ;;  %p197_p4 = scmp.eq.s32.totalorder %s13250_s29, 1 }
   0x9   : > { %s16455_s10 = scalar_select %p178_p1, %s16364_s26, %s180_s8  }
   0xa   : > { %p16457_p5 = por %p191_p2, %p190_p0  ;;  %p16461_p6 = por %p197_p4, %p196_p3 }
   0xb   : > { %p13251_p7 = scmp.ge.s32.totalorder %s16368_s27, 1  ;;  %p204_p8 = scmp.lt.s32.totalorder %s16368_s27, 3 }
   0xc   : > { %s21791_s11 = scalar_select %p16457_p5, 1, 0 }
   0xd   : > { %s21792_s12 = scalar_select %p16461_p6, 1, 0 }
   0xe   : > { %p21619_p9 = scmp.eq.s32.totalorder %s16440_s28, 0  ;;  %p16468_p10 = pnand %p13251_p7, %p204_p8 }
   0xf   : > { %s16370_s14 = smov [#allocation3]   ;;  %s16274_s19 = scalar_lea.hbm %s21614_s3, 9216 }
  0x10   : > { %s21793_s13 = scalar_select %p16468_p10, 1, 0 }
  0x11   : > { %s222_s15 = sshll.u32 %s16370_s14, 4  ;;  %p16014_p11 = pneg %p16468_p10  ;;  %s223_s15 = int_to_ptr.vmem [resolvable:$true] %s222_s15 }
  0x12   : > { %p16275_p13 = scmp.ne.s32.totalorder %s21614_s3, %s16274_s19  ;;  %p16281_p3 = scmp.lt.u32.totalorder %s16274_s19, %s21614_s3 }
  0x13   : > { %p16476_p12 = pnand %p21619_p9, %p16014_p11 }
  0x15   : > { %p16276_p0 = pneg %p16476_p12 }
  0x17   : > { %p16277_p1 = pnand %p16276_p0, %p16275_p13 }
  0x19   : > { %p16278_p2 = pneg %p16277_p1 }
  0x1b   : > { %p16283_p4 = pnand %p16281_p3, %p16278_p2 }
  0x1d   : > { %16286 = shalt.err (!%p16283_p4)
}
  0x1e   : > { %s16287_s29 = scalar_lea.vmem %s223_s15, 9216  ;;  %p16295_p9 = scmp.lt.s32.totalorder %s223_s15, %s223_s15 }
  0x1f   : > { %p16288_p7 = scmp.ne.s32.totalorder %s223_s15, %s16287_s29  ;;  %p16296_p6 = scmp.lt.s32.totalorder %s16287_s29, %s16287_s29 }
  0x21   : > { %p16290_p8 = pnand %p16288_p7, %p16276_p0  ;;  %p16297_p5 = por %p16296_p6, %p16295_p9 }
  0x23   : > { %p16291_p11 = pneg %p16290_p8 }
  0x25   : > { %p16298_p10 = pnand %p16297_p5, %p16291_p11 }
  0x27   : > { %16301 = shalt.err (!%p16298_p10)
}
  0x28   : > { %s16371_s8 = smov 64   ;;  %s16372_s9 = smov 4  }
  0x29   : > { %16017 = dma.hbm_to_vmem [thread:$0]  (!%p16476_p12), %s21614_s3, 9216, %s223_s15, [#allocation4], %s16371_s8, %s16371_s8, %s16372_s9  }
  0x2a   : > { %p21795_p13 = scmp.ne.s32.totalorder %s21793_s13, 0 }
  0x2c   : > { %255 = sbr.rel (%p21795_p13) target bundleno = 1833 (0x729), region = 48 }
  0x33   : > { %p21796_p1 = scmp.eq.s32.totalorder %s16440_s28, 0 }
  0x35   : > { %16347 = dma.done.wait (%p21796_p1), [#allocation4], 9216   ;;  %p21797_p0 = pmov %p21796_p1 }
  0x36   : > { %p287_p5 = scmp.lt.s32.totalorder %s16440_s28, 1  ;;  %vm342_vm0 = vsmask.f32 3328  ;;  %vm343_vm1 = vsmask.f32 7440  ;;  %vm831_vm2 = vcmask 1041408  }
  0x37   : > { %16349 = vsyncadd (%p21797_p0), [#allocation4], 4294958080  ;;  %v16065_v0 = vld [vmem:[%s21612_s1] ss:$0 sps:$4 sm:$0xcc]   ;;  %vm782_vm3 = vcmask 31744  }
  0x38   : > { %s288_s18 = scalar_select %p287_p5, %s16440_s28, 1  ;;  %v781_v4 = vrot.slane %v16065_v0, 2  ;;  %v325_v10 = vld [vmem:[%s21612_s1] sm:$0x3]  ;;  %vm16548_vm4 = vmor %vm342_vm0, %vm343_vm1  ;;  %vm1336_vm5 = vcmask 1042432   ;;  %vm1337_vm6 = vcmask 1046532  }
  0x39   : > { %v1125_v35 = vsel %vm831_vm2, %v325_v10, 0  ;;  %vm16862_vm7 = vmor %vm1336_vm5, %vm1337_vm6  ;;  %vm4938_vm8 = vcmask 1040384   ;;  %vm4939_vm9 = vsmask.f32 256  ;;  %vm4995_vm11 = vsmask.f32 7938 }
  0x3a   : > { %s16007_s19 = smul.u32 216, %s288_s18  ;;  %15997 = vmatprep.subr.msk.bf16.mxu0 %vm831_vm2, %v781_v4  ;;  %v833_v12 = vsel %vm831_vm2, %v781_v4, 0  ;;  %vm18251_vm10 = vmand %vm4938_vm8, %vm4939_vm9  ;;  %vm5470_vm13 = vcmask 1043456   ;;  %vm5147_vm14 = vsmask.f32 4368  ;;  %vm11572_vm1 = vcmask 1042434  }
  0x3b   : > { %14738 = vmatpush3.bf16.msra.mxu0 %v833_v12  ;;  %vm18259_vm12 = vmand %vm4938_vm8, %vm4995_vm11  ;;  %s284_s15 = sand.u32 1, %s16360_s25   ;;  %s14322_s29 = sshll.u32 %s16440_s28, 10 }
  0x3c   : > { %s16507_s21 = scalar_lea.vmem %s21611_s0, %s16007_s19  ;;  %15998 = vmatprep.subr.msk.bf16.mxu0 %vm831_vm2, %v325_v10  ;;  %vm18347_vm15 = vmand %vm5470_vm13, %vm4995_vm11  ;;  %vm12893_vm11 = vcmask 1045509   ;;  %s13256_s22 = sshll.u32 %s284_s15, 6 }
  0x3d   : > { %v16513_v1 = vld [vmem:[%s16507_s21] sm:$0xf]  ;;  %v16516_v2 = vld [vmem:[%s16507_s21 + $0x4] sm:$0xf]  ;;  %v326_v3 = vld [vmem:[%s16507_s21 + $0x8] sm:$0x1]  ;;  %s21563_s17 = scalar_lea.hbm %s21618_s7, %s14322_s29 }
  0x3e   : > { %v346_v5 = vshrl.u32 %v16513_v1, 16  ;;  %v349_v6 = vshll.u32 %v16513_v1, 16  ;;  %v355_v7 = vshll.u32 %v16516_v2, 16  ;;  %v359_v8 = vshrl.u32 %v16516_v2, 16  ;;  %v16527_v11 = vld [vmem:[%s16507_s21 + $0xc] sm:$0xf]  ;;  %vm18354_vm0 = vmor %vm4939_vm9, %vm5147_vm14 }
  0x3f   : > { %v365_v9 = vshll.u32 %v326_v3, 16  ;;  %v16532_v16 = vld [vmem:[%s16507_s21 + $0x10] sm:$0xf]  ;;  %v16535_v18 = vld [vmem:[%s16507_s21 + $0x14] sm:$0x1]  ;;  %v370_v19 = vshrl.u32 %v16527_v11, 16  ;;  %vm20038_vm5 = vmor %vm4938_vm8, %vm11572_vm1 }
  0x40   : > { %v348_v13 = vrot.slane %v346_v5, 4  ;;  %v351_v14 = vrot.slane %v349_v6, 5  ;;  %v357_v15 = vrot.slane %v355_v7, 5  ;;  %v361_v17 = vrot.slane %v359_v8, 4  ;;  %v16544_v25 = vld [vmem:[%s16507_s21 + $0x18] sm:$0xf] }
  0x41   : > { %v373_v20 = vshll.u32 %v16527_v11, 16  ;;  %v379_v22 = vshll.u32 %v16532_v16, 16  ;;  %v383_v23 = vshrl.u32 %v16532_v16, 16  ;;  %v389_v24 = vshll.u32 %v16535_v18, 16  ;;  %v16553_v31 = vld [vmem:[%s16507_s21 + $0x1c] sm:$0xf] }
  0x42   : > { %v352_v21 = vor.u32 %v351_v14, %v348_v13  ;;  %v362_v27 = vor.u32 %v361_v17, %v357_v15  ;;  %v367_v28 = vrot.slane %v365_v9, 5  ;;  %v372_v29 = vrot.slane %v370_v19, 4  ;;  %v328_v42 = vld [vmem:[%s16507_s21 + $0x20] sm:$0x1]  ;;  %v16563_v45 = vld [vmem:[%s16507_s21 + $0x24] sm:$0xf] }
  0x43   : > { %v375_v30 = vrot.slane %v373_v20, 5  ;;  %v381_v33 = vrot.slane %v379_v22, 5  ;;  %v385_v34 = vrot.slane %v383_v23, 4  ;;  %v391_v38 = vrot.slane %v389_v24, 5  ;;  %v16569_v50 = vld [vmem:[%s16507_s21 + $0x28] sm:$0xf] }
  0x44   : > { %v353_v32 = vrot.slane %v352_v21, 4  ;;  %v363_v36 = vrot.slane %v362_v27, 4  ;;  %v394_v39 = vshrl.u32 %v16544_v25, 16  ;;  %v397_v43 = vshll.u32 %v16544_v25, 16  ;;  %v329_v61 = vld [vmem:[%s16507_s21 + $0x2c] sm:$0x1] }
  0x45   : > { %v376_v37 = vor.u32 %v375_v30, %v372_v29  ;;  %v386_v41 = vor.u32 %v385_v34, %v381_v33  ;;  %v403_v44 = vshll.u32 %v16553_v31, 16  ;;  %v407_v49 = vshrl.u32 %v16553_v31, 16  ;;  %v16581_v0 = vld [vmem:[%s16507_s21 + $0x30] sm:$0xf]  ;;  %v16584_v7 = vld [vmem:[%s16507_s21 + $0x34] sm:$0xf] }
  0x46   : > { %v358_v40 = vsel %vm16548_vm4, %v353_v32, %v357_v15  ;;  %v368_v46 = vsel %vm16548_vm4, %v363_v36, %v367_v28  ;;  %v396_v48 = vrot.slane %v394_v39, 4  ;;  %v399_v53 = vrot.slane %v397_v43, 5  ;;  %v16593_v22 = vld [vmem:[%s16507_s21 + $0x38] sm:$0x1]  ;;  %v16597_v24 = vld [vmem:[%s16507_s21 + $0x3c] sm:$0xf] }
  0x47   : > { %v377_v47 = vrot.slane %v376_v37, 4  ;;  %v13258_v51 = vcombine.low %v358_v40, %v368_v46  ;;  %v387_v52 = vrot.slane %v386_v41, 4  ;;  %v405_v54 = vrot.slane %v403_v44, 5  ;;  %v16602_v32 = vld [vmem:[%s16507_s21 + $0x40] sm:$0xf]  ;;  %s21524_s23 = scalar_lea.vmem [#allocation6], %s13256_s22 }
  0x48   : > { %v409_v56 = vrot.slane %v407_v49, 4  ;;  %v413_v57 = vshll.u32 %v328_v42, 16  ;;  %v418_v58 = vshrl.u32 %v16563_v45, 16  ;;  %v400_v60 = vor.u32 %v399_v53, %v396_v48  ;;  %v16611_v43 = vld [vmem:[%s16507_s21 + $0x44] sm:$0x1]  ;;  %s13176_s8 = sshll.u32 %s21524_s23, 4  ;;  %s21565_s8 = int_to_ptr.vmem [resolvable:$true] %s13176_s8 }
  0x49   : > { %v382_v55 = vsel %vm16548_vm4, %v377_v47, %v381_v33  ;;  %14739 = vmatprep.mubr.msk.bf16.mxu0 %vm782_vm3, %v13258_v51  ;;  %v392_v59 = vsel %vm16548_vm4, %v387_v52, %v391_v38  ;;  %v421_v62 = vshll.u32 %v16563_v45, 16  ;;  %v427_v63 = vshll.u32 %v16569_v50, 16  ;;  %v16616_v52 = vld [vmem:[%s16507_s21 + $0x48] sm:$0xf]  ;;  %s21570_s18 = scalar_lea.sflag [#allocation5], %s284_s15  ;;  %s16302_s19 = scalar_lea.vmem %s21565_s8, 1024 }
  0x4a   : > { %v13259_v3 = vcombine.low %v382_v55, %v392_v59  ;;  %v410_v4 = vor.u32 %v409_v56, %v405_v54  ;;  %v415_v5 = vrot.slane %v413_v57, 5  ;;  %v420_v6 = vrot.slane %v418_v58, 4  ;;  %v16622_v57 = vld [vmem:[%s16507_s21 + $0x4c] sm:$0xf]  ;;  %p16303_p6 = scmp.ne.s32.totalorder %s21565_s8, %s16302_s19  ;;  %p22254_p9 = scmp.ne.s32.totalorder %s21791_s11, 0 }
  0x4b   : > { %v401_v8 = vrot.slane %v400_v60, 4  ;;  %v423_v9 = vrot.slane %v421_v62, 5  ;;  %v429_v10 = vrot.slane %v427_v63, 5  ;;  %v431_v12 = vshrl.u32 %v16569_v50, 16  ;;  %s16376_s28 = smov [#allocation6]  }
  0x4c   : > { %14740 = vmatmul.mubr.msk.bf16.vlgmr.msra.gmra.mrb[0].mxu0 %vm782_vm3, %v13259_v3  ;;  %v411_v13 = vrot.slane %v410_v4, 4  ;;  %v437_v14 = vshll.u32 %v329_v61, 16  ;;  %v442_v15 = vshrl.u32 %v16581_v0, 16  ;;  %v445_v17 = vshll.u32 %v16581_v0, 16  ;;  %v16628_v3 = vld [vmem:[%s16507_s21 + $0x50] sm:$0x1]  ;;  %p16304_p10 = pnand %p16303_p6, %p22254_p9 }
  0x4d   : > { %14772 = vmatpush3.bf16.msra.mxu0 %v1125_v35  ;;  %v406_v19 = vsel %vm16548_vm4, %v401_v8, %v405_v54  ;;  %v424_v20 = vor.u32 %v423_v9, %v420_v6  ;;  %v433_v21 = vrot.slane %v431_v12, 4  ;;  %v451_v23 = vshll.u32 %v16584_v7, 16 }
  0x4e   : > { %v416_v27 = vsel %vm16548_vm4, %v411_v13, %v415_v5  ;;  %v439_v28 = vrot.slane %v437_v14, 5  ;;  %v444_v29 = vrot.slane %v442_v15, 4  ;;  %v447_v30 = vrot.slane %v445_v17, 5  ;;  %v16636_v17 = vld [vmem:[%s16507_s21 + $0x54] sm:$0xf]  ;;  %p16305_p12 = pneg %p16304_p10 }
  0x4f   : > { %v13260_v33 = vcombine.low %v406_v19, %v416_v27  ;;  %v425_v34 = vrot.slane %v424_v20, 4  ;;  %v434_v35 = vor.u32 %v433_v21, %v429_v10  ;;  %v453_v36 = vrot.slane %v451_v23, 5  ;;  %v16642_v27 = vld [vmem:[%s16507_s21 + $0x58] sm:$0xf] }
  0x50   : > { %v448_v37 = vor.u32 %v447_v30, %v444_v29  ;;  %v455_v38 = vshrl.u32 %v16584_v7, 16  ;;  %v461_v39 = vshll.u32 %v16593_v22, 16  ;;  %v466_v40 = vshrl.u32 %v16597_v24, 16 }
  0x51   : > { %14743 = vmatprep.mubr.msk.bf16.mxu0 %vm782_vm3, %v13260_v33  ;;  %v430_v41 = vsel %vm16548_vm4, %v425_v34, %v429_v10  ;;  %v435_v42 = vrot.slane %v434_v35, 4  ;;  %v469_v44 = vshll.u32 %v16597_v24, 16  ;;  %v475_v46 = vshll.u32 %v16602_v32, 16 }
  0x52   : > { %v449_v47 = vrot.slane %v448_v37, 4  ;;  %v457_v48 = vrot.slane %v455_v38, 4  ;;  %v463_v49 = vrot.slane %v461_v39, 5  ;;  %v468_v51 = vrot.slane %v466_v40, 4 }
  0x53   : > { %v440_v53 = vsel %vm16548_vm4, %v435_v42, %v439_v28  ;;  %v471_v54 = vrot.slane %v469_v44, 5  ;;  %v477_v55 = vrot.slane %v475_v46, 5  ;;  %v479_v56 = vshrl.u32 %v16602_v32, 16  ;;  %v16657_v44 = vld [vmem:[%s16507_s21 + $0x60] sm:$0xf] }
  0x54   : > { %v13261_v58 = vcombine.low %v430_v41, %v440_v53  ;;  %v454_v59 = vsel %vm16548_vm4, %v449_v47, %v453_v36  ;;  %v458_v60 = vor.u32 %v457_v48, %v453_v36  ;;  %v485_v61 = vshll.u32 %v16611_v43, 16  ;;  %v16647_v36 = vld [vmem:[%s16507_s21 + $0x5c] sm:$0x1] }
  0x55   : > { %v472_v62 = vor.u32 %v471_v54, %v468_v51  ;;  %v481_v63 = vrot.slane %v479_v56, 4  ;;  %v490_v4 = vshrl.u32 %v16616_v52, 16  ;;  %v493_v5 = vshll.u32 %v16616_v52, 16  ;;  %v16660_v51 = vld [vmem:[%s16507_s21 + $0x64] sm:$0xf] }
  0x56   : > { %14744 = vmatmul.mubr.msk.bf16.gmra.mrb[4].mxu0 %vm782_vm3, %v13261_v58  ;;  %v459_v6 = vrot.slane %v458_v60, 4  ;;  %v487_v8 = vrot.slane %v485_v61, 5  ;;  %v499_v9 = vshll.u32 %v16622_v57, 16  ;;  %v503_v10 = vshrl.u32 %v16622_v57, 16  ;;  %v16669_v60 = vld [vmem:[%s16507_s21 + $0x68] sm:$0x1] }
  0x57   : > { %v473_v12 = vrot.slane %v472_v62, 4  ;;  %v482_v13 = vor.u32 %v481_v63, %v477_v55  ;;  %v492_v14 = vrot.slane %v490_v4, 4  ;;  %v495_v15 = vrot.slane %v493_v5, 5  ;;  %21800 = vst [vmem:[#allocation9_spill] sm:$0xff] %v16669_v60  ;;  %v16674_v63 = vld [vmem:[%s16507_s21 + $0x6c] sm:$0xf] }
  0x58   : > { %v464_v19 = vsel %vm16548_vm4, %v459_v6, %v463_v49  ;;  %v501_v20 = vrot.slane %v499_v9, 5  ;;  %v505_v21 = vrot.slane %v503_v10, 4  ;;  %v509_v23 = vshll.u32 %v16628_v3, 16 }
  0x59   : > { %v13262_v28 = vcombine.low %v454_v59, %v464_v19  ;;  %v478_v29 = vsel %vm16548_vm4, %v473_v12, %v477_v55  ;;  %v483_v30 = vrot.slane %v482_v13, 4  ;;  %v496_v33 = vor.u32 %v495_v15, %v492_v14  ;;  %v16679_v14 = vld [vmem:[%s16507_s21 + $0x70] sm:$0xf] }
  0x5a   : > { %v506_v34 = vor.u32 %v505_v21, %v501_v20  ;;  %v511_v35 = vrot.slane %v509_v23, 5  ;;  %v514_v37 = vshrl.u32 %v16636_v17, 16  ;;  %v517_v38 = vshll.u32 %v16636_v17, 16  ;;  %v16684_v21 = vld [vmem:[%s16507_s21 + $0x74] sm:$0x1] }
  0x5b   : > { %14747 = vmatprep.mubr.msk.bf16.mxu0 %vm782_vm3, %v13262_v28  ;;  %v488_v39 = vsel %vm16548_vm4, %v483_v30, %v487_v8  ;;  %v497_v40 = vrot.slane %v496_v33, 4  ;;  %v523_v41 = vshll.u32 %v16642_v27, 16  ;;  %v527_v42 = vshrl.u32 %v16642_v27, 16  ;;  %21801 = vst [vmem:[#allocation10_spill] sm:$0xff] %v16684_v21 }
  0x5c   : > { %v13263_v46 = vcombine.low %v478_v29, %v488_v39  ;;  %v507_v47 = vrot.slane %v506_v34, 4  ;;  %v516_v48 = vrot.slane %v514_v37, 4  ;;  %v519_v49 = vrot.slane %v517_v38, 5  ;;  %v16691_v34 = vld [vmem:[%s16507_s21 + $0x78] sm:$0xf] }
  0x5d   : > { %v502_v53 = vsel %vm16548_vm4, %v497_v40, %v501_v20  ;;  %v525_v54 = vrot.slane %v523_v41, 5  ;;  %v529_v55 = vrot.slane %v527_v42, 4  ;;  %v533_v56 = vshll.u32 %v16647_v36, 16 }
  0x5e   : > { %14748 = vmatmul.mubr.msk.bf16.gmra.mrb[8].mxu0 %vm782_vm3, %v13263_v46  ;;  %v512_v58 = vsel %vm16548_vm4, %v507_v47, %v511_v35  ;;  %v520_v59 = vor.u32 %v519_v49, %v516_v48  ;;  %v538_v61 = vshrl.u32 %v16657_v44, 16  ;;  %v541_v62 = vshll.u32 %v16657_v44, 16  ;;  %v16696_v35 = vld [vmem:[%s21612_s1 + $0x4] sm:$0x3]  ;;  %v16704_v48 = vld [vmem:[%s16507_s21 + $0x7c] sm:$0xf] }
  0x5f   : > { %v13264_v4 = vcombine.low %v502_v53, %v512_v58  ;;  %v530_v5 = vor.u32 %v529_v55, %v525_v54  ;;  %v535_v6 = vrot.slane %v533_v56, 5  ;;  %v547_v8 = vshll.u32 %v16660_v51, 16  ;;  %15999 = vmatprep.subr.msk.bf16.mxu0 %vm831_vm2, %v16696_v35 }
  0x60   : > { %v521_v9 = vrot.slane %v520_v59, 4  ;;  %v540_v10 = vrot.slane %v538_v61, 4  ;;  %v543_v12 = vrot.slane %v541_v62, 5  ;;  %v551_v13 = vshrl.u32 %v16660_v51, 16  ;;  %v16713_v61 = vld [vmem:[%s16507_s21 + $0x80] sm:$0x1] }
  0x61   : > { %14751 = vmatprep.mubr.msk.bf16.mxu0 %vm782_vm3, %v13264_v4  ;;  %v531_v15 = vrot.slane %v530_v5, 4  ;;  %v549_v19 = vrot.slane %v547_v8, 5  ;;  %v557_v20 = vshll.u32 %v16669_v60, 16  ;;  %v562_v23 = vshrl.u32 %v16674_v63, 16  ;;  %21802 = vst [vmem:[#allocation11_spill] sm:$0xff] %v16713_v61 }
  0x62   : > { %v526_v28 = vsel %vm16548_vm4, %v521_v9, %v525_v54  ;;  %v544_v29 = vor.u32 %v543_v12, %v540_v10  ;;  %v553_v30 = vrot.slane %v551_v13, 4  ;;  %v565_v33 = vshll.u32 %v16674_v63, 16  ;;  %v16718_v9 = vld [vmem:[%s16507_s21 + $0x84] sm:$0xf] }
  0x63   : > { %v536_v37 = vsel %vm16548_vm4, %v531_v15, %v535_v6  ;;  %v559_v38 = vrot.slane %v557_v20, 5  ;;  %v564_v39 = vrot.slane %v562_v23, 4  ;;  %v571_v40 = vshll.u32 %v16679_v14, 16 }
  0x64   : > { %v13265_v41 = vcombine.low %v526_v28, %v536_v37  ;;  %v545_v42 = vrot.slane %v544_v29, 4  ;;  %v554_v46 = vor.u32 %v553_v30, %v549_v19  ;;  %v567_v47 = vrot.slane %v565_v33, 5 }
  0x65   : > { %v573_v49 = vrot.slane %v571_v40, 5  ;;  %v575_v53 = vshrl.u32 %v16679_v14, 16  ;;  %v581_v54 = vshll.u32 %v16684_v21, 16  ;;  %v586_v55 = vshrl.u32 %v16691_v34, 16  ;;  %v16734_v40 = vld [vmem:[%s16507_s21 + $0x90] sm:$0xf] }
  0x66   : > { %14752 = vmatmul.mubr.msk.bf16.gmra.mrb[12].mxu0 %vm782_vm3, %v13265_v41  ;;  %v550_v56 = vsel %vm16548_vm4, %v545_v42, %v549_v19  ;;  %v555_v58 = vrot.slane %v554_v46, 4  ;;  %v568_v59 = vor.u32 %v567_v47, %v564_v39  ;;  %v589_v62 = vshll.u32 %v16691_v34, 16  ;;  %v16724_v19 = vld [vmem:[%s16507_s21 + $0x88] sm:$0xf]  ;;  %v16730_v39 = vld [vmem:[%s16507_s21 + $0x8c] sm:$0x1] }
  0x67   : > { %v577_v4 = vrot.slane %v575_v53, 4  ;;  %v583_v5 = vrot.slane %v581_v54, 5  ;;  %v588_v6 = vrot.slane %v586_v55, 4  ;;  %v595_v8 = vshll.u32 %v16704_v48, 16  ;;  %21803 = vst [vmem:[#allocation12_spill] sm:$0xff] %v16730_v39 }
  0x68   : > { %v560_v10 = vsel %vm16548_vm4, %v555_v58, %v559_v38  ;;  %v569_v12 = vrot.slane %v568_v59, 4  ;;  %v591_v13 = vrot.slane %v589_v62, 5  ;;  %v599_v15 = vshrl.u32 %v16704_v48, 16  ;;  %v16740_v53 = vld [vmem:[%s16507_s21 + $0x94] sm:$0xf] }
  0x69   : > { %v13266_v20 = vcombine.low %v550_v56, %v560_v10  ;;  %v578_v23 = vor.u32 %v577_v4, %v573_v49  ;;  %v597_v28 = vrot.slane %v595_v8, 5  ;;  %v605_v29 = vshll.u32 %v16713_v61, 16 }
  0x6a   : > { %v574_v30 = vsel %vm16548_vm4, %v569_v12, %v573_v49  ;;  %v592_v33 = vor.u32 %v591_v13, %v588_v6  ;;  %v601_v37 = vrot.slane %v599_v15, 4  ;;  %v610_v38 = vshrl.u32 %v16718_v9, 16  ;;  %v16747_v6 = vld [vmem:[%s16507_s21 + $0x98] sm:$0x1]  ;;  %v16752_v15 = vld [vmem:[%s16507_s21 + $0x9c] sm:$0xf] }
  0x6b   : > { %14755 = vmatprep.mubr.msk.bf16.mxu0 %vm782_vm3, %v13266_v20  ;;  %v579_v41 = vrot.slane %v578_v23, 4  ;;  %v607_v42 = vrot.slane %v605_v29, 5  ;;  %v613_v46 = vshll.u32 %v16718_v9, 16  ;;  %v619_v47 = vshll.u32 %v16724_v19, 16  ;;  %21804 = vst [vmem:[#allocation13_spill] sm:$0xff] %v16747_v6 }
  0x6c   : > { %v593_v49 = vrot.slane %v592_v33, 4  ;;  %v602_v54 = vor.u32 %v601_v37, %v597_v28  ;;  %v612_v55 = vrot.slane %v610_v38, 4  ;;  %v623_v56 = vshrl.u32 %v16724_v19, 16  ;;  %v16757_v33 = vld [vmem:[%s16507_s21 + $0xa0] sm:$0xf] }
  0x6d   : > { %v584_v58 = vsel %vm16548_vm4, %v579_v41, %v583_v5  ;;  %v615_v59 = vrot.slane %v613_v46, 5  ;;  %v621_v62 = vrot.slane %v619_v47, 5  ;;  %v629_v4 = vshll.u32 %v16730_v39, 16  ;;  %v16788_v39 = vld [vmem:[%s16507_s21 + $0xb4] sm:$0xf] }
  0x6e   : > { %v13267_v8 = vcombine.low %v574_v30, %v584_v58  ;;  %v598_v10 = vsel %vm16548_vm4, %v593_v49, %v597_v28  ;;  %v603_v12 = vrot.slane %v602_v54, 4  ;;  %v625_v13 = vrot.slane %v623_v56, 4  ;;  %v16765_v54 = vld [vmem:[%s16507_s21 + $0xa4] sm:$0x1] }
  0x6f   : > { %v616_v20 = vor.u32 %v615_v59, %v612_v55  ;;  %v631_v23 = vrot.slane %v629_v4, 5  ;;  %v634_v29 = vshrl.u32 %v16734_v40, 16  ;;  %v637_v5 = vshll.u32 %v16734_v40, 16  ;;  %21805 = vst [vmem:[#allocation14_spill] sm:$0xff] %v16765_v54  ;;  %v16769_v4 = vld [vmem:[%s16507_s21 + $0xa8] sm:$0xf] }
  0x70   : > { %14756 = vmatmul.mubr.msk.bf16.gmra.mrb[16].mxu0 %vm782_vm3, %v13267_v8  ;;  %v608_v30 = vsel %vm16548_vm4, %v603_v12, %v607_v42  ;;  %v626_v28 = vor.u32 %v625_v13, %v621_v62  ;;  %v643_v37 = vshll.u32 %v16740_v53, 16  ;;  %v647_v38 = vshrl.u32 %v16740_v53, 16  ;;  %v16777_v13 = vld [vmem:[%s16507_s21 + $0xac] sm:$0xf] }
  0x71   : > { %v13268_v41 = vcombine.low %v598_v10, %v608_v30  ;;  %v617_v46 = vrot.slane %v616_v20, 4  ;;  %v636_v47 = vrot.slane %v634_v29, 4  ;;  %v639_v49 = vrot.slane %v637_v5, 5 }
  0x72   : > { %v627_v55 = vrot.slane %v626_v28, 4  ;;  %v645_v56 = vrot.slane %v643_v37, 5  ;;  %v649_v58 = vrot.slane %v647_v38, 4  ;;  %v653_v59 = vshll.u32 %v16747_v6, 16 }
  0x73   : > { %14759 = vmatprep.mubr.msk.bf16.mxu0 %vm782_vm3, %v13268_v41  ;;  %v622_v42 = vsel %vm16548_vm4, %v617_v46, %v621_v62  ;;  %v640_v8 = vor.u32 %v639_v49, %v636_v47  ;;  %v658_v10 = vshrl.u32 %v16752_v15, 16  ;;  %v661_v12 = vshll.u32 %v16752_v15, 16  ;;  %v16783_v62 = vld [vmem:[%s16507_s21 + $0xb0] sm:$0x1] }
  0x74   : > { %v632_v20 = vsel %vm16548_vm4, %v627_v55, %v631_v23  ;;  %v650_v29 = vor.u32 %v649_v58, %v645_v56  ;;  %v655_v5 = vrot.slane %v653_v59, 5  ;;  %v667_v30 = vshll.u32 %v16757_v33, 16  ;;  %21806 = vst [vmem:[#allocation15_spill] sm:$0xff] %v16783_v62 }
  0x75   : > { %v13269_v28 = vcombine.low %v622_v42, %v632_v20  ;;  %v641_v37 = vrot.slane %v640_v8, 4  ;;  %v660_v38 = vrot.slane %v658_v10, 4  ;;  %v663_v41 = vrot.slane %v661_v12, 5 }
  0x76   : > { %v651_v46 = vrot.slane %v650_v29, 4  ;;  %v669_v47 = vrot.slane %v667_v30, 5  ;;  %v671_v49 = vshrl.u32 %v16757_v33, 16  ;;  %v677_v6 = vshll.u32 %v16765_v54, 16 }
  0x77   : > { %v646_v23 = vsel %vm16548_vm4, %v641_v37, %v645_v56  ;;  %v664_v55 = vor.u32 %v663_v41, %v660_v38  ;;  %v682_v58 = vshrl.u32 %v16769_v4, 16  ;;  %v685_v59 = vshll.u32 %v16769_v4, 16  ;;  %v16799_v56 = vld [vmem:[%s16507_s21 + $0xb8] sm:$0xf] }
  0x78   : > { %14760 = vmatmul.mubr.msk.bf16.gmra.mrb[20].mxu0 %vm782_vm3, %v13269_v28  ;;  %v656_v42 = vsel %vm16548_vm4, %v651_v46, %v655_v5  ;;  %v673_v8 = vrot.slane %v671_v49, 4  ;;  %v679_v10 = vrot.slane %v677_v6, 5  ;;  %v691_v12 = vshll.u32 %v16777_v13, 16  ;;  %v16804_v28 = vld [vmem:[%s16507_s21 + $0xbc] sm:$0x1] }
  0x79   : > { %v13270_v20 = vcombine.low %v646_v23, %v656_v42  ;;  %v665_v29 = vrot.slane %v664_v55, 4  ;;  %v684_v30 = vrot.slane %v682_v58, 4  ;;  %v687_v54 = vrot.slane %v685_v59, 5 }
  0x7a   : > { %v674_v37 = vor.u32 %v673_v8, %v669_v47  ;;  %v693_v38 = vrot.slane %v691_v12, 5  ;;  %v695_v41 = vshrl.u32 %v16777_v13, 16  ;;  %v701_v61 = vshll.u32 %v16783_v62, 16 }
  0x7b   : > { %14763 = vmatprep.mubr.msk.bf16.mxu0 %vm782_vm3, %v13270_v20  ;;  %v670_v6 = vsel %vm16548_vm4, %v665_v29, %v669_v47  ;;  %v688_v5 = vor.u32 %v687_v54, %v684_v30  ;;  %v706_v46 = vshrl.u32 %v16788_v39, 16  ;;  %v709_v49 = vshll.u32 %v16788_v39, 16 }
  0x7c   : > { %v675_v23 = vrot.slane %v674_v37, 4  ;;  %v697_v55 = vrot.slane %v695_v41, 4  ;;  %v703_v58 = vrot.slane %v701_v61, 5  ;;  %v715_v59 = vshll.u32 %v16799_v56, 16 }
  0x7d   : > { %v689_v42 = vrot.slane %v688_v5, 4  ;;  %v708_v8 = vrot.slane %v706_v46, 4  ;;  %v711_v12 = vrot.slane %v709_v49, 5  ;;  %v719_v62 = vshrl.u32 %v16799_v56, 16 }
  0x7e   : > { %v680_v20 = vsel %vm16548_vm4, %v675_v23, %v679_v10  ;;  %v698_v21 = vor.u32 %v697_v55, %v693_v38  ;;  %v717_v47 = vrot.slane %v715_v59, 5  ;;  %v725_v54 = vshll.u32 %v16804_v28, 16  ;;  %v1289_v55 = vld [vmem:[%s16507_s21 + $0xc] sm:$0xe] }
  0x7f   : > { %v13271_v29 = vcombine.low %v670_v6, %v680_v20  ;;  %v712_v30 = vor.u32 %v711_v12, %v708_v8  ;;  %v721_v60 = vrot.slane %v719_v62, 4  ;;  %v1348_v37 = vrot.slane %v16532_v16, 5  ;;  %v1296_v20 = vld [vmem:[%s16507_s21 + $0x60] sm:$0xe]  ;;  %v1297_v12 = vld [vmem:[%s16507_s21 + $0x6c] sm:$0xe] }
  0x80   : > { %v694_v61 = vsel %vm16548_vm4, %v689_v42, %v693_v38  ;;  %v699_v41 = vrot.slane %v698_v21, 4  ;;  %v13292_v5 = vcombine.low %v16527_v11, %v16532_v16  ;;  %v1351_v46 = vrot.slane %v16535_v18, 5  ;;  %v1301_v8 = vld [vmem:[%s16507_s21 + $0x9c] sm:$0xe] }
  0x81   : > { %14764 = vmatmul.mubr.msk.bf16.gmra.mrb[24].mxu0 %vm782_vm3, %v13271_v29  ;;  %v713_v10 = vrot.slane %v712_v30, 4  ;;  %v722_v49 = vor.u32 %v721_v60, %v717_v47  ;;  %v727_v23 = vrot.slane %v725_v54, 5  ;;  %v13291_v6 = vcombine.low %v16513_v1, %v16516_v2  ;;  %v16860_v30 = vld [vmem:[%s21612_s1 + $0x4] ss:$0 sps:$4 sm:$0xcc]   ;;  %v21816_v2 = vld [vmem:[#allocation15_spill] sm:$0xff] }
  0x82   : > { %v704_v62 = vsel %vm16548_vm4, %v699_v41, %v703_v58  ;;  %v13295_v38 = vcombine.low %v16581_v0, %v16584_v7  ;;  %v13296_v21 = vcombine.low %v16597_v24, %v16602_v32  ;;  %v13324_v41 = vrot.slane %v1289_v55, 9 }
  0x83   : > { %v13272_v11 = vcombine.low %v694_v61, %v704_v62  ;;  %v718_v16 = vsel %vm16548_vm4, %v713_v10, %v717_v47  ;;  %v723_v18 = vrot.slane %v722_v49, 4  ;;  %v21807_v61 = vmov 0  ;;  %v1292_v49 = vld [vmem:[%s16507_s21 + $0x30] sm:$0xe] }
  0x84   : > { %v21808_v61 = vsel %vm16862_vm7, 4294967295, %v21807_v61  ;;  %v1350_v10 = vrot.slane %v1348_v37, 4  ;;  %v1549_v55 = vsel %vm831_vm2, %v16696_v35, 0  ;;  %v1376_v29 = vrot.slane %v16602_v32, 5 }
  0x85   : > { %14767 = vmatprep.mubr.msk.bf16.mxu0 %vm782_vm3, %v13272_v11  ;;  %v728_v42 = vsel %vm16548_vm4, %v723_v18, %v727_v23  ;;  %21809 = vst [vmem:[#allocation16_spill] sm:$0xff] %v21808_v61  ;;  %v16871_v23 = vsel %vm16862_vm7, %v13324_v41, %v1348_v37  ;;  %v1293_v11 = vld [vmem:[%s16507_s21 + $0x3c] sm:$0xe]  ;;  %v1294_v18 = vld [vmem:[%s16507_s21 + $0x48] sm:$0xe]  ;;  %v13293_v37 = vcombine.low %v16544_v25, %v16553_v31  ;;  %v1372_v41 = vrot.slane %v16593_v22, 5 }
  0x86   : > { %v13273_v47 = vcombine.low %v718_v16, %v728_v42  ;;  %v16875_v62 = vsel %vm16862_vm7, %v1350_v10, %v1351_v46  ;;  %v13327_v42 = vrot.slane %v1292_v49, 9  ;;  %v1369_v46 = vrot.slane %v16584_v7, 5  ;;  %v21814_v7 = vld [vmem:[#allocation13_spill] sm:$0xff] }
  0x87   : > { %v13328_v10 = vrot.slane %v1293_v11, 9  ;;  %v1379_v16 = vrot.slane %v16611_v43, 5  ;;  %v13329_v54 = vrot.slane %v1294_v18, 9  ;;  %v13294_v25 = vcombine.low %v16563_v45, %v16569_v50  ;;  %v21811_v50 = vld [vmem:[#allocation10_spill] sm:$0xff] }
  0x88   : > { %v16893_v35 = vsel %vm16862_vm7, %v13327_v42, %v1369_v46  ;;  %v1371_v49 = vrot.slane %v1369_v46, 4  ;;  %v1378_v22 = vrot.slane %v1376_v29, 4  ;;  %v1383_v11 = vrot.slane %v16622_v57, 5 }
  0x89   : > { %14768 = vmatmul.mubr.msk.bf16.gmra.mrb[28].mxu0 %vm782_vm3, %v13273_v47  ;;  %v1295_v47 = vld [vmem:[%s16507_s21 + $0x54] sm:$0xe]  ;;  %v16900_v31 = vsel %vm16862_vm7, %v13328_v10, %v1376_v29  ;;  %v1386_v18 = vrot.slane %v16628_v3, 5  ;;  %v1390_v45 = vrot.slane %v16642_v27, 5  ;;  %v13331_v10 = vrot.slane %v1296_v20, 9 }
  0x8a   : > { %14773 = vmatprep.mubr.msk.bf16.mxu0 %vm782_vm3, %v13291_v6  ;;  %v21629_v6 = vrot.slane %v16860_v30, 2  ;;  %v16907_v43 = vsel %vm16862_vm7, %v1371_v49, %v1372_v41  ;;  %v13330_v42 = vrot.slane %v1295_v47, 9  ;;  %v16916_v29 = vsel %vm16862_vm7, %v1378_v22, %v1379_v16  ;;  %v1298_v41 = vld [vmem:[%s16507_s21 + $0x78] sm:$0xe] }
  0x8b   : > { %v1385_v46 = vrot.slane %v1383_v11, 4  ;;  %v1392_v16 = vrot.slane %v1390_v45, 4  ;;  %v1393_v47 = vrot.slane %v16647_v36, 5  ;;  %v1397_v49 = vrot.slane %v16660_v51, 5  ;;  %v21810_v22 = vld [vmem:[#allocation9_spill] sm:$0xff] }
  0x8c   : > { %v1404_v36 = vrot.slane %v16679_v14, 5  ;;  %v1425_v0 = vrot.slane %v16740_v53, 5  ;;  %v1442_v58 = vrot.slane %v21816_v2, 5  ;;  %vm12883_vm9 = vcmask 1041409  }
  0x8d   : > { %v16951_v20 = vsel %vm16862_vm7, %v13331_v10, %v1397_v49  ;;  %v21812_v10 = vld [vmem:[#allocation11_spill] sm:$0xff] }
  0x91   : > { %14774 = vmatmul.mubr.msk.bf16.vlgmr.msra.gmra.mrb[0].mxu0 %vm782_vm3, %v13292_v5  ;;  %v16920_v5 = vsel %vm16862_vm7, %v13329_v54, %v1383_v11  ;;  %v16936_v54 = vsel %vm16862_vm7, %v1385_v46, %v1386_v18  ;;  %v1400_v11 = vrot.slane %v21810_v22, 5  ;;  %v1399_v46 = vrot.slane %v1397_v49, 4 }
  0x92   : > { %14806 = vmatpush3.bf16.msra.mxu0 %v1549_v55  ;;  %14777 = vmatprep.mubr.msk.bf16.mxu0 %vm782_vm3, %v13293_v37  ;;  %v16930_v55 = vsel %vm16862_vm7, %v13330_v42, %v1390_v45  ;;  %v1299_v37 = vld [vmem:[%s16507_s21 + $0x84] sm:$0xe]  ;;  %v16944_v42 = vsel %vm16862_vm7, %v1392_v16, %v1393_v47  ;;  %v13332_v45 = vrot.slane %v1297_v12, 9  ;;  %v1407_v22 = vrot.slane %v21811_v50, 5 }
  0x93   : > { %16000 = vmatprep.subr.msk.bf16.mxu0 %vm831_vm2, %v21629_v6  ;;  %v1300_v6 = vld [vmem:[%s16507_s21 + $0x90] sm:$0xe]  ;;  %v1406_v16 = vrot.slane %v1404_v36, 4  ;;  %v13333_v12 = vrot.slane %v1298_v41, 9  ;;  %v1411_v47 = vrot.slane %v16704_v48, 5  ;;  %v16963_v18 = vsel %vm16862_vm7, %v1399_v46, %v1400_v11 }
  0x94   : > { %v16957_v3 = vsel %vm16862_vm7, %v13332_v45, %v1404_v36  ;;  %v1414_v49 = vrot.slane %v21812_v10, 5  ;;  %v13334_v59 = vrot.slane %v1299_v37, 9  ;;  %v1418_v50 = vrot.slane %v16724_v19, 5  ;;  %v1302_v46 = vld [vmem:[%s16507_s21 + $0xa8] sm:$0xe] }
  0x95   : > { %v16972_v41 = vsel %vm16862_vm7, %v1406_v16, %v1407_v22  ;;  %v16976_v36 = vsel %vm16862_vm7, %v13333_v12, %v1411_v47  ;;  %v1413_v11 = vrot.slane %v1411_v47, 4  ;;  %v21813_v16 = vld [vmem:[#allocation12_spill] sm:$0xff]  ;;  %v13335_v47 = vrot.slane %v1300_v6, 9 }
  0x96   : > { %v16987_v37 = vsel %vm16862_vm7, %v13334_v59, %v1418_v50  ;;  %v1420_v22 = vrot.slane %v1418_v50, 4  ;;  %v1421_v10 = vrot.slane %v21813_v16, 5  ;;  %v1303_v45 = vld [vmem:[%s16507_s21 + $0xb4] sm:$0xe]  ;;  %v13336_v50 = vrot.slane %v1301_v8, 9 }
  0x97   : > { %v16993_v12 = vsel %vm16862_vm7, %v1413_v11, %v1414_v49  ;;  %v1432_v16 = vrot.slane %v16757_v33, 5  ;;  %v17008_v6 = vsel %vm16862_vm7, %v13335_v47, %v1425_v0  ;;  %v1427_v49 = vrot.slane %v1425_v0, 4  ;;  %v21815_v11 = vld [vmem:[#allocation14_spill] sm:$0xff] }
  0x98   : > { %v17001_v59 = vsel %vm16862_vm7, %v1420_v22, %v1421_v10  ;;  %v13337_v22 = vrot.slane %v1302_v46, 9  ;;  %v1439_v8 = vrot.slane %v16777_v13, 5  ;;  %v13338_v60 = vrot.slane %v1303_v45, 9 }
  0x99   : > { %14778 = vmatmul.mubr.msk.bf16.gmra.mrb[4].mxu0 %vm782_vm3, %v13294_v25  ;;  %v17013_v25 = vsel %vm16862_vm7, %v13336_v50, %v1432_v16  ;;  %v1434_v1 = vrot.slane %v1432_v16, 4  ;;  %v1446_v47 = vrot.slane %v16799_v56, 5 }
  0x9a   : > { %14781 = vmatprep.mubr.msk.bf16.mxu0 %vm782_vm3, %v13295_v38  ;;  %v1428_v38 = vrot.slane %v21814_v7, 5  ;;  %v1435_v7 = vrot.slane %v21815_v11, 5  ;;  %v17030_v46 = vsel %vm16862_vm7, %v13337_v22, %v1439_v8  ;;  %v1441_v16 = vrot.slane %v1439_v8, 4  ;;  %v1290_v8 = vld [vmem:[%s16507_s21 + $0x18] sm:$0xe] }
  0x9b   : > { %v1448_v45 = vrot.slane %v1446_v47, 4 }
  0x9c   : > { %v17018_v10 = vsel %vm16862_vm7, %v1427_v49, %v1428_v38  ;;  %v17026_v50 = vsel %vm16862_vm7, %v1434_v1, %v1435_v7  ;;  %v17040_v1 = vsel %vm16862_vm7, %v13338_v60, %v1446_v47  ;;  %v1449_v38 = vrot.slane %v16804_v28, 5  ;;  %v16238_v7 = vld [vmem:[%s16507_s21 + $0x8] sm:$0x1] }
  0x9d   : > { %v13351_v0 = vcombine.low %v17008_v6, %v17018_v10  ;;  %v13352_v2 = vcombine.low %v17013_v25, %v17026_v50  ;;  %v21817_v49 = vcombine.low %v16616_v52, %v16622_v57  ;;  %v1443_v24 = vsel %vm16862_vm7, %v1441_v16, %v1442_v58  ;;  %v1288_v58 = vld [vmem:[%s16507_s21] sm:$0xe]  ;;  %v17189_v25 = vld [vmem:[%s16507_s21 + $0x50] sm:$0x1] }
  0x9e   : > { %v13353_v32 = vcombine.low %v17030_v46, %v1443_v24  ;;  %v21818_v60 = vcombine.low %v16636_v17, %v16642_v27  ;;  %v21819_v52 = vcombine.low %v16657_v44, %v16660_v51  ;;  %v21820_v57 = vcombine.low %v16674_v63, %v16679_v14  ;;  %v16237_v17 = vld [vmem:[%s16507_s21 + $0x4] sm:$0xf]  ;;  %v16240_v46 = vld [vmem:[%s16507_s21 + $0x20] sm:$0x1] }
  0x9f   : > { %v21821_v28 = vcombine.low %v16691_v34, %v16704_v48  ;;  %v1341_v27 = vrot.slane %v16237_v17, 5  ;;  %v1344_v22 = vrot.slane %v16238_v7, 5  ;;  %v21822_v44 = vcombine.low %v16718_v9, %v16724_v19  ;;  %v16239_v9 = vld [vmem:[%s16507_s21 + $0x1c] sm:$0xf] }
  0xa0   : > { %v21823_v51 = vcombine.low %v16734_v40, %v16740_v53  ;;  %v13323_v63 = vrot.slane %v1288_v58, 9  ;;  %v21824_v34 = vcombine.low %v16752_v15, %v16757_v33  ;;  %v21825_v48 = vcombine.low %v16769_v4, %v16777_v13  ;;  %v16241_v13 = vld [vmem:[%s16507_s21 + $0x28] sm:$0xf] }
  0xa1   : > { %14782 = vmatmul.mubr.msk.bf16.gmra.mrb[8].mxu0 %vm782_vm3, %v13296_v21  ;;  %v1450_v21 = vsel %vm16862_vm7, %v1448_v45, %v1449_v38  ;;  %v1343_v14 = vrot.slane %v1341_v27, 4  ;;  %v1355_v19 = vrot.slane %v16239_v9, 5  ;;  %v13325_v15 = vrot.slane %v1290_v8, 9  ;;  %v16091_v8 = vld [vmem:[%s16507_s21 + $0x6c] sm:$0xff]  }
  0xa2   : > { %14785 = vmatprep.mubr.msk.bf16.mxu0 %vm782_vm3, %v21817_v49  ;;  %v13354_v11 = vcombine.low %v17040_v1, %v1450_v21  ;;  %v1342_v40 = vsel %vm16862_vm7, %v13323_v63, %v1341_v27  ;;  %v1358_v16 = vrot.slane %v16240_v46, 5  ;;  %v21826_v4 = vcombine.low %v16788_v39, %v16799_v56  ;;  %v1291_v49 = vld [vmem:[%s16507_s21 + $0x24] sm:$0xe]  ;;  %v13523_v63 = vld [vmem:[%s16507_s21 + $0x60] sm:$0xe] }
  0xa3   : > { %v1345_v53 = vsel %vm16862_vm7, %v1343_v14, %v1344_v22  ;;  %v1357_v33 = vrot.slane %v1355_v19, 4  ;;  %v1362_v1 = vrot.slane %v16241_v13, 5  ;;  %v1356_v45 = vsel %vm16862_vm7, %v13325_v15, %v1355_v19  ;;  %v16090_v19 = vld [vmem:[%s16507_s21 + $0x60] sm:$0xff]  }
  0xa4   : > { %v13339_v47 = vcombine.low %v1342_v40, %v1345_v53  ;;  %v13326_v21 = vrot.slane %v1291_v49, 9  ;;  %v21827_v39 = vrot.slane %v16860_v30, 2  ;;  %v21828_v17 = vcombine.low %v16871_v23, %v16875_v62  ;;  %v13436_v40 = vld [vmem:[%s16507_s21 + $0xc] sm:$0xf] }
  0xa5   : > { %v1359_v38 = vsel %vm16862_vm7, %v1357_v33, %v1358_v16  ;;  %v21829_v23 = vcombine.low %v16893_v35, %v16907_v43  ;;  %v21830_v62 = vcombine.low %v16900_v31, %v16916_v29  ;;  %v21831_v7 = vcombine.low %v16920_v5, %v16936_v54  ;;  %v16083_v5 = vld [vmem:[%s16507_s21 + $0xc] sm:$0xff]   ;;  %v16085_v54 = vld [vmem:[%s16507_s21 + $0x24] sm:$0xff]   ;;  %v13439_v33 = vld [vmem:[%s16507_s21 + $0x18] sm:$0xf] }
  0xa6   : > { %v13341_v24 = vcombine.low %v1356_v45, %v1359_v38  ;;  %v1911_v56 = vsel %vm831_vm2, %v21827_v39, 0  ;;  %v1363_v27 = vsel %vm16862_vm7, %v13326_v21, %v1362_v1  ;;  %v21832_v22 = vcombine.low %v16930_v55, %v16944_v42  ;;  %v16084_v55 = vld [vmem:[%s16507_s21 + $0x18] sm:$0xff]   ;;  %v17242_v38 = vld [vmem:[%s16507_s21 + $0x80] sm:$0x1] }
  0xa7   : > { %v21833_v35 = vcombine.low %v16951_v20, %v16963_v18  ;;  %v21834_v31 = vcombine.low %v16957_v3, %v16972_v41  ;;  %v21835_v43 = vcombine.low %v16976_v36, %v16993_v12  ;;  %v21836_v29 = vcombine.low %v16987_v37, %v17001_v59  ;;  %v17171_v3 = vld [vmem:[%s21612_s1 + $0x8] ss:$0 sps:$4 sm:$0xcc]   ;;  %v16086_v20 = vld [vmem:[%s16507_s21 + $0x30] sm:$0xff]   ;;  %v16087_v41 = vld [vmem:[%s16507_s21 + $0x3c] sm:$0xff]  }
  0xa8   : > { %v21630_v18 = vrot.slane %v17171_v3, 2  ;;  %v17186_v36 = vld [vmem:[%s16507_s21 + $0x4c] sm:$0xf]  ;;  %v13521_v37 = vld [vmem:[%s16507_s21 + $0x48] sm:$0xe]  ;;  %v2935_v59 = vrot.slane %v17189_v25, 5 }
  0xa9   : > { %14786 = vmatmul.mubr.msk.bf16.gmra.mrb[12].mxu0 %vm782_vm3, %v21818_v60  ;;  %v1364_v60 = vrot.slane %v1362_v1, 4  ;;  %v2932_v12 = vrot.slane %v17186_v36, 5  ;;  %v13537_v6 = vrot.slane %v13521_v37, 9  ;;  %v2155_v16 = vshrl.u32 %v13436_v40, 16  ;;  %v17239_v45 = vld [vmem:[%s16507_s21 + $0x7c] sm:$0xf] }
  0xaa   : > { %14789 = vmatprep.mubr.msk.bf16.mxu0 %vm782_vm3, %v21819_v52  ;;  %v16242_v52 = vld [vmem:[%s16507_s21 + $0x2c] sm:$0x1]  ;;  %v2179_v49 = vshrl.u32 %v13439_v33, 16  ;;  %v13525_v21 = vld [vmem:[%s16507_s21 + $0x78] sm:$0xe] }
  0xab   : > { %v2934_v10 = vrot.slane %v2932_v12, 4  ;;  %v17198_v50 = vsel %vm16862_vm7, %v13537_v6, %v2932_v12  ;;  %v13541_v39 = vrot.slane %v13525_v21, 9  ;;  %v17278_v37 = vld [vmem:[%s16507_s21 + $0x28] sm:$0xf]  ;;  %v17281_v12 = vld [vmem:[%s16507_s21 + $0x94] sm:$0xf] }
  0xb1   : > { %14790 = vmatmul.mubr.msk.bf16.gmra.mrb[16].mxu0 %vm782_vm3, %v21820_v57  ;;  %v1365_v57 = vrot.slane %v16242_v52, 5  ;;  %v2963_v52 = vrot.slane %v17242_v38, 5 }
  0xb2   : > { %14793 = vmatprep.mubr.msk.bf16.mxu0 %vm782_vm3, %v21821_v28  ;;  %v2538_v28 = vld [vmem:[%s21612_s1 + $0x8] sm:$0x3] }
  0xb3   : > { %v1366_v30 = vsel %vm16862_vm7, %v1364_v60, %v1365_v57  ;;  %v2636_v42 = vsel %vm831_vm2, %v2538_v28, 0  ;;  %v2960_v60 = vrot.slane %v17239_v45, 5  ;;  %v17249_v57 = vld [vmem:[%s16507_s21 + $0x1c] sm:$0xf] }
  0xb4   : > { %v13342_v58 = vcombine.low %v1363_v27, %v1366_v30  ;;  %v17253_v27 = vld [vmem:[%s16507_s21 + $0x14] sm:$0x1] }
  0xb9   : > { %14794 = vmatmul.mubr.msk.bf16.gmra.mrb[20].mxu0 %vm782_vm3, %v21822_v44  ;;  %v17209_v44 = vld [vmem:[%s16507_s21 + $0x64] sm:$0xf] }
  0xba   : > { %14797 = vmatprep.mubr.msk.bf16.mxu0 %vm782_vm3, %v21823_v51  ;;  %v17212_v51 = vld [vmem:[%s16507_s21 + $0x68] sm:$0x1]  ;;  %v2946_v14 = vrot.slane %v17209_v44, 5 }
  0xbc   : > { %v2948_v9 = vrot.slane %v2946_v14, 4 }
  0xc1   : > { %14798 = vmatmul.mubr.msk.bf16.gmra.mrb[24].mxu0 %vm782_vm3, %v21824_v34  ;;  %v2949_v34 = vrot.slane %v17212_v51, 5 }
  0xc2   : > { %14801 = vmatprep.mubr.msk.bf16.mxu0 %vm782_vm3, %v21825_v48  ;;  %v13539_v48 = vrot.slane %v13523_v63, 9 }
  0xc3   : > { %v17230_v15 = vsel %vm16862_vm7, %v2948_v9, %v2949_v34 }
  0xc4   : > { %v17222_v53 = vsel %vm16862_vm7, %v13539_v48, %v2946_v14  ;;  %21837 = vst [vmem:[#allocation9_spill] sm:$0xff] %v17230_v15 }
  0xc9   : > { %14802 = vmatmul.mubr.msk.bf16.gmra.mrb[28].mxu0 %vm782_vm3, %v21826_v4  ;;  %v2158_v4 = vshll.u32 %v13436_v40, 16 }
  0xca   : > { %14807 = vmatprep.mubr.msk.bf16.mxu0 %vm782_vm3, %v13339_v47  ;;  %v17226_v47 = vld [vmem:[%s16507_s21 + $0x10] sm:$0xf] }
  0xcb   : > { %v2164_v13 = vshll.u32 %v17226_v47, 16  ;;  %v2168_v1 = vshrl.u32 %v17226_v47, 16  ;;  %v2160_v30 = vrot.slane %v2158_v4, 5  ;;  %v2216_v4 = vshrl.u32 %v17278_v37, 16 }
  0xd1   : > { %14808 = vmatmul.mubr.msk.bf16.vlgmr.msra.gmra.mrb[0].mxu0 %vm782_vm3, %v21828_v17  ;;  %v16092_v17 = vld [vmem:[%s16507_s21 + $0x78] sm:$0xff]  }
  0xd2   : > { %14840 = vmatpush3.bf16.msra.mxu0 %v1911_v56  ;;  %14811 = vmatprep.mubr.msk.bf16.mxu0 %vm782_vm3, %v13341_v24  ;;  %v2182_v24 = vshll.u32 %v13439_v33, 16  ;;  %v2157_v56 = vrot.slane %v2155_v16, 4 }
  0xd3   : > { %16001 = vmatprep.subr.msk.bf16.mxu0 %vm831_vm2, %v2538_v28  ;;  %v2962_v28 = vrot.slane %v2960_v60, 4 }
  0xd9   : > { %14812 = vmatmul.mubr.msk.bf16.gmra.mrb[4].mxu0 %vm782_vm3, %v13342_v58  ;;  %v17255_v58 = vrot.slane %v2164_v13, 5  ;;  %v13445_v13 = vld [vmem:[%s16507_s21 + $0x30] sm:$0xf] }
  0xda   : > { %14815 = vmatprep.mubr.msk.bf16.mxu0 %vm782_vm3, %v21829_v23  ;;  %v2170_v23 = vrot.slane %v2168_v1, 4  ;;  %v17298_v1 = vld [vmem:[%s16507_s21 + $0x34] sm:$0xf] }
  0xe1   : > { %14816 = vmatmul.mubr.msk.bf16.gmra.mrb[8].mxu0 %vm782_vm3, %v21830_v62  ;;  %v17259_v62 = vsel %vm16862_vm7, %v13541_v39, %v2960_v60 }
  0xe2   : > { %14819 = vmatprep.mubr.msk.bf16.mxu0 %vm782_vm3, %v21831_v7  ;;  %21838 = vst [vmem:[#allocation10_spill] sm:$0xff] %v17259_v62  ;;  %v16093_v7 = vld [vmem:[%s16507_s21 + $0x84] sm:$0xff]  }
  0xe9   : > { %14820 = vmatmul.mubr.msk.bf16.gmra.mrb[12].mxu0 %vm782_vm3, %v21832_v22  ;;  %v2181_v22 = vrot.slane %v2179_v49, 4 }
  0xea   : > { %14823 = vmatprep.mubr.msk.bf16.mxu0 %vm782_vm3, %v21833_v35  ;;  %v2184_v35 = vrot.slane %v2182_v24, 5  ;;  %v16095_v24 = vld [vmem:[%s16507_s21 + $0x9c] sm:$0xff]  }
  0xec   : > { %v2185_v6 = vor.u32 %v2184_v35, %v2181_v22  ;;  %v2227_v22 = vshrl.u32 %v13445_v13, 16  ;;  %v2230_v35 = vshll.u32 %v13445_v13, 16 }
  0xf1   : > { %14824 = vmatmul.mubr.msk.bf16.gmra.mrb[16].mxu0 %vm782_vm3, %v21834_v31  ;;  %v2188_v31 = vshll.u32 %v17249_v57, 16 }
  0xf2   : > { %14827 = vmatprep.mubr.msk.bf16.mxu0 %vm782_vm3, %v21835_v43  ;;  %v17265_v43 = vsel %vm16862_vm7, %v2962_v28, %v2963_v52  ;;  %v17305_v52 = vrot.slane %v2185_v6, 4 }
  0xf3   : > { %21839 = vst [vmem:[#allocation11_spill] sm:$0xff] %v17265_v43 }
  0xf9   : > { %14828 = vmatmul.mubr.msk.bf16.gmra.mrb[20].mxu0 %vm782_vm3, %v21836_v29  ;;  %v2192_v29 = vshrl.u32 %v17249_v57, 16 }
  0xfa   : > { %14831 = vmatprep.mubr.msk.bf16.mxu0 %vm782_vm3, %v13351_v0  ;;  %v16088_v0 = vld [vmem:[%s16507_s21 + $0x48] sm:$0xff]  }
  0xfb   : > { %v2194_v14 = vrot.slane %v2192_v29, 4  ;;  %v2218_v29 = vrot.slane %v2216_v4, 4  ;;  %v16096_v4 = vld [vmem:[%s16507_s21 + $0xa8] sm:$0xff]  }
 0x101   : > { %14832 = vmatmul.mubr.msk.bf16.gmra.mrb[24].mxu0 %vm782_vm3, %v13352_v2  ;;  %v16089_v2 = vld [vmem:[%s16507_s21 + $0x54] sm:$0xff]  }
 0x102   : > { %14835 = vmatprep.mubr.msk.bf16.mxu0 %vm782_vm3, %v13353_v32  ;;  %v17203_v32 = vsel %vm16862_vm7, %v2934_v10, %v2935_v59  ;;  %v17284_v59 = vld [vmem:[%s16507_s21 + $0x98] sm:$0x1]  ;;  %v17287_v10 = vrot.slane %v2188_v31, 5  ;;  %v2236_v31 = vshll.u32 %v17298_v1, 16 }
 0x103   : > { %v2977_v63 = vrot.slane %v17284_v59, 5 }
 0x109   : > { %14836 = vmatmul.mubr.msk.bf16.gmra.mrb[28].mxu0 %vm782_vm3, %v13354_v11  ;;  %v16098_v11 = vld [vmem:[%s16507_s21 + $0xc0] sm:$0xff]  }
 0x10a   : > { %14841 = vmatprep.mubr.msk.bf16.mxu0 %vm782_vm3, %v16083_v5  ;;  %v17379_v5 = vld [vmem:[%s16507_s21 + $0xc4] sm:$0xf] }
 0x111   : > { %14842 = vmatmul.mubr.msk.bf16.vlgmr.msra.gmra.mrb[0].mxu0 %vm782_vm3, %v16084_v55  ;;  %v2174_v55 = vshll.u32 %v17253_v27, 16 }
 0x112   : > { %14874 = vmatpush3.bf16.msra.mxu0 %v2636_v42  ;;  %14845 = vmatprep.mubr.msk.bf16.mxu0 %vm782_vm3, %v16085_v54  ;;  %v17272_v54 = vld [vmem:[%s16507_s21 + $0x20] sm:$0x1]  ;;  %v13442_v42 = vld [vmem:[%s16507_s21 + $0x24] sm:$0xf] }
 0x113   : > { %16002 = vmatprep.subr.msk.bf16.mxu0 %vm831_vm2, %v21630_v18  ;;  %v2203_v34 = vshrl.u32 %v13442_v42, 16  ;;  %v2206_v48 = vshll.u32 %v13442_v42, 16  ;;  %v2198_v40 = vshll.u32 %v17272_v54, 16  ;;  %v2176_v60 = vrot.slane %v2174_v55, 5  ;;  %v17323_v42 = vld [vmem:[%s16507_s21 + $0xac] sm:$0xf] }
 0x114   : > { %v2240_v55 = vshrl.u32 %v17298_v1, 16 }
 0x115   : > { %v2205_v28 = vrot.slane %v2203_v34, 4  ;;  %v17332_v6 = vrot.slane %v2198_v40, 5  ;;  %v2229_v40 = vrot.slane %v2227_v22, 4 }
 0x119   : > { %14846 = vmatmul.mubr.msk.bf16.gmra.mrb[4].mxu0 %vm782_vm3, %v16086_v20  ;;  %v2161_v20 = vor.u32 %v2160_v30, %v2157_v56  ;;  %v2195_v56 = vor.u32 %v2194_v14, %v17287_v10 }
 0x11a   : > { %14849 = vmatprep.mubr.msk.bf16.mxu0 %vm782_vm3, %v16087_v41  ;;  %v2171_v41 = vor.u32 %v2170_v23, %v17255_v58  ;;  %v17315_v23 = vld [vmem:[%s16507_s21 + $0x2c] sm:$0x1] }
 0x11b   : > { %v2162_v16 = vrot.slane %v2161_v20, 4  ;;  %v17326_v20 = vld [vmem:[%s16507_s21 + $0xb0] sm:$0x1]  ;;  %v17339_v34 = vrot.slane %v2195_v56, 4 }
 0x11c   : > { %v2172_v21 = vrot.slane %v2171_v41, 4 }
 0x11d   : > { %v2167_v41 = vsel %vm16548_vm4, %v2162_v16, %v17255_v58  ;;  %v2222_v58 = vshll.u32 %v17315_v23, 16 }
 0x11e   : > { %v2177_v14 = vsel %vm16548_vm4, %v2172_v21, %v2176_v60  ;;  %v17351_v21 = vrot.slane %v2236_v31, 5  ;;  %v2242_v60 = vrot.slane %v2240_v55, 4  ;;  %v2191_v31 = vsel %vm16548_vm4, %v17305_v52, %v17287_v10 }
 0x11f   : > { %v2201_v10 = vsel %vm16548_vm4, %v17339_v34, %v17332_v6  ;;  %v17389_v34 = vld [vmem:[%s16507_s21 + $0x44] sm:$0x1] }
 0x121   : > { %14850 = vmatmul.mubr.msk.bf16.gmra.mrb[8].mxu0 %vm782_vm3, %v16088_v0  ;;  %v13527_v0 = vld [vmem:[%s16507_s21 + $0x90] sm:$0xe] }
 0x122   : > { %14853 = vmatprep.mubr.msk.bf16.mxu0 %vm782_vm3, %v16089_v2  ;;  %v2974_v2 = vrot.slane %v17281_v12, 5  ;;  %v13543_v9 = vrot.slane %v13527_v0, 9  ;;  %v13529_v0 = vld [vmem:[%s16507_s21 + $0xa8] sm:$0xe] }
 0x124   : > { %v2976_v33 = vrot.slane %v2974_v2, 4  ;;  %v17302_v49 = vsel %vm16862_vm7, %v13543_v9, %v2974_v2  ;;  %v2988_v2 = vrot.slane %v17323_v42, 5  ;;  %v13448_v9 = vld [vmem:[%s16507_s21 + $0x3c] sm:$0xf] }
 0x125   : > { %21840 = vst [vmem:[#allocation12_spill] sm:$0xff] %v17302_v49  ;;  %v2254_v22 = vshll.u32 %v13448_v9, 16 }
 0x126   : > { %v17309_v39 = vsel %vm16862_vm7, %v2976_v33, %v2977_v63  ;;  %v2991_v63 = vrot.slane %v17326_v20, 5  ;;  %v17344_v33 = vld [vmem:[%s16507_s21 + $0x40] sm:$0xf]  ;;  %v2990_v16 = vrot.slane %v2988_v2, 4 }
 0x127   : > { %21841 = vst [vmem:[#allocation13_spill] sm:$0xff] %v17309_v39  ;;  %v2264_v55 = vshrl.u32 %v17344_v33, 16 }
 0x128   : > { %v17361_v30 = vsel %vm16862_vm7, %v2990_v16, %v2991_v63 }
 0x129   : > { %14854 = vmatmul.mubr.msk.bf16.gmra.mrb[12].mxu0 %vm782_vm3, %v16090_v19  ;;  %v16094_v19 = vld [vmem:[%s16507_s21 + $0x90] sm:$0xff]   ;;  %21843 = vst [vmem:[#allocation15_spill] sm:$0xff] %v17361_v30 }
 0x12a   : > { %14857 = vmatprep.mubr.msk.bf16.mxu0 %vm782_vm3, %v16091_v8  ;;  %v2212_v8 = vshll.u32 %v17278_v37, 16 }
 0x131   : > { %14858 = vmatmul.mubr.msk.bf16.gmra.mrb[16].mxu0 %vm782_vm3, %v16092_v17  ;;  %v2208_v17 = vrot.slane %v2206_v48, 5 }
 0x132   : > { %14861 = vmatprep.mubr.msk.bf16.mxu0 %vm782_vm3, %v16093_v7  ;;  %v17317_v7 = vrot.slane %v2212_v8, 5  ;;  %v2232_v8 = vrot.slane %v2230_v35, 5  ;;  %v13451_v35 = vld [vmem:[%s16507_s21 + $0x48] sm:$0xf] }
 0x133   : > { %v2209_v48 = vor.u32 %v2208_v17, %v2205_v28  ;;  %v16097_v28 = vld [vmem:[%s16507_s21 + $0xb4] sm:$0xff]   ;;  %v13484_v17 = vcombine.low %v2167_v41, %v2177_v14  ;;  %v2224_v14 = vrot.slane %v2222_v58, 5  ;;  %v2275_v16 = vshrl.u32 %v13451_v35, 16 }
 0x134   : > { %v2219_v13 = vor.u32 %v2218_v29, %v17317_v7  ;;  %v2260_v29 = vshll.u32 %v17344_v33, 16  ;;  %v2278_v41 = vshll.u32 %v13451_v35, 16  ;;  %v17407_v35 = vld [vmem:[%s16507_s21 + $0x58] sm:$0xf] }
 0x136   : > { %v2220_v52 = vrot.slane %v2219_v13, 4  ;;  %v17391_v13 = vrot.slane %v2260_v29, 5  ;;  %v2288_v29 = vshrl.u32 %v17186_v36, 16 }
 0x138   : > { %v2225_v30 = vsel %vm16548_vm4, %v2220_v52, %v2224_v14  ;;  %v2277_v52 = vrot.slane %v2275_v16, 4 }
 0x139   : > { %14862 = vmatmul.mubr.msk.bf16.gmra.mrb[20].mxu0 %vm782_vm3, %v16094_v19  ;;  %v13545_v19 = vrot.slane %v13529_v0, 9  ;;  %v2251_v0 = vshrl.u32 %v13448_v9, 16  ;;  %v2233_v9 = vor.u32 %v2232_v8, %v2229_v40  ;;  %v2256_v40 = vrot.slane %v2254_v22, 5  ;;  %v13531_v8 = vld [vmem:[%s16507_s21 + $0xc0] sm:$0xe] }
 0x13a   : > { %14865 = vmatprep.mubr.msk.bf16.mxu0 %vm782_vm3, %v16095_v24  ;;  %v17349_v24 = vld [vmem:[%s16507_s21 + $0x38] sm:$0x1]  ;;  %v13547_v46 = vrot.slane %v13531_v8, 9 }
 0x13b   : > { %v17355_v56 = vsel %vm16862_vm7, %v13545_v19, %v2988_v2  ;;  %v2210_v2 = vrot.slane %v2209_v48, 4  ;;  %v2246_v63 = vshll.u32 %v17349_v24, 16  ;;  %v2243_v19 = vor.u32 %v2242_v60, %v17351_v21  ;;  %v17382_v48 = vld [vmem:[%s16507_s21 + $0xc8] sm:$0x1] }
 0x13c   : > { %21842 = vst [vmem:[#allocation14_spill] sm:$0xff] %v17355_v56  ;;  %v2253_v58 = vrot.slane %v2251_v0, 4  ;;  %v3005_v6 = vrot.slane %v17382_v48, 5  ;;  %v2266_v60 = vrot.slane %v2264_v55, 4  ;;  %v17397_v0 = vrot.slane %v2233_v9, 4 }
 0x13d   : > { %v17399_v22 = vrot.slane %v2246_v63, 5  ;;  %v2284_v56 = vshll.u32 %v17186_v36, 16  ;;  %v13454_v55 = vld [vmem:[%s16507_s21 + $0x54] sm:$0xf]  ;;  %v2270_v9 = vshll.u32 %v17389_v34, 16  ;;  %v2280_v36 = vrot.slane %v2278_v41, 5 }
 0x13e   : > { %v2267_v14 = vor.u32 %v2266_v60, %v17391_v13 }
 0x13f   : > { %v17429_v41 = vrot.slane %v2284_v56, 5  ;;  %v13457_v56 = vld [vmem:[%s16507_s21 + $0x60] sm:$0xf] }
 0x141   : > { %14866 = vmatmul.mubr.msk.bf16.gmra.mrb[24].mxu0 %vm782_vm3, %v16096_v4  ;;  %v3002_v4 = vrot.slane %v17379_v5, 5 }
 0x142   : > { %14869 = vmatprep.mubr.msk.bf16.mxu0 %vm782_vm3, %v16097_v28  ;;  %v2215_v28 = vsel %vm16548_vm4, %v2210_v2, %v17317_v7  ;;  %v17413_v7 = vrot.slane %v2243_v19, 4  ;;  %v2257_v2 = vor.u32 %v2256_v40, %v2253_v58  ;;  %v2308_v19 = vshll.u32 %v17407_v35, 16 }
 0x143   : > { %v3004_v18 = vrot.slane %v3002_v4, 4  ;;  %v17411_v8 = vsel %vm16862_vm7, %v13547_v46, %v3002_v4  ;;  %v2299_v46 = vshrl.u32 %v13454_v55, 16  ;;  %v2302_v4 = vshll.u32 %v13454_v55, 16 }
 0x144   : > { %21844 = vst [vmem:[#allocation17_spill] sm:$0xff] %v17411_v8  ;;  %v2312_v58 = vshrl.u32 %v17407_v35, 16  ;;  %v21846_v40 = vrot.slane %v17171_v3, 2  ;;  %v13486_v60 = vcombine.low %v2215_v28, %v2225_v30  ;;  %v2239_v55 = vsel %vm16548_vm4, %v17397_v0, %v17351_v21  ;;  %v13460_v30 = vld [vmem:[%s16507_s21 + $0x6c] sm:$0xf] }
 0x145   : > { %v17418_v63 = vsel %vm16862_vm7, %v3004_v18, %v3005_v6  ;;  %v13485_v18 = vcombine.low %v2191_v31, %v2201_v10  ;;  %v2290_v6 = vrot.slane %v2288_v29, 4  ;;  %v2272_v3 = vrot.slane %v2270_v9, 5  ;;  %v17441_v31 = vld [vmem:[%s16507_s21 + $0x5c] sm:$0x1]  ;;  %v17449_v0 = vld [vmem:[%s16507_s21 + $0x70] sm:$0xf] }
 0x146   : > { %21845 = vst [vmem:[#allocation18_spill] sm:$0xff] %v17418_v63  ;;  %v3109_v16 = vsel %vm831_vm2, %v21846_v40, 0  ;;  %v2258_v10 = vrot.slane %v2257_v2, 4  ;;  %v2268_v29 = vrot.slane %v2267_v14, 4  ;;  %v2281_v40 = vor.u32 %v2280_v36, %v2277_v52 }
 0x147   : > { %v2301_v28 = vrot.slane %v2299_v46, 4  ;;  %v2304_v39 = vrot.slane %v2302_v4, 5  ;;  %v17446_v63 = vrot.slane %v2308_v19, 5  ;;  %v2314_v21 = vrot.slane %v2312_v58, 4 }
 0x148   : > { %v2291_v8 = vor.u32 %v2290_v6, %v17429_v41  ;;  %v2326_v9 = vshll.u32 %v13457_v56, 16  ;;  %v2332_v2 = vshll.u32 %v17209_v44, 16  ;;  %v2336_v14 = vshrl.u32 %v17209_v44, 16  ;;  %v13463_v44 = vld [vmem:[%s16507_s21 + $0x78] sm:$0xf] }
 0x149   : > { %14870 = vmatmul.mubr.msk.bf16.gmra.mrb[28].mxu0 %vm782_vm3, %v16098_v11  ;;  %v2249_v11 = vsel %vm16548_vm4, %v17413_v7, %v17399_v22  ;;  %v2318_v22 = vshll.u32 %v17441_v31, 16  ;;  %v2323_v7 = vshrl.u32 %v13457_v56, 16  ;;  %v2350_v52 = vshll.u32 %v13460_v30, 16 }
 0x14a   : > { %14875 = vmatprep.mubr.msk.bf16.mxu0 %vm782_vm3, %v13484_v17  ;;  %v2294_v17 = vshll.u32 %v17189_v25, 16  ;;  %v2347_v25 = vshrl.u32 %v13460_v30, 16  ;;  %v2263_v36 = vsel %vm16548_vm4, %v2258_v10, %v17391_v13  ;;  %v2273_v46 = vsel %vm16548_vm4, %v2268_v29, %v2272_v3  ;;  %v17467_v30 = vld [vmem:[%s21612_s1 + $0xc] sm:$0x3] }
 0x14b   : > { %v2356_v4 = vshll.u32 %v17449_v0, 16  ;;  %v2360_v19 = vshrl.u32 %v17449_v0, 16  ;;  %v2282_v58 = vrot.slane %v2281_v40, 4  ;;  %v2305_v56 = vor.u32 %v2304_v39, %v2301_v28 }
 0x14c   : > { %v2296_v6 = vrot.slane %v2294_v17, 5  ;;  %v2315_v49 = vor.u32 %v2314_v21, %v17446_v63  ;;  %v2292_v13 = vrot.slane %v2291_v8, 4  ;;  %v2320_v3 = vrot.slane %v2318_v22, 5  ;;  %v17474_v21 = vld [vmem:[%s16507_s21 + $0x74] sm:$0x1] }
 0x14d   : > { %v2325_v10 = vrot.slane %v2323_v7, 4  ;;  %v2328_v29 = vrot.slane %v2326_v9, 5  ;;  %v17471_v40 = vrot.slane %v2332_v2, 5  ;;  %v2338_v39 = vrot.slane %v2336_v14, 4 }
 0x14e   : > { %v2349_v17 = vrot.slane %v2347_v25, 4  ;;  %v2352_v28 = vrot.slane %v2350_v52, 5  ;;  %v17476_v43 = vrot.slane %v2356_v4, 5  ;;  %v2362_v62 = vrot.slane %v2360_v19, 4  ;;  %v13466_v19 = vld [vmem:[%s16507_s21 + $0x84] sm:$0xf] }
 0x14f   : > { %v2371_v15 = vshrl.u32 %v13463_v44, 16  ;;  %v2374_v8 = vshll.u32 %v13463_v44, 16  ;;  %v2384_v22 = vshrl.u32 %v17239_v45, 16  ;;  %v13487_v7 = vcombine.low %v2239_v55, %v2249_v11 }
 0x150   : > { %v13488_v9 = vcombine.low %v2263_v36, %v2273_v46  ;;  %v2287_v2 = vsel %vm16548_vm4, %v2282_v58, %v17429_v41  ;;  %v2297_v14 = vsel %vm16548_vm4, %v2292_v13, %v2296_v6  ;;  %v2329_v25 = vor.u32 %v2328_v29, %v2325_v10 }
 0x151   : > { %14876 = vmatmul.mubr.msk.bf16.vlgmr.msra.gmra.mrb[0].mxu0 %vm782_vm3, %v13485_v18  ;;  %v2306_v18 = vrot.slane %v2305_v56, 4  ;;  %v2339_v52 = vor.u32 %v2338_v39, %v17471_v40  ;;  %v2342_v4 = vshll.u32 %v17212_v51, 16  ;;  %v17492_v56 = vld [vmem:[%s16507_s21 + $0x88] sm:$0xf]  ;;  %v2363_v55 = vor.u32 %v2362_v62, %v17476_v43 }
 0x152   : > { %14908 = vmatpush3.bf16.msra.mxu0 %v3109_v16  ;;  %14879 = vmatprep.mubr.msk.bf16.mxu0 %vm782_vm3, %v13486_v60  ;;  %v2316_v16 = vrot.slane %v2315_v49, 4  ;;  %v2380_v60 = vshll.u32 %v17239_v45, 16  ;;  %v2366_v49 = vshll.u32 %v17474_v21, 16  ;;  %v2353_v45 = vor.u32 %v2352_v28, %v2349_v17 }
 0x153   : > { %16003 = vmatprep.subr.msk.bf16.mxu0 %vm831_vm2, %v17467_v30  ;;  %v2373_v11 = vrot.slane %v2371_v15, 4  ;;  %v2376_v36 = vrot.slane %v2374_v8, 5  ;;  %v2311_v41 = vsel %vm16548_vm4, %v2306_v18, %v17446_v63  ;;  %v2386_v51 = vrot.slane %v2384_v22, 4  ;;  %v13469_v8 = vld [vmem:[%s16507_s21 + $0x90] sm:$0xf] }
 0x154   : > { %v2321_v46 = vsel %vm16548_vm4, %v2316_v16, %v2320_v3  ;;  %v17500_v58 = vrot.slane %v2380_v60, 5  ;;  %v2395_v6 = vshrl.u32 %v13466_v19, 16  ;;  %v2398_v44 = vshll.u32 %v13466_v19, 16  ;;  %v17510_v22 = vld [vmem:[%s16507_s21 + $0x8c] sm:$0x1] }
 0x155   : > { %v2404_v62 = vshll.u32 %v17492_v56, 16  ;;  %v2408_v15 = vshrl.u32 %v17492_v56, 16  ;;  %v2330_v13 = vrot.slane %v2329_v25, 4  ;;  %v2340_v63 = vrot.slane %v2339_v52, 4 }
 0x156   : > { %v2344_v10 = vrot.slane %v2342_v4, 5  ;;  %v2368_v29 = vrot.slane %v2366_v49, 5  ;;  %v2354_v3 = vrot.slane %v2353_v45, 4  ;;  %v2364_v39 = vrot.slane %v2363_v55, 4 }
 0x157   : > { %v2377_v17 = vor.u32 %v2376_v36, %v2373_v11  ;;  %v2390_v28 = vshll.u32 %v17242_v38, 16  ;;  %v13489_v18 = vcombine.low %v2287_v2, %v2297_v14  ;;  %v13490_v16 = vcombine.low %v2311_v41, %v2321_v46  ;;  %v13472_v2 = vld [vmem:[%s16507_s21 + $0x9c] sm:$0xf]  ;;  %v17521_v14 = vld [vmem:[%s16507_s21 + $0xa0] sm:$0xf] }
 0x158   : > { %v2387_v60 = vor.u32 %v2386_v51, %v17500_v58  ;;  %v17512_v25 = vrot.slane %v2404_v62, 5  ;;  %v2410_v52 = vrot.slane %v2408_v15, 4  ;;  %v2335_v4 = vsel %vm16548_vm4, %v2330_v13, %v17471_v40 }
 0x159   : > { %14880 = vmatmul.mubr.msk.bf16.gmra.mrb[4].mxu0 %vm782_vm3, %v13487_v7  ;;  %v2397_v7 = vrot.slane %v2395_v6, 4  ;;  %v2345_v49 = vsel %vm16548_vm4, %v2340_v63, %v2344_v10  ;;  %v2419_v38 = vshrl.u32 %v13469_v8, 16  ;;  %v2422_v19 = vshll.u32 %v13469_v8, 16 }
 0x15a   : > { %14883 = vmatprep.mubr.msk.bf16.mxu0 %vm782_vm3, %v13488_v9  ;;  %v2400_v9 = vrot.slane %v2398_v44, 5  ;;  %v2359_v45 = vsel %vm16548_vm4, %v2354_v3, %v17476_v43  ;;  %v2369_v55 = vsel %vm16548_vm4, %v2364_v39, %v2368_v29  ;;  %v2378_v11 = vrot.slane %v2377_v17, 4 }
 0x15b   : > { %v2392_v36 = vrot.slane %v2390_v28, 5  ;;  %v2388_v41 = vrot.slane %v2387_v60, 4  ;;  %v2414_v40 = vshll.u32 %v17510_v22, 16  ;;  %v2428_v46 = vshll.u32 %v17281_v12, 16 }
 0x15c   : > { %v2432_v51 = vshrl.u32 %v17281_v12, 16  ;;  %v2443_v6 = vshrl.u32 %v13472_v2, 16  ;;  %v2446_v44 = vshll.u32 %v13472_v2, 16  ;;  %v2452_v62 = vshll.u32 %v17521_v14, 16 }
 0x15d   : > { %v2456_v43 = vshrl.u32 %v17521_v14, 16  ;;  %v2401_v15 = vor.u32 %v2400_v9, %v2397_v7  ;;  %v2411_v13 = vor.u32 %v2410_v52, %v17512_v25  ;;  %v2421_v63 = vrot.slane %v2419_v38, 4  ;;  %v13475_v52 = vld [vmem:[%s16507_s21 + $0xa8] sm:$0xf] }
 0x15e   : > { %v2424_v10 = vrot.slane %v2422_v19, 5  ;;  %v13491_v29 = vcombine.low %v2335_v4, %v2345_v49  ;;  %v13492_v3 = vcombine.low %v2359_v45, %v2369_v55  ;;  %v2383_v12 = vsel %vm16548_vm4, %v2378_v11, %v17500_v58 }
 0x15f   : > { %v2393_v39 = vsel %vm16548_vm4, %v2388_v41, %v2392_v36  ;;  %v2416_v17 = vrot.slane %v2414_v40, 5  ;;  %v17541_v28 = vrot.slane %v2428_v46, 5  ;;  %v2434_v8 = vrot.slane %v2432_v51, 4  ;;  %v13478_v36 = vld [vmem:[%s16507_s21 + $0xb4] sm:$0xf] }
 0x160   : > { %v2448_v60 = vrot.slane %v2446_v44, 5  ;;  %v2454_v7 = vrot.slane %v2452_v62, 5  ;;  %v2458_v9 = vrot.slane %v2456_v43, 4  ;;  %v2402_v4 = vrot.slane %v2401_v15, 4  ;;  %v17552_v41 = vld [vmem:[%s16507_s21 + $0xb8] sm:$0xf] }
 0x161   : > { %14884 = vmatmul.mubr.msk.bf16.gmra.mrb[8].mxu0 %vm782_vm3, %v13489_v18  ;;  %v17544_v18 = vld [vmem:[%s16507_s21 + $0xa4] sm:$0x1]  ;;  %v2412_v49 = vrot.slane %v2411_v13, 4  ;;  %v2425_v38 = vor.u32 %v2424_v10, %v2421_v63  ;;  %v2438_v58 = vshll.u32 %v17284_v59, 16  ;;  %v13493_v2 = vcombine.low %v2383_v12, %v2393_v39 }
 0x162   : > { %14887 = vmatprep.mubr.msk.bf16.mxu0 %vm782_vm3, %v13490_v16  ;;  %v2445_v16 = vrot.slane %v2443_v6, 4  ;;  %v2462_v19 = vshll.u32 %v17544_v18, 16  ;;  %v2435_v45 = vor.u32 %v2434_v8, %v17541_v28  ;;  %v2467_v55 = vshrl.u32 %v13475_v52, 16 }
 0x163   : > { %v2470_v11 = vshll.u32 %v13475_v52, 16  ;;  %v2459_v46 = vor.u32 %v2458_v9, %v2454_v7  ;;  %v2476_v51 = vshll.u32 %v17323_v42, 16  ;;  %v2480_v6 = vshrl.u32 %v17323_v42, 16 }
 0x164   : > { %v2449_v40 = vor.u32 %v2448_v60, %v2445_v16  ;;  %v2407_v59 = vsel %vm16548_vm4, %v2402_v4, %v17512_v25  ;;  %v2417_v44 = vsel %vm16548_vm4, %v2412_v49, %v2416_v17  ;;  %v2426_v62 = vrot.slane %v2425_v38, 4  ;;  %v13481_v49 = vld [vmem:[%s16507_s21 + $0xc0] sm:$0xf] }
 0x165   : > { %v2440_v43 = vrot.slane %v2438_v58, 5  ;;  %v2491_v15 = vshrl.u32 %v13478_v36, 16  ;;  %v2494_v13 = vshll.u32 %v13478_v36, 16  ;;  %v2500_v63 = vshll.u32 %v17552_v41, 16 }
 0x166   : > { %v2504_v10 = vshrl.u32 %v17552_v41, 16  ;;  %v2464_v42 = vrot.slane %v2462_v19, 5  ;;  %v2472_v12 = vrot.slane %v2470_v11, 5  ;;  %v2450_v39 = vrot.slane %v2449_v40, 4 }
 0x167   : > { %v2460_v8 = vrot.slane %v2459_v46, 4  ;;  %v2478_v25 = vrot.slane %v2476_v51, 5  ;;  %v2482_v16 = vrot.slane %v2480_v6, 4  ;;  %v13494_v60 = vcombine.low %v2407_v59, %v2417_v44 }
 0x168   : > { %v2493_v17 = vrot.slane %v2491_v15, 4  ;;  %v2496_v9 = vrot.slane %v2494_v13, 5  ;;  %v2502_v52 = vrot.slane %v2500_v63, 5  ;;  %v2506_v4 = vrot.slane %v2504_v10, 4 }
 0x169   : > { %14888 = vmatmul.mubr.msk.bf16.gmra.mrb[12].mxu0 %vm782_vm3, %v13491_v29  ;;  %v2436_v29 = vrot.slane %v2435_v45, 4  ;;  %v2431_v38 = vsel %vm16548_vm4, %v2426_v62, %v17541_v28  ;;  %v17572_v45 = vld [vmem:[%s16507_s21 + $0xbc] sm:$0x1]  ;;  %v2465_v11 = vsel %vm16548_vm4, %v2460_v8, %v2464_v42  ;;  %v2483_v36 = vor.u32 %v2482_v16, %v2478_v25 }
 0x16a   : > { %14891 = vmatprep.mubr.msk.bf16.mxu0 %vm782_vm3, %v13492_v3  ;;  %v2469_v3 = vrot.slane %v2467_v55, 4  ;;  %v2455_v55 = vsel %vm16548_vm4, %v2450_v39, %v2454_v7  ;;  %v2486_v40 = vshll.u32 %v17326_v20, 16  ;;  %v2515_v28 = vshrl.u32 %v13481_v49, 16 }
 0x16b   : > { %v2441_v58 = vsel %vm16548_vm4, %v2436_v29, %v2440_v43  ;;  %v2518_v46 = vshll.u32 %v13481_v49, 16  ;;  %v2524_v51 = vshll.u32 %v17379_v5, 16  ;;  %v2528_v6 = vshrl.u32 %v17379_v5, 16  ;;  %v13516_v49 = vld [vmem:[%s16507_s21 + $0xc] sm:$0xe] }
 0x16c   : > { %v2473_v19 = vor.u32 %v2472_v12, %v2469_v3  ;;  %v2497_v59 = vor.u32 %v2496_v9, %v2493_v17  ;;  %v2507_v44 = vor.u32 %v2506_v4, %v2502_v52  ;;  %v13495_v62 = vcombine.low %v2431_v38, %v2441_v58 }
 0x16d   : > { %v13496_v7 = vcombine.low %v2455_v55, %v2465_v11  ;;  %v2484_v15 = vrot.slane %v2483_v36, 4  ;;  %v2488_v13 = vrot.slane %v2486_v40, 5  ;;  %v2517_v63 = vrot.slane %v2515_v28, 4 }
 0x16e   : > { %v2474_v43 = vrot.slane %v2473_v19, 4  ;;  %v2520_v10 = vrot.slane %v2518_v46, 5  ;;  %v2526_v20 = vrot.slane %v2524_v51, 5  ;;  %v2530_v29 = vrot.slane %v2528_v6, 4  ;;  %v13517_v51 = vld [vmem:[%s16507_s21 + $0x18] sm:$0xe] }
 0x16f   : > { %v2498_v42 = vrot.slane %v2497_v59, 4  ;;  %v2508_v3 = vrot.slane %v2507_v44, 4  ;;  %v2489_v39 = vsel %vm16548_vm4, %v2484_v15, %v2488_v13  ;;  %v2897_v4 = vrot.slane %v17226_v47, 5  ;;  %v13518_v6 = vld [vmem:[%s16507_s21 + $0x24] sm:$0xe] }
 0x170   : > { %v2479_v5 = vsel %vm16548_vm4, %v2474_v43, %v2478_v25  ;;  %v2521_v8 = vor.u32 %v2520_v10, %v2517_v63  ;;  %v2531_v16 = vor.u32 %v2530_v29, %v2526_v20  ;;  %v13532_v11 = vrot.slane %v13516_v49, 9  ;;  %v17630_v29 = vld [vmem:[%s21612_s1 + $0xc] ss:$0 sps:$4 sm:$0xcc]   ;;  %v13522_v49 = vld [vmem:[%s16507_s21 + $0x54] sm:$0xe] }
 0x171   : > { %14892 = vmatmul.mubr.msk.bf16.gmra.mrb[16].mxu0 %vm782_vm3, %v13493_v2  ;;  %v2510_v2 = vshll.u32 %v17572_v45, 16  ;;  %v2503_v17 = vsel %vm16548_vm4, %v2498_v42, %v2502_v52  ;;  %v13497_v25 = vcombine.low %v2479_v5, %v2489_v39  ;;  %v2899_v36 = vrot.slane %v2897_v4, 4  ;;  %v13520_v42 = vld [vmem:[%s16507_s21 + $0x3c] sm:$0xe] }
 0x172   : > { %14895 = vmatprep.mubr.msk.bf16.mxu0 %vm782_vm3, %v13494_v60  ;;  %v2534_v60 = vshll.u32 %v17382_v48, 16  ;;  %v2522_v58 = vrot.slane %v2521_v8, 4  ;;  %v2532_v19 = vrot.slane %v2531_v16, 4  ;;  %v2900_v48 = vrot.slane %v17253_v27, 5 }
 0x173   : > { %v2512_v12 = vrot.slane %v2510_v2, 5  ;;  %v2904_v40 = vrot.slane %v17249_v57, 5  ;;  %v2898_v28 = vsel %vm16862_vm7, %v13532_v11, %v2897_v4  ;;  %v2911_v27 = vrot.slane %v17278_v37, 5 }
 0x174   : > { %v2536_v55 = vrot.slane %v2534_v60, 5  ;;  %v2527_v52 = vsel %vm16548_vm4, %v2522_v58, %v2526_v20  ;;  %v2901_v46 = vsel %vm16862_vm7, %v2899_v36, %v2900_v48  ;;  %v13533_v2 = vrot.slane %v13517_v51, 9  ;;  %v13519_v20 = vld [vmem:[%s16507_s21 + $0x30] sm:$0xe]  ;;  %v13524_v48 = vld [vmem:[%s16507_s21 + $0x6c] sm:$0xe] }
 0x175   : > { %v2513_v9 = vsel %vm16548_vm4, %v2508_v3, %v2512_v12  ;;  %v13548_v44 = vcombine.low %v2898_v28, %v2901_v46  ;;  %v13534_v43 = vrot.slane %v13518_v6, 9  ;;  %v2913_v57 = vrot.slane %v2911_v27, 4 }
 0x176   : > { %v13498_v38 = vcombine.low %v2503_v17, %v2513_v9  ;;  %v2537_v47 = vsel %vm16548_vm4, %v2532_v19, %v2536_v55  ;;  %v2914_v15 = vrot.slane %v17315_v23, 5  ;;  %v2905_v37 = vsel %vm16862_vm7, %v13533_v2, %v2904_v40 }
 0x177   : > { %v13499_v59 = vcombine.low %v2527_v52, %v2537_v47  ;;  %v2918_v63 = vrot.slane %v17298_v1, 5  ;;  %v2912_v10 = vsel %vm16862_vm7, %v13534_v43, %v2911_v27  ;;  %v2925_v23 = vrot.slane %v17344_v33, 5  ;;  %v13526_v27 = vld [vmem:[%s16507_s21 + $0x84] sm:$0xe] }
 0x178   : > { %v3467_v12 = vsel %vm831_vm2, %v17467_v30, 0  ;;  %v13535_v5 = vrot.slane %v13519_v20, 9  ;;  %v2921_v8 = vrot.slane %v17349_v24, 5  ;;  %v13536_v16 = vrot.slane %v13520_v42, 9 }
 0x179   : > { %14896 = vmatmul.mubr.msk.bf16.gmra.mrb[20].mxu0 %vm782_vm3, %v13495_v62  ;;  %v2906_v62 = vrot.slane %v2904_v40, 4  ;;  %v2920_v39 = vrot.slane %v2918_v63, 4  ;;  %v2927_v60 = vrot.slane %v2925_v23, 4  ;;  %v2928_v33 = vrot.slane %v17389_v34, 5 }
 0x17a   : > { %14899 = vmatprep.mubr.msk.bf16.mxu0 %vm782_vm3, %v13496_v7  ;;  %v2907_v7 = vrot.slane %v17272_v54, 5  ;;  %v2915_v54 = vsel %vm16862_vm7, %v2913_v57, %v2914_v15  ;;  %v4146_v17 = vrot.slane %v17630_v29, 2  ;;  %v2919_v30 = vsel %vm16862_vm7, %v13535_v5, %v2918_v63  ;;  %v17737_v29 = vld [vmem:[%s16507_s21 + $0x58] sm:$0xf] }
 0x17b   : > { %v13550_v1 = vcombine.low %v2912_v10, %v2915_v54  ;;  %v2922_v9 = vsel %vm16862_vm7, %v2920_v39, %v2921_v8  ;;  %v2926_v24 = vsel %vm16862_vm7, %v13536_v16, %v2925_v23  ;;  %v2929_v34 = vsel %vm16862_vm7, %v2927_v60, %v2928_v33  ;;  %v13530_v54 = vld [vmem:[%s16507_s21 + $0xb4] sm:$0xe]  ;;  %v21856_v8 = vld [vmem:[#allocation14_spill] sm:$0xff]  ;;  %v21857_v16 = vld [vmem:[#allocation15_spill] sm:$0xff] }
 0x17c   : > { %v2908_v13 = vsel %vm16862_vm7, %v2906_v62, %v2907_v7  ;;  %v2939_v4 = vrot.slane %v17407_v35, 5  ;;  %v13538_v58 = vrot.slane %v13522_v49, 9  ;;  %v2942_v55 = vrot.slane %v17441_v31, 5  ;;  %v13528_v7 = vld [vmem:[%s16507_s21 + $0x9c] sm:$0xe] }
 0x17d   : > { %v13549_v3 = vcombine.low %v2905_v37, %v2908_v13  ;;  %v2953_v36 = vrot.slane %v17449_v0, 5  ;;  %v13540_v47 = vrot.slane %v13524_v48, 9  ;;  %v2956_v28 = vrot.slane %v17474_v21, 5  ;;  %v21851_v37 = vld [vmem:[#allocation11_spill] sm:$0xff]  ;;  %v21859_v33 = vld [vmem:[#allocation17_spill] sm:$0xff] }
 0x17e   : > { %v2941_v19 = vrot.slane %v2939_v4, 4  ;;  %v2940_v11 = vsel %vm16862_vm7, %v13538_v58, %v2939_v4  ;;  %v21847_v31 = vcombine.low %v17198_v50, %v17203_v32  ;;  %v2967_v51 = vrot.slane %v17492_v56, 5  ;;  %v21848_v50 = vld [vmem:[#allocation9_spill] sm:$0xff]  ;;  %v17727_v49 = vld [vmem:[%s21612_s1 + $0x10] sm:$0x3] }
 0x17f   : > { %v2955_v40 = vrot.slane %v2953_v36, 4  ;;  %v2954_v46 = vsel %vm16862_vm7, %v13540_v47, %v2953_v36  ;;  %v21849_v32 = vcombine.low %v17222_v53, %v21848_v50  ;;  %v2981_v62 = vrot.slane %v17521_v14, 5  ;;  %v21850_v53 = vld [vmem:[#allocation10_spill] sm:$0xff]  ;;  %v13731_v58 = vld [vmem:[%s16507_s21 + $0x54] sm:$0xe]  ;;  %v16109_v50 = vld [vmem:[%s16507_s21 + $0x78] sm:$0xff]  }
 0x180   : > { %v2943_v35 = vsel %vm16862_vm7, %v2941_v19, %v2942_v55  ;;  %v2969_v21 = vrot.slane %v2967_v51, 4  ;;  %v13544_v57 = vrot.slane %v13528_v7, 9  ;;  %v2984_v15 = vrot.slane %v17544_v18, 5  ;;  %v16106_v36 = vld [vmem:[%s16507_s21 + $0x54] sm:$0xff]  }
 0x181   : > { %14900 = vmatmul.mubr.msk.bf16.gmra.mrb[24].mxu0 %vm782_vm3, %v13497_v25  ;;  %v13551_v25 = vcombine.low %v2919_v30, %v2922_v9  ;;  %v13554_v52 = vcombine.low %v2940_v11, %v2943_v35  ;;  %v2957_v0 = vsel %vm16862_vm7, %v2955_v40, %v2956_v28  ;;  %v21852_v13 = vcombine.low %v21850_v53, %v21851_v37  ;;  %v21860_v30 = vld [vmem:[#allocation18_spill] sm:$0xff]  ;;  %v17760_v28 = vld [vmem:[%s16507_s21 + $0x70] sm:$0xf]  ;;  %v17793_v53 = vld [vmem:[%s16507_s21 + $0x8c] sm:$0x1] }
 0x182   : > { %14903 = vmatprep.mubr.msk.bf16.mxu0 %vm782_vm3, %v13498_v38  ;;  %v13552_v38 = vcombine.low %v2926_v24, %v2929_v34  ;;  %v13556_v6 = vcombine.low %v2954_v46, %v2957_v0  ;;  %v2982_v63 = vsel %vm16862_vm7, %v13544_v57, %v2981_v62  ;;  %v2995_v10 = vrot.slane %v17552_v41, 5  ;;  %v16102_v24 = vld [vmem:[%s16507_s21 + $0x24] sm:$0xff]   ;;  %v16103_v34 = vld [vmem:[%s16507_s21 + $0x30] sm:$0xff]   ;;  %v13733_v46 = vld [vmem:[%s16507_s21 + $0x6c] sm:$0xe] }
 0x183   : > { %v13546_v20 = vrot.slane %v13530_v54, 9  ;;  %v2998_v42 = vrot.slane %v17572_v45, 5  ;;  %v21858_v60 = vcombine.low %v21856_v8, %v21857_v16  ;;  %v16100_v45 = vld [vmem:[%s16507_s21 + $0x18] sm:$0xff]   ;;  %v21861_v9 = vcombine.low %v21859_v33, %v21860_v30  ;;  %v17800_v54 = vld [vmem:[%s16507_s21 + $0x28] sm:$0xf] }
 0x184   : > { %v2997_v23 = vrot.slane %v2995_v10, 4  ;;  %v4196_v4 = vsel %vm831_vm2, %v4146_v17, 0  ;;  %v4492_v19 = vrot.slane %v17737_v29, 5  ;;  %v13747_v11 = vrot.slane %v13731_v58, 9  ;;  %v17832_v58 = vld [vmem:[%s16507_s21 + $0xa0] sm:$0xf] }
 0x185   : > { %v2996_v5 = vsel %vm16862_vm7, %v13546_v20, %v2995_v10  ;;  %v4506_v0 = vrot.slane %v17760_v28, 5  ;;  %v4523_v10 = vrot.slane %v17793_v53, 5  ;;  %v3748_v33 = vshrl.u32 %v17800_v54, 16 }
 0x186   : > { %v2999_v41 = vsel %vm16862_vm7, %v2997_v23, %v2998_v42  ;;  %v4494_v35 = vrot.slane %v4492_v19, 4  ;;  %v17749_v48 = vsel %vm16862_vm7, %v13747_v11, %v4492_v19  ;;  %v16110_v42 = vld [vmem:[%s16507_s21 + $0x84] sm:$0xff]  }
 0x187   : > { %v13562_v39 = vcombine.low %v2996_v5, %v2999_v41  ;;  %v17835_v19 = vld [vmem:[%s16507_s21 + $0xa4] sm:$0x1] }
 0x189   : > { %14904 = vmatmul.mubr.msk.bf16.gmra.mrb[28].mxu0 %vm782_vm3, %v13499_v59  ;;  %v13542_v59 = vrot.slane %v13526_v27, 9  ;;  %v13749_v27 = vrot.slane %v13733_v46, 9  ;;  %v3750_v46 = vrot.slane %v3748_v33, 4 }
 0x18a   : > { %14909 = vmatprep.mubr.msk.bf16.mxu0 %vm782_vm3, %v13548_v44  ;;  %v2970_v44 = vrot.slane %v17510_v22, 5  ;;  %v2983_v22 = vrot.slane %v2981_v62, 4  ;;  %v16116_v62 = vld [vmem:[%s16507_s21 + $0xcc] sm:$0xff]  }
 0x18b   : > { %v2968_v2 = vsel %vm16862_vm7, %v13542_v59, %v2967_v51  ;;  %v16108_v59 = vld [vmem:[%s16507_s21 + $0x6c] sm:$0xff]  }
 0x18c   : > { %v2971_v56 = vsel %vm16862_vm7, %v2969_v21, %v2970_v44  ;;  %v2985_v14 = vsel %vm16862_vm7, %v2983_v22, %v2984_v15  ;;  %v13645_v21 = vld [vmem:[%s16507_s21 + $0x18] sm:$0xf]  ;;  %v17773_v44 = vsel %vm16862_vm7, %v13749_v27, %v4506_v0  ;;  %v17790_v15 = vld [vmem:[%s16507_s21 + $0x88] sm:$0xf] }
 0x18d   : > { %v13558_v43 = vcombine.low %v2968_v2, %v2971_v56  ;;  %v13560_v18 = vcombine.low %v2982_v63, %v2985_v14  ;;  %v13648_v56 = vld [vmem:[%s16507_s21 + $0x24] sm:$0xf]  ;;  %v3711_v7 = vshrl.u32 %v13645_v21, 16  ;;  %v4520_v14 = vrot.slane %v17790_v15, 5 }
 0x18e   : > { %v3735_v37 = vshrl.u32 %v13648_v56, 16  ;;  %v13735_v63 = vld [vmem:[%s16507_s21 + $0x84] sm:$0xe] }
 0x18f   : > { %v3713_v20 = vrot.slane %v3711_v7, 4  ;;  %v4522_v23 = vrot.slane %v4520_v14, 4 }
 0x190   : > { %v3737_v8 = vrot.slane %v3735_v37, 4  ;;  %v16113_v37 = vld [vmem:[%s16507_s21 + $0xa8] sm:$0xff]  }
 0x191   : > { %14910 = vmatmul.mubr.msk.bf16.vlgmr.msra.gmra.mrb[0].mxu0 %vm782_vm3, %v13549_v3  ;;  %v21853_v3 = vld [vmem:[#allocation12_spill] sm:$0xff] }
 0x192   : > { %14942 = vmatpush3.bf16.msra.mxu0 %v3467_v12  ;;  %14913 = vmatprep.mubr.msk.bf16.mxu0 %vm782_vm3, %v13550_v1  ;;  %v21854_v12 = vld [vmem:[#allocation13_spill] sm:$0xff] }
 0x193   : > { %16004 = vmatprep.subr.msk.bf16.mxu0 %vm831_vm2, %v4146_v17  ;;  %v21855_v1 = vcombine.low %v21853_v3, %v21854_v12  ;;  %v17740_v17 = vld [vmem:[%s16507_s21 + $0x5c] sm:$0x1]  ;;  %v17804_v3 = vld [vmem:[%s16507_s21 + $0x20] sm:$0x1] }
 0x194   : > { %v4495_v55 = vrot.slane %v17740_v17, 5 }
 0x196   : > { %v17754_v47 = vsel %vm16862_vm7, %v4494_v35, %v4495_v55  ;;  %v13737_v35 = vld [vmem:[%s16507_s21 + $0x9c] sm:$0xe] }
 0x197   : > { %v13753_v27 = vrot.slane %v13737_v35, 9 }
 0x199   : > { %14914 = vmatmul.mubr.msk.bf16.gmra.mrb[4].mxu0 %vm782_vm3, %v13551_v25  ;;  %v16104_v25 = vld [vmem:[%s16507_s21 + $0x3c] sm:$0xff]  }
 0x19a   : > { %14917 = vmatprep.mubr.msk.bf16.mxu0 %vm782_vm3, %v13552_v38  ;;  %v16105_v38 = vld [vmem:[%s16507_s21 + $0x48] sm:$0xff]  }
 0x1a1   : > { %14918 = vmatmul.mubr.msk.bf16.gmra.mrb[8].mxu0 %vm782_vm3, %v21847_v31  ;;  %v17763_v31 = vld [vmem:[%s16507_s21 + $0x74] sm:$0x1] }
 0x1a2   : > { %14921 = vmatprep.mubr.msk.bf16.mxu0 %vm782_vm3, %v13554_v52  ;;  %v16107_v52 = vld [vmem:[%s16507_s21 + $0x60] sm:$0xff]   ;;  %v4509_v51 = vrot.slane %v17763_v31, 5 }
 0x1a9   : > { %14922 = vmatmul.mubr.msk.bf16.gmra.mrb[12].mxu0 %vm782_vm3, %v21849_v32  ;;  %v17777_v32 = vld [vmem:[%s16507_s21 + $0x1c] sm:$0xf] }
 0x1aa   : > { %14925 = vmatprep.mubr.msk.bf16.mxu0 %vm782_vm3, %v13556_v6  ;;  %v4508_v6 = vrot.slane %v4506_v0, 4  ;;  %v3720_v57 = vshll.u32 %v17777_v32, 16  ;;  %v3724_v22 = vshrl.u32 %v17777_v32, 16 }
 0x1ac   : > { %v17781_v2 = vsel %vm16862_vm7, %v4508_v6, %v4509_v51  ;;  %v3726_v5 = vrot.slane %v3724_v22, 4  ;;  %v16112_v6 = vld [vmem:[%s16507_s21 + $0x9c] sm:$0xff]  }
 0x1ad   : > { %21862 = vst [vmem:[#allocation9_spill] sm:$0xff] %v17781_v2  ;;  %v18019_v2 = vld [vmem:[%s16507_s21 + $0x80] sm:$0x1] }
 0x1b1   : > { %14926 = vmatmul.mubr.msk.bf16.gmra.mrb[16].mxu0 %vm782_vm3, %v21852_v13  ;;  %v3738_v13 = vshll.u32 %v13648_v56, 16 }
 0x1b2   : > { %14929 = vmatprep.mubr.msk.bf16.mxu0 %vm782_vm3, %v13558_v43  ;;  %v3714_v43 = vshll.u32 %v13645_v21, 16 }
 0x1b3   : > { %v3740_v16 = vrot.slane %v3738_v13, 5 }
 0x1b4   : > { %v3716_v12 = vrot.slane %v3714_v43, 5  ;;  %v13654_v43 = vld [vmem:[%s16507_s21 + $0x3c] sm:$0xf] }
 0x1b5   : > { %v3741_v55 = vor.u32 %v3740_v16, %v3737_v8  ;;  %v3786_v8 = vshll.u32 %v13654_v43, 16 }
 0x1b9   : > { %14930 = vmatmul.mubr.msk.bf16.gmra.mrb[20].mxu0 %vm782_vm3, %v21855_v1  ;;  %v17806_v1 = vrot.slane %v3720_v57, 5  ;;  %v17849_v57 = vld [vmem:[%s16507_s21 + $0x40] sm:$0xf] }
 0x1ba   : > { %14933 = vmatprep.mubr.msk.bf16.mxu0 %vm782_vm3, %v13560_v18  ;;  %v13751_v18 = vrot.slane %v13735_v63, 9  ;;  %v3792_v16 = vshll.u32 %v17849_v57, 16  ;;  %v3796_v33 = vshrl.u32 %v17849_v57, 16 }
 0x1bc   : > { %v17810_v41 = vsel %vm16862_vm7, %v13751_v18, %v4520_v14  ;;  %v17856_v14 = vrot.slane %v3741_v55, 4  ;;  %v13739_v55 = vld [vmem:[%s16507_s21 + $0xb4] sm:$0xe] }
 0x1bd   : > { %21863 = vst [vmem:[#allocation10_spill] sm:$0xff] %v17810_v41 }
 0x1c1   : > { %14934 = vmatmul.mubr.msk.bf16.gmra.mrb[24].mxu0 %vm782_vm3, %v21858_v60  ;;  %v3744_v60 = vshll.u32 %v17800_v54, 16 }
 0x1c2   : > { %14937 = vmatprep.mubr.msk.bf16.mxu0 %vm782_vm3, %v13562_v39  ;;  %v16111_v39 = vld [vmem:[%s16507_s21 + $0x90] sm:$0xff]  }
 0x1c3   : > { %v17838_v11 = vrot.slane %v3744_v60, 5 }
 0x1c5   : > { %v3751_v18 = vor.u32 %v3750_v46, %v17838_v11 }
 0x1c7   : > { %v17890_v46 = vrot.slane %v3751_v18, 4  ;;  %v16115_v18 = vld [vmem:[%s16507_s21 + $0xc0] sm:$0xff]  }
 0x1c9   : > { %14938 = vmatmul.mubr.msk.bf16.gmra.mrb[28].mxu0 %vm782_vm3, %v21861_v9  ;;  %v3730_v9 = vshll.u32 %v17804_v3, 16 }
 0x1ca   : > { %14943 = vmatprep.mubr.msk.bf16.mxu0 %vm782_vm3, %v16100_v45  ;;  %v17816_v45 = vsel %vm16862_vm7, %v4522_v23, %v4523_v10 }
 0x1cb   : > { %21864 = vst [vmem:[#allocation11_spill] sm:$0xff] %v17816_v45  ;;  %v3732_v63 = vrot.slane %v3730_v9, 5  ;;  %v17874_v9 = vld [vmem:[%s16507_s21 + $0xb8] sm:$0xf] }
 0x1cc   : > { %v4548_v35 = vrot.slane %v17874_v9, 5 }
 0x1d1   : > { %14944 = vmatmul.mubr.msk.bf16.vlgmr.msra.gmra.mrb[0].mxu0 %vm782_vm3, %v16102_v24  ;;  %v17823_v24 = vld [vmem:[%s16507_s21 + $0x2c] sm:$0x1] }
 0x1d2   : > { %14976 = vmatpush3.bf16.msra.mxu0 %v4196_v4  ;;  %14947 = vmatprep.mubr.msk.bf16.mxu0 %vm782_vm3, %v16103_v34  ;;  %v13651_v34 = vld [vmem:[%s16507_s21 + $0x30] sm:$0xf]  ;;  %v3717_v4 = vor.u32 %v3716_v12, %v3713_v20  ;;  %v17866_v12 = vld [vmem:[%s16507_s21 + $0x38] sm:$0x1] }
 0x1d3   : > { %16005 = vmatprep.subr.msk.bf16.mxu0 %vm831_vm2, %v17727_v49  ;;  %v3759_v0 = vshrl.u32 %v13651_v34, 16  ;;  %v3762_v51 = vshll.u32 %v13651_v34, 16  ;;  %v17877_v34 = vld [vmem:[%s16507_s21 + $0xbc] sm:$0x1] }
 0x1d4   : > { %v3718_v56 = vrot.slane %v3717_v4, 4 }
 0x1d5   : > { %v3761_v20 = vrot.slane %v3759_v0, 4  ;;  %v3764_v23 = vrot.slane %v3762_v51, 5  ;;  %v13657_v51 = vld [vmem:[%s16507_s21 + $0x48] sm:$0xf] }
 0x1d6   : > { %v3723_v4 = vsel %vm16548_vm4, %v3718_v56, %v17806_v1  ;;  %v16114_v56 = vld [vmem:[%s16507_s21 + $0xb4] sm:$0xff]  }
 0x1d7   : > { %v3765_v0 = vor.u32 %v3764_v23, %v3761_v20  ;;  %v3807_v23 = vshrl.u32 %v13657_v51, 16 }
 0x1d9   : > { %14948 = vmatmul.mubr.msk.bf16.gmra.mrb[4].mxu0 %vm782_vm3, %v16104_v25  ;;  %v3727_v25 = vor.u32 %v3726_v5, %v17806_v1  ;;  %v3778_v1 = vshll.u32 %v17866_v12, 16 }
 0x1da   : > { %14951 = vmatprep.mubr.msk.bf16.mxu0 %vm782_vm3, %v16105_v38  ;;  %v17829_v38 = vld [vmem:[%s16507_s21 + $0x34] sm:$0xf] }
 0x1db   : > { %v3768_v21 = vshll.u32 %v17829_v38, 16  ;;  %v3772_v7 = vshrl.u32 %v17829_v38, 16  ;;  %v3728_v13 = vrot.slane %v3727_v25, 4 }
 0x1dd   : > { %v17868_v5 = vrot.slane %v3768_v21, 5  ;;  %v3774_v60 = vrot.slane %v3772_v7, 4  ;;  %v17895_v21 = vld [vmem:[%s16507_s21 + $0x4c] sm:$0xf] }
 0x1df   : > { %v3775_v7 = vor.u32 %v3774_v60, %v17868_v5  ;;  %v3816_v60 = vshll.u32 %v17895_v21, 16 }
 0x1e1   : > { %14952 = vmatmul.mubr.msk.bf16.gmra.mrb[8].mxu0 %vm782_vm3, %v16106_v36  ;;  %v4534_v36 = vrot.slane %v17832_v58, 5 }
 0x1e2   : > { %14955 = vmatprep.mubr.msk.bf16.mxu0 %vm782_vm3, %v16107_v52  ;;  %v4537_v52 = vrot.slane %v17835_v19, 5 }
 0x1e3   : > { %v17853_v22 = vsel %vm16862_vm7, %v13753_v27, %v4534_v36  ;;  %v13755_v27 = vrot.slane %v13739_v55, 9 }
 0x1e4   : > { %21865 = vst [vmem:[#allocation12_spill] sm:$0xff] %v17853_v22 }
 0x1e9   : > { %14956 = vmatmul.mubr.msk.bf16.gmra.mrb[12].mxu0 %vm782_vm3, %v16108_v59  ;;  %v3754_v59 = vshll.u32 %v17823_v24, 16 }
 0x1ea   : > { %14959 = vmatprep.mubr.msk.bf16.mxu0 %vm782_vm3, %v16109_v50  ;;  %v4536_v50 = vrot.slane %v4534_v36, 4  ;;  %v4551_v36 = vrot.slane %v17877_v34, 5 }
 0x1eb   : > { %v17883_v25 = vrot.slane %v3754_v59, 5  ;;  %v3788_v59 = vrot.slane %v3786_v8, 5  ;;  %v13660_v8 = vld [vmem:[%s16507_s21 + $0x54] sm:$0xf] }
 0x1ec   : > { %v17860_v10 = vsel %vm16862_vm7, %v4536_v50, %v4537_v52  ;;  %v3733_v52 = vsel %vm16548_vm4, %v3728_v13, %v3732_v63  ;;  %v4550_v50 = vrot.slane %v4548_v35, 4  ;;  %v3798_v13 = vrot.slane %v3796_v33, 4 }
 0x1ed   : > { %21866 = vst [vmem:[#allocation13_spill] sm:$0xff] %v17860_v10  ;;  %v17906_v63 = vsel %vm16862_vm7, %v13755_v27, %v4548_v35  ;;  %v13693_v20 = vcombine.low %v3723_v4, %v3733_v52  ;;  %v3820_v33 = vshrl.u32 %v17895_v21, 16  ;;  %v3766_v35 = vrot.slane %v3765_v0, 4  ;;  %v17933_v0 = vld [vmem:[%s16507_s21 + $0xd4] sm:$0x1] }
 0x1ee   : > { %21867 = vst [vmem:[#allocation14_spill] sm:$0xff] %v17906_v63  ;;  %v17912_v55 = vsel %vm16862_vm7, %v4550_v50, %v4551_v36  ;;  %v3780_v52 = vrot.slane %v3778_v1, 5  ;;  %v3831_v50 = vshrl.u32 %v13660_v8, 16  ;;  %v3809_v1 = vrot.slane %v3807_v23, 4 }
 0x1ef   : > { %21868 = vst [vmem:[#allocation15_spill] sm:$0xff] %v17912_v55  ;;  %v3834_v4 = vshll.u32 %v13660_v8, 16  ;;  %v3840_v63 = vshll.u32 %v17737_v29, 16  ;;  %v17958_v8 = vld [vmem:[%s16507_s21 + $0x64] sm:$0xf] }
 0x1f1   : > { %14960 = vmatmul.mubr.msk.bf16.gmra.mrb[16].mxu0 %vm782_vm3, %v16110_v42  ;;  %v17930_v42 = vld [vmem:[%s16507_s21 + $0xd0] sm:$0xf] }
 0x1f2   : > { %14963 = vmatprep.mubr.msk.bf16.mxu0 %vm782_vm3, %v16111_v39  ;;  %v3783_v39 = vshrl.u32 %v13654_v43, 16  ;;  %v17900_v43 = vld [vmem:[%s16507_s21 + $0x44] sm:$0x1] }
 0x1f3   : > { %v3802_v36 = vshll.u32 %v17900_v43, 16 }
 0x1f9   : > { %14964 = vmatmul.mubr.msk.bf16.gmra.mrb[20].mxu0 %vm782_vm3, %v16112_v6  ;;  %v3785_v6 = vrot.slane %v3783_v39, 4  ;;  %v3810_v39 = vshll.u32 %v13657_v51, 16 }
 0x1fa   : > { %14967 = vmatprep.mubr.msk.bf16.mxu0 %vm782_vm3, %v16113_v37  ;;  %v17902_v37 = vrot.slane %v3792_v16, 5  ;;  %v3747_v16 = vsel %vm16548_vm4, %v17856_v14, %v17838_v11  ;;  %v3757_v11 = vsel %vm16548_vm4, %v17890_v46, %v17883_v25  ;;  %v3776_v14 = vrot.slane %v3775_v7, 4  ;;  %v17940_v46 = vld [vmem:[%s16507_s21 + $0x50] sm:$0x1] }
 0x1fb   : > { %v3789_v51 = vor.u32 %v3788_v59, %v3785_v6  ;;  %v3812_v6 = vrot.slane %v3810_v39, 5  ;;  %v13741_v59 = vld [vmem:[%s16507_s21 + $0xcc] sm:$0xe]  ;;  %v4565_v25 = vrot.slane %v17933_v0, 5  ;;  %v17942_v7 = vrot.slane %v3816_v60, 5 }
 0x1fc   : > { %v3799_v27 = vor.u32 %v3798_v13, %v17902_v37  ;;  %v3822_v13 = vrot.slane %v3820_v33, 4  ;;  %v13757_v30 = vrot.slane %v13741_v59, 9  ;;  %v17950_v39 = vrot.slane %v3802_v36, 5  ;;  %v13663_v33 = vld [vmem:[%s16507_s21 + $0x60] sm:$0xf] }
 0x1fd   : > { %v17948_v23 = vrot.slane %v3789_v51, 4  ;;  %v3781_v55 = vsel %vm16548_vm4, %v3776_v14, %v3780_v52  ;;  %v3844_v60 = vshrl.u32 %v17737_v29, 16  ;;  %v3826_v51 = vshll.u32 %v17940_v46, 16 }
 0x1fe   : > { %v3823_v52 = vor.u32 %v3822_v13, %v17942_v7  ;;  %v3833_v14 = vrot.slane %v3831_v50, 4  ;;  %v3836_v29 = vrot.slane %v3834_v4, 5  ;;  %v17979_v50 = vrot.slane %v3840_v63, 5 }
 0x1ff   : > { %v3846_v4 = vrot.slane %v3844_v60, 4  ;;  %v3795_v13 = vsel %vm16548_vm4, %v17948_v23, %v17902_v37  ;;  %v17999_v23 = vld [vmem:[%s16507_s21 + $0x7c] sm:$0xf] }
 0x200   : > { %v3824_v60 = vrot.slane %v3823_v52, 4  ;;  %v3892_v52 = vshrl.u32 %v17760_v28, 16 }
 0x201   : > { %14968 = vmatmul.mubr.msk.bf16.gmra.mrb[24].mxu0 %vm782_vm3, %v16114_v56  ;;  %v4562_v56 = vrot.slane %v17930_v42, 5 }
 0x202   : > { %14971 = vmatprep.mubr.msk.bf16.mxu0 %vm782_vm3, %v16115_v18  ;;  %v3771_v18 = vsel %vm16548_vm4, %v3766_v35, %v17868_v5  ;;  %v17964_v5 = vrot.slane %v3799_v27, 4  ;;  %v3813_v35 = vor.u32 %v3812_v6, %v3809_v1  ;;  %v3864_v27 = vshll.u32 %v17958_v8, 16 }
 0x203   : > { %v4564_v40 = vrot.slane %v4562_v56, 4  ;;  %v17962_v59 = vsel %vm16862_vm7, %v13757_v30, %v4562_v56  ;;  %v3855_v30 = vshrl.u32 %v13663_v33, 16  ;;  %v3858_v56 = vshll.u32 %v13663_v33, 16 }
 0x204   : > { %21869 = vst [vmem:[#allocation17_spill] sm:$0xff] %v17962_v59  ;;  %v3868_v1 = vshrl.u32 %v17958_v8, 16  ;;  %v4665_v6 = vsel %vm831_vm2, %v17727_v49, 0  ;;  %v13666_v49 = vld [vmem:[%s16507_s21 + $0x6c] sm:$0xf]  ;;  %v3814_v63 = vrot.slane %v3813_v35, 4  ;;  %v3837_v33 = vor.u32 %v3836_v29, %v3833_v14 }
 0x205   : > { %v17969_v36 = vsel %vm16862_vm7, %v4564_v40, %v4565_v25  ;;  %v13694_v40 = vcombine.low %v3747_v16, %v3757_v11  ;;  %v13695_v25 = vcombine.low %v3771_v18, %v3781_v55  ;;  %v3828_v16 = vrot.slane %v3826_v51, 5  ;;  %v17991_v11 = vld [vmem:[%s16507_s21 + $0x68] sm:$0x1]  ;;  %v13669_v55 = vld [vmem:[%s16507_s21 + $0x78] sm:$0xf] }
 0x206   : > { %21870 = vst [vmem:[#allocation18_spill] sm:$0xff] %v17969_v36  ;;  %v3857_v18 = vrot.slane %v3855_v30, 4  ;;  %v3860_v10 = vrot.slane %v3858_v56, 5  ;;  %v17996_v36 = vrot.slane %v3864_v27, 5  ;;  %v3870_v37 = vrot.slane %v3868_v1, 4 }
 0x207   : > { %v3847_v59 = vor.u32 %v3846_v4, %v17979_v50  ;;  %v3882_v51 = vshll.u32 %v13666_v49, 16  ;;  %v3888_v35 = vshll.u32 %v17760_v28, 16  ;;  %v3906_v14 = vshll.u32 %v13669_v55, 16  ;;  %v13672_v28 = vld [vmem:[%s16507_s21 + $0x84] sm:$0xf] }
 0x208   : > { %v3819_v29 = vsel %vm16548_vm4, %v3814_v63, %v17942_v7  ;;  %v3829_v30 = vsel %vm16548_vm4, %v3824_v60, %v3828_v16  ;;  %v3912_v56 = vshll.u32 %v17999_v23, 16  ;;  %v3916_v27 = vshrl.u32 %v17999_v23, 16 }
 0x209   : > { %14972 = vmatmul.mubr.msk.bf16.gmra.mrb[28].mxu0 %vm782_vm3, %v16116_v62  ;;  %v3805_v62 = vsel %vm16548_vm4, %v17964_v5, %v17950_v39  ;;  %v3874_v39 = vshll.u32 %v17991_v11, 16  ;;  %v3879_v5 = vshrl.u32 %v13666_v49, 16  ;;  %v3838_v1 = vrot.slane %v3837_v33, 4 }
 0x20a   : > { %14977 = vmatprep.mubr.msk.bf16.mxu0 %vm782_vm3, %v13693_v20  ;;  %v3850_v20 = vshll.u32 %v17740_v17, 16  ;;  %v3903_v17 = vshrl.u32 %v13669_v55, 16  ;;  %v3861_v49 = vor.u32 %v3860_v10, %v3857_v18  ;;  %v3871_v22 = vor.u32 %v3870_v37, %v17996_v36 }
 0x20b   : > { %v3848_v55 = vrot.slane %v3847_v59, 4  ;;  %v3876_v45 = vrot.slane %v3874_v39, 5  ;;  %v3881_v41 = vrot.slane %v3879_v5, 4  ;;  %v3884_v7 = vrot.slane %v3882_v51, 5 }
 0x20c   : > { %v3852_v4 = vrot.slane %v3850_v20, 5  ;;  %v18016_v16 = vrot.slane %v3888_v35, 5  ;;  %v3894_v63 = vrot.slane %v3892_v52, 4  ;;  %v3905_v60 = vrot.slane %v3903_v17, 4 }
 0x20d   : > { %v3908_v33 = vrot.slane %v3906_v14, 5  ;;  %v18021_v10 = vrot.slane %v3912_v56, 5  ;;  %v3918_v20 = vrot.slane %v3916_v27, 4  ;;  %v3930_v59 = vshll.u32 %v13672_v28, 16  ;;  %v13675_v56 = vld [vmem:[%s16507_s21 + $0x90] sm:$0xf] }
 0x20e   : > { %v3862_v18 = vrot.slane %v3861_v49, 4  ;;  %v3872_v37 = vrot.slane %v3871_v22, 4  ;;  %v13696_v39 = vcombine.low %v3795_v13, %v3805_v62  ;;  %v13697_v5 = vcombine.low %v3819_v29, %v3829_v30  ;;  %v18035_v27 = vld [vmem:[%s16507_s21 + $0x94] sm:$0xf] }
 0x20f   : > { %v3843_v51 = vsel %vm16548_vm4, %v3838_v1, %v17979_v50  ;;  %v3853_v35 = vsel %vm16548_vm4, %v3848_v55, %v3852_v4  ;;  %v3885_v52 = vor.u32 %v3884_v7, %v3881_v41  ;;  %v3895_v17 = vor.u32 %v3894_v63, %v18016_v16 }
 0x210   : > { %v3898_v14 = vshll.u32 %v17763_v31, 16  ;;  %v3922_v22 = vshll.u32 %v18019_v2, 16  ;;  %v3919_v13 = vor.u32 %v3918_v20, %v18021_v10  ;;  %v3932_v29 = vrot.slane %v3930_v59, 5 }
 0x211   : > { %14978 = vmatmul.mubr.msk.bf16.vlgmr.msra.gmra.mrb[0].mxu0 %vm782_vm3, %v13694_v40  ;;  %v3927_v40 = vshrl.u32 %v13672_v28, 16  ;;  %v3867_v50 = vsel %vm16548_vm4, %v3862_v18, %v17996_v36  ;;  %v3877_v41 = vsel %vm16548_vm4, %v3872_v37, %v3876_v45  ;;  %v3951_v1 = vshrl.u32 %v13675_v56, 16 }
 0x212   : > { %15010 = vmatpush3.bf16.msra.mxu0 %v4665_v6  ;;  %14981 = vmatprep.mubr.msk.bf16.mxu0 %vm782_vm3, %v13695_v25  ;;  %v3936_v6 = vshll.u32 %v17790_v15, 16  ;;  %v3940_v25 = vshrl.u32 %v17790_v15, 16  ;;  %v3909_v15 = vor.u32 %v3908_v33, %v3905_v60  ;;  %v3954_v4 = vshll.u32 %v13675_v56, 16 }
 0x213   : > { %v3929_v62 = vrot.slane %v3927_v40, 4  ;;  %v3960_v49 = vshll.u32 %v18035_v27, 16  ;;  %v3964_v28 = vshrl.u32 %v18035_v27, 16  ;;  %v3886_v55 = vrot.slane %v3885_v52, 4  ;;  %v13678_v40 = vld [vmem:[%s16507_s21 + $0x9c] sm:$0xf] }
 0x214   : > { %v18043_v30 = vrot.slane %v3936_v6, 5  ;;  %v3942_v31 = vrot.slane %v3940_v25, 4  ;;  %v3896_v36 = vrot.slane %v3895_v17, 4  ;;  %v3900_v7 = vrot.slane %v3898_v14, 5  ;;  %v18053_v6 = vld [vmem:[%s16507_s21 + $0x98] sm:$0x1] }
 0x215   : > { %v3924_v63 = vrot.slane %v3922_v22, 5  ;;  %v3910_v45 = vrot.slane %v3909_v15, 4  ;;  %v3920_v60 = vrot.slane %v3919_v13, 4  ;;  %v3933_v33 = vor.u32 %v3932_v29, %v3929_v62 }
 0x216   : > { %v3946_v20 = vshll.u32 %v17793_v53, 16  ;;  %v13698_v59 = vcombine.low %v3843_v51, %v3853_v35  ;;  %v13699_v18 = vcombine.low %v3867_v50, %v3877_v41  ;;  %v3943_v37 = vor.u32 %v3942_v31, %v18043_v30  ;;  %v13681_v51 = vld [vmem:[%s16507_s21 + $0xa8] sm:$0xf]  ;;  %v18064_v35 = vld [vmem:[%s16507_s21 + $0xac] sm:$0xf] }
 0x217   : > { %v3953_v25 = vrot.slane %v3951_v1, 4  ;;  %v3966_v52 = vrot.slane %v3964_v28, 4  ;;  %v3891_v17 = vsel %vm16548_vm4, %v3886_v55, %v18016_v16  ;;  %v3901_v14 = vsel %vm16548_vm4, %v3896_v36, %v3900_v7 }
 0x218   : > { %v3975_v53 = vshrl.u32 %v13678_v40, 16  ;;  %v3978_v22 = vshll.u32 %v13678_v40, 16  ;;  %v3915_v56 = vsel %vm16548_vm4, %v3910_v45, %v18021_v10  ;;  %v3925_v15 = vsel %vm16548_vm4, %v3920_v60, %v3924_v63  ;;  %v18087_v40 = vld [vmem:[%s16507_s21 + $0xb0] sm:$0x1] }
 0x219   : > { %14982 = vmatmul.mubr.msk.bf16.gmra.mrb[4].mxu0 %vm782_vm3, %v13696_v39  ;;  %v3956_v39 = vrot.slane %v3954_v4, 5  ;;  %v3934_v13 = vrot.slane %v3933_v33, 4  ;;  %v3948_v62 = vrot.slane %v3946_v20, 5  ;;  %v3944_v29 = vrot.slane %v3943_v37, 4 }
 0x21a   : > { %14985 = vmatprep.mubr.msk.bf16.mxu0 %vm782_vm3, %v13697_v5  ;;  %v18055_v5 = vrot.slane %v3960_v49, 5  ;;  %v3970_v16 = vshll.u32 %v18053_v6, 16  ;;  %v3984_v50 = vshll.u32 %v17832_v58, 16  ;;  %v3988_v41 = vshrl.u32 %v17832_v58, 16 }
 0x21b   : > { %v3999_v31 = vshrl.u32 %v13681_v51, 16  ;;  %v4002_v1 = vshll.u32 %v13681_v51, 16  ;;  %v4008_v4 = vshll.u32 %v18064_v35, 16  ;;  %v4012_v10 = vshrl.u32 %v18064_v35, 16 }
 0x21c   : > { %v3957_v49 = vor.u32 %v3956_v39, %v3953_v25  ;;  %v3967_v28 = vor.u32 %v3966_v52, %v18055_v5  ;;  %v3977_v55 = vrot.slane %v3975_v53, 4  ;;  %v3980_v36 = vrot.slane %v3978_v22, 5  ;;  %v13684_v39 = vld [vmem:[%s16507_s21 + $0xb4] sm:$0xf] }
 0x21d   : > { %v13700_v7 = vcombine.low %v3891_v17, %v3901_v14  ;;  %v13701_v63 = vcombine.low %v3915_v56, %v3925_v15  ;;  %v3939_v58 = vsel %vm16548_vm4, %v3934_v13, %v18043_v30  ;;  %v3949_v45 = vsel %vm16548_vm4, %v3944_v29, %v3948_v62  ;;  %v13687_v13 = vld [vmem:[%s16507_s21 + $0xc0] sm:$0xf]  ;;  %v18095_v62 = vld [vmem:[%s16507_s21 + $0xc4] sm:$0xf] }
 0x21e   : > { %v3972_v60 = vrot.slane %v3970_v16, 5  ;;  %v18084_v33 = vrot.slane %v3984_v50, 5  ;;  %v3990_v20 = vrot.slane %v3988_v41, 4  ;;  %v4010_v37 = vrot.slane %v4008_v4, 5 }
 0x21f   : > { %v4014_v25 = vrot.slane %v4012_v10, 4  ;;  %v3958_v52 = vrot.slane %v3957_v49, 4  ;;  %v3968_v17 = vrot.slane %v3967_v28, 4  ;;  %v3981_v14 = vor.u32 %v3980_v36, %v3977_v55 }
 0x220   : > { %v3994_v30 = vshll.u32 %v17835_v19, 16  ;;  %v4018_v53 = vshll.u32 %v18087_v40, 16  ;;  %v13702_v22 = vcombine.low %v3939_v58, %v3949_v45  ;;  %v3991_v51 = vor.u32 %v3990_v20, %v18084_v33 }
 0x221   : > { %14986 = vmatmul.mubr.msk.bf16.gmra.mrb[8].mxu0 %vm782_vm3, %v13698_v59  ;;  %v4001_v59 = vrot.slane %v3999_v31, 4  ;;  %v4023_v56 = vshrl.u32 %v13684_v39, 16  ;;  %v4026_v15 = vshll.u32 %v13684_v39, 16  ;;  %v4015_v16 = vor.u32 %v4014_v25, %v4010_v37 }
 0x222   : > { %14989 = vmatprep.mubr.msk.bf16.mxu0 %vm782_vm3, %v13699_v18  ;;  %v4004_v18 = vrot.slane %v4002_v1, 5  ;;  %v4032_v50 = vshll.u32 %v17874_v9, 16  ;;  %v4036_v41 = vshrl.u32 %v17874_v9, 16  ;;  %v3963_v19 = vsel %vm16548_vm4, %v3958_v52, %v18055_v5  ;;  %v13690_v52 = vld [vmem:[%s16507_s21 + $0xcc] sm:$0xf] }
 0x223   : > { %v3973_v31 = vsel %vm16548_vm4, %v3968_v17, %v3972_v60  ;;  %v3982_v1 = vrot.slane %v3981_v14, 4  ;;  %v3996_v4 = vrot.slane %v3994_v30, 5  ;;  %v4047_v10 = vshrl.u32 %v13687_v13, 16 }
 0x224   : > { %v4005_v29 = vor.u32 %v4004_v18, %v4001_v59  ;;  %v4050_v49 = vshll.u32 %v13687_v13, 16  ;;  %v4056_v28 = vshll.u32 %v18095_v62, 16  ;;  %v4060_v55 = vshrl.u32 %v18095_v62, 16 }
 0x225   : > { %v3992_v36 = vrot.slane %v3991_v51, 4  ;;  %v4020_v9 = vrot.slane %v4018_v53, 5  ;;  %v4016_v45 = vrot.slane %v4015_v16, 4  ;;  %v4034_v5 = vrot.slane %v4032_v50, 5  ;;  %v18115_v53 = vld [vmem:[%s16507_s21 + $0xc8] sm:$0x1] }
 0x226   : > { %v4006_v58 = vrot.slane %v4005_v29, 4  ;;  %v4038_v20 = vrot.slane %v4036_v41, 4  ;;  %v13703_v59 = vcombine.low %v3963_v19, %v3973_v31  ;;  %v4049_v60 = vrot.slane %v4047_v10, 4 }
 0x227   : > { %v4052_v18 = vrot.slane %v4050_v49, 5  ;;  %v4058_v25 = vrot.slane %v4056_v28, 5  ;;  %v4062_v39 = vrot.slane %v4060_v55, 4  ;;  %v3987_v17 = vsel %vm16548_vm4, %v3982_v1, %v18084_v33 }
 0x228   : > { %v3997_v14 = vsel %vm16548_vm4, %v3992_v36, %v3996_v4  ;;  %v4011_v51 = vsel %vm16548_vm4, %v4006_v58, %v4010_v37  ;;  %v4042_v13 = vshll.u32 %v17877_v34, 16  ;;  %v4071_v33 = vshrl.u32 %v13690_v52, 16 }
 0x229   : > { %14990 = vmatmul.mubr.msk.bf16.gmra.mrb[12].mxu0 %vm782_vm3, %v13700_v7  ;;  %v4025_v7 = vrot.slane %v4023_v56, 4  ;;  %v4021_v56 = vsel %vm16548_vm4, %v4016_v45, %v4020_v9  ;;  %v4074_v29 = vshll.u32 %v13690_v52, 16  ;;  %v4080_v16 = vshll.u32 %v17930_v42, 16 }
 0x22a   : > { %14993 = vmatprep.mubr.msk.bf16.mxu0 %vm782_vm3, %v13701_v63  ;;  %v4028_v63 = vrot.slane %v4026_v15, 5  ;;  %v4039_v15 = vor.u32 %v4038_v20, %v4034_v5  ;;  %v4084_v50 = vshrl.u32 %v17930_v42, 16  ;;  %v4053_v41 = vor.u32 %v4052_v18, %v4049_v60 }
 0x22b   : > { %v4063_v19 = vor.u32 %v4062_v39, %v4058_v25  ;;  %v13704_v31 = vcombine.low %v3987_v17, %v3997_v14  ;;  %v13705_v37 = vcombine.low %v4011_v51, %v4021_v56  ;;  %v4044_v10 = vrot.slane %v4042_v13, 5  ;;  %v13726_v39 = vld [vmem:[%s16507_s21 + $0x18] sm:$0xe] }
 0x22c   : > { %v4029_v30 = vor.u32 %v4028_v63, %v4025_v7  ;;  %v4040_v4 = vrot.slane %v4039_v15, 4  ;;  %v4073_v49 = vrot.slane %v4071_v33, 4  ;;  %v4076_v28 = vrot.slane %v4074_v29, 5  ;;  %v13727_v29 = vld [vmem:[%s16507_s21 + $0x24] sm:$0xe] }
 0x22d   : > { %v4082_v34 = vrot.slane %v4080_v16, 5  ;;  %v4086_v55 = vrot.slane %v4084_v50, 4  ;;  %v4054_v36 = vrot.slane %v4053_v41, 4  ;;  %v4064_v9 = vrot.slane %v4063_v19, 4  ;;  %v13728_v16 = vld [vmem:[%s16507_s21 + $0x30] sm:$0xe] }
 0x22e   : > { %v4030_v1 = vrot.slane %v4029_v30, 4  ;;  %v4045_v63 = vsel %vm16548_vm4, %v4040_v4, %v4044_v10  ;;  %v4077_v58 = vor.u32 %v4076_v28, %v4073_v49  ;;  %v4090_v20 = vshll.u32 %v17933_v0, 16  ;;  %v13729_v28 = vld [vmem:[%s16507_s21 + $0x3c] sm:$0xe] }
 0x22f   : > { %v4087_v45 = vor.u32 %v4086_v55, %v4082_v34  ;;  %v4457_v18 = vrot.slane %v17777_v32, 5  ;;  %v13742_v51 = vrot.slane %v13726_v39, 9  ;;  %v4460_v0 = vrot.slane %v17804_v3, 5 }
 0x230   : > { %v4035_v42 = vsel %vm16548_vm4, %v4030_v1, %v4034_v5  ;;  %v4078_v17 = vrot.slane %v4077_v58, 4  ;;  %v4092_v30 = vrot.slane %v4090_v20, 5  ;;  %v4464_v15 = vrot.slane %v17800_v54, 5 }
 0x231   : > { %14994 = vmatmul.mubr.msk.bf16.gmra.mrb[16].mxu0 %vm782_vm3, %v13702_v22  ;;  %v4066_v22 = vshll.u32 %v18115_v53, 16  ;;  %v13706_v5 = vcombine.low %v4035_v42, %v4045_v63  ;;  %v4088_v14 = vrot.slane %v4087_v45, 4  ;;  %v4459_v56 = vrot.slane %v4457_v18, 4 }
 0x232   : > { %14997 = vmatprep.mubr.msk.bf16.mxu0 %vm782_vm3, %v13703_v59  ;;  %v4059_v59 = vsel %vm16548_vm4, %v4054_v36, %v4058_v25  ;;  %v4083_v25 = vsel %vm16548_vm4, %v4078_v17, %v4082_v34  ;;  %v4458_v13 = vsel %vm16862_vm7, %v13742_v51, %v4457_v18  ;;  %v4471_v3 = vrot.slane %v17829_v38, 5  ;;  %v13730_v34 = vld [vmem:[%s16507_s21 + $0x48] sm:$0xe] }
 0x233   : > { %v4068_v7 = vrot.slane %v4066_v22, 5  ;;  %v4093_v32 = vsel %vm16548_vm4, %v4088_v14, %v4092_v30  ;;  %v4461_v33 = vsel %vm16862_vm7, %v4459_v56, %v4460_v0  ;;  %v13743_v19 = vrot.slane %v13727_v29, 9  ;;  %v13734_v30 = vld [vmem:[%s16507_s21 + $0x78] sm:$0xe] }
 0x234   : > { %v13708_v50 = vcombine.low %v4083_v25, %v4093_v32  ;;  %v13758_v41 = vcombine.low %v4458_v13, %v4461_v33  ;;  %v4466_v22 = vrot.slane %v4464_v15, 4  ;;  %v4473_v54 = vrot.slane %v4471_v3, 4  ;;  %v13736_v13 = vld [vmem:[%s16507_s21 + $0x90] sm:$0xe] }
 0x235   : > { %v4069_v60 = vsel %vm16548_vm4, %v4064_v9, %v4068_v7  ;;  %v4474_v1 = vrot.slane %v17866_v12, 5  ;;  %v4465_v38 = vsel %vm16862_vm7, %v13743_v19, %v4464_v15  ;;  %v4478_v10 = vrot.slane %v17849_v57, 5 }
 0x236   : > { %v13707_v52 = vcombine.low %v4059_v59, %v4069_v60  ;;  %v4485_v12 = vrot.slane %v17895_v21, 5  ;;  %v13745_v9 = vrot.slane %v13729_v28, 9  ;;  %v4481_v42 = vrot.slane %v17900_v43, 5  ;;  %v21877_v28 = vld [vmem:[#allocation12_spill] sm:$0xff] }
 0x237   : > { %v4480_v7 = vrot.slane %v4478_v10, 4  ;;  %v13746_v63 = vrot.slane %v13730_v34, 9  ;;  %v4488_v57 = vrot.slane %v17940_v46, 5  ;;  %v4499_v59 = vrot.slane %v17958_v8, 5  ;;  %v13732_v46 = vld [vmem:[%s16507_s21 + $0x60] sm:$0xe] }
 0x238   : > { %v4487_v58 = vrot.slane %v4485_v12, 4  ;;  %v4479_v45 = vsel %vm16862_vm7, %v13745_v9, %v4478_v10  ;;  %v13748_v39 = vrot.slane %v13732_v46, 9  ;;  %v4513_v8 = vrot.slane %v17999_v23, 5  ;;  %v21880_v9 = vld [vmem:[#allocation14_spill] sm:$0xff] }
 0x239   : > { %14998 = vmatmul.mubr.msk.bf16.gmra.mrb[20].mxu0 %vm782_vm3, %v13704_v31  ;;  %v4467_v31 = vrot.slane %v17823_v24, 5  ;;  %v4475_v24 = vsel %vm16862_vm7, %v4473_v54, %v4474_v1  ;;  %v4482_v21 = vsel %vm16862_vm7, %v4480_v7, %v4481_v42  ;;  %v4486_v20 = vsel %vm16862_vm7, %v13746_v63, %v4485_v12  ;;  %v21878_v12 = vld [vmem:[#allocation13_spill] sm:$0xff]  ;;  %v21881_v7 = vld [vmem:[#allocation15_spill] sm:$0xff]  ;;  %v21884_v63 = vld [vmem:[#allocation18_spill] sm:$0xff] }
 0x23a   : > { %15001 = vmatprep.mubr.msk.bf16.mxu0 %vm782_vm3, %v13705_v37  ;;  %v13744_v37 = vrot.slane %v13728_v16, 9  ;;  %v4489_v43 = vsel %vm16862_vm7, %v4487_v58, %v4488_v57  ;;  %v13761_v60 = vcombine.low %v4479_v45, %v4482_v21  ;;  %v4500_v17 = vsel %vm16862_vm7, %v13748_v39, %v4499_v59  ;;  %v16117_v57 = vld [vmem:[#allocation3 + $0x40] sm:$0xff]   ;;  %v5000_v39 = vld [vmem:[#allocation2 + $0x14] sm:$0x1] }
 0x23b   : > { %v4468_v4 = vsel %vm16862_vm7, %v4466_v22, %v4467_v31  ;;  %v13762_v18 = vcombine.low %v4486_v20, %v4489_v43  ;;  %v13750_v56 = vrot.slane %v13734_v30, 9  ;;  %v4515_v0 = vrot.slane %v4513_v8, 4  ;;  %v4947_v21 = vld [vmem:[#allocation2 + $0x18] sm:$0x1]  ;;  %15043 = vmatprep.subr.bf16.mxu1 %v16117_v57 }
 0x23c   : > { %v4472_v49 = vsel %vm16862_vm7, %v13744_v37, %v4471_v3  ;;  %v13759_v55 = vcombine.low %v4465_v38, %v4468_v4  ;;  %v4516_v25 = vrot.slane %v18019_v2, 5  ;;  %v4527_v15 = vrot.slane %v18035_v27, 5  ;;  %v21875_v37 = vld [vmem:[#allocation11_spill] sm:$0xff]  ;;  %v13740_v4 = vld [vmem:[%s16507_s21 + $0xc0] sm:$0xe]  ;;  %15044 = vmatpush3.bf16.msra.mxu1 %v16117_v57 }
 0x23d   : > { %v13760_v36 = vcombine.low %v4472_v49, %v4475_v24  ;;  %v4514_v32 = vsel %vm16862_vm7, %v13750_v56, %v4513_v8  ;;  %v13752_v29 = vrot.slane %v13736_v13, 9  ;;  %v4530_v3 = vrot.slane %v18053_v6, 5  ;;  %v4950_v8 = vld [vmem:[#allocation2 + $0x24] sm:$0x1]  ;;  %v16121_v13 = vld [vmem:[#allocation3 + $0x60] sm:$0xff]  }
 0x23e   : > { %v4517_v23 = vsel %vm16862_vm7, %v4515_v0, %v4516_v25  ;;  %v4529_v2 = vrot.slane %v4527_v15, 4  ;;  %v4544_v31 = vrot.slane %v18087_v40, 5  ;;  %v13756_v49 = vrot.slane %v13740_v4, 9  ;;  %v5009_v0 = vld [vmem:[#allocation2 + $0x38] sm:$0x1] }
 0x23f   : > { %v13766_v33 = vcombine.low %v4514_v32, %v4517_v23  ;;  %v4528_v16 = vsel %vm16862_vm7, %v13752_v29, %v4527_v15  ;;  %v4558_v40 = vrot.slane %v18115_v53, 5  ;;  %v21879_v34 = vcombine.low %v21877_v28, %v21878_v12  ;;  %v21883_v53 = vld [vmem:[#allocation17_spill] sm:$0xff]  ;;  %v16120_v32 = vld [vmem:[#allocation3 + $0x58] sm:$0xff]   ;;  %v4959_v15 = vld [vmem:[#allocation2 + $0x48] sm:$0x1] }
 0x240   : > { %v4531_v27 = vsel %vm16862_vm7, %v4529_v2, %v4530_v3  ;;  %v21882_v42 = vcombine.low %v21880_v9, %v21881_v7  ;;  %v21885_v58 = vcombine.low %v21883_v53, %v21884_v63  ;;  %v4948_v20 = vsel %vm18251_vm10, 0, %v4947_v21  ;;  %v4956_v2 = vld [vmem:[#allocation2 + $0x3c] sm:$0x1]  ;;  %v4971_v63 = vld [vmem:[#allocation2 + $0x78] sm:$0x1] }
 0x241   : > { %15002 = vmatmul.mubr.msk.bf16.gmra.mrb[24].mxu0 %vm782_vm3, %v13706_v5  ;;  %v4501_v5 = vrot.slane %v4499_v59, 4  ;;  %v13768_v19 = vcombine.low %v4528_v16, %v4531_v27  ;;  %v21888_v43 = vmov 0  ;;  %v4944_v59 = vld [vmem:[#allocation2 + $0xc] sm:$0x1]  ;;  %4949 = vst [vmem:[#allocation2 + $0x18] sm:$0x1] %v4948_v20 }
 0x242   : > { %15005 = vmatprep.mubr.msk.bf16.mxu0 %vm782_vm3, %v13707_v52  ;;  %v4502_v52 = vrot.slane %v17991_v11, 5  ;;  %v21871_v11 = vcombine.low %v17749_v48, %v17754_v47  ;;  %v21872_v48 = vld [vmem:[#allocation9_spill] sm:$0xff]  ;;  %v21889_v43 = vsel %vm18259_vm12, 4294967295, %v21888_v43  ;;  %v4945_v46 = vsel %vm18251_vm10, 0, %v4944_v59  ;;  %v5012_v27 = vld [vmem:[#allocation2 + $0x44] sm:$0x1] }
 0x243   : > { %v21873_v47 = vcombine.low %v17773_v44, %v21872_v48  ;;  %v21874_v44 = vld [vmem:[#allocation10_spill] sm:$0xff]  ;;  %21890 = vst [vmem:[#allocation9_spill] sm:$0xff] %v21889_v43  ;;  %4946 = vst [vmem:[#allocation2 + $0xc] sm:$0x1] %v4945_v46  ;;  %v4951_v30 = vsel %vm18251_vm10, 0, %v4950_v8  ;;  %v16373_v56 = vmov 0  }
 0x244   : > { %v4503_v14 = vsel %vm16862_vm7, %v4501_v5, %v4502_v52  ;;  %v21876_v54 = vcombine.low %v21874_v44, %v21875_v37  ;;  %v16118_v5 = vld [vmem:[#allocation3 + $0x48] sm:$0xff]   ;;  %v5001_v52 = vsel %vm18259_vm12, 0, %v5000_v39  ;;  %4952 = vst [vmem:[#allocation2 + $0x24] sm:$0x1] %v4951_v30  ;;  %4931 = vst [vmem:[#allocation2] sm:$0xf] %v16373_v56 }
 0x245   : > { %v13764_v51 = vcombine.low %v4500_v17, %v4503_v14  ;;  %5002 = vst [vmem:[#allocation2 + $0x14] sm:$0x1] %v5001_v52  ;;  %15045 = vmatprep.subr.bf16.mxu1 %v16118_v5  ;;  %v4953_v17 = vld [vmem:[#allocation2 + $0x30] sm:$0x1]  ;;  %4932 = vst [vmem:[#allocation2 + $0x4] sm:$0xf] %v16373_v56 }
 0x246   : > { %15046 = vmatpush3.bf16.msra.mxu1 %v16118_v5  ;;  %v4954_v14 = vsel %vm18251_vm10, 0, %v4953_v17  ;;  %4933 = vst [vmem:[#allocation2 + $0x8] sm:$0x1] %v16373_v56  ;;  %4935 = vst [vmem:[#allocation2 + $0xcc] sm:$0xf] %v16373_v56  ;;  %v5010_v25 = vsel %vm18259_vm12, 0, %v5009_v0 }
 0x247   : > { %4955 = vst [vmem:[#allocation2 + $0x30] sm:$0x1] %v4954_v14  ;;  %4936 = vst [vmem:[#allocation2 + $0xd0] sm:$0xf] %v16373_v56  ;;  %v4960_v29 = vsel %vm18251_vm10, 0, %v4959_v15  ;;  %v4957_v48 = vsel %vm18251_vm10, 0, %v4956_v2 }
 0x248   : > { %4937 = vst [vmem:[#allocation2 + $0xd4] sm:$0x1] %v16373_v56  ;;  %5011 = vst [vmem:[#allocation2 + $0x38] sm:$0x1] %v5010_v25  ;;  %v4972_v57 = vsel %vm18251_vm10, 0, %v4971_v63  ;;  %v18309_v30 = vld [vmem:[#allocation3] sm:$0xff]  }
 0x249   : > { %15006 = vmatmul.mubr.msk.bf16.gmra.mrb[28].mxu0 %vm782_vm3, %v13708_v50  ;;  %v4541_v50 = vrot.slane %v18064_v35, 5  ;;  %v4555_v35 = vrot.slane %v18095_v62, 5  ;;  %4961 = vst [vmem:[#allocation2 + $0x48] sm:$0x1] %v4960_v29  ;;  %4958 = vst [vmem:[#allocation2 + $0x3c] sm:$0x1] %v4957_v48 }
 0x24a   : > { %15011 = vmatprep.mubr.msk.bf16.mxu0 %vm782_vm3, %v13758_v41  ;;  %v13738_v41 = vld [vmem:[%s16507_s21 + $0xa8] sm:$0xe]  ;;  %v4968_v21 = vld [vmem:[#allocation2 + $0x6c] sm:$0x1]  ;;  %4973 = vst [vmem:[#allocation2 + $0x78] sm:$0x1] %v4972_v57 }
 0x24b   : > { %v13754_v22 = vrot.slane %v13738_v41, 9  ;;  %v4543_v6 = vrot.slane %v4541_v50, 4  ;;  %v4557_v24 = vrot.slane %v4555_v35, 4  ;;  %v5013_v41 = vsel %vm18259_vm12, 0, %v5012_v27  ;;  %v5027_v39 = vld [vmem:[#allocation2 + $0x80] sm:$0x1] }
 0x24c   : > { %5014 = vst [vmem:[#allocation2 + $0x44] sm:$0x1] %v5013_v41  ;;  %v5585_v4 = vld [vmem:[#allocation2 + $0x4] sm:$0xf]  ;;  %v4969_v46 = vsel %vm18251_vm10, 0, %v4968_v21  ;;  %v5028_v52 = vsel %vm18259_vm12, 0, %v5027_v39 }
 0x24d   : > { %v4542_v1 = vsel %vm16862_vm7, %v13754_v22, %v4541_v50  ;;  %v4545_v38 = vsel %vm16862_vm7, %v4543_v6, %v4544_v31  ;;  %v16122_v50 = vld [vmem:[#allocation3 + $0x68] sm:$0xff]   ;;  %v16123_v6 = vld [vmem:[#allocation3 + $0x70] sm:$0xff]   ;;  %4970 = vst [vmem:[#allocation2 + $0x6c] sm:$0x1] %v4969_v46  ;;  %5029 = vst [vmem:[#allocation2 + $0x80] sm:$0x1] %v5028_v52 }
 0x24e   : > { %v13770_v10 = vcombine.low %v4542_v1, %v4545_v38  ;;  %v4965_v31 = vld [vmem:[#allocation2 + $0x60] sm:$0x1]  ;;  %v5024_v14 = vld [vmem:[#allocation2 + $0x74] sm:$0x1]  ;;  %v4974_v0 = vld [vmem:[#allocation2 + $0x84] sm:$0x1] }
 0x24f   : > { %v4966_v37 = vsel %vm18251_vm10, 0, %v4965_v31  ;;  %v5025_v8 = vsel %vm18259_vm12, 0, %v5024_v14  ;;  %v5033_v25 = vld [vmem:[#allocation2 + $0x98] sm:$0x1]  ;;  %v4980_v29 = vld [vmem:[#allocation2 + $0x9c] sm:$0x1] }
 0x250   : > { %4967 = vst [vmem:[#allocation2 + $0x60] sm:$0x1] %v4966_v37  ;;  %5026 = vst [vmem:[#allocation2 + $0x74] sm:$0x1] %v5025_v8  ;;  %v5039_v2 = vld [vmem:[#allocation2 + $0xb0] sm:$0x1] }
 0x251   : > { %15012 = vmatmul.mubr.msk.bf16.vlgmr.msra.gmra.mrb[0].mxu0 %vm782_vm3, %v13759_v55  ;;  %v4556_v55 = vsel %vm16862_vm7, %v13756_v49, %v4555_v35  ;;  %v5021_v35 = vld [vmem:[#allocation2 + $0x68] sm:$0x1]  ;;  %v5040_v48 = vsel %vm18259_vm12, 0, %v5039_v2  ;;  %v4989_v27 = vld [vmem:[#allocation2 + $0xc0] sm:$0x1] }
 0x252   : > { %15015 = vmatprep.mubr.msk.bf16.mxu0 %vm782_vm3, %v13760_v36  ;;  %v4559_v36 = vsel %vm16862_vm7, %v4557_v24, %v4558_v40  ;;  %v5022_v49 = vsel %vm18259_vm12, 0, %v5021_v35  ;;  %v5018_v24 = vld [vmem:[#allocation2 + $0x5c] sm:$0x1]  ;;  %v16124_v40 = vld [vmem:[#allocation3 + $0x78] sm:$0xff]   ;;  %5041 = vst [vmem:[#allocation2 + $0xb0] sm:$0x1] %v5040_v48 }
 0x253   : > { %v13772_v62 = vcombine.low %v4556_v55, %v4559_v36  ;;  %5023 = vst [vmem:[#allocation2 + $0x68] sm:$0x1] %v5022_v49  ;;  %v5019_v28 = vsel %vm18259_vm12, 0, %v5018_v24  ;;  %v5658_v55 = vshll.u32 %v5585_v4, 16  ;;  %v4986_v41 = vld [vmem:[#allocation2 + $0xb4] sm:$0x1] }
 0x254   : > { %5020 = vst [vmem:[#allocation2 + $0x5c] sm:$0x1] %v5019_v28  ;;  %v18339_v37 = vld [vmem:[%s21613_s2] ss:$0 sm:$0xff] }
 0x255   : > { %v5660_v7 = vrot.slane %v5658_v55, 5 }
 0x259   : > { %15016 = vmatmul.mubr.msk.bf16.gmra.mrb[4].mxu0 %vm782_vm3, %v13761_v60  ;;  %v5003_v60 = vld [vmem:[#allocation2 + $0x20] sm:$0x1] }
 0x25a   : > { %15019 = vmatprep.mubr.msk.bf16.mxu0 %vm782_vm3, %v13762_v18  ;;  %v5004_v18 = vsel %vm18259_vm12, 0, %v5003_v60 }
 0x25b   : > { %5005 = vst [vmem:[#allocation2 + $0x20] sm:$0x1] %v5004_v18 }
 0x261   : > { %15020 = vmatmul.mubr.msk.bf16.gmra.mrb[8].mxu0 %vm782_vm3, %v21871_v11  ;;  %v5006_v11 = vld [vmem:[#allocation2 + $0x2c] sm:$0x1] }
 0x262   : > { %15023 = vmatprep.mubr.msk.bf16.mxu0 %vm782_vm3, %v13764_v51  ;;  %v16119_v51 = vld [vmem:[#allocation3 + $0x50] sm:$0xff]   ;;  %v5007_v23 = vsel %vm18259_vm12, 0, %v5006_v11  ;;  %v4975_v11 = vsel %vm18251_vm10, 0, %v4974_v0 }
 0x263   : > { %15047 = vmatprep.subr.bf16.mxu1 %v16119_v51  ;;  %5008 = vst [vmem:[#allocation2 + $0x2c] sm:$0x1] %v5007_v23  ;;  %v5030_v23 = vld [vmem:[#allocation2 + $0x8c] sm:$0x1]  ;;  %4976 = vst [vmem:[#allocation2 + $0x84] sm:$0x1] %v4975_v11 }
 0x264   : > { %15048 = vmatpush3.bf16.msra.mxu1 %v16119_v51  ;;  %v4977_v51 = vld [vmem:[#allocation2 + $0x90] sm:$0x1]  ;;  %v5031_v15 = vsel %vm18259_vm12, 0, %v5030_v23 }
 0x265   : > { %15049 = vmatprep.subr.bf16.mxu1 %v16120_v32  ;;  %v4978_v56 = vsel %vm18251_vm10, 0, %v4977_v51  ;;  %5032 = vst [vmem:[#allocation2 + $0x8c] sm:$0x1] %v5031_v15 }
 0x266   : > { %4979 = vst [vmem:[#allocation2 + $0x90] sm:$0x1] %v4978_v56  ;;  %v5472_v56 = vld [vmem:[#allocation2 + $0xc] sm:$0xf] }
 0x268   : > { %15050 = vmatpush3.bf16.msra.mxu1 %v16120_v32  ;;  %v5034_v32 = vsel %vm18259_vm12, 0, %v5033_v25 }
 0x269   : > { %15024 = vmatmul.mubr.msk.bf16.gmra.mrb[12].mxu0 %vm782_vm3, %v21873_v47  ;;  %v5015_v47 = vld [vmem:[#allocation2 + $0x50] sm:$0x1]  ;;  %15051 = vmatprep.subr.bf16.mxu1 %v16121_v13  ;;  %5035 = vst [vmem:[#allocation2 + $0x98] sm:$0x1] %v5034_v32 }
 0x26a   : > { %15027 = vmatprep.mubr.msk.bf16.mxu0 %vm782_vm3, %v13766_v33  ;;  %v4941_v33 = vld [vmem:[#allocation2] sm:$0x1]  ;;  %v5016_v16 = vsel %vm18259_vm12, 0, %v5015_v47  ;;  %v5036_v47 = vld [vmem:[#allocation2 + $0xa4] sm:$0x1] }
 0x26b   : > { %v4942_v3 = vsel %vm18251_vm10, 0, %v4941_v33  ;;  %5017 = vst [vmem:[#allocation2 + $0x50] sm:$0x1] %v5016_v16  ;;  %v5037_v16 = vsel %vm18259_vm12, 0, %v5036_v47  ;;  %v5476_v47 = vld [vmem:[#allocation2 + $0x14] sm:$0x1] }
 0x26c   : > { %4943 = vst [vmem:[#allocation2] sm:$0x1] %v4942_v3  ;;  %15052 = vmatpush3.bf16.msra.mxu1 %v16121_v13  ;;  %v4983_v13 = vld [vmem:[#allocation2 + $0xa8] sm:$0x1]  ;;  %v4981_v3 = vsel %vm18251_vm10, 0, %v4980_v29 }
 0x26d   : > { %15053 = vmatprep.subr.bf16.mxu1 %v16122_v50  ;;  %v4984_v33 = vsel %vm18251_vm10, 0, %v4983_v13  ;;  %4982 = vst [vmem:[#allocation2 + $0x9c] sm:$0x1] %v4981_v3  ;;  %5038 = vst [vmem:[#allocation2 + $0xa4] sm:$0x1] %v5037_v16 }
 0x26e   : > { %4985 = vst [vmem:[#allocation2 + $0xa8] sm:$0x1] %v4984_v33  ;;  %v5483_v13 = vld [vmem:[#allocation2 + $0x20] sm:$0x1] }
 0x270   : > { %15054 = vmatpush3.bf16.msra.mxu1 %v16122_v50  ;;  %v4990_v50 = vsel %vm18251_vm10, 0, %v4989_v27 }
 0x271   : > { %15028 = vmatmul.mubr.msk.bf16.gmra.mrb[16].mxu0 %vm782_vm3, %v21876_v54  ;;  %v4962_v54 = vld [vmem:[#allocation2 + $0x54] sm:$0x1]  ;;  %15055 = vmatprep.subr.bf16.mxu1 %v16123_v6  ;;  %4991 = vst [vmem:[#allocation2 + $0xc0] sm:$0x1] %v4990_v50 }
 0x272   : > { %15031 = vmatprep.mubr.msk.bf16.mxu0 %vm782_vm3, %v13768_v19  ;;  %v4997_v19 = vld [vmem:[#allocation2 + $0x8] sm:$0x1]  ;;  %v4963_v38 = vsel %vm18251_vm10, 0, %v4962_v54 }
 0x273   : > { %v4998_v22 = vsel %vm18259_vm12, 0, %v4997_v19  ;;  %v5584_v44 = vld [vmem:[#allocation2] sm:$0xf]  ;;  %4964 = vst [vmem:[#allocation2 + $0x54] sm:$0x1] %v4963_v38  ;;  %v4987_v19 = vsel %vm18251_vm10, 0, %v4986_v41 }
 0x274   : > { %4999 = vst [vmem:[#allocation2 + $0x8] sm:$0x1] %v4998_v22  ;;  %v5649_v1 = vshrl.u32 %v5584_v44, 16  ;;  %15056 = vmatpush3.bf16.msra.mxu1 %v16123_v6  ;;  %4988 = vst [vmem:[#allocation2 + $0xb4] sm:$0x1] %v4987_v19 }
 0x275   : > { %15057 = vmatprep.subr.bf16.mxu1 %v16124_v40  ;;  %v5045_v22 = vld [vmem:[#allocation2 + $0xc8] sm:$0x1]  ;;  %v5042_v6 = vld [vmem:[#allocation2 + $0xbc] sm:$0x1] }
 0x276   : > { %v5651_v12 = vrot.slane %v5649_v1, 4  ;;  %v5046_v31 = vsel %vm18259_vm12, 0, %v5045_v22 }
 0x277   : > { %5047 = vst [vmem:[#allocation2 + $0xc8] sm:$0x1] %v5046_v31 }
 0x278   : > { %15058 = vmatpush3.bf16.msra.mxu1 %v16124_v40 }
 0x279   : > { %15032 = vmatmul.mubr.msk.bf16.gmra.mrb[20].mxu0 %vm782_vm3, %v21879_v34  ;;  %15091 = vmatprep.subr.bf16.mxu1 %v18309_v30 }
 0x27a   : > { %15035 = vmatprep.mubr.msk.bf16.mxu0 %vm782_vm3, %v13770_v10  ;;  %v5652_v10 = vshll.u32 %v5584_v44, 16  ;;  %v5043_v44 = vsel %vm18259_vm12, 0, %v5042_v6 }
 0x27b   : > { %v5632_v36 = vld [vmem:[#allocation2 + $0x8] sm:$0x1]  ;;  %5044 = vst [vmem:[#allocation2 + $0xbc] sm:$0x1] %v5043_v44 }
 0x27c   : > { %v5654_v34 = vrot.slane %v5652_v10, 5 }
 0x27e   : > { %v5655_v9 = vor.u32 %v5654_v34, %v5651_v12 }
 0x281   : > { %15036 = vmatmul.mubr.msk.bf16.gmra.mrb[24].mxu0 %vm782_vm3, %v21882_v42  ;;  %v5668_v42 = vshll.u32 %v5632_v36, 16 }
 0x282   : > { %15039 = vmatprep.mubr.msk.bf16.mxu0 %vm782_vm3, %v13772_v62  ;;  %v5662_v62 = vshrl.u32 %v5585_v4, 16 }
 0x283   : > { %v5670_v59 = vrot.slane %v5668_v42, 5 }
 0x284   : > { %v5664_v53 = vrot.slane %v5662_v62, 4 }
 0x286   : > { %v5665_v20 = vor.u32 %v5664_v53, %v5660_v7 }
 0x288   : > { %v5666_v18 = vrot.slane %v5665_v20, 4 }
 0x289   : > { %15040 = vmatmul.mubr.msk.bf16.gmra.mrb[28].mxu0 %vm782_vm3, %v21885_v58  ;;  %v5656_v58 = vrot.slane %v5655_v9, 4 }
 0x28a   : > { %v5671_v5 = vsel %vm16548_vm4, %v5666_v18, %v5670_v59  ;;  %v5479_v18 = vld [vmem:[#allocation2 + $0x18] sm:$0xf] }
 0x28b   : > { %v5661_v60 = vsel %vm16548_vm4, %v5656_v58, %v5660_v7 }
 0x28c   : > { %v13823_v17 = vcombine.low %v5661_v60, %v5671_v5 }
 0x28e   : > { %15059 = vmatprep.mubr.bf16.mxu1 %v13823_v17 }
 0x324   : > { %v15013_v54 = vpop.f32.mrb[0].mxu0 }
 0x325   : > { %v4869_v1 = vadd.f32 %v15013_v54, %v18339_v37  ;;  %v4701_v38 = vpop.f32.mrb[1].mxu0 }
 0x326   : > { %v4867_v35 = vadd.f32 %v18339_v37, %v4701_v38  ;;  %v15014_v4 = vpop.f32.mrb[2].mxu0 }
 0x327   : > { %v4901_v10 = vmax.f32 %v4869_v1, 0.0  ;;  %v4870_v49 = vadd.f32 %v15014_v4, %v18339_v37  ;;  %v4704_v24 = vpop.f32.mrb[3].mxu0 }
 0x328   : > { %v4899_v40 = vmax.f32 %v4867_v35, 0.0  ;;  %v4868_v28 = vadd.f32 %v18339_v37, %v4704_v24 }
 0x329   : > { %v14292_v12 = vpack.c.bf16 %v4901_v10, %v4901_v10  ;;  %v4902_v34 = vmax.f32 %v4870_v49, 0.0 }
 0x32a   : > { %v14290_v55 = vpack.c.bf16 %v4899_v40, %v4899_v40  ;;  %v4900_v36 = vmax.f32 %v4868_v28, 0.0  ;;  %v5493_v28 = vld [vmem:[#allocation2 + $0x30] sm:$0xf] }
 0x32b   : > { %v5167_v62 = vshrl.u32 %v14292_v12, 16  ;;  %v14293_v9 = vpack.c.bf16 %v4902_v34, %v4902_v34  ;;  %v5170_v7 = vshll.u32 %v14292_v12, 16 }
 0x32c   : > { %v5150_v42 = vshrl.u32 %v14290_v55, 16  ;;  %v5153_v53 = vshll.u32 %v14290_v55, 16  ;;  %v14291_v63 = vpack.c.bf16 %v4900_v36, %v4900_v36  ;;  %v15017_v58 = vpop.f32.mrb[4].mxu0 }
 0x32d   : > { %v5169_v57 = vrot.slane %v5167_v62, 7  ;;  %v5175_v21 = vshrl.u32 %v14293_v9, 16  ;;  %v5178_v20 = vshll.u32 %v14293_v9, 16  ;;  %v4873_v59 = vadd.f32 %v15017_v58, %v18339_v37  ;;  %v4717_v46 = vpop.f32.mrb[5].mxu0 }
 0x32e   : > { %v5152_v39 = vrot.slane %v5150_v42, 7  ;;  %v5158_v5 = vshrl.u32 %v14291_v63, 16  ;;  %v5161_v52 = vshll.u32 %v14291_v63, 16  ;;  %v4871_v17 = vadd.f32 %v18339_v37, %v4717_v46  ;;  %v15018_v14 = vpop.f32.mrb[6].mxu0 }
 0x32f   : > { %v5172_v8 = vor.u32 %v5170_v7, %v5169_v57  ;;  %v5173_v51 = vrot.slane %v5169_v57, 4  ;;  %v5177_v0 = vrot.slane %v5175_v21, 7  ;;  %v4905_v25 = vmax.f32 %v4873_v59, 0.0  ;;  %v4720_v11 = vpop.f32.mrb[7].mxu0  ;;  %v5486_v7 = vld [vmem:[#allocation2 + $0x24] sm:$0xf] }
 0x330   : > { %v5155_v32 = vor.u32 %v5153_v53, %v5152_v39  ;;  %v5156_v23 = vrot.slane %v5152_v39, 4  ;;  %v5160_v33 = vrot.slane %v5158_v5, 7  ;;  %v4903_v29 = vmax.f32 %v4871_v17, 0.0 }
 0x331   : > { %v5480_v2 = vsel %vm18347_vm15, %v5172_v8, %v5479_v18  ;;  %v5180_v3 = vor.u32 %v5178_v20, %v5177_v0  ;;  %v5182_v48 = vrot.slane %v5177_v0, 4  ;;  %v14296_v16 = vpack.c.bf16 %v4905_v25, %v4905_v25  ;;  %v5497_v25 = vld [vmem:[#allocation2 + $0x38] sm:$0x1] }
 0x332   : > { %5481 = vst [vmem:[#allocation2 + $0x18] sm:$0xf] %v5480_v2  ;;  %v5473_v27 = vsel %vm18347_vm15, %v5155_v32, %v5472_v56  ;;  %v5163_v50 = vor.u32 %v5161_v52, %v5160_v33  ;;  %v5165_v41 = vrot.slane %v5160_v33, 4  ;;  %v14294_v19 = vpack.c.bf16 %v4903_v29, %v4903_v29 }
 0x333   : > { %5474 = vst [vmem:[#allocation2 + $0xc] sm:$0xf] %v5473_v27  ;;  %v5181_v22 = vsel %vm18354_vm0, %v5173_v51, %v5180_v3  ;;  %v5484_v6 = vsel %vm18251_vm10, %v5182_v48, %v5483_v13  ;;  %v5201_v31 = vshrl.u32 %v14296_v16, 16  ;;  %v5204_v1 = vshll.u32 %v14296_v16, 16 }
 0x334   : > { %5482 = vst [vmem:[#allocation2 + $0x1c] sm:$0xf] %v5181_v22  ;;  %5485 = vst [vmem:[#allocation2 + $0x20] sm:$0x1] %v5484_v6  ;;  %v5164_v44 = vsel %vm18354_vm0, %v5156_v23, %v5163_v50  ;;  %v5477_v54 = vsel %vm18251_vm10, %v5165_v41, %v5476_v47  ;;  %v5184_v38 = vshrl.u32 %v14294_v19, 16  ;;  %v15021_v35 = vpop.f32.mrb[8].mxu0  ;;  %v4874_v10 = vadd.f32 %v15018_v14, %v18339_v37 }
 0x335   : > { %5475 = vst [vmem:[#allocation2 + $0x10] sm:$0xf] %v5164_v44  ;;  %5478 = vst [vmem:[#allocation2 + $0x14] sm:$0x1] %v5477_v54  ;;  %v18370_v4 = vrot.slane %v5201_v31, 7  ;;  %v4872_v49 = vadd.f32 %v18339_v37, %v4720_v11  ;;  %v4877_v24 = vadd.f32 %v15021_v35, %v18339_v37  ;;  %v4733_v40 = vpop.f32.mrb[9].mxu0 }
 0x336   : > { %v5186_v12 = vrot.slane %v5184_v38, 7  ;;  %v5187_v34 = vshll.u32 %v14294_v19, 16  ;;  %v4875_v55 = vadd.f32 %v18339_v37, %v4733_v40  ;;  %v15022_v36 = vpop.f32.mrb[10].mxu0  ;;  %v4906_v42 = vmax.f32 %v4874_v10, 0.0  ;;  %v5490_v11 = vld [vmem:[#allocation2 + $0x2c] sm:$0x1] }
 0x337   : > { %v5206_v62 = vor.u32 %v5204_v1, %v18370_v4  ;;  %v5207_v9 = vrot.slane %v18370_v4, 4  ;;  %v4904_v53 = vmax.f32 %v4872_v49, 0.0  ;;  %v4736_v63 = vpop.f32.mrb[11].mxu0  ;;  %v4909_v21 = vmax.f32 %v4877_v24, 0.0  ;;  %v5507_v50 = vld [vmem:[#allocation2 + $0x48] sm:$0xf] }
 0x338   : > { %v5189_v58 = vor.u32 %v5187_v34, %v5186_v12  ;;  %v5190_v57 = vrot.slane %v5186_v12, 4  ;;  %v4907_v20 = vmax.f32 %v4875_v55, 0.0  ;;  %v14297_v46 = vpack.c.bf16 %v4906_v42, %v4906_v42  ;;  %v5500_v38 = vld [vmem:[#allocation2 + $0x3c] sm:$0xf] }
 0x339   : > { %v5494_v59 = vsel %vm18347_vm15, %v5206_v62, %v5493_v28  ;;  %v14295_v18 = vpack.c.bf16 %v4904_v53, %v4904_v53  ;;  %v4878_v39 = vadd.f32 %v15022_v36, %v18339_v37  ;;  %v14300_v52 = vpack.c.bf16 %v4909_v21, %v4909_v21 }
 0x33a   : > { %5495 = vst [vmem:[#allocation2 + $0x30] sm:$0xf] %v5494_v59  ;;  %v5487_v5 = vsel %vm18347_vm15, %v5189_v58, %v5486_v7  ;;  %v14298_v17 = vpack.c.bf16 %v4907_v20, %v4907_v20  ;;  %v4876_v14 = vadd.f32 %v18339_v37, %v4736_v63  ;;  %v5209_v8 = vshrl.u32 %v14297_v46, 16 }
 0x33b   : > { %5488 = vst [vmem:[#allocation2 + $0x24] sm:$0xf] %v5487_v5  ;;  %v5212_v51 = vshll.u32 %v14297_v46, 16  ;;  %v5192_v56 = vshrl.u32 %v14295_v18, 16  ;;  %v5195_v0 = vshll.u32 %v14295_v18, 16  ;;  %v5235_v32 = vshrl.u32 %v14300_v52, 16 }
 0x33c   : > { %v5238_v23 = vshll.u32 %v14300_v52, 16  ;;  %v5218_v13 = vshrl.u32 %v14298_v17, 16  ;;  %v5221_v33 = vshll.u32 %v14298_v17, 16  ;;  %v15025_v29 = vpop.f32.mrb[12].mxu0  ;;  %v5211_v2 = vrot.slane %v5209_v8, 7 }
 0x33d   : > { %v5194_v3 = vrot.slane %v5192_v56, 7  ;;  %v4910_v48 = vmax.f32 %v4878_v39, 0.0  ;;  %v4908_v47 = vmax.f32 %v4876_v14, 0.0  ;;  %v4749_v16 = vpop.f32.mrb[13].mxu0  ;;  %v18384_v27 = vrot.slane %v5235_v32, 7 }
 0x33e   : > { %v18386_v41 = vrot.slane %v5218_v13, 7  ;;  %v4881_v19 = vadd.f32 %v15025_v29, %v18339_v37  ;;  %v4879_v22 = vadd.f32 %v18339_v37, %v4749_v16  ;;  %v15026_v6 = vpop.f32.mrb[14].mxu0  ;;  %v5214_v31 = vor.u32 %v5212_v51, %v5211_v2  ;;  %v5511_v46 = vld [vmem:[#allocation2 + $0x50] sm:$0x1]  ;;  %v5504_v51 = vld [vmem:[#allocation2 + $0x44] sm:$0x1] }
 0x33f   : > { %v5216_v44 = vrot.slane %v5211_v2, 4  ;;  %v5197_v54 = vor.u32 %v5195_v0, %v5194_v3  ;;  %v5199_v1 = vrot.slane %v5194_v3, 4  ;;  %v4752_v35 = vpop.f32.mrb[15].mxu0  ;;  %v5240_v4 = vor.u32 %v5238_v23, %v18384_v27 }
 0x340   : > { %v5241_v10 = vrot.slane %v18384_v27, 4  ;;  %v5223_v49 = vor.u32 %v5221_v33, %v18386_v41  ;;  %v5224_v24 = vrot.slane %v18386_v41, 4  ;;  %v5215_v40 = vsel %vm18354_vm0, %v5207_v9, %v5214_v31  ;;  %v5521_v31 = vld [vmem:[#allocation2 + $0x60] sm:$0xf] }
 0x341   : > { %v5498_v28 = vsel %vm18251_vm10, %v5216_v44, %v5497_v25  ;;  %v5198_v12 = vsel %vm18354_vm0, %v5190_v57, %v5197_v54  ;;  %v5491_v34 = vsel %vm18251_vm10, %v5199_v1, %v5490_v11  ;;  %5496 = vst [vmem:[#allocation2 + $0x34] sm:$0xf] %v5215_v40  ;;  %v5508_v55 = vsel %vm18347_vm15, %v5240_v4, %v5507_v50  ;;  %v5514_v44 = vld [vmem:[#allocation2 + $0x54] sm:$0xf]  ;;  %v5586_v4 = vld [vmem:[#allocation2 + $0xc] sm:$0xf] }
 0x342   : > { %5499 = vst [vmem:[#allocation2 + $0x38] sm:$0x1] %v5498_v28  ;;  %5489 = vst [vmem:[#allocation2 + $0x28] sm:$0xf] %v5198_v12  ;;  %v5501_v36 = vsel %vm18347_vm15, %v5223_v49, %v5500_v38  ;;  %v14301_v62 = vpack.c.bf16 %v4910_v48, %v4910_v48  ;;  %v14299_v9 = vpack.c.bf16 %v4908_v47, %v4908_v47  ;;  %v4913_v7 = vmax.f32 %v4881_v19, 0.0 }
 0x343   : > { %5492 = vst [vmem:[#allocation2 + $0x2c] sm:$0x1] %v5491_v34  ;;  %5509 = vst [vmem:[#allocation2 + $0x48] sm:$0xf] %v5508_v55  ;;  %v4911_v42 = vmax.f32 %v4879_v22, 0.0  ;;  %v4882_v53 = vadd.f32 %v15026_v6, %v18339_v37  ;;  %v4880_v63 = vadd.f32 %v18339_v37, %v4752_v35 }
 0x344   : > { %5502 = vst [vmem:[#allocation2 + $0x3c] sm:$0xf] %v5501_v36  ;;  %v5243_v58 = vshrl.u32 %v14301_v62, 16  ;;  %v5246_v57 = vshll.u32 %v14301_v62, 16  ;;  %v5226_v21 = vshrl.u32 %v14299_v9, 16  ;;  %v5229_v20 = vshll.u32 %v14299_v9, 16 }
 0x345   : > { %v15029_v59 = vpop.f32.mrb[16].mxu0  ;;  %v14304_v18 = vpack.c.bf16 %v4913_v7, %v4913_v7  ;;  %v14302_v39 = vpack.c.bf16 %v4911_v42, %v4911_v42  ;;  %v4914_v5 = vmax.f32 %v4882_v53, 0.0  ;;  %v4912_v52 = vmax.f32 %v4880_v63, 0.0  ;;  %v5525_v55 = vld [vmem:[#allocation2 + $0x68] sm:$0x1] }
 0x346   : > { %v4765_v17 = vpop.f32.mrb[17].mxu0  ;;  %v5245_v14 = vrot.slane %v5243_v58, 7  ;;  %v5228_v8 = vrot.slane %v5226_v21, 7  ;;  %v4885_v56 = vadd.f32 %v15029_v59, %v18339_v37  ;;  %v5518_v36 = vld [vmem:[#allocation2 + $0x5c] sm:$0x1] }
 0x347   : > { %v4883_v0 = vadd.f32 %v18339_v37, %v4765_v17  ;;  %v15030_v25 = vpop.f32.mrb[18].mxu0  ;;  %v5269_v11 = vshrl.u32 %v14304_v18, 16  ;;  %v5272_v32 = vshll.u32 %v14304_v18, 16  ;;  %v5252_v23 = vshrl.u32 %v14302_v39, 16  ;;  %v5587_v59 = vld [vmem:[#allocation2 + $0x10] sm:$0xf] }
 0x348   : > { %v5255_v13 = vshll.u32 %v14302_v39, 16  ;;  %v4768_v33 = vpop.f32.mrb[19].mxu0  ;;  %v5248_v29 = vor.u32 %v5246_v57, %v5245_v14  ;;  %v5250_v2 = vrot.slane %v5245_v14, 4  ;;  %v5231_v3 = vor.u32 %v5229_v20, %v5228_v8 }
 0x349   : > { %v5233_v48 = vrot.slane %v5228_v8, 4  ;;  %v5271_v47 = vrot.slane %v5269_v11, 7  ;;  %v5254_v16 = vrot.slane %v5252_v23, 7  ;;  %v14305_v27 = vpack.c.bf16 %v4914_v5, %v4914_v5 }
 0x34a   : > { %v14303_v50 = vpack.c.bf16 %v4912_v52, %v4912_v52  ;;  %v5249_v41 = vsel %vm18354_vm0, %v5241_v10, %v5248_v29  ;;  %v5512_v19 = vsel %vm18251_vm10, %v5250_v2, %v5511_v46  ;;  %v5232_v22 = vsel %vm18354_vm0, %v5224_v24, %v5231_v3 }
 0x34b   : > { %v5505_v6 = vsel %vm18251_vm10, %v5233_v48, %v5504_v51  ;;  %5510 = vst [vmem:[#allocation2 + $0x4c] sm:$0xf] %v5249_v41  ;;  %5513 = vst [vmem:[#allocation2 + $0x50] sm:$0x1] %v5512_v19  ;;  %v5274_v54 = vor.u32 %v5272_v32, %v5271_v47  ;;  %v5275_v1 = vrot.slane %v5271_v47, 4  ;;  %v5257_v38 = vor.u32 %v5255_v13, %v5254_v16 }
 0x34c   : > { %5503 = vst [vmem:[#allocation2 + $0x40] sm:$0xf] %v5232_v22  ;;  %5506 = vst [vmem:[#allocation2 + $0x44] sm:$0x1] %v5505_v6  ;;  %v5258_v35 = vrot.slane %v5254_v16, 4  ;;  %v5277_v10 = vshrl.u32 %v14305_v27, 16  ;;  %v4886_v63 = vadd.f32 %v15030_v25, %v18339_v37  ;;  %v4884_v58 = vadd.f32 %v18339_v37, %v4768_v33 }
 0x34d   : > { %v5280_v49 = vshll.u32 %v14305_v27, 16  ;;  %v5260_v40 = vshrl.u32 %v14303_v50, 16  ;;  %v5263_v28 = vshll.u32 %v14303_v50, 16  ;;  %v18418_v12 = vpop.f32.mrb[20].mxu0  ;;  %v5522_v24 = vsel %vm18347_vm15, %v5274_v54, %v5521_v31  ;;  %v5535_v13 = vld [vmem:[#allocation2 + $0x78] sm:$0xf] }
 0x34e   : > { %v5515_v34 = vsel %vm18347_vm15, %v5257_v38, %v5514_v44  ;;  %v4917_v62 = vmax.f32 %v4885_v56, 0.0  ;;  %v4915_v9 = vmax.f32 %v4883_v0, 0.0  ;;  %v18424_v7 = vpop.f32.mrb[21].mxu0  ;;  %5523 = vst [vmem:[#allocation2 + $0x60] sm:$0xf] %v5522_v24  ;;  %v5279_v42 = vrot.slane %v5277_v10, 7 }
 0x34f   : > { %5516 = vst [vmem:[#allocation2 + $0x54] sm:$0xf] %v5515_v34  ;;  %v5262_v53 = vrot.slane %v5260_v40, 7  ;;  %v18428_v57 = vpop.f32.mrb[22].mxu0  ;;  %v5673_v46 = vshrl.u32 %v5586_v4, 16  ;;  %v5676_v18 = vshll.u32 %v5586_v4, 16 }
 0x350   : > { %v14308_v21 = vpack.c.bf16 %v4917_v62, %v4917_v62  ;;  %v14306_v20 = vpack.c.bf16 %v4915_v9, %v4915_v9  ;;  %v18430_v39 = vpop.f32.mrb[23].mxu0  ;;  %v5282_v5 = vor.u32 %v5280_v49, %v5279_v42  ;;  %v5284_v52 = vrot.slane %v5279_v42, 4  ;;  %v5528_v33 = vld [vmem:[#allocation2 + $0x6c] sm:$0xf]  ;;  %v5633_v47 = vld [vmem:[#allocation2 + $0x14] sm:$0x1] }
 0x351   : > { %v5265_v17 = vor.u32 %v5263_v28, %v5262_v53  ;;  %v5267_v14 = vrot.slane %v5262_v53, 4  ;;  %v4918_v3 = vmax.f32 %v4886_v63, 0.0  ;;  %v4916_v48 = vmax.f32 %v4884_v58, 0.0  ;;  %v5588_v4 = vld [vmem:[#allocation2 + $0x18] sm:$0xf] }
 0x352   : > { %v5303_v8 = vshrl.u32 %v14308_v21, 16  ;;  %v5306_v51 = vshll.u32 %v14308_v21, 16  ;;  %v5286_v56 = vshrl.u32 %v14306_v20, 16  ;;  %v5289_v0 = vshll.u32 %v14306_v20, 16  ;;  %v5589_v34 = vld [vmem:[#allocation2 + $0x1c] sm:$0xf] }
 0x353   : > { %v5283_v25 = vsel %vm18354_vm0, %v5275_v1, %v5282_v5  ;;  %v5526_v11 = vsel %vm18251_vm10, %v5284_v52, %v5525_v55  ;;  %v5266_v32 = vsel %vm18354_vm0, %v5258_v35, %v5265_v17  ;;  %v5519_v23 = vsel %vm18251_vm10, %v5267_v14, %v5518_v36  ;;  %v5532_v52 = vld [vmem:[#allocation2 + $0x74] sm:$0x1] }
 0x354   : > { %5524 = vst [vmem:[#allocation2 + $0x64] sm:$0xf] %v5283_v25  ;;  %5527 = vst [vmem:[#allocation2 + $0x68] sm:$0x1] %v5526_v11  ;;  %v5305_v29 = vrot.slane %v5303_v8, 7  ;;  %v5288_v2 = vrot.slane %v5286_v56, 7  ;;  %v14309_v54 = vpack.c.bf16 %v4918_v3, %v4918_v3  ;;  %v14307_v1 = vpack.c.bf16 %v4916_v48, %v4916_v48 }
 0x355   : > { %5517 = vst [vmem:[#allocation2 + $0x58] sm:$0xf] %v5266_v32  ;;  %5520 = vst [vmem:[#allocation2 + $0x5c] sm:$0x1] %v5519_v23  ;;  %v5675_v16 = vrot.slane %v5673_v46, 4  ;;  %v5678_v27 = vrot.slane %v5676_v18, 5 }
 0x356   : > { %v5682_v50 = vshll.u32 %v5587_v59, 16  ;;  %v5686_v41 = vshrl.u32 %v5587_v59, 16  ;;  %v18440_v19 = vpop.f32.mrb[24].mxu0  ;;  %v5308_v22 = vor.u32 %v5306_v51, %v5305_v29  ;;  %v5309_v6 = vrot.slane %v5305_v29, 4  ;;  %v5539_v59 = vld [vmem:[#allocation2 + $0x80] sm:$0x1] }
 0x357   : > { %v5291_v31 = vor.u32 %v5289_v0, %v5288_v2  ;;  %v18442_v44 = vpop.f32.mrb[25].mxu0  ;;  %v5679_v38 = vor.u32 %v5678_v27, %v5675_v16  ;;  %v5692_v24 = vshll.u32 %v5633_v47, 16  ;;  %v5292_v36 = vrot.slane %v5288_v2, 4  ;;  %v5634_v32 = vld [vmem:[#allocation2 + $0x20] sm:$0x1] }
 0x358   : > { %v5684_v35 = vrot.slane %v5682_v50, 5  ;;  %v18444_v10 = vpop.f32.mrb[26].mxu0  ;;  %v5536_v49 = vsel %vm18347_vm15, %v5308_v22, %v5535_v13  ;;  %v5688_v28 = vrot.slane %v5686_v41, 4  ;;  %v5311_v62 = vshrl.u32 %v14309_v54, 16  ;;  %v5590_v3 = vld [vmem:[#allocation2 + $0x24] sm:$0xf] }
 0x359   : > { %v5529_v40 = vsel %vm18347_vm15, %v5291_v31, %v5528_v33  ;;  %v18450_v55 = vpop.f32.mrb[27].mxu0  ;;  %5537 = vst [vmem:[#allocation2 + $0x78] sm:$0xf] %v5536_v49  ;;  %v5314_v9 = vshll.u32 %v14309_v54, 16  ;;  %v5294_v42 = vshrl.u32 %v14307_v1, 16  ;;  %v5297_v53 = vshll.u32 %v14307_v1, 16 }
 0x35a   : > { %5530 = vst [vmem:[#allocation2 + $0x6c] sm:$0xf] %v5529_v40  ;;  %v5680_v63 = vrot.slane %v5679_v38, 4  ;;  %v5689_v58 = vor.u32 %v5688_v28, %v5684_v35  ;;  %v5694_v21 = vrot.slane %v5692_v24, 5  ;;  %v5313_v20 = vrot.slane %v5311_v62, 7 }
 0x35b   : > { %v5296_v46 = vrot.slane %v5294_v42, 7  ;;  %v5697_v18 = vshrl.u32 %v5588_v4, 16  ;;  %v5700_v5 = vshll.u32 %v5588_v4, 16  ;;  %v5706_v8 = vshll.u32 %v5589_v34, 16  ;;  %v5591_v28 = vld [vmem:[#allocation2 + $0x28] sm:$0xf] }
 0x35c   : > { %v5685_v17 = vsel %vm16548_vm4, %v5680_v63, %v5684_v35  ;;  %v5690_v14 = vrot.slane %v5689_v58, 4  ;;  %v5710_v51 = vshrl.u32 %v5589_v34, 16  ;;  %v5316_v56 = vor.u32 %v5314_v9, %v5313_v20  ;;  %v18454_v23 = vpop.f32.mrb[28].mxu0 }
 0x35d   : > { %v5318_v0 = vrot.slane %v5313_v20, 4  ;;  %v5299_v25 = vor.u32 %v5297_v53, %v5296_v46  ;;  %v5301_v11 = vrot.slane %v5296_v46, 4  ;;  %v5699_v33 = vrot.slane %v5697_v18, 4  ;;  %v18458_v48 = vpop.f32.mrb[29].mxu0 }
 0x35e   : > { %v5695_v13 = vsel %vm16548_vm4, %v5690_v14, %v5694_v21  ;;  %v5702_v29 = vrot.slane %v5700_v5, 5  ;;  %v5708_v2 = vrot.slane %v5706_v8, 5  ;;  %v5317_v47 = vsel %vm18354_vm0, %v5309_v6, %v5316_v56  ;;  %v18468_v41 = vpop.f32.mrb[30].mxu0  ;;  %v16126_v6 = vld [vmem:[#allocation3 + $0x8] sm:$0xff]   ;;  %v5549_v56 = vld [vmem:[#allocation2 + $0x90] sm:$0xf] }
 0x35f   : > { %v5540_v16 = vsel %vm18251_vm10, %v5318_v0, %v5539_v59  ;;  %v5300_v27 = vsel %vm18354_vm0, %v5292_v36, %v5299_v25  ;;  %v5533_v50 = vsel %vm18251_vm10, %v5301_v11, %v5532_v52  ;;  %5538 = vst [vmem:[#allocation2 + $0x7c] sm:$0xf] %v5317_v47  ;;  %v13824_v22 = vcombine.low %v5685_v17, %v5695_v13  ;;  %v18470_v38 = vpop.f32.mrb[31].mxu0  ;;  %v5542_v25 = vld [vmem:[#allocation2 + $0x84] sm:$0xf] }
 0x360   : > { %5541 = vst [vmem:[#allocation2 + $0x80] sm:$0x1] %v5540_v16  ;;  %5531 = vst [vmem:[#allocation2 + $0x70] sm:$0xf] %v5300_v27  ;;  %v5703_v31 = vor.u32 %v5702_v29, %v5699_v33  ;;  %v5712_v54 = vrot.slane %v5710_v51, 4  ;;  %v5716_v1 = vshll.u32 %v5634_v32, 16  ;;  %v4889_v35 = vadd.f32 %v18418_v12, %v18339_v37 }
 0x361   : > { %5534 = vst [vmem:[#allocation2 + $0x74] sm:$0x1] %v5533_v50  ;;  %v4887_v4 = vadd.f32 %v18339_v37, %v18424_v7  ;;  %v4890_v49 = vadd.f32 %v18428_v57, %v18339_v37  ;;  %v4888_v40 = vadd.f32 %v18339_v37, %v18430_v39  ;;  %15060 = vmatmul.mubr.bf16.vlgmr.msra.gmra.mrb[0].mxu1 %v13824_v22  ;;  %v5721_v62 = vshrl.u32 %v5590_v3, 16  ;;  %v16127_v39 = vld [vmem:[#allocation3 + $0x10] sm:$0xff]   ;;  %v16128_v33 = vld [vmem:[#allocation3 + $0x18] sm:$0xff]  }
 0x362   : > { %v5704_v24 = vrot.slane %v5703_v31, 4  ;;  %v5713_v34 = vor.u32 %v5712_v54, %v5708_v2  ;;  %v5718_v36 = vrot.slane %v5716_v1, 5  ;;  %15092 = vmatpush3.bf16.msra.mxu1 %v18309_v30  ;;  %v4921_v9 = vmax.f32 %v4889_v35, 0.0  ;;  %v5546_v16 = vld [vmem:[#allocation2 + $0x8c] sm:$0x1]  ;;  %v16129_v1 = vld [vmem:[#allocation3 + $0x20] sm:$0xff]  }
 0x363   : > { %v4919_v42 = vmax.f32 %v4887_v4, 0.0  ;;  %v4922_v12 = vmax.f32 %v4890_v49, 0.0  ;;  %v4920_v53 = vmax.f32 %v4888_v40, 0.0  ;;  %15093 = vmatprep.subr.bf16.mxu1 %v16126_v6  ;;  %v5723_v57 = vrot.slane %v5721_v62, 4  ;;  %v18485_v62 = vld [vmem:[#allocation2 + $0x30] sm:$0xf] }
 0x364   : > { %v5709_v7 = vsel %vm16548_vm4, %v5704_v24, %v5708_v2  ;;  %v5714_v63 = vrot.slane %v5713_v34, 4  ;;  %v5724_v58 = vshll.u32 %v5590_v3, 16  ;;  %v14312_v21 = vpack.c.bf16 %v4921_v9, %v4921_v9  ;;  %v5553_v3 = vld [vmem:[#allocation2 + $0x98] sm:$0x1] }
 0x365   : > { %v14310_v20 = vpack.c.bf16 %v4919_v42, %v4919_v42  ;;  %v14313_v59 = vpack.c.bf16 %v4922_v12, %v4922_v12  ;;  %v14311_v46 = vpack.c.bf16 %v4920_v53, %v4920_v53  ;;  %v5730_v5 = vshll.u32 %v5591_v28, 16 }
 0x366   : > { %v5719_v18 = vsel %vm16548_vm4, %v5714_v63, %v5718_v36  ;;  %v5726_v30 = vrot.slane %v5724_v58, 5  ;;  %v5734_v52 = vshrl.u32 %v5591_v28, 16  ;;  %v5337_v14 = vshrl.u32 %v14312_v21, 16  ;;  %15094 = vmatpush3.bf16.msra.mxu1 %v16126_v6  ;;  %v5635_v36 = vld [vmem:[#allocation2 + $0x2c] sm:$0x1] }
 0x367   : > { %v13825_v17 = vcombine.low %v5709_v7, %v5719_v18  ;;  %v5340_v8 = vshll.u32 %v14312_v21, 16  ;;  %v5320_v51 = vshrl.u32 %v14310_v20, 16  ;;  %v5323_v0 = vshll.u32 %v14310_v20, 16  ;;  %15095 = vmatprep.subr.bf16.mxu1 %v16127_v39  ;;  %v18491_v7 = vld [vmem:[#allocation2 + $0x34] sm:$0xf] }
 0x368   : > { %v5345_v11 = vshrl.u32 %v14313_v59, 16  ;;  %v5348_v32 = vshll.u32 %v14313_v59, 16  ;;  %v5328_v13 = vshrl.u32 %v14311_v46, 16  ;;  %v5339_v29 = vrot.slane %v5337_v14, 7  ;;  %v5636_v63 = vld [vmem:[#allocation2 + $0x38] sm:$0x1] }
 0x369   : > { %15063 = vmatprep.mubr.bf16.mxu1 %v13825_v17  ;;  %v5322_v2 = vrot.slane %v5320_v51, 7  ;;  %v5331_v47 = vshll.u32 %v14311_v46, 16  ;;  %v5727_v27 = vor.u32 %v5726_v30, %v5723_v57  ;;  %v5732_v31 = vrot.slane %v5730_v5, 5  ;;  %v16130_v14 = vld [vmem:[#allocation3 + $0x28] sm:$0xff]  }
 0x36a   : > { %v5347_v50 = vrot.slane %v5345_v11, 7  ;;  %v5330_v22 = vrot.slane %v5328_v13, 7  ;;  %v5736_v54 = vrot.slane %v5734_v52, 4  ;;  %v5342_v6 = vor.u32 %v5340_v8, %v5339_v29  ;;  %15096 = vmatpush3.bf16.msra.mxu1 %v16127_v39 }
 0x36b   : > { %v5343_v35 = vrot.slane %v5339_v29, 4  ;;  %v5325_v4 = vor.u32 %v5323_v0, %v5322_v2  ;;  %v5326_v49 = vrot.slane %v5322_v2, 4  ;;  %15097 = vmatprep.subr.bf16.mxu1 %v16128_v33  ;;  %v5728_v12 = vrot.slane %v5727_v27, 4 }
 0x36c   : > { %v5350_v40 = vor.u32 %v5348_v32, %v5347_v50  ;;  %v5352_v28 = vrot.slane %v5347_v50, 4  ;;  %v5333_v24 = vor.u32 %v5331_v47, %v5330_v22  ;;  %v5335_v34 = vrot.slane %v5330_v22, 4  ;;  %v16131_v50 = vld [vmem:[#allocation3 + $0x30] sm:$0xff]  }
 0x36d   : > { %v5550_v9 = vsel %vm18347_vm15, %v5342_v6, %v5549_v56  ;;  %v5543_v42 = vsel %vm18347_vm15, %v5325_v4, %v5542_v25  ;;  %v5737_v53 = vor.u32 %v5736_v54, %v5732_v31  ;;  %v5733_v20 = vsel %vm16548_vm4, %v5728_v12, %v5732_v31  ;;  %v16132_v12 = vld [vmem:[#allocation3 + $0x38] sm:$0xff]  }
 0x36e   : > { %5551 = vst [vmem:[#allocation2 + $0x90] sm:$0xf] %v5550_v9  ;;  %5544 = vst [vmem:[#allocation2 + $0x84] sm:$0xf] %v5543_v42  ;;  %v5351_v57 = vsel %vm18354_vm0, %v5343_v35, %v5350_v40  ;;  %v5554_v58 = vsel %vm18251_vm10, %v5352_v28, %v5553_v3  ;;  %v5334_v39 = vsel %vm18354_vm0, %v5326_v49, %v5333_v24  ;;  %v5740_v46 = vshll.u32 %v5635_v36, 16 }
 0x36f   : > { %v5547_v21 = vsel %vm18251_vm10, %v5335_v34, %v5546_v16  ;;  %5552 = vst [vmem:[#allocation2 + $0x94] sm:$0xf] %v5351_v57  ;;  %5555 = vst [vmem:[#allocation2 + $0x98] sm:$0x1] %v5554_v58  ;;  %v5738_v59 = vrot.slane %v5737_v53, 4  ;;  %v5745_v18 = vshrl.u32 %v18485_v62, 16  ;;  %15098 = vmatpush3.bf16.msra.mxu1 %v16128_v33  ;;  %v4893_v56 = vadd.f32 %v18440_v19, %v18339_v37 }
 0x370   : > { %5545 = vst [vmem:[#allocation2 + $0x88] sm:$0xf] %v5334_v39  ;;  %5548 = vst [vmem:[#allocation2 + $0x8c] sm:$0x1] %v5547_v21  ;;  %v5748_v30 = vshll.u32 %v18485_v62, 16  ;;  %v5754_v5 = vshll.u32 %v18491_v7, 16  ;;  %15099 = vmatprep.subr.bf16.mxu1 %v16129_v1  ;;  %v4891_v0 = vadd.f32 %v18339_v37, %v18442_v44  ;;  %v4894_v47 = vadd.f32 %v18444_v10, %v18339_v37 }
 0x371   : > { %v5758_v52 = vshrl.u32 %v18491_v7, 16  ;;  %v5764_v17 = vshll.u32 %v5636_v63, 16  ;;  %v5742_v8 = vrot.slane %v5740_v46, 5  ;;  %v5747_v51 = vrot.slane %v5745_v18, 4  ;;  %v18511_v33 = vld [vmem:[#allocation2 + $0x3c] sm:$0xf] }
 0x372   : > { %v5750_v25 = vrot.slane %v5748_v30, 5  ;;  %v5756_v11 = vrot.slane %v5754_v5, 5  ;;  %v4925_v2 = vmax.f32 %v4893_v56, 0.0  ;;  %v4923_v3 = vmax.f32 %v4891_v0, 0.0  ;;  %v5563_v34 = vld [vmem:[#allocation2 + $0xa8] sm:$0xf] }
 0x373   : > { %v5760_v32 = vrot.slane %v5758_v52, 4  ;;  %v5766_v13 = vrot.slane %v5764_v17, 5  ;;  %v5743_v29 = vsel %vm16548_vm4, %v5738_v59, %v5742_v8  ;;  %15100 = vmatpush3.bf16.msra.mxu1 %v16129_v1  ;;  %v4892_v44 = vadd.f32 %v18339_v37, %v18450_v55  ;;  %v5556_v36 = vld [vmem:[#allocation2 + $0x9c] sm:$0xf]  ;;  %v18525_v58 = vld [vmem:[#allocation2 + $0x40] sm:$0xf] }
 0x374   : > { %v13826_v16 = vcombine.low %v5733_v20, %v5743_v29  ;;  %v5751_v19 = vor.u32 %v5750_v25, %v5747_v51  ;;  %15101 = vmatprep.subr.bf16.mxu1 %v16130_v14  ;;  %v14316_v22 = vpack.c.bf16 %v4925_v2, %v4925_v2  ;;  %v14314_v31 = vpack.c.bf16 %v4923_v3, %v4923_v3  ;;  %v5637_v18 = vld [vmem:[#allocation2 + $0x44] sm:$0x1]  ;;  %v18535_v3 = vld [vmem:[#allocation2 + $0x48] sm:$0xf] }
 0x375   : > { %v5761_v27 = vor.u32 %v5760_v32, %v5756_v11  ;;  %v4926_v54 = vmax.f32 %v4894_v47, 0.0  ;;  %v5769_v6 = vshrl.u32 %v18511_v33, 16  ;;  %v4924_v49 = vmax.f32 %v4892_v44, 0.0  ;;  %v5560_v8 = vld [vmem:[#allocation2 + $0xa4] sm:$0x1] }
 0x376   : > { %15064 = vmatmul.mubr.bf16.gmra.mrb[4].mxu1 %v13826_v16  ;;  %v5752_v35 = vrot.slane %v5751_v19, 4  ;;  %v5772_v10 = vshll.u32 %v18511_v33, 16  ;;  %v5371_v1 = vshrl.u32 %v14316_v22, 16  ;;  %v5374_v40 = vshll.u32 %v14316_v22, 16  ;;  %v18537_v44 = vld [vmem:[#allocation2 + $0x4c] sm:$0xf] }
 0x377   : > { %v5762_v4 = vrot.slane %v5761_v27, 4  ;;  %v5354_v28 = vshrl.u32 %v14314_v31, 16  ;;  %v5357_v24 = vshll.u32 %v14314_v31, 16  ;;  %15102 = vmatpush3.bf16.msra.mxu1 %v16130_v14  ;;  %v14317_v9 = vpack.c.bf16 %v4926_v54, %v4926_v54  ;;  %v5567_v14 = vld [vmem:[#allocation2 + $0xb0] sm:$0x1] }
 0x378   : > { %v5757_v37 = vsel %vm16548_vm4, %v5752_v35, %v5756_v11  ;;  %v14315_v42 = vpack.c.bf16 %v4924_v49, %v4924_v49  ;;  %15103 = vmatprep.subr.bf16.mxu1 %v16131_v50  ;;  %v5373_v63 = vrot.slane %v5371_v1, 7  ;;  %v5771_v39 = vrot.slane %v5769_v6, 4  ;;  %v18528_v11 = vld [vmem:[#allocation3 + $0x80] sm:$0xff]   ;;  %v18539_v6 = vld [vmem:[#allocation2 + $0x50] sm:$0x1] }
 0x379   : > { %v5767_v55 = vsel %vm16548_vm4, %v5762_v4, %v5766_v13  ;;  %v5356_v57 = vrot.slane %v5354_v28, 7  ;;  %v5379_v21 = vshrl.u32 %v14317_v9, 16  ;;  %v5382_v20 = vshll.u32 %v14317_v9, 16 }
 0x37a   : > { %v13827_v53 = vcombine.low %v5757_v37, %v5767_v55  ;;  %v5362_v59 = vshrl.u32 %v14315_v42, 16  ;;  %v5365_v46 = vshll.u32 %v14315_v42, 16  ;;  %v5376_v30 = vor.u32 %v5374_v40, %v5373_v63 }
 0x37b   : > { %v5377_v5 = vrot.slane %v5373_v63, 4  ;;  %v5359_v52 = vor.u32 %v5357_v24, %v5356_v57  ;;  %v5360_v17 = vrot.slane %v5356_v57, 4  ;;  %15104 = vmatpush3.bf16.msra.mxu1 %v16131_v50  ;;  %v5381_v51 = vrot.slane %v5379_v21, 7 }
 0x37c   : > { %15067 = vmatprep.mubr.bf16.mxu1 %v13827_v53  ;;  %v5364_v56 = vrot.slane %v5362_v59, 7  ;;  %v5774_v0 = vrot.slane %v5772_v10, 5  ;;  %v5778_v25 = vshll.u32 %v18525_v58, 16  ;;  %15105 = vmatprep.subr.bf16.mxu1 %v16132_v12  ;;  %v5564_v32 = vsel %vm18347_vm15, %v5376_v30, %v5563_v34  ;;  %v18561_v59 = vld [vmem:[#allocation2 + $0x54] sm:$0xf] }
 0x37d   : > { %v5557_v13 = vsel %vm18347_vm15, %v5359_v52, %v5556_v36  ;;  %v5782_v29 = vshrl.u32 %v18525_v58, 16  ;;  %v5788_v2 = vshll.u32 %v5637_v18, 16  ;;  %5565 = vst [vmem:[#allocation2 + $0xa8] sm:$0xf] %v5564_v32  ;;  %v5384_v47 = vor.u32 %v5382_v20, %v5381_v51  ;;  %v16243_v36 = vld [vmem:[%s21613_s2] ss:$0 sm:$0xff] }
 0x37e   : > { %5558 = vst [vmem:[#allocation2 + $0x9c] sm:$0xf] %v5557_v13  ;;  %v5386_v16 = vrot.slane %v5381_v51, 4  ;;  %v5367_v19 = vor.u32 %v5365_v46, %v5364_v56  ;;  %v5369_v27 = vrot.slane %v5364_v56, 4  ;;  %v5775_v50 = vor.u32 %v5774_v0, %v5771_v39 }
 0x37f   : > { %v5780_v22 = vrot.slane %v5778_v25, 5  ;;  %v5784_v31 = vrot.slane %v5782_v29, 4  ;;  %v5790_v54 = vrot.slane %v5788_v2, 5  ;;  %15106 = vmatpush3.bf16.msra.mxu1 %v16132_v12  ;;  %v5385_v35 = vsel %vm18354_vm0, %v5377_v5, %v5384_v47  ;;  %v5577_v2 = vld [vmem:[#allocation2 + $0xc0] sm:$0xf] }
 0x380   : > { %v5568_v4 = vsel %vm18251_vm10, %v5386_v16, %v5567_v14  ;;  %v5368_v49 = vsel %vm18354_vm0, %v5360_v17, %v5367_v19  ;;  %v5561_v10 = vsel %vm18251_vm10, %v5369_v27, %v5560_v8  ;;  %15139 = vmatprep.subr.bf16.mxu1 %v18528_v11  ;;  %5566 = vst [vmem:[#allocation2 + $0xac] sm:$0xf] %v5385_v35  ;;  %v5776_v1 = vrot.slane %v5775_v50, 4  ;;  %v18573_v50 = vld [vmem:[#allocation2 + $0x58] sm:$0xf] }
 0x381   : > { %5569 = vst [vmem:[#allocation2 + $0xb0] sm:$0x1] %v5568_v4  ;;  %5559 = vst [vmem:[#allocation2 + $0xa0] sm:$0xf] %v5368_v49  ;;  %v5785_v40 = vor.u32 %v5784_v31, %v5780_v22  ;;  %v5793_v28 = vshrl.u32 %v18535_v3, 16  ;;  %v5796_v24 = vshll.u32 %v18535_v3, 16  ;;  %v4897_v9 = vadd.f32 %v16243_v36, %v18454_v23 }
 0x382   : > { %5562 = vst [vmem:[#allocation2 + $0xa4] sm:$0x1] %v5561_v10  ;;  %v5802_v37 = vshll.u32 %v18537_v44, 16  ;;  %v5806_v55 = vshrl.u32 %v18537_v44, 16  ;;  %v5812_v34 = vshll.u32 %v18539_v6, 16  ;;  %v5781_v42 = vsel %vm16548_vm4, %v5776_v1, %v5780_v22 }
 0x383   : > { %v5786_v12 = vrot.slane %v5785_v40, 4  ;;  %v5795_v53 = vrot.slane %v5793_v28, 4  ;;  %v5798_v63 = vrot.slane %v5796_v24, 5  ;;  %v4929_v20 = vmax.f32 %v4897_v9, 0.0  ;;  %v5570_v24 = vld [vmem:[#allocation2 + $0xb4] sm:$0xf] }
 0x384   : > { %v5804_v57 = vrot.slane %v5802_v37, 5  ;;  %v5808_v39 = vrot.slane %v5806_v55, 4  ;;  %v5814_v21 = vrot.slane %v5812_v34, 5  ;;  %v4895_v30 = vadd.f32 %v16243_v36, %v18458_v48  ;;  %v5581_v9 = vld [vmem:[#allocation2 + $0xc8] sm:$0x1] }
 0x385   : > { %v5791_v46 = vsel %vm16548_vm4, %v5786_v12, %v5790_v54  ;;  %v5799_v18 = vor.u32 %v5798_v63, %v5795_v53  ;;  %v4898_v23 = vadd.f32 %v16243_v36, %v18468_v41  ;;  %v14320_v17 = vpack.c.bf16 %v4929_v20, %v4929_v20  ;;  %v5574_v20 = vld [vmem:[#allocation2 + $0xbc] sm:$0x1] }
 0x386   : > { %v13828_v5 = vcombine.low %v5781_v42, %v5791_v46  ;;  %v5809_v52 = vor.u32 %v5808_v39, %v5804_v57  ;;  %v4896_v14 = vadd.f32 %v16243_v36, %v18470_v38  ;;  %v4927_v51 = vmax.f32 %v4895_v30, 0.0  ;;  %v18580_v46 = vld [vmem:[#allocation2 + $0x5c] sm:$0x1] }
 0x387   : > { %v5800_v8 = vrot.slane %v5799_v18, 4  ;;  %v4930_v56 = vmax.f32 %v4898_v23, 0.0  ;;  %v5817_v0 = vshrl.u32 %v18561_v59, 16  ;;  %v5405_v32 = vshrl.u32 %v14320_v17, 16 }
 0x388   : > { %15068 = vmatmul.mubr.bf16.gmra.mrb[8].mxu1 %v13828_v5  ;;  %v5810_v25 = vrot.slane %v5809_v52, 4  ;;  %v5408_v13 = vshll.u32 %v14320_v17, 16  ;;  %v4928_v29 = vmax.f32 %v4896_v14, 0.0  ;;  %v14318_v41 = vpack.c.bf16 %v4927_v51, %v4927_v51  ;;  %v18582_v52 = vld [vmem:[#allocation2 + $0x60] sm:$0xf] }
 0x389   : > { %v5805_v48 = vsel %vm16548_vm4, %v5800_v8, %v5804_v57  ;;  %v14321_v47 = vpack.c.bf16 %v4930_v56, %v4930_v56  ;;  %v5819_v16 = vrot.slane %v5817_v0, 4  ;;  %v5407_v19 = vrot.slane %v5405_v32, 7  ;;  %v18584_v17 = vld [vmem:[#allocation2 + $0x64] sm:$0xf]  ;;  %v18592_v0 = vld [vmem:[#allocation2 + $0x68] sm:$0x1] }
 0x38a   : > { %v5815_v38 = vsel %vm16548_vm4, %v5810_v25, %v5814_v21  ;;  %v14319_v27 = vpack.c.bf16 %v4928_v29, %v4928_v29  ;;  %v5820_v22 = vshll.u32 %v18561_v59, 16  ;;  %v5388_v54 = vshrl.u32 %v14318_v41, 16 }
 0x38b   : > { %v13829_v31 = vcombine.low %v5805_v48, %v5815_v38  ;;  %v5391_v35 = vshll.u32 %v14318_v41, 16  ;;  %v5413_v4 = vshrl.u32 %v14321_v47, 16  ;;  %v5410_v49 = vor.u32 %v5408_v13, %v5407_v19 }
 0x38c   : > { %v5411_v10 = vrot.slane %v5407_v19, 4  ;;  %v5416_v1 = vshll.u32 %v14321_v47, 16  ;;  %v5396_v40 = vshrl.u32 %v14319_v27, 16  ;;  %v5390_v28 = vrot.slane %v5388_v54, 7  ;;  %v18602_v47 = vld [vmem:[#allocation2 + $0x6c] sm:$0xf] }
 0x38d   : > { %15071 = vmatprep.mubr.bf16.mxu1 %v13829_v31  ;;  %v5415_v37 = vrot.slane %v5413_v4, 7  ;;  %v5399_v55 = vshll.u32 %v14319_v27, 16  ;;  %v5822_v34 = vrot.slane %v5820_v22, 5  ;;  %v5578_v36 = vsel %vm18347_vm15, %v5410_v49, %v5577_v2  ;;  %v18608_v27 = vld [vmem:[#allocation2 + $0x70] sm:$0xf] }
 0x38e   : > { %v5398_v42 = vrot.slane %v5396_v40, 7  ;;  %v5826_v12 = vshll.u32 %v18573_v50, 16  ;;  %v5830_v53 = vshrl.u32 %v18573_v50, 16  ;;  %5579 = vst [vmem:[#allocation2 + $0xc0] sm:$0xf] %v5578_v36  ;;  %v5393_v63 = vor.u32 %v5391_v35, %v5390_v28 }
 0x38f   : > { %v5394_v57 = vrot.slane %v5390_v28, 4  ;;  %v5418_v39 = vor.u32 %v5416_v1, %v5415_v37  ;;  %v5420_v21 = vrot.slane %v5415_v37, 4  ;;  %v5823_v23 = vor.u32 %v5822_v34, %v5819_v16  ;;  %v18610_v4 = vld [vmem:[#allocation2 + $0x74] sm:$0x1]  ;;  %v18618_v34 = vld [vmem:[#allocation2 + $0x78] sm:$0xf] }
 0x390   : > { %v5401_v18 = vor.u32 %v5399_v55, %v5398_v42  ;;  %v5403_v30 = vrot.slane %v5398_v42, 4  ;;  %v5828_v5 = vrot.slane %v5826_v12, 5  ;;  %v5571_v14 = vsel %vm18347_vm15, %v5393_v63, %v5570_v24  ;;  %v18620_v36 = vld [vmem:[#allocation2 + $0x7c] sm:$0xf] }
 0x391   : > { %v5419_v8 = vsel %vm18354_vm0, %v5411_v10, %v5418_v39  ;;  %v5582_v51 = vsel %vm18251_vm10, %v5420_v21, %v5581_v9  ;;  %v5832_v56 = vrot.slane %v5830_v53, 4  ;;  %5572 = vst [vmem:[#allocation2 + $0xb4] sm:$0xf] %v5571_v14  ;;  %v5824_v60 = vrot.slane %v5823_v23, 4 }
 0x392   : > { %5580 = vst [vmem:[#allocation2 + $0xc4] sm:$0xf] %v5419_v8  ;;  %5583 = vst [vmem:[#allocation2 + $0xc8] sm:$0x1] %v5582_v51  ;;  %v5402_v25 = vsel %vm18354_vm0, %v5394_v57, %v5401_v18  ;;  %v5575_v32 = vsel %vm18251_vm10, %v5403_v30, %v5574_v20  ;;  %v5836_v13 = vshll.u32 %v18580_v46, 16  ;;  %v5841_v48 = vshrl.u32 %v18582_v52, 16 }
 0x393   : > { %5573 = vst [vmem:[#allocation2 + $0xb8] sm:$0xf] %v5402_v25  ;;  %5576 = vst [vmem:[#allocation2 + $0xbc] sm:$0x1] %v5575_v32  ;;  %v5833_v29 = vor.u32 %v5832_v56, %v5828_v5  ;;  %v5844_v2 = vshll.u32 %v18582_v52, 16  ;;  %v5850_v41 = vshll.u32 %v18584_v17, 16  ;;  %v5829_v15 = vsel %vm16548_vm4, %v5824_v60, %v5828_v5 }
 0x394   : > { %v5838_v16 = vrot.slane %v5836_v13, 5  ;;  %v5854_v38 = vshrl.u32 %v18584_v17, 16  ;;  %v5860_v19 = vshll.u32 %v18592_v0, 16  ;;  %v5843_v31 = vrot.slane %v5841_v48, 4  ;;  %v18623_v30 = vld [vmem:[#allocation2 + $0x80] sm:$0x1] }
 0x395   : > { %v5834_v22 = vrot.slane %v5833_v29, 4  ;;  %v5846_v54 = vrot.slane %v5844_v2, 5  ;;  %v5852_v35 = vrot.slane %v5850_v41, 5  ;;  %v5865_v1 = vshrl.u32 %v18602_v47, 16  ;;  %v18630_v25 = vld [vmem:[#allocation2 + $0x84] sm:$0xf] }
 0x396   : > { %v5856_v49 = vrot.slane %v5854_v38, 4  ;;  %v5862_v10 = vrot.slane %v5860_v19, 5  ;;  %v5868_v40 = vshll.u32 %v18602_v47, 16  ;;  %v5874_v37 = vshll.u32 %v18608_v27, 16  ;;  %v18632_v32 = vld [vmem:[#allocation2 + $0x88] sm:$0xf] }
 0x397   : > { %v5839_v28 = vsel %vm16548_vm4, %v5834_v22, %v5838_v16  ;;  %v5847_v24 = vor.u32 %v5846_v54, %v5843_v31  ;;  %v5878_v55 = vshrl.u32 %v18608_v27, 16  ;;  %v5867_v12 = vrot.slane %v5865_v1, 4  ;;  %v18641_v54 = vld [vmem:[#allocation2 + $0x90] sm:$0xf] }
 0x398   : > { %v13830_v9 = vcombine.low %v5829_v15, %v5839_v28  ;;  %v5857_v42 = vor.u32 %v5856_v49, %v5852_v35  ;;  %v5870_v53 = vrot.slane %v5868_v40, 5  ;;  %v5876_v57 = vrot.slane %v5874_v37, 5 }
 0x399   : > { %v5848_v63 = vrot.slane %v5847_v24, 4  ;;  %v5880_v39 = vrot.slane %v5878_v55, 4  ;;  %v5884_v21 = vshll.u32 %v18610_v4, 16  ;;  %v5889_v23 = vshrl.u32 %v18618_v34, 16 }
 0x39a   : > { %15072 = vmatmul.mubr.bf16.gmra.mrb[12].mxu1 %v13830_v9  ;;  %v5858_v20 = vrot.slane %v5857_v42, 4  ;;  %v5871_v18 = vor.u32 %v5870_v53, %v5867_v12  ;;  %v5892_v5 = vshll.u32 %v18618_v34, 16  ;;  %v5898_v56 = vshll.u32 %v18620_v36, 16  ;;  %v18649_v9 = vld [vmem:[#allocation2 + $0x94] sm:$0xf] }
 0x39b   : > { %v5853_v14 = vsel %vm16548_vm4, %v5848_v63, %v5852_v35  ;;  %v5881_v8 = vor.u32 %v5880_v39, %v5876_v57  ;;  %v5886_v51 = vrot.slane %v5884_v21, 5  ;;  %v5891_v29 = vrot.slane %v5889_v23, 4 }
 0x39c   : > { %v5863_v60 = vsel %vm16548_vm4, %v5858_v20, %v5862_v10  ;;  %v5872_v13 = vrot.slane %v5871_v18, 4  ;;  %v5894_v48 = vrot.slane %v5892_v5, 5  ;;  %v5900_v15 = vrot.slane %v5898_v56, 5  ;;  %v18645_v10 = vld [vmem:[#allocation2 + $0x8c] sm:$0x1] }
 0x39d   : > { %v13831_v2 = vcombine.low %v5853_v14, %v5863_v60  ;;  %v5882_v41 = vrot.slane %v5881_v8, 4  ;;  %v5902_v16 = vshrl.u32 %v18620_v36, 16  ;;  %v5908_v22 = vshll.u32 %v18623_v30, 16  ;;  %v18657_v14 = vld [vmem:[#allocation2 + $0x98] sm:$0x1] }
 0x39e   : > { %v5877_v38 = vsel %vm16548_vm4, %v5872_v13, %v5876_v57  ;;  %v5895_v19 = vor.u32 %v5894_v48, %v5891_v29  ;;  %v5913_v31 = vshrl.u32 %v18630_v25, 16  ;;  %v5916_v1 = vshll.u32 %v18630_v25, 16  ;;  %v18661_v29 = vld [vmem:[#allocation2 + $0x9c] sm:$0xf] }
 0x39f   : > { %15075 = vmatprep.mubr.bf16.mxu1 %v13831_v2  ;;  %v5887_v35 = vsel %vm16548_vm4, %v5882_v41, %v5886_v51  ;;  %v5904_v49 = vrot.slane %v5902_v16, 4  ;;  %v5922_v40 = vshll.u32 %v18632_v32, 16  ;;  %v5910_v37 = vrot.slane %v5908_v22, 5  ;;  %v18665_v16 = vld [vmem:[#allocation2 + $0xa0] sm:$0xf] }
 0x3a0   : > { %v13832_v28 = vcombine.low %v5877_v38, %v5887_v35  ;;  %v5896_v24 = vrot.slane %v5895_v19, 4  ;;  %v5915_v55 = vrot.slane %v5913_v31, 4  ;;  %v5918_v12 = vrot.slane %v5916_v1, 5  ;;  %v18668_v35 = vld [vmem:[#allocation2 + $0xa8] sm:$0xf] }
 0x3a1   : > { %v5905_v42 = vor.u32 %v5904_v49, %v5900_v15  ;;  %v5924_v53 = vrot.slane %v5922_v40, 5  ;;  %v5926_v63 = vshrl.u32 %v18632_v32, 16  ;;  %v5932_v39 = vshll.u32 %v18645_v10, 16 }
 0x3a2   : > { %15076 = vmatmul.mubr.bf16.gmra.mrb[16].mxu1 %v13832_v28  ;;  %v5901_v57 = vsel %vm16548_vm4, %v5896_v24, %v5900_v15  ;;  %v5937_v21 = vshrl.u32 %v18641_v54, 16  ;;  %v5940_v20 = vshll.u32 %v18641_v54, 16  ;;  %v5919_v23 = vor.u32 %v5918_v12, %v5915_v55 }
 0x3a3   : > { %v5906_v18 = vrot.slane %v5905_v42, 4  ;;  %v5928_v5 = vrot.slane %v5926_v63, 4  ;;  %v5946_v8 = vshll.u32 %v18649_v9, 16  ;;  %v5934_v51 = vrot.slane %v5932_v39, 5  ;;  %v18674_v42 = vld [vmem:[#allocation2 + $0xa4] sm:$0x1] }
 0x3a4   : > { %v5939_v56 = vrot.slane %v5937_v21, 4  ;;  %v5942_v60 = vrot.slane %v5940_v20, 5  ;;  %v5950_v13 = vshrl.u32 %v18649_v9, 16  ;;  %v5920_v2 = vrot.slane %v5919_v23, 4  ;;  %v18680_v21 = vld [vmem:[#allocation2 + $0xac] sm:$0xf] }
 0x3a5   : > { %v5911_v48 = vsel %vm16548_vm4, %v5906_v18, %v5910_v37  ;;  %v5929_v41 = vor.u32 %v5928_v5, %v5924_v53  ;;  %v5948_v15 = vrot.slane %v5946_v8, 5  ;;  %v5956_v31 = vshll.u32 %v18657_v14, 16  ;;  %v18684_v8 = vld [vmem:[#allocation2 + $0xb0] sm:$0x1] }
 0x3a6   : > { %v13833_v38 = vcombine.low %v5901_v57, %v5911_v48  ;;  %v5943_v19 = vor.u32 %v5942_v60, %v5939_v56  ;;  %v5952_v22 = vrot.slane %v5950_v13, 4  ;;  %v5925_v49 = vsel %vm16548_vm4, %v5920_v2, %v5924_v53  ;;  %v18686_v56 = vld [vmem:[#allocation2 + $0xb4] sm:$0xf] }
 0x3a7   : > { %v5930_v1 = vrot.slane %v5929_v41, 4  ;;  %v5961_v40 = vshrl.u32 %v18661_v29, 16  ;;  %v5964_v28 = vshll.u32 %v18661_v29, 16  ;;  %v5958_v55 = vrot.slane %v5956_v31, 5 }
 0x3a8   : > { %15079 = vmatprep.mubr.bf16.mxu1 %v13833_v38  ;;  %v5944_v24 = vrot.slane %v5943_v19, 4  ;;  %v5953_v37 = vor.u32 %v5952_v22, %v5948_v15  ;;  %v5970_v12 = vshll.u32 %v18665_v16, 16  ;;  %v5974_v53 = vshrl.u32 %v18665_v16, 16 }
 0x3a9   : > { %v5935_v63 = vsel %vm16548_vm4, %v5930_v1, %v5934_v51  ;;  %v5963_v57 = vrot.slane %v5961_v40, 4  ;;  %v5966_v39 = vrot.slane %v5964_v28, 5  ;;  %v5980_v51 = vshll.u32 %v18674_v42, 16  ;;  %v18695_v1 = vld [vmem:[#allocation2 + $0xb8] sm:$0xf] }
 0x3aa   : > { %v13834_v20 = vcombine.low %v5925_v49, %v5935_v63  ;;  %v5949_v18 = vsel %vm16548_vm4, %v5944_v24, %v5948_v15  ;;  %v5954_v23 = vrot.slane %v5953_v37, 4  ;;  %v5972_v5 = vrot.slane %v5970_v12, 5 }
 0x3ab   : > { %v5967_v60 = vor.u32 %v5966_v39, %v5963_v57  ;;  %v5976_v13 = vrot.slane %v5974_v53, 4  ;;  %v5985_v48 = vshrl.u32 %v18668_v35, 16  ;;  %v5988_v41 = vshll.u32 %v18668_v35, 16 }
 0x3ac   : > { %15080 = vmatmul.mubr.bf16.gmra.mrb[20].mxu1 %v13834_v20  ;;  %v5959_v2 = vsel %vm16548_vm4, %v5954_v23, %v5958_v55  ;;  %v5994_v15 = vshll.u32 %v18680_v21, 16  ;;  %v5998_v38 = vshrl.u32 %v18680_v21, 16  ;;  %v5982_v49 = vrot.slane %v5980_v51, 5  ;;  %v18701_v20 = vld [vmem:[#allocation2 + $0xbc] sm:$0x1] }
 0x3ad   : > { %v13835_v19 = vcombine.low %v5949_v18, %v5959_v2  ;;  %v5968_v22 = vrot.slane %v5967_v60, 4  ;;  %v5977_v31 = vor.u32 %v5976_v13, %v5972_v5  ;;  %v5987_v40 = vrot.slane %v5985_v48, 4 }
 0x3ae   : > { %v5990_v28 = vrot.slane %v5988_v41, 5  ;;  %v5996_v24 = vrot.slane %v5994_v15, 5  ;;  %v6000_v37 = vrot.slane %v5998_v38, 4  ;;  %v6004_v63 = vshll.u32 %v18684_v8, 16 }
 0x3af   : > { %15083 = vmatprep.mubr.bf16.mxu1 %v13835_v19  ;;  %v5973_v55 = vsel %vm16548_vm4, %v5968_v22, %v5972_v5  ;;  %v5978_v12 = vrot.slane %v5977_v31, 4  ;;  %v6009_v57 = vshrl.u32 %v18686_v56, 16  ;;  %v6012_v18 = vshll.u32 %v18686_v56, 16 }
 0x3b0   : > { %v5991_v39 = vor.u32 %v5990_v28, %v5987_v40  ;;  %v6001_v53 = vor.u32 %v6000_v37, %v5996_v24  ;;  %v6018_v23 = vshll.u32 %v18695_v1, 16  ;;  %v6006_v13 = vrot.slane %v6004_v63, 5  ;;  %v16244_v63 = vld [vmem:[#allocation2] sm:$0xf] }
 0x3b1   : > { %v5983_v60 = vsel %vm16548_vm4, %v5978_v12, %v5982_v49  ;;  %v6011_v51 = vrot.slane %v6009_v57, 4  ;;  %v6022_v5 = vshrl.u32 %v18695_v1, 16  ;;  %v6014_v15 = vrot.slane %v6012_v18, 5 }
 0x3b2   : > { %v13836_v48 = vcombine.low %v5973_v55, %v5983_v60  ;;  %v5992_v2 = vrot.slane %v5991_v39, 4  ;;  %v6002_v41 = vrot.slane %v6001_v53, 4  ;;  %v6020_v38 = vrot.slane %v6018_v23, 5  ;;  %v18713_v55 = vld [vmem:[#allocation2 + $0x4] sm:$0xf] }
 0x3b3   : > { %v6024_v19 = vrot.slane %v6022_v5, 4  ;;  %v6028_v22 = vshll.u32 %v18701_v20, 16  ;;  %v6015_v49 = vor.u32 %v6014_v15, %v6011_v51  ;;  %v13847_v57 = vcombine.low %v16244_v63, %v18713_v55  ;;  %v6634_v63 = vld [vmem:[#allocation2 + $0x60] sm:$0xe] }
 0x3b4   : > { %15084 = vmatmul.mubr.bf16.gmra.mrb[24].mxu1 %v13836_v48  ;;  %v5997_v31 = vsel %vm16548_vm4, %v5992_v2, %v5996_v24  ;;  %v6007_v40 = vsel %vm16548_vm4, %v6002_v41, %v6006_v13  ;;  %v13854_v18 = vcombine.low %v18561_v59, %v18573_v50  ;;  %v13855_v24 = vcombine.low %v18582_v52, %v18584_v17  ;;  %v6636_v48 = vld [vmem:[#allocation2 + $0x78] sm:$0xe] }
 0x3b5   : > { %v13837_v28 = vcombine.low %v5997_v31, %v6007_v40  ;;  %v6025_v37 = vor.u32 %v6024_v19, %v6020_v38  ;;  %v6016_v12 = vrot.slane %v6015_v49, 4  ;;  %v6030_v53 = vrot.slane %v6028_v22, 5  ;;  %v16246_v19 = vld [vmem:[#allocation2 + $0xc] sm:$0xf]  ;;  %v18738_v22 = vld [vmem:[#allocation2 + $0x10] sm:$0xf] }
 0x3b6   : > { %v13856_v60 = vcombine.low %v18602_v47, %v18608_v27  ;;  %v13848_v31 = vcombine.low %v16246_v19, %v18738_v22  ;;  %v16137_v40 = vld [vmem:[#allocation3 + $0x88] sm:$0xff]   ;;  %v16248_v49 = vld [vmem:[#allocation2 + $0x18] sm:$0xf]  ;;  %v18747_v19 = vld [vmem:[#allocation2 + $0x28] sm:$0xf]  ;;  %v13879_v41 = vrot.slane %v6634_v63, 9  ;;  %v21896_v59 = vcombine.low %v18630_v25, %v18632_v32 }
 0x3b7   : > { %15087 = vmatprep.mubr.bf16.mxu1 %v13837_v28  ;;  %v6026_v39 = vrot.slane %v6025_v37, 4  ;;  %v6021_v23 = vsel %vm16548_vm4, %v6016_v12, %v6020_v38  ;;  %v18741_v28 = vld [vmem:[#allocation2 + $0x1c] sm:$0xf]  ;;  %v6633_v12 = vld [vmem:[#allocation2 + $0x54] sm:$0xe]  ;;  %v6735_v2 = vrot.slane %v18592_v0, 5 }
 0x3b8   : > { %v13849_v37 = vcombine.low %v16248_v49, %v18741_v28  ;;  %v6676_v52 = vrot.slane %v18713_v55, 5 }
 0x3b9   : > { %v6031_v5 = vsel %vm16548_vm4, %v6026_v39, %v6030_v53  ;;  %v6725_v39 = vrot.slane %v18573_v50, 5  ;;  %v13878_v53 = vrot.slane %v6633_v12, 9  ;;  %v21897_v50 = vcombine.low %v18641_v54, %v18649_v9 }
 0x3ba   : > { %v13838_v15 = vcombine.low %v6021_v23, %v6031_v5  ;;  %v6732_v23 = vrot.slane %v18584_v17, 5  ;;  %v6635_v5 = vld [vmem:[#allocation2 + $0x6c] sm:$0xe]  ;;  %v6626_v17 = vld [vmem:[#allocation2] sm:$0xe]  ;;  %v6678_v47 = vrot.slane %v6676_v52, 4 }
 0x3bb   : > { %v6727_v49 = vrot.slane %v6725_v39, 4  ;;  %v13880_v63 = vrot.slane %v6635_v5, 9  ;;  %v13881_v5 = vrot.slane %v6636_v48, 9  ;;  %v6690_v54 = vrot.slane %v18741_v28, 5 }
 0x3bc   : > { %15088 = vmatmul.mubr.bf16.gmra.mrb[28].mxu1 %v13838_v15  ;;  %v16250_v15 = vld [vmem:[#allocation2 + $0x24] sm:$0xf]  ;;  %v6734_v12 = vrot.slane %v6732_v23, 4  ;;  %v6697_v28 = vrot.slane %v18747_v19, 5 }
 0x3bd   : > { %15107 = vmatprep.mubr.bf16.mxu1 %v13847_v57  ;;  %v16140_v57 = vld [vmem:[#allocation3 + $0x90] sm:$0xff]   ;;  %v13850_v38 = vcombine.low %v16250_v15, %v18747_v19  ;;  %v6746_v15 = vrot.slane %v18620_v36, 5 }
 0x3be   : > { %v18771_v0 = vsel %vm16862_vm7, %v6734_v12, %v6735_v2  ;;  %v6753_v12 = vrot.slane %v18632_v32, 5  ;;  %v6683_v32 = vrot.slane %v18738_v22, 5  ;;  %v16256_v19 = vld [vmem:[#allocation2 + $0x2c] sm:$0x1] }
 0x3bf   : > { %v6748_v13 = vrot.slane %v6746_v15, 4  ;;  %v18789_v48 = vsel %vm16862_vm7, %v13881_v5, %v6746_v15  ;;  %v13852_v15 = vcombine.low %v18511_v33, %v18525_v58  ;;  %v6763_v5 = vrot.slane %v18657_v14, 5 }
 0x3c0   : > { %v6767_v33 = vrot.slane %v18665_v16, 5  ;;  %v13853_v58 = vcombine.low %v18535_v3, %v18537_v44  ;;  %v6685_v55 = vrot.slane %v6683_v32, 4 }
 0x3c4   : > { %15108 = vmatmul.mubr.bf16.vlgmr.msra.gmra.mrb[0].mxu1 %v13848_v31  ;;  %v6728_v31 = vrot.slane %v18580_v46, 5  ;;  %v18764_v46 = vsel %vm16862_vm7, %v13879_v41, %v6732_v23  ;;  %v6640_v41 = vld [vmem:[#allocation2 + $0xa8] sm:$0xe] }
 0x3c5   : > { %15140 = vmatpush3.bf16.msra.mxu1 %v18528_v11  ;;  %15111 = vmatprep.mubr.bf16.mxu1 %v13849_v37  ;;  %v13851_v11 = vcombine.low %v18485_v62, %v18491_v7  ;;  %v18755_v37 = vsel %vm16862_vm7, %v13878_v53, %v6725_v39  ;;  %v6739_v62 = vrot.slane %v18608_v27, 5  ;;  %v6637_v7 = vld [vmem:[#allocation2 + $0x84] sm:$0xe]  ;;  %v16143_v39 = vld [vmem:[#allocation3 + $0x98] sm:$0xff]   ;;  %v21898_v27 = vcombine.low %v18661_v29, %v18665_v16  ;;  %v6627_v16 = vld [vmem:[#allocation2 + $0xc] sm:$0xe] }
 0x3c6   : > { %15141 = vmatprep.subr.bf16.mxu1 %v16137_v40  ;;  %v18760_v51 = vsel %vm16862_vm7, %v6727_v49, %v6728_v31  ;;  %v6749_v49 = vrot.slane %v18623_v30, 5  ;;  %v6638_v31 = vld [vmem:[#allocation2 + $0x90] sm:$0xe]  ;;  %v13882_v2 = vrot.slane %v6637_v7, 9  ;;  %v6756_v30 = vrot.slane %v18645_v10, 5 }
 0x3c7   : > { %v6741_v23 = vrot.slane %v6739_v62, 4  ;;  %v18780_v53 = vsel %vm16862_vm7, %v13880_v63, %v6739_v62  ;;  %v16146_v63 = vld [vmem:[#allocation3 + $0xa0] sm:$0xff]   ;;  %v13883_v7 = vrot.slane %v6638_v31, 9  ;;  %v21900_v29 = vcombine.low %v18686_v56, %v18695_v1  ;;  %v16255_v56 = vld [vmem:[#allocation2 + $0x34] sm:$0xf] }
 0x3c8   : > { %v18806_v62 = vsel %vm16862_vm7, %v13882_v2, %v6753_v12  ;;  %v6774_v2 = vrot.slane %v18680_v21, 5 }
 0x3c9   : > { %15142 = vmatpush3.bf16.msra.mxu1 %v16137_v40  ;;  %v6742_v40 = vrot.slane %v18610_v4, 5 }
 0x3ca   : > { %15143 = vmatprep.subr.bf16.mxu1 %v16140_v57  ;;  %v6776_v10 = vrot.slane %v6774_v2, 4 }
 0x3cb   : > { %v18785_v4 = vsel %vm16862_vm7, %v6741_v23, %v6742_v40  ;;  %v6639_v40 = vld [vmem:[#allocation2 + $0x9c] sm:$0xe] }
 0x3cc   : > { %15112 = vmatmul.mubr.bf16.gmra.mrb[4].mxu1 %v13850_v38  ;;  %v6760_v38 = vrot.slane %v18649_v9, 5  ;;  %v13884_v31 = vrot.slane %v6639_v40, 9  ;;  %v6781_v40 = vrot.slane %v18695_v1, 5  ;;  %v6704_v1 = vrot.slane %v16255_v56, 5 }
 0x3cd   : > { %15115 = vmatprep.mubr.bf16.mxu1 %v13851_v11  ;;  %15144 = vmatpush3.bf16.msra.mxu1 %v16140_v57  ;;  %v18797_v57 = vsel %vm16862_vm7, %v6748_v13, %v6749_v49  ;;  %v6755_v11 = vrot.slane %v6753_v12, 4  ;;  %v6641_v12 = vld [vmem:[#allocation2 + $0xb4] sm:$0xe] }
 0x3ce   : > { %15145 = vmatprep.subr.bf16.mxu1 %v16143_v39  ;;  %v6762_v23 = vrot.slane %v6760_v38, 4  ;;  %v18814_v49 = vsel %vm16862_vm7, %v13883_v7, %v6760_v38  ;;  %v6770_v7 = vrot.slane %v18674_v42, 5 }
 0x3cf   : > { %v18810_v13 = vsel %vm16862_vm7, %v6755_v11, %v6756_v30  ;;  %v16149_v30 = vld [vmem:[#allocation3 + $0xa8] sm:$0xff]   ;;  %v6769_v11 = vrot.slane %v6767_v33, 4 }
 0x3d0   : > { %v18821_v14 = vsel %vm16862_vm7, %v6762_v23, %v6763_v5  ;;  %v6777_v23 = vrot.slane %v18684_v8, 5  ;;  %v18833_v5 = vsel %vm16862_vm7, %v13884_v31, %v6767_v33  ;;  %v6784_v33 = vrot.slane %v18701_v20, 5  ;;  %v16152_v31 = vld [vmem:[#allocation3 + $0xb0] sm:$0xff]   ;;  %v16157_v20 = vld [vmem:[#allocation3 + $0xc0] sm:$0xff]  }
 0x3d1   : > { %15146 = vmatpush3.bf16.msra.mxu1 %v16143_v39  ;;  %v13885_v39 = vrot.slane %v6640_v41, 9  ;;  %v18837_v38 = vsel %vm16862_vm7, %v6769_v11, %v6770_v7  ;;  %v13886_v41 = vrot.slane %v6641_v12, 9  ;;  %v21895_v12 = vcombine.low %v18618_v34, %v18620_v36  ;;  %v6628_v7 = vld [vmem:[#allocation2 + $0x18] sm:$0xe] }
 0x3d2   : > { %15147 = vmatprep.subr.bf16.mxu1 %v16146_v63  ;;  %v18847_v8 = vsel %vm16862_vm7, %v6776_v10, %v6777_v23  ;;  %v21899_v34 = vcombine.low %v18668_v35, %v18680_v21  ;;  %v16253_v35 = vld [vmem:[#allocation2 + $0x14] sm:$0x1]  ;;  %v21918_v43 = vcombine.low %v18806_v62, %v18810_v13  ;;  %v8259_v62 = vld [vmem:[#allocation2 + $0xb4] sm:$0xe] }
 0x3d3   : > { %v18841_v42 = vsel %vm16862_vm7, %v13885_v39, %v6774_v2  ;;  %v18854_v2 = vsel %vm16862_vm7, %v13886_v41, %v6781_v40  ;;  %v6686_v21 = vrot.slane %v16253_v35, 5  ;;  %v16254_v39 = vld [vmem:[#allocation2 + $0x20] sm:$0x1]  ;;  %v13873_v41 = vrot.slane %v6628_v7, 9  ;;  %v6631_v7 = vld [vmem:[#allocation2 + $0x3c] sm:$0xe] }
 0x3d4   : > { %15116 = vmatmul.mubr.bf16.gmra.mrb[8].mxu1 %v13852_v15  ;;  %v6783_v15 = vrot.slane %v6781_v40, 4  ;;  %v6693_v23 = vrot.slane %v16254_v39, 5  ;;  %v13872_v40 = vrot.slane %v6627_v16, 9 }
 0x3d5   : > { %15119 = vmatprep.mubr.bf16.mxu1 %v13853_v58  ;;  %15148 = vmatpush3.bf16.msra.mxu1 %v16146_v63  ;;  %v16155_v58 = vld [vmem:[#allocation3 + $0xb8] sm:$0xff]   ;;  %v6687_v22 = vsel %vm16862_vm7, %v6685_v55, %v6686_v21 }
 0x3d6   : > { %15149 = vmatprep.subr.bf16.mxu1 %v16149_v30  ;;  %v18858_v63 = vsel %vm16862_vm7, %v6783_v15, %v6784_v33  ;;  %v6684_v33 = vsel %vm16862_vm7, %v13872_v40, %v6683_v32 }
 0x3d9   : > { %15150 = vmatpush3.bf16.msra.mxu1 %v16149_v30  ;;  %v13871_v30 = vrot.slane %v6626_v17, 9  ;;  %v6706_v17 = vrot.slane %v6704_v1, 4 }
 0x3da   : > { %15151 = vmatprep.subr.bf16.mxu1 %v16152_v31 }
 0x3db   : > { %v6677_v36 = vsel %vm16862_vm7, %v13871_v30, %v6676_v52  ;;  %v6629_v52 = vld [vmem:[#allocation2 + $0x24] sm:$0xe]  ;;  %v16257_v30 = vld [vmem:[#allocation2 + $0x38] sm:$0x1] }
 0x3dc   : > { %15120 = vmatmul.mubr.bf16.gmra.mrb[12].mxu1 %v13854_v18  ;;  %v16252_v18 = vld [vmem:[#allocation2 + $0x8] sm:$0x1] }
 0x3dd   : > { %15123 = vmatprep.mubr.bf16.mxu1 %v13855_v24  ;;  %15152 = vmatpush3.bf16.msra.mxu1 %v16152_v31  ;;  %v6679_v24 = vrot.slane %v16252_v18, 5  ;;  %v13888_v31 = vcombine.low %v6684_v33, %v6687_v22  ;;  %v6700_v18 = vrot.slane %v16256_v19, 5  ;;  %v6721_v22 = vrot.slane %v18539_v6, 5  ;;  %v16162_v6 = vld [vmem:[#allocation3 + $0xe8] sm:$0xff]   ;;  %v18927_v19 = vld [vmem:[#allocation2 + $0x34] sm:$0xf] }
 0x3de   : > { %15153 = vmatprep.subr.bf16.mxu1 %v16155_v58 }
 0x3df   : > { %v6680_v25 = vsel %vm16862_vm7, %v6678_v47, %v6679_v24  ;;  %v6630_v24 = vld [vmem:[#allocation2 + $0x30] sm:$0xe]  ;;  %v6707_v47 = vrot.slane %v16257_v30, 5  ;;  %v18931_v30 = vld [vmem:[#allocation2 + $0x40] sm:$0xf] }
 0x3e0   : > { %v13887_v9 = vcombine.low %v6677_v36, %v6680_v25  ;;  %v16258_v25 = vld [vmem:[#allocation2 + $0x40] sm:$0xf] }
 0x3e1   : > { %15154 = vmatpush3.bf16.msra.mxu1 %v16155_v58  ;;  %v6691_v58 = vsel %vm16862_vm7, %v13873_v41, %v6690_v54  ;;  %v6711_v32 = vrot.slane %v16258_v25, 5  ;;  %v13876_v41 = vrot.slane %v6631_v7, 9  ;;  %v8248_v25 = vld [vmem:[#allocation2 + $0x30] sm:$0xe] }
 0x3e2   : > { %15187 = vmatprep.subr.bf16.mxu1 %v16157_v20 }
 0x3e3   : > { %v6713_v21 = vrot.slane %v6711_v32, 4  ;;  %v6712_v33 = vsel %vm16862_vm7, %v13876_v41, %v6711_v32  ;;  %v21902_v32 = vcombine.low %v18764_v46, %v18771_v0 }
 0x3e4   : > { %15124 = vmatmul.mubr.bf16.gmra.mrb[16].mxu1 %v13856_v60  ;;  %v6692_v60 = vrot.slane %v6690_v54, 4  ;;  %v13875_v54 = vrot.slane %v6630_v24, 9  ;;  %v18929_v24 = vld [vmem:[#allocation2 + $0x38] sm:$0x1] }
 0x3e5   : > { %15127 = vmatprep.mubr.bf16.mxu1 %v21895_v12  ;;  %v16158_v12 = vld [vmem:[#allocation3 + $0xc8] sm:$0xff]   ;;  %v8335_v7 = vrot.slane %v18929_v24, 5 }
 0x3e6   : > { %v6694_v15 = vsel %vm16862_vm7, %v6692_v60, %v6693_v23  ;;  %v6705_v16 = vsel %vm16862_vm7, %v13875_v54, %v6704_v1  ;;  %v16160_v60 = vld [vmem:[#allocation3 + $0xd8] sm:$0xff]   ;;  %v16259_v23 = vld [vmem:[#allocation2 + $0x44] sm:$0x1] }
 0x3e7   : > { %v6714_v40 = vrot.slane %v16259_v23, 5 }
 0x3ec   : > { %15128 = vmatmul.mubr.bf16.gmra.mrb[20].mxu1 %v21896_v59  ;;  %v13889_v59 = vcombine.low %v6691_v58, %v6694_v15  ;;  %v6715_v15 = vsel %vm16862_vm7, %v6713_v21, %v6714_v40  ;;  %v13962_v21 = vrot.slane %v8248_v25, 9  ;;  %v21906_v25 = vcombine.low %v18780_v53, %v18785_v4  ;;  %v19007_v53 = vld [vmem:[#allocation2 + $0x7c] sm:$0xf]  ;;  %v7527_v4 = vld [vmem:[#allocation2 + $0x98] sm:$0x1] }
 0x3ed   : > { %15131 = vmatprep.mubr.bf16.mxu1 %v21897_v50  ;;  %v6699_v50 = vrot.slane %v6697_v28, 4  ;;  %v8391_v13 = vrot.slane %v7527_v4, 5 }
 0x3ef   : > { %v6701_v36 = vsel %vm16862_vm7, %v6699_v50, %v6700_v18  ;;  %v18923_v50 = vld [vmem:[#allocation2 + $0x28] sm:$0xf]  ;;  %v8247_v18 = vld [vmem:[#allocation2 + $0x24] sm:$0xe] }
 0x3f0   : > { %v13961_v54 = vrot.slane %v8247_v18, 9 }
 0x3f4   : > { %15132 = vmatmul.mubr.bf16.gmra.mrb[24].mxu1 %v21898_v27  ;;  %v16159_v27 = vld [vmem:[#allocation3 + $0xd0] sm:$0xff]  }
 0x3f5   : > { %15135 = vmatprep.mubr.bf16.mxu1 %v21899_v34  ;;  %v13874_v34 = vrot.slane %v6629_v52, 9  ;;  %v18925_v52 = vld [vmem:[#allocation2 + $0x2c] sm:$0x1] }
 0x3f7   : > { %v6698_v55 = vsel %vm16862_vm7, %v13874_v34, %v6697_v28  ;;  %v16161_v28 = vld [vmem:[#allocation3 + $0xe0] sm:$0xff]   ;;  %v18937_v34 = vld [vmem:[#allocation2 + $0x44] sm:$0x1] }
 0x3fc   : > { %15136 = vmatmul.mubr.bf16.gmra.mrb[28].mxu1 %v21900_v29  ;;  %v13890_v29 = vcombine.low %v6698_v55, %v6701_v36  ;;  %v18939_v36 = vld [vmem:[#allocation2 + $0x4c] sm:$0xf]  ;;  %v8249_v55 = vld [vmem:[#allocation2 + $0x3c] sm:$0xe] }
 0x3fd   : > { %15155 = vmatprep.mubr.bf16.mxu1 %v13887_v9  ;;  %v6708_v9 = vsel %vm16862_vm7, %v6706_v17, %v6707_v47  ;;  %v16164_v17 = vld [vmem:[#allocation3 + $0xf8] sm:$0xff]   ;;  %v8325_v47 = vrot.slane %v18923_v50, 5  ;;  %v13963_v40 = vrot.slane %v8249_v55, 9 }
 0x3fe   : > { %v13891_v35 = vcombine.low %v6705_v16, %v6708_v9  ;;  %v8250_v16 = vld [vmem:[#allocation2 + $0x48] sm:$0xe] }
 0x3ff   : > { %v8327_v9 = vrot.slane %v8325_v47, 4  ;;  %v18956_v46 = vsel %vm16862_vm7, %v13961_v54, %v8325_v47 }
 0x404   : > { %15156 = vmatmul.mubr.bf16.vlgmr.msra.gmra.mrb[0].mxu1 %v13888_v31  ;;  %v13892_v31 = vcombine.low %v6712_v33, %v6715_v15  ;;  %v8342_v15 = vrot.slane %v18937_v34, 5 }
 0x405   : > { %15188 = vmatpush3.bf16.msra.mxu1 %v16157_v20  ;;  %15159 = vmatprep.mubr.bf16.mxu1 %v13889_v59  ;;  %v6718_v20 = vrot.slane %v18537_v44, 5  ;;  %v6632_v44 = vld [vmem:[#allocation2 + $0x48] sm:$0xe] }
 0x406   : > { %15189 = vmatprep.subr.bf16.mxu1 %v16158_v12  ;;  %v13877_v56 = vrot.slane %v6632_v44, 9  ;;  %v16163_v59 = vld [vmem:[#allocation3 + $0xf0] sm:$0xff]   ;;  %v8339_v44 = vrot.slane %v18931_v30, 5 }
 0x407   : > { %v6720_v39 = vrot.slane %v6718_v20, 4 }
 0x408   : > { %v6719_v58 = vsel %vm16862_vm7, %v13877_v56, %v6718_v20  ;;  %v8328_v20 = vrot.slane %v18925_v52, 5  ;;  %v13964_v56 = vrot.slane %v8250_v16, 9  ;;  %v21909_v16 = vcombine.low %v18789_v48, %v18797_v57 }
 0x409   : > { %15190 = vmatpush3.bf16.msra.mxu1 %v16158_v12  ;;  %v6722_v1 = vsel %vm16862_vm7, %v6720_v39, %v6721_v22  ;;  %v8251_v22 = vld [vmem:[#allocation2 + $0x54] sm:$0xe]  ;;  %v19053_v39 = vld [vmem:[#allocation2 + $0xa0] sm:$0xf] }
 0x40a   : > { %15191 = vmatprep.subr.bf16.mxu1 %v16159_v27  ;;  %v13893_v12 = vcombine.low %v6719_v58, %v6722_v1  ;;  %v18960_v0 = vsel %vm16862_vm7, %v8327_v9, %v8328_v20  ;;  %v8346_v1 = vrot.slane %v18939_v36, 5  ;;  %v8341_v58 = vrot.slane %v8339_v44, 4 }
 0x40b   : > { %v13965_v47 = vrot.slane %v8251_v22, 9  ;;  %v19017_v22 = vld [vmem:[#allocation2 + $0x80] sm:$0x1] }
 0x40c   : > { %15160 = vmatmul.mubr.bf16.gmra.mrb[4].mxu1 %v13890_v29  ;;  %v18945_v29 = vld [vmem:[#allocation3 + $0x100] sm:$0xff]   ;;  %v8348_v18 = vrot.slane %v8346_v1, 4  ;;  %v18996_v54 = vsel %vm16862_vm7, %v8341_v58, %v8342_v15  ;;  %v19000_v9 = vsel %vm16862_vm7, %v13964_v56, %v8346_v1  ;;  %v19026_v1 = vld [vmem:[#allocation2 + $0x88] sm:$0xf]  ;;  %v7524_v58 = vld [vmem:[#allocation2 + $0x8c] sm:$0x1] }
 0x40d   : > { %15163 = vmatprep.mubr.bf16.mxu1 %v13891_v35  ;;  %15192 = vmatpush3.bf16.msra.mxu1 %v16159_v27  ;;  %v21901_v27 = vcombine.low %v18755_v37, %v18760_v51  ;;  %v18947_v51 = vld [vmem:[#allocation2 + $0x50] sm:$0x1]  ;;  %v8332_v37 = vrot.slane %v18927_v19, 5  ;;  %v18952_v35 = vld [vmem:[#allocation2 + $0x5c] sm:$0x1]  ;;  %21907 = vst [vmem:[#allocation13_spill] sm:$0xff] %v18996_v54 }
 0x40e   : > { %15193 = vmatprep.subr.bf16.mxu1 %v16160_v60  ;;  %21908 = vst [vmem:[#allocation14_spill] sm:$0xff] %v19000_v9  ;;  %v8356_v20 = vrot.slane %v18952_v35, 5  ;;  %v8381_v10 = vrot.slane %v19026_v1, 5  ;;  %v8384_v11 = vrot.slane %v7524_v58, 5  ;;  %v21920_v58 = vcombine.low %v18814_v49, %v18821_v14 }
 0x40f   : > { %v8334_v23 = vrot.slane %v8332_v37, 4  ;;  %v18970_v41 = vsel %vm16862_vm7, %v13962_v21, %v8332_v37  ;;  %v8253_v37 = vld [vmem:[#allocation2 + $0x6c] sm:$0xe]  ;;  %v8395_v14 = vrot.slane %v19053_v39, 5 }
 0x410   : > { %21903 = vst [vmem:[#allocation10_spill] sm:$0xff] %v18970_v41  ;;  %v9886_v41 = vld [vmem:[#allocation2 + $0x54] sm:$0xe] }
 0x411   : > { %15194 = vmatpush3.bf16.msra.mxu1 %v16160_v60  ;;  %v18950_v60 = vld [vmem:[#allocation2 + $0x58] sm:$0xf]  ;;  %v18977_v33 = vsel %vm16862_vm7, %v8334_v23, %v8335_v7 }
 0x412   : > { %15195 = vmatprep.subr.bf16.mxu1 %v16161_v28  ;;  %21904 = vst [vmem:[#allocation11_spill] sm:$0xff] %v18977_v33 }
 0x414   : > { %15164 = vmatmul.mubr.bf16.gmra.mrb[8].mxu1 %v13892_v31  ;;  %v18981_v31 = vsel %vm16862_vm7, %v13963_v40, %v8339_v44  ;;  %v8254_v40 = vld [vmem:[#allocation2 + $0x78] sm:$0xe]  ;;  %v19015_v44 = vld [vmem:[#allocation2 + $0x74] sm:$0x1] }
 0x415   : > { %15167 = vmatprep.mubr.bf16.mxu1 %v13893_v12  ;;  %15196 = vmatpush3.bf16.msra.mxu1 %v16161_v28  ;;  %v18966_v28 = vld [vmem:[#allocation2 + $0x64] sm:$0xf]  ;;  %21905 = vst [vmem:[#allocation12_spill] sm:$0xff] %v18981_v31  ;;  %v8252_v12 = vld [vmem:[#allocation2 + $0x60] sm:$0xe]  ;;  %v13968_v48 = vrot.slane %v8254_v40, 9 }
 0x416   : > { %15197 = vmatprep.subr.bf16.mxu1 %v16162_v6  ;;  %v8360_v55 = vrot.slane %v18966_v28, 5  ;;  %v13966_v23 = vrot.slane %v8252_v12, 9  ;;  %v19332_v31 = vld [vmem:[#allocation2 + $0x58] sm:$0xf] }
 0x417   : > { %21947 = vst [vmem:[#allocation48_spill] sm:$0xff] %v19332_v31 }
 0x418   : > { %v8362_v15 = vrot.slane %v8360_v55, 4  ;;  %v19034_v12 = vsel %vm16862_vm7, %v13966_v23, %v8360_v55  ;;  %v7530_v55 = vld [vmem:[#allocation2 + $0xa4] sm:$0x1] }
 0x419   : > { %15198 = vmatpush3.bf16.msra.mxu1 %v16162_v6  ;;  %v8349_v6 = vrot.slane %v18947_v51, 5  ;;  %21913 = vst [vmem:[#allocation19_spill] sm:$0xff] %v19034_v12  ;;  %v8383_v12 = vrot.slane %v8381_v10, 4 }
 0x41a   : > { %15199 = vmatprep.subr.bf16.mxu1 %v16163_v59 }
 0x41b   : > { %v19013_v21 = vsel %vm16862_vm7, %v8348_v18, %v8349_v6  ;;  %v13967_v18 = vrot.slane %v8253_v37, 9 }
 0x41c   : > { %15168 = vmatmul.mubr.bf16.gmra.mrb[12].mxu1 %v21901_v27  ;;  %v8353_v27 = vrot.slane %v18950_v60, 5  ;;  %21910 = vst [vmem:[#allocation15_spill] sm:$0xff] %v19013_v21  ;;  %v7516_v21 = vld [vmem:[#allocation2 + $0x6c] sm:$0xf] }
 0x41d   : > { %15171 = vmatprep.mubr.bf16.mxu1 %v21902_v32  ;;  %15200 = vmatpush3.bf16.msra.mxu1 %v16163_v59  ;;  %v18984_v59 = vld [vmem:[#allocation2 + $0x68] sm:$0x1]  ;;  %v18992_v32 = vld [vmem:[#allocation2 + $0x70] sm:$0xf] }
 0x41e   : > { %15201 = vmatprep.subr.bf16.mxu1 %v16164_v17  ;;  %v8355_v7 = vrot.slane %v8353_v27, 4  ;;  %v19023_v57 = vsel %vm16862_vm7, %v13965_v47, %v8353_v27  ;;  %v8363_v56 = vrot.slane %v18984_v59, 5  ;;  %v8256_v47 = vld [vmem:[#allocation2 + $0x90] sm:$0xe] }
 0x41f   : > { %21911 = vst [vmem:[#allocation17_spill] sm:$0xff] %v19023_v57  ;;  %v19080_v57 = vld [vmem:[#allocation2 + $0xb8] sm:$0xf] }
 0x420   : > { %v19030_v6 = vsel %vm16862_vm7, %v8355_v7, %v8356_v20  ;;  %v19043_v27 = vsel %vm16862_vm7, %v8362_v15, %v8363_v56  ;;  %v8374_v20 = vrot.slane %v19007_v53, 5  ;;  %v8255_v7 = vld [vmem:[#allocation2 + $0x84] sm:$0xe]  ;;  %v8377_v56 = vrot.slane %v19017_v22, 5 }
 0x421   : > { %15202 = vmatpush3.bf16.msra.mxu1 %v16164_v17  ;;  %21912 = vst [vmem:[#allocation18_spill] sm:$0xff] %v19030_v6  ;;  %21914 = vst [vmem:[#allocation20_spill] sm:$0xff] %v19043_v27  ;;  %v8370_v17 = vrot.slane %v19015_v44, 5  ;;  %v13970_v6 = vrot.slane %v8256_v47, 9  ;;  %v19088_v47 = vsel %vm16862_vm7, %v8383_v12, %v8384_v11  ;;  %v8397_v12 = vrot.slane %v8395_v14, 4 }
 0x422   : > { %15235 = vmatprep.subr.bf16.mxu1 %v18945_v29  ;;  %v19057_v40 = vsel %vm16862_vm7, %v13968_v48, %v8374_v20  ;;  %v8376_v15 = vrot.slane %v8374_v20, 4  ;;  %v7532_v48 = vld [vmem:[#allocation2 + $0xac] sm:$0xf]  ;;  %v7536_v20 = vld [vmem:[#allocation2 + $0xbc] sm:$0x1]  ;;  %21922 = vst [vmem:[#allocation26_spill] sm:$0xff] %v19088_v47  ;;  %v21929_v11 = vcombine.low %v18833_v5, %v18837_v38 }
 0x423   : > { %21916 = vst [vmem:[#allocation22_spill] sm:$0xff] %v19057_v40  ;;  %v8409_v47 = vrot.slane %v19080_v57, 5 }
 0x424   : > { %15172 = vmatmul.mubr.bf16.gmra.mrb[16].mxu1 %v21906_v25  ;;  %v8367_v25 = vrot.slane %v18992_v32, 5  ;;  %v19073_v27 = vsel %vm16862_vm7, %v8376_v15, %v8377_v56  ;;  %v7538_v56 = vld [vmem:[#allocation2 + $0xc4] sm:$0xf] }
 0x425   : > { %15175 = vmatprep.mubr.bf16.mxu1 %v21909_v16  ;;  %v19037_v16 = vld [vmem:[#allocation2 + $0x94] sm:$0xf]  ;;  %21919 = vst [vmem:[#allocation24_spill] sm:$0xff] %v19073_v27  ;;  %v7539_v27 = vld [vmem:[#allocation2 + $0xc8] sm:$0x1] }
 0x426   : > { %v19050_v37 = vsel %vm16862_vm7, %v13967_v18, %v8367_v25  ;;  %v8369_v23 = vrot.slane %v8367_v25, 4  ;;  %v13969_v25 = vrot.slane %v8255_v7, 9  ;;  %v8388_v3 = vrot.slane %v19037_v16, 5  ;;  %v7533_v7 = vld [vmem:[#allocation2 + $0xb0] sm:$0x1] }
 0x427   : > { %21915 = vst [vmem:[#allocation21_spill] sm:$0xff] %v19050_v37  ;;  %v8405_v4 = vrot.slane %v7533_v7, 5  ;;  %v8411_v7 = vrot.slane %v8409_v47, 4 }
 0x428   : > { %v19063_v18 = vsel %vm16862_vm7, %v8369_v23, %v8370_v17  ;;  %v8257_v17 = vld [vmem:[#allocation2 + $0x9c] sm:$0xe]  ;;  %v8258_v23 = vld [vmem:[#allocation2 + $0xa8] sm:$0xe]  ;;  %v19084_v15 = vsel %vm16862_vm7, %v13969_v25, %v8381_v10  ;;  %v19092_v49 = vsel %vm16862_vm7, %v13970_v6, %v8388_v3  ;;  %v8402_v25 = vrot.slane %v7532_v48, 5 }
 0x429   : > { %21917 = vst [vmem:[#allocation23_spill] sm:$0xff] %v19063_v18  ;;  %21921 = vst [vmem:[#allocation25_spill] sm:$0xff] %v19084_v15  ;;  %v13971_v10 = vrot.slane %v8257_v17, 9  ;;  %v13972_v6 = vrot.slane %v8258_v23, 9  ;;  %v16179_v15 = vld [vmem:[#allocation2 + $0x78] sm:$0xff]  }
 0x42a   : > { %21923 = vst [vmem:[#allocation27_spill] sm:$0xff] %v19092_v49  ;;  %v8404_v18 = vrot.slane %v8402_v25, 4 }
 0x42b   : > { %v19105_v40 = vsel %vm16862_vm7, %v13971_v10, %v8395_v14  ;;  %v19114_v17 = vsel %vm16862_vm7, %v13972_v6, %v8402_v25  ;;  %v8412_v10 = vrot.slane %v7536_v20, 5  ;;  %v16168_v6 = vld [vmem:[#allocation2 + $0x24] sm:$0xff]  }
 0x42c   : > { %15176 = vmatmul.mubr.bf16.gmra.mrb[20].mxu1 %v21918_v43  ;;  %v8390_v43 = vrot.slane %v8388_v3, 4  ;;  %v8398_v3 = vrot.slane %v7530_v55, 5  ;;  %21925 = vst [vmem:[#allocation29_spill] sm:$0xff] %v19105_v40  ;;  %21927 = vst [vmem:[#allocation31_spill] sm:$0xff] %v19114_v17  ;;  %v8416_v55 = vrot.slane %v7538_v56, 5  ;;  %v19120_v14 = vsel %vm16862_vm7, %v8404_v18, %v8405_v4  ;;  %v16167_v4 = vld [vmem:[#allocation2 + $0x18] sm:$0xff]  }
 0x42d   : > { %15179 = vmatprep.mubr.bf16.mxu1 %v21920_v58  ;;  %21928 = vst [vmem:[#allocation32_spill] sm:$0xff] %v19120_v14  ;;  %v21930_v56 = vcombine.low %v18841_v42, %v18847_v8  ;;  %v19136_v20 = vsel %vm16862_vm7, %v8411_v7, %v8412_v10  ;;  %v16165_v8 = vld [vmem:[#allocation2 + $0xc] sm:$0xff]  }
 0x42e   : > { %v19099_v58 = vsel %vm16862_vm7, %v8390_v43, %v8391_v13  ;;  %v8260_v43 = vld [vmem:[#allocation2 + $0xc0] sm:$0xe]  ;;  %v19110_v48 = vsel %vm16862_vm7, %v8397_v12, %v8398_v3  ;;  %v13973_v13 = vrot.slane %v8259_v62, 9  ;;  %v8418_v3 = vrot.slane %v8416_v55, 4  ;;  %21932 = vst [vmem:[#allocation34_spill] sm:$0xff] %v19136_v20 }
 0x42f   : > { %21924 = vst [vmem:[#allocation28_spill] sm:$0xff] %v19099_v58  ;;  %21926 = vst [vmem:[#allocation30_spill] sm:$0xff] %v19110_v48  ;;  %v13974_v25 = vrot.slane %v8260_v43, 9  ;;  %v8419_v62 = vrot.slane %v7539_v27, 5  ;;  %v16172_v43 = vld [vmem:[#allocation3 + $0x110] sm:$0xff]   ;;  %v7602_v48 = vshrl.u32 %v18923_v50, 16 }
 0x430   : > { %v19132_v18 = vsel %vm16862_vm7, %v13973_v13, %v8409_v47  ;;  %v21935_v47 = vcombine.low %v18854_v2, %v18858_v63  ;;  %v7492_v13 = vld [vmem:[#allocation2 + $0xc] sm:$0xf]  ;;  %v16170_v2 = vld [vmem:[#allocation2 + $0x30] sm:$0xff]  }
 0x431   : > { %21931 = vst [vmem:[#allocation33_spill] sm:$0xff] %v19132_v18  ;;  %v19142_v5 = vsel %vm16862_vm7, %v13974_v25, %v8416_v55  ;;  %v19146_v27 = vsel %vm16862_vm7, %v8418_v3, %v8419_v62  ;;  %v7493_v55 = vld [vmem:[#allocation2 + $0x10] sm:$0xf]  ;;  %v7541_v7 = vshrl.u32 %v7492_v13, 16  ;;  %v7544_v10 = vshll.u32 %v7492_v13, 16  ;;  %v16173_v18 = vld [vmem:[#allocation2 + $0x48] sm:$0xff]  }
 0x432   : > { %21933 = vst [vmem:[#allocation35_spill] sm:$0xff] %v19142_v5  ;;  %21934 = vst [vmem:[#allocation36_spill] sm:$0xff] %v19146_v27  ;;  %v7550_v25 = vshll.u32 %v7493_v55, 16  ;;  %v7554_v3 = vshrl.u32 %v7493_v55, 16  ;;  %v7495_v62 = vld [vmem:[#allocation2 + $0x18] sm:$0xf] }
 0x433   : > { %v16175_v63 = vld [vmem:[#allocation3 + $0x118] sm:$0xff]   ;;  %v7498_v5 = vld [vmem:[#allocation2 + $0x24] sm:$0xf] }
 0x434   : > { %15180 = vmatmul.mubr.bf16.gmra.mrb[24].mxu1 %v21929_v11  ;;  %v16169_v11 = vld [vmem:[#allocation3 + $0x108] sm:$0xff]   ;;  %v7552_v42 = vrot.slane %v7550_v25, 5  ;;  %v7556_v38 = vrot.slane %v7554_v3, 4  ;;  %v19154_v55 = vld [vmem:[#allocation2 + $0x14] sm:$0x1] }
 0x435   : > { %15183 = vmatprep.mubr.bf16.mxu1 %v21930_v56  ;;  %v16171_v56 = vld [vmem:[#allocation2 + $0x3c] sm:$0xff]   ;;  %v7560_v25 = vshll.u32 %v19154_v55, 16 }
 0x436   : > { %v19159_v3 = vld [vmem:[#allocation2 + $0x20] sm:$0x1] }
 0x43c   : > { %15184 = vmatmul.mubr.bf16.gmra.mrb[28].mxu1 %v21935_v47  ;;  %v7565_v47 = vshrl.u32 %v7495_v62, 16 }
 0x43d   : > { %15203 = vmatprep.mubr.bf16.mxu1 %v16165_v8  ;;  %v7496_v8 = vld [vmem:[#allocation2 + $0x1c] sm:$0xf] }
 0x43e   : > { %v7574_v13 = vshll.u32 %v7496_v8, 16  ;;  %v7578_v12 = vshrl.u32 %v7496_v8, 16  ;;  %v7567_v23 = vrot.slane %v7565_v47, 4  ;;  %v7592_v8 = vshll.u32 %v7498_v5, 16 }
 0x440   : > { %v7594_v17 = vrot.slane %v7592_v8, 5 }
 0x444   : > { %15204 = vmatmul.mubr.bf16.vlgmr.msra.gmra.mrb[0].mxu1 %v16167_v4  ;;  %v7568_v4 = vshll.u32 %v7495_v62, 16  ;;  %v16181_v62 = vld [vmem:[#allocation3 + $0x128] sm:$0xff]  }
 0x445   : > { %15236 = vmatpush3.bf16.msra.mxu1 %v18945_v29  ;;  %15207 = vmatprep.mubr.bf16.mxu1 %v16168_v6  ;;  %v7543_v29 = vrot.slane %v7541_v7, 4  ;;  %v7546_v6 = vrot.slane %v7544_v10, 5  ;;  %v7580_v7 = vrot.slane %v7578_v12, 4  ;;  %v16174_v10 = vld [vmem:[#allocation2 + $0x54] sm:$0xff]   ;;  %v7598_v12 = vshll.u32 %v18923_v50, 16  ;;  %v16177_v50 = vld [vmem:[#allocation2 + $0x6c] sm:$0xff]  }
 0x446   : > { %15237 = vmatprep.subr.bf16.mxu1 %v16169_v11  ;;  %v7570_v27 = vrot.slane %v7568_v4, 5 }
 0x447   : > { %v7547_v20 = vor.u32 %v7546_v6, %v7543_v29  ;;  %v7584_v6 = vshll.u32 %v19159_v3, 16 }
 0x448   : > { %v7571_v47 = vor.u32 %v7570_v27, %v7567_v23  ;;  %v7504_v27 = vld [vmem:[#allocation2 + $0x3c] sm:$0xf] }
 0x449   : > { %15238 = vmatpush3.bf16.msra.mxu1 %v16169_v11  ;;  %v16178_v11 = vld [vmem:[#allocation3 + $0x120] sm:$0xff]  }
 0x44a   : > { %15239 = vmatprep.subr.bf16.mxu1 %v16172_v43 }
 0x44c   : > { %15208 = vmatmul.mubr.bf16.gmra.mrb[4].mxu1 %v16170_v2  ;;  %v7557_v2 = vor.u32 %v7556_v38, %v7552_v42  ;;  %v16184_v38 = vld [vmem:[#allocation3 + $0x130] sm:$0xff]  }
 0x44d   : > { %15211 = vmatprep.mubr.bf16.mxu1 %v16171_v56  ;;  %15240 = vmatpush3.bf16.msra.mxu1 %v16172_v43  ;;  %v19156_v43 = vrot.slane %v7574_v13, 5  ;;  %v7589_v56 = vshrl.u32 %v7498_v5, 16  ;;  %v7562_v13 = vrot.slane %v7560_v25, 5  ;;  %v7572_v5 = vrot.slane %v7571_v47, 4 }
 0x44e   : > { %15241 = vmatprep.subr.bf16.mxu1 %v16175_v63  ;;  %v7558_v4 = vrot.slane %v7557_v2, 4  ;;  %v16187_v2 = vld [vmem:[#allocation3 + $0x138] sm:$0xff]   ;;  %v19169_v25 = vrot.slane %v7598_v12, 5  ;;  %v7604_v47 = vrot.slane %v7602_v48, 4  ;;  %v7650_v48 = vshrl.u32 %v18931_v30, 16  ;;  %v19181_v12 = vld [vmem:[#allocation3 + $0x140] sm:$0xff]  }
 0x44f   : > { %v7581_v29 = vor.u32 %v7580_v7, %v19156_v43  ;;  %v7591_v14 = vrot.slane %v7589_v56, 4  ;;  %v7608_v56 = vshll.u32 %v18925_v52, 16  ;;  %v7640_v52 = vshll.u32 %v7504_v27, 16 }
 0x450   : > { %v7652_v49 = vrot.slane %v7650_v48, 4 }
 0x451   : > { %15242 = vmatpush3.bf16.msra.mxu1 %v16175_v63  ;;  %v7548_v63 = vrot.slane %v7547_v20, 4  ;;  %v7563_v20 = vsel %vm16548_vm4, %v7558_v4, %v7562_v13  ;;  %v7582_v7 = vrot.slane %v7581_v29, 4  ;;  %v7595_v8 = vor.u32 %v7594_v17, %v7591_v14  ;;  %v7507_v14 = vld [vmem:[#allocation2 + $0x48] sm:$0xf] }
 0x452   : > { %15243 = vmatprep.subr.bf16.mxu1 %v16178_v11  ;;  %v7622_v4 = vshll.u32 %v18927_v19, 16  ;;  %v7626_v29 = vshrl.u32 %v18927_v19, 16  ;;  %v7646_v17 = vshll.u32 %v18931_v30, 16  ;;  %v7674_v19 = vshrl.u32 %v18939_v36, 16  ;;  %v7510_v30 = vld [vmem:[#allocation2 + $0x54] sm:$0xf] }
 0x453   : > { %v7553_v23 = vsel %vm16548_vm4, %v7548_v63, %v7552_v42  ;;  %v7577_v63 = vsel %vm16548_vm4, %v7572_v5, %v19156_v43  ;;  %v19185_v43 = vrot.slane %v7608_v56, 5  ;;  %v7670_v5 = vshll.u32 %v18939_v36, 16 }
 0x454   : > { %15212 = vmatmul.mubr.bf16.gmra.mrb[8].mxu1 %v16173_v18  ;;  %v7501_v18 = vld [vmem:[#allocation2 + $0x30] sm:$0xf]  ;;  %v19172_v42 = vcombine.low %v7553_v23, %v7563_v20  ;;  %v7664_v58 = vshll.u32 %v7507_v14, 16  ;;  %v19194_v56 = vrot.slane %v7646_v17, 5  ;;  %v7632_v17 = vshll.u32 %v18929_v24, 16 }
 0x455   : > { %15215 = vmatprep.mubr.bf16.mxu1 %v16174_v10  ;;  %15244 = vmatpush3.bf16.msra.mxu1 %v16178_v11  ;;  %v16176_v11 = vld [vmem:[#allocation2 + $0x60] sm:$0xff]   ;;  %v7586_v10 = vrot.slane %v7584_v6, 5  ;;  %v7616_v40 = vshll.u32 %v7501_v18, 16  ;;  %v7637_v6 = vshrl.u32 %v7504_v27, 16  ;;  %v19192_v27 = vrot.slane %v7622_v4, 5 }
 0x456   : > { %15245 = vmatprep.subr.bf16.mxu1 %v16181_v62  ;;  %v19197_v36 = vrot.slane %v7670_v5, 5  ;;  %v7513_v5 = vld [vmem:[#allocation2 + $0x60] sm:$0xf] }
 0x457   : > { %v7587_v13 = vsel %vm16548_vm4, %v7582_v7, %v7586_v10  ;;  %v7618_v20 = vrot.slane %v7616_v40, 5  ;;  %v7639_v7 = vrot.slane %v7637_v6, 4  ;;  %v7642_v10 = vrot.slane %v7640_v52, 5 }
 0x458   : > { %v7688_v40 = vshll.u32 %v7510_v30, 16  ;;  %v19199_v4 = vcombine.low %v7577_v63, %v7587_v13  ;;  %v7698_v6 = vshrl.u32 %v18950_v60, 16  ;;  %v7653_v13 = vor.u32 %v7652_v49, %v19194_v56 }
 0x459   : > { %15246 = vmatpush3.bf16.msra.mxu1 %v16181_v62  ;;  %v7613_v62 = vshrl.u32 %v7501_v18, 16  ;;  %v7605_v18 = vor.u32 %v7604_v47, %v19169_v25  ;;  %v7685_v47 = vshrl.u32 %v7510_v30, 16  ;;  %v7656_v30 = vshll.u32 %v18937_v34, 16 }
 0x45a   : > { %15247 = vmatprep.subr.bf16.mxu1 %v16184_v38  ;;  %v7709_v24 = vshrl.u32 %v7513_v5, 16 }
 0x45b   : > { %v7615_v23 = vrot.slane %v7613_v62, 4  ;;  %v16180_v62 = vld [vmem:[#allocation2 + $0x84] sm:$0xff]   ;;  %v7606_v52 = vrot.slane %v7605_v18, 4  ;;  %v7687_v37 = vrot.slane %v7685_v47, 4  ;;  %v7700_v18 = vrot.slane %v7698_v6, 4  ;;  %v16183_v6 = vld [vmem:[#allocation2 + $0x9c] sm:$0xff]  }
 0x45c   : > { %15216 = vmatmul.mubr.bf16.gmra.mrb[12].mxu1 %v16176_v11  ;;  %v7628_v11 = vrot.slane %v7626_v29, 4  ;;  %v7694_v29 = vshll.u32 %v18950_v60, 16  ;;  %v7690_v60 = vrot.slane %v7688_v40, 5  ;;  %v7658_v47 = vrot.slane %v7656_v30, 5 }
 0x45d   : > { %15219 = vmatprep.mubr.bf16.mxu1 %v16177_v50  ;;  %15248 = vmatpush3.bf16.msra.mxu1 %v16184_v38  ;;  %v19189_v38 = vrot.slane %v7595_v8, 4  ;;  %v7661_v50 = vshrl.u32 %v7507_v14, 16  ;;  %v7676_v8 = vrot.slane %v7674_v19, 4  ;;  %v7666_v14 = vrot.slane %v7664_v58, 5 }
 0x45e   : > { %15249 = vmatprep.subr.bf16.mxu1 %v16187_v2  ;;  %v7619_v19 = vor.u32 %v7618_v20, %v7615_v23  ;;  %v7629_v63 = vor.u32 %v7628_v11, %v19192_v27  ;;  %v7718_v23 = vshll.u32 %v18966_v28, 16  ;;  %v7722_v20 = vshrl.u32 %v18966_v28, 16 }
 0x45f   : > { %v7663_v48 = vrot.slane %v7661_v50, 4  ;;  %v7712_v50 = vshll.u32 %v7513_v5, 16  ;;  %v7611_v34 = vsel %vm16548_vm4, %v7606_v52, %v19185_v43  ;;  %v7634_v11 = vrot.slane %v7632_v17, 5 }
 0x460   : > { %v7630_v49 = vrot.slane %v7629_v63, 4  ;;  %v19221_v54 = vrot.slane %v7718_v23, 5  ;;  %v7724_v43 = vrot.slane %v7722_v20, 4  ;;  %v7733_v30 = vshrl.u32 %v7516_v21, 16 }
 0x461   : > { %15250 = vmatpush3.bf16.msra.mxu1 %v16187_v2  ;;  %v7601_v2 = vsel %vm16548_vm4, %v19189_v38, %v19169_v25  ;;  %v7643_v25 = vor.u32 %v7642_v10, %v7639_v7  ;;  %v7677_v38 = vor.u32 %v7676_v8, %v19197_v36  ;;  %v7667_v58 = vor.u32 %v7666_v14, %v7663_v48  ;;  %v16182_v10 = vld [vmem:[#allocation2 + $0x90] sm:$0xff]  }
 0x462   : > { %15283 = vmatprep.subr.bf16.mxu1 %v19181_v12  ;;  %v7654_v7 = vrot.slane %v7653_v13, 4  ;;  %v7620_v8 = vrot.slane %v7619_v19, 4  ;;  %v7711_v14 = vrot.slane %v7709_v24, 4  ;;  %v7714_v5 = vrot.slane %v7712_v50, 5  ;;  %v19249_v50 = vld [vmem:[#allocation2 + $0x78] sm:$0xf] }
 0x463   : > { %v7678_v40 = vrot.slane %v7677_v38, 4  ;;  %v7644_v48 = vrot.slane %v7643_v25, 4  ;;  %v7668_v28 = vrot.slane %v7667_v58, 4  ;;  %v19223_v52 = vcombine.low %v7601_v2, %v7611_v34  ;;  %v19260_v34 = vld [vmem:[#allocation2 + $0x20] sm:$0x1] }
 0x464   : > { %15220 = vmatmul.mubr.bf16.gmra.mrb[16].mxu1 %v16179_v15  ;;  %v19212_v15 = vrot.slane %v7694_v29, 5  ;;  %v7691_v29 = vor.u32 %v7690_v60, %v7687_v37  ;;  %v7635_v17 = vsel %vm16548_vm4, %v7630_v49, %v7634_v11  ;;  %v7659_v37 = vsel %vm16548_vm4, %v7654_v7, %v7658_v47  ;;  %21936 = vst [vmem:[#allocation37_spill] sm:$0xff] %v19260_v34  ;;  %v16185_v49 = vld [vmem:[#allocation2 + $0xa8] sm:$0xff]   ;;  %v9881_v47 = vld [vmem:[#allocation2 + $0x18] sm:$0xe] }
 0x465   : > { %15223 = vmatprep.mubr.bf16.mxu1 %v16180_v62  ;;  %v7680_v62 = vshll.u32 %v18947_v51, 16  ;;  %v7704_v19 = vshll.u32 %v18952_v35, 16  ;;  %v7736_v25 = vshll.u32 %v7516_v21, 16  ;;  %v7625_v2 = vsel %vm16548_vm4, %v7620_v8, %v19192_v27  ;;  %v19251_v27 = vld [vmem:[#allocation2 + $0x1c] sm:$0xf] }
 0x466   : > { %v7701_v51 = vor.u32 %v7700_v18, %v19212_v15  ;;  %v19232_v13 = vrot.slane %v7691_v29, 4  ;;  %v7715_v60 = vor.u32 %v7714_v5, %v7711_v14  ;;  %v7742_v18 = vshll.u32 %v18992_v32, 16  ;;  %v19273_v8 = vld [vmem:[#allocation2 + $0x2c] sm:$0x1]  ;;  %v9882_v14 = vld [vmem:[#allocation2 + $0x24] sm:$0xe] }
 0x467   : > { %v7682_v9 = vrot.slane %v7680_v62, 5  ;;  %v19240_v24 = vcombine.low %v7625_v2, %v7635_v17  ;;  %v7649_v35 = vsel %vm16548_vm4, %v7644_v48, %v19194_v56  ;;  %v7725_v21 = vor.u32 %v7724_v43, %v19221_v54  ;;  %v19262_v56 = vld [vmem:[#allocation2 + $0x28] sm:$0xf]  ;;  %21937 = vst [vmem:[#allocation38_spill] sm:$0xff] %v19273_v8  ;;  %v19289_v17 = vld [vmem:[#allocation2 + $0x34] sm:$0xf] }
 0x468   : > { %v19237_v38 = vrot.slane %v7701_v51, 4  ;;  %v19253_v58 = vcombine.low %v7649_v35, %v7659_v37  ;;  %v19257_v23 = vrot.slane %v7704_v19, 5  ;;  %v19268_v11 = vrot.slane %v7733_v30, 4  ;;  %v19291_v37 = vld [vmem:[#allocation2 + $0x38] sm:$0x1]  ;;  %v16188_v35 = vld [vmem:[#allocation2 + $0xc0] sm:$0xff]  }
 0x469   : > { %v7683_v63 = vsel %vm16548_vm4, %v7678_v40, %v7682_v9  ;;  %v7673_v9 = vsel %vm16548_vm4, %v7668_v28, %v19197_v36  ;;  %v19270_v7 = vrot.slane %v7736_v25, 5  ;;  %v16186_v40 = vld [vmem:[#allocation2 + $0xb4] sm:$0xff]   ;;  %v19281_v48 = vrot.slane %v7742_v18, 5  ;;  %21938 = vst [vmem:[#allocation39_spill] sm:$0xff] %v19291_v37  ;;  %v19293_v19 = vld [vmem:[#allocation2 + $0x40] sm:$0xf] }
 0x46a   : > { %v19255_v62 = vcombine.low %v7673_v9, %v7683_v63  ;;  %v9947_v51 = vrot.slane %v19251_v27, 5  ;;  %v19284_v5 = vrot.slane %v7725_v21, 4  ;;  %v7757_v28 = vshrl.u32 %v19249_v50, 16  ;;  %21939 = vst [vmem:[#allocation40_spill] sm:$0xff] %v19293_v19  ;;  %v9883_v21 = vld [vmem:[#allocation2 + $0x30] sm:$0xe] }
 0x46b   : > { %v14047_v63 = vrot.slane %v9881_v47, 9  ;;  %v9950_v25 = vrot.slane %v19260_v34, 5  ;;  %v9954_v2 = vrot.slane %v19262_v56, 5  ;;  %v14048_v9 = vrot.slane %v9882_v14, 9  ;;  %v9884_v36 = vld [vmem:[#allocation2 + $0x3c] sm:$0xe] }
 0x46c   : > { %15224 = vmatmul.mubr.bf16.gmra.mrb[20].mxu1 %v16182_v10  ;;  %v7746_v10 = vshrl.u32 %v18992_v32, 16  ;;  %v9949_v30 = vrot.slane %v9947_v51, 4  ;;  %v9957_v20 = vrot.slane %v19273_v8, 5  ;;  %v19316_v14 = vld [vmem:[#allocation2 + $0x44] sm:$0x1]  ;;  %v9968_v43 = vrot.slane %v19293_v19, 5 }
 0x46d   : > { %15227 = vmatprep.mubr.bf16.mxu1 %v16183_v6  ;;  %v19279_v6 = vrot.slane %v7715_v60, 4  ;;  %v9956_v32 = vrot.slane %v9954_v2, 4  ;;  %21943 = vst [vmem:[#allocation44_spill] sm:$0xff] %v19316_v14  ;;  %v9885_v29 = vld [vmem:[#allocation2 + $0x48] sm:$0xe]  ;;  %v14050_v33 = vrot.slane %v9884_v36, 9 }
 0x46e   : > { %v19299_v18 = vrot.slane %v7746_v10, 4  ;;  %v19310_v47 = vsel %vm16862_vm7, %v9949_v30, %v9950_v25  ;;  %v19313_v10 = vrot.slane %v7757_v28, 4  ;;  %v19325_v30 = vsel %vm16862_vm7, %v14048_v9, %v9954_v2  ;;  %v19339_v9 = vld [vmem:[#allocation2 + $0x5c] sm:$0x1]  ;;  %v19346_v19 = vld [vmem:[#allocation2 + $0x64] sm:$0xf] }
 0x46f   : > { %21942 = vst [vmem:[#allocation43_spill] sm:$0xff] %v19310_v47  ;;  %21945 = vst [vmem:[#allocation46_spill] sm:$0xff] %v19325_v30  ;;  %v19329_v25 = vsel %vm16862_vm7, %v9956_v32, %v9957_v20  ;;  %v14049_v28 = vrot.slane %v9883_v21, 9  ;;  %v9970_v32 = vrot.slane %v9968_v43, 4  ;;  %v9971_v21 = vrot.slane %v19316_v14, 5 }
 0x470   : > { %21946 = vst [vmem:[#allocation47_spill] sm:$0xff] %v19329_v25  ;;  %21948 = vst [vmem:[#allocation49_spill] sm:$0xff] %v19339_v9  ;;  %v19354_v36 = vsel %vm16862_vm7, %v14050_v33, %v9968_v43  ;;  %v14051_v2 = vrot.slane %v9885_v29, 9  ;;  %v19360_v30 = vld [vmem:[#allocation2 + $0x70] sm:$0xf]  ;;  %v9982_v29 = vrot.slane %v19332_v31, 5 }
 0x471   : > { %21950 = vst [vmem:[#allocation51_spill] sm:$0xff] %v19346_v19  ;;  %21952 = vst [vmem:[#allocation53_spill] sm:$0xff] %v19354_v36  ;;  %v19370_v43 = vld [vmem:[#allocation2 + $0x7c] sm:$0xf]  ;;  %v14052_v14 = vrot.slane %v9886_v41, 9  ;;  %v9996_v36 = vrot.slane %v19360_v30, 5 }
 0x472   : > { %21954 = vst [vmem:[#allocation55_spill] sm:$0xff] %v19360_v30  ;;  %v19375_v8 = vld [vmem:[#allocation2 + $0x74] sm:$0x1]  ;;  %v9890_v31 = vld [vmem:[#allocation2 + $0x84] sm:$0xe] }
 0x473   : > { %v19390_v41 = vsel %vm16862_vm7, %v14052_v14, %v9982_v29  ;;  %v16190_v14 = vld [vmem:[#allocation3 + $0x148] sm:$0xff]   ;;  %v9998_v30 = vrot.slane %v9996_v36, 4  ;;  %v19411_v34 = vld [vmem:[#allocation2 + $0x94] sm:$0xf] }
 0x474   : > { %15228 = vmatmul.mubr.bf16.gmra.mrb[24].mxu1 %v16185_v49  ;;  %v19302_v49 = vld [vmem:[#allocation2 + $0x4c] sm:$0xf]  ;;  %21959 = vst [vmem:[#allocation60_spill] sm:$0xff] %v19390_v41  ;;  %21963 = vst [vmem:[#allocation64_spill] sm:$0xff] %v19411_v34 }
 0x475   : > { %15231 = vmatprep.mubr.bf16.mxu1 %v16186_v40  ;;  %21940 = vst [vmem:[#allocation41_spill] sm:$0xff] %v19302_v49  ;;  %v19306_v40 = vsel %vm16862_vm7, %v14047_v63, %v9947_v51  ;;  %v9961_v51 = vrot.slane %v19289_v17, 5  ;;  %v19321_v63 = vld [vmem:[#allocation2 + $0x50] sm:$0x1]  ;;  %v9975_v25 = vrot.slane %v19302_v49, 5  ;;  %v9985_v49 = vrot.slane %v19339_v9, 5 }
 0x476   : > { %21941 = vst [vmem:[#allocation42_spill] sm:$0xff] %v19306_v40  ;;  %21944 = vst [vmem:[#allocation45_spill] sm:$0xff] %v19321_v63  ;;  %v9964_v40 = vrot.slane %v19291_v37, 5  ;;  %v9978_v33 = vrot.slane %v19321_v63, 5  ;;  %v9888_v37 = vld [vmem:[#allocation2 + $0x6c] sm:$0xe] }
 0x477   : > { %v9963_v47 = vrot.slane %v9961_v51, 4  ;;  %v19343_v20 = vsel %vm16862_vm7, %v14049_v28, %v9961_v51  ;;  %v9887_v51 = vld [vmem:[#allocation2 + $0x60] sm:$0xe]  ;;  %v19358_v28 = vld [vmem:[#allocation2 + $0x68] sm:$0x1]  ;;  %v14054_v63 = vrot.slane %v9888_v37, 9 }
 0x478   : > { %21949 = vst [vmem:[#allocation50_spill] sm:$0xff] %v19343_v20  ;;  %21953 = vst [vmem:[#allocation54_spill] sm:$0xff] %v19358_v28  ;;  %v19382_v20 = vld [vmem:[#allocation2 + $0x80] sm:$0x1]  ;;  %v9891_v9 = vld [vmem:[#allocation2 + $0x90] sm:$0xe] }
 0x479   : > { %v19350_v60 = vsel %vm16862_vm7, %v9963_v47, %v9964_v40  ;;  %v19366_v40 = vsel %vm16862_vm7, %v9970_v32, %v9971_v21  ;;  %v9977_v47 = vrot.slane %v9975_v25, 4  ;;  %v19379_v32 = vsel %vm16862_vm7, %v14051_v2, %v9975_v25  ;;  %21957 = vst [vmem:[#allocation58_spill] sm:$0xff] %v19382_v20  ;;  %v9889_v25 = vld [vmem:[#allocation2 + $0x78] sm:$0xe]  ;;  %v19394_v2 = vld [vmem:[#allocation2 + $0x88] sm:$0xf] }
 0x47a   : > { %21951 = vst [vmem:[#allocation52_spill] sm:$0xff] %v19350_v60  ;;  %21955 = vst [vmem:[#allocation56_spill] sm:$0xff] %v19366_v40  ;;  %v9984_v21 = vrot.slane %v9982_v29, 4  ;;  %v9989_v60 = vrot.slane %v19346_v19, 5  ;;  %v9992_v40 = vrot.slane %v19358_v28, 5  ;;  %v9999_v19 = vrot.slane %v19375_v8, 5 }
 0x47b   : > { %21956 = vst [vmem:[#allocation57_spill] sm:$0xff] %v19379_v32  ;;  %v19419_v37 = vsel %vm16862_vm7, %v14054_v63, %v9996_v36  ;;  %v10003_v29 = vrot.slane %v19370_v43, 5  ;;  %v10006_v63 = vrot.slane %v19382_v20, 5  ;;  %v10010_v36 = vrot.slane %v19394_v2, 5  ;;  %v9166_v32 = vld [vmem:[#allocation2 + $0xb0] sm:$0x1] }
 0x47c   : > { %15232 = vmatmul.mubr.bf16.gmra.mrb[28].mxu1 %v16188_v35  ;;  %v14053_v35 = vrot.slane %v9887_v51, 9  ;;  %v19396_v51 = vld [vmem:[#allocation2 + $0x8c] sm:$0x1]  ;;  %21965 = vst [vmem:[#allocation66_spill] sm:$0xff] %v19419_v37 }
 0x47d   : > { %15251 = vmatprep.mubr.bf16.mxu1 %v19172_v42  ;;  %v19386_v42 = vsel %vm16862_vm7, %v9977_v47, %v9978_v33  ;;  %21960 = vst [vmem:[#allocation61_spill] sm:$0xff] %v19396_v51  ;;  %v19402_v33 = vsel %vm16862_vm7, %v9984_v21, %v9985_v49  ;;  %v9991_v47 = vrot.slane %v9989_v60, 4  ;;  %v14055_v21 = vrot.slane %v9889_v25, 9 }
 0x47e   : > { %21958 = vst [vmem:[#allocation59_spill] sm:$0xff] %v19386_v42  ;;  %21961 = vst [vmem:[#allocation62_spill] sm:$0xff] %v19402_v33  ;;  %v19408_v28 = vsel %vm16862_vm7, %v14053_v35, %v9989_v60  ;;  %v19423_v60 = vld [vmem:[#allocation2 + $0x98] sm:$0x1]  ;;  %v19425_v35 = vld [vmem:[#allocation2 + $0xa0] sm:$0xf] }
 0x47f   : > { %21962 = vst [vmem:[#allocation63_spill] sm:$0xff] %v19408_v28  ;;  %v19415_v49 = vsel %vm16862_vm7, %v9991_v47, %v9992_v40  ;;  %21966 = vst [vmem:[#allocation67_spill] sm:$0xff] %v19423_v60  ;;  %v19431_v40 = vsel %vm16862_vm7, %v9998_v30, %v9999_v19  ;;  %v10005_v25 = vrot.slane %v10003_v29, 4  ;;  %v14056_v47 = vrot.slane %v9890_v31, 9  ;;  %v9892_v33 = vld [vmem:[#allocation2 + $0x9c] sm:$0xe] }
 0x480   : > { %21964 = vst [vmem:[#allocation65_spill] sm:$0xff] %v19415_v49  ;;  %21967 = vst [vmem:[#allocation68_spill] sm:$0xff] %v19425_v35  ;;  %v10013_v41 = vrot.slane %v19396_v51, 5  ;;  %v16191_v49 = vld [vmem:[#allocation3 + $0x150] sm:$0xff]   ;;  %v9163_v19 = vld [vmem:[#allocation2 + $0xa4] sm:$0x1]  ;;  %v19442_v30 = vsel %vm16862_vm7, %v14055_v21, %v10003_v29 }
 0x481   : > { %21968 = vst [vmem:[#allocation69_spill] sm:$0xff] %v19431_v40  ;;  %21969 = vst [vmem:[#allocation70_spill] sm:$0xff] %v19442_v30  ;;  %v10012_v28 = vrot.slane %v10010_v36, 4  ;;  %v14057_v42 = vrot.slane %v9891_v9, 9  ;;  %v19449_v31 = vsel %vm16862_vm7, %v10005_v25, %v10006_v63  ;;  %v10020_v40 = vrot.slane %v19423_v60, 5  ;;  %v16192_v9 = vld [vmem:[#allocation3 + $0x158] sm:$0xff]  }
 0x482   : > { %21970 = vst [vmem:[#allocation71_spill] sm:$0xff] %v19449_v31  ;;  %v10024_v29 = vrot.slane %v19425_v35, 5  ;;  %v19457_v21 = vld [vmem:[#allocation2 + $0xb8] sm:$0xf]  ;;  %v14058_v63 = vrot.slane %v9892_v33, 9  ;;  %v10027_v20 = vrot.slane %v9163_v19, 5 }
 0x483   : > { %v19463_v37 = vsel %vm16862_vm7, %v10012_v28, %v10013_v41  ;;  %v9893_v25 = vld [vmem:[#allocation2 + $0xa8] sm:$0xe]  ;;  %v19471_v31 = vld [vmem:[#allocation2 + $0xbc] sm:$0x1]  ;;  %v19473_v28 = vld [vmem:[#allocation2 + $0xc4] sm:$0xf] }
 0x484   : > { %15252 = vmatmul.mubr.bf16.vlgmr.msra.gmra.mrb[0].mxu1 %v19199_v4  ;;  %v19453_v4 = vsel %vm16862_vm7, %v14056_v47, %v10010_v36  ;;  %21972 = vst [vmem:[#allocation73_spill] sm:$0xff] %v19463_v37  ;;  %v21973_v36 = vshll.u32 %v19007_v53, 16  ;;  %v10026_v60 = vrot.slane %v10024_v29, 4  ;;  %v14059_v37 = vrot.slane %v9893_v25, 9 }
 0x485   : > { %15284 = vmatpush3.bf16.msra.mxu1 %v19181_v12  ;;  %15255 = vmatprep.mubr.bf16.mxu1 %v19223_v52  ;;  %v10017_v12 = vrot.slane %v19411_v34, 5  ;;  %v19445_v52 = vld [vmem:[#allocation2 + $0xac] sm:$0xf]  ;;  %21971 = vst [vmem:[#allocation72_spill] sm:$0xff] %v19453_v4  ;;  %v9894_v34 = vld [vmem:[#allocation2 + $0xb4] sm:$0xe] }
 0x486   : > { %15285 = vmatprep.subr.bf16.mxu1 %v16190_v14  ;;  %v19467_v47 = vrot.slane %v21973_v36, 5  ;;  %v10031_v19 = vrot.slane %v19445_v52, 5  ;;  %v19492_v35 = vsel %vm16862_vm7, %v10026_v60, %v10027_v20  ;;  %v14060_v4 = vrot.slane %v9894_v34, 9 }
 0x487   : > { %v10019_v51 = vrot.slane %v10017_v12, 4  ;;  %v19477_v41 = vsel %vm16862_vm7, %v14057_v42, %v10017_v12  ;;  %21977 = vst [vmem:[#allocation77_spill] sm:$0xff] %v19492_v35  ;;  %v10038_v42 = vrot.slane %v19457_v21, 5  ;;  %v9895_v12 = vld [vmem:[#allocation2 + $0xc0] sm:$0xe]  ;;  %v21978_v20 = vshrl.u32 %v19007_v53, 16 }
 0x488   : > { %21974 = vst [vmem:[#allocation74_spill] sm:$0xff] %v19477_v41  ;;  %v10041_v36 = vrot.slane %v19471_v31, 5  ;;  %v7522_v41 = vld [vmem:[#allocation2 + $0x84] sm:$0xf] }
 0x489   : > { %15286 = vmatpush3.bf16.msra.mxu1 %v16190_v14  ;;  %v19481_v33 = vsel %vm16862_vm7, %v10019_v51, %v10020_v40  ;;  %v19485_v14 = vsel %vm16862_vm7, %v14058_v63, %v10024_v29  ;;  %v19496_v51 = vld [vmem:[#allocation2 + $0xc8] sm:$0x1]  ;;  %v10033_v29 = vrot.slane %v10031_v19, 4  ;;  %v10034_v63 = vrot.slane %v9166_v32, 5 }
 0x48a   : > { %15287 = vmatprep.subr.bf16.mxu1 %v16191_v49  ;;  %21975 = vst [vmem:[#allocation75_spill] sm:$0xff] %v19481_v33  ;;  %21976 = vst [vmem:[#allocation76_spill] sm:$0xff] %v19485_v14  ;;  %v7772_v60 = vrot.slane %v21978_v20, 4  ;;  %v10040_v25 = vrot.slane %v10038_v42, 4  ;;  %v10045_v33 = vrot.slane %v19473_v28, 5  ;;  %v19507_v40 = vsel %vm16862_vm7, %v14059_v37, %v10031_v19 }
 0x48b   : > { %21979 = vst [vmem:[#allocation78_spill] sm:$0xff] %v19507_v40  ;;  %v19511_v34 = vsel %vm16862_vm7, %v10033_v29, %v10034_v63  ;;  %v19515_v53 = vsel %vm16862_vm7, %v14060_v4, %v10038_v42  ;;  %v10048_v37 = vrot.slane %v19496_v51, 5  ;;  %v21983_v19 = vshll.u32 %v19249_v50, 16  ;;  %v16217_v40 = vld [vmem:[#allocation2 + $0x78] sm:$0xff]  }
 0x48c   : > { %15256 = vmatmul.mubr.bf16.gmra.mrb[4].mxu1 %v19240_v24  ;;  %v16193_v24 = vld [vmem:[#allocation3 + $0x160] sm:$0xff]   ;;  %21980 = vst [vmem:[#allocation79_spill] sm:$0xff] %v19511_v34  ;;  %21981 = vst [vmem:[#allocation80_spill] sm:$0xff] %v19515_v53  ;;  %v10047_v20 = vrot.slane %v10045_v33, 4  ;;  %v7790_v29 = vshll.u32 %v19026_v1, 16  ;;  %v7794_v63 = vshrl.u32 %v19026_v1, 16  ;;  %v21986_v50 = vor.u32 %v19270_v7, %v19268_v11 }
 0x48d   : > { %15259 = vmatprep.mubr.bf16.mxu1 %v19253_v58  ;;  %15288 = vmatpush3.bf16.msra.mxu1 %v16191_v49  ;;  %v14061_v58 = vrot.slane %v9895_v12, 9  ;;  %v19521_v49 = vsel %vm16862_vm7, %v10040_v25, %v10041_v36  ;;  %v7762_v35 = vrot.slane %v21983_v19, 5  ;;  %v7781_v42 = vshrl.u32 %v7522_v41, 16 }
 0x48e   : > { %15289 = vmatprep.subr.bf16.mxu1 %v16192_v9  ;;  %21982 = vst [vmem:[#allocation81_spill] sm:$0xff] %v19521_v49  ;;  %v7784_v12 = vshll.u32 %v7522_v41, 16  ;;  %v19536_v25 = vsel %vm16862_vm7, %v10047_v20, %v10048_v37  ;;  %v7740_v19 = vrot.slane %v21986_v50, 4  ;;  %v21987_v1 = vor.u32 %v19299_v18, %v19281_v48  ;;  %v16194_v41 = vld [vmem:[#allocation3 + $0x168] sm:$0xff]  }
 0x48f   : > { %v19532_v36 = vsel %vm16862_vm7, %v14061_v58, %v10045_v33  ;;  %21985 = vst [vmem:[#allocation83_spill] sm:$0xff] %v19536_v25  ;;  %v21988_v58 = vsel %vm16548_vm4, %v19237_v38, %v19257_v23  ;;  %v21989_v11 = vsel %vm16548_vm4, %v19232_v13, %v19212_v15  ;;  %v21990_v18 = vshll.u32 %v18984_v59, 16  ;;  %v7525_v38 = vld [vmem:[#allocation2 + $0x90] sm:$0xf]  ;;  %v16205_v25 = vld [vmem:[#allocation2 + $0x18] sm:$0xff]  }
 0x490   : > { %21984 = vst [vmem:[#allocation82_spill] sm:$0xff] %v19532_v36  ;;  %v7750_v32 = vrot.slane %v21987_v1, 4  ;;  %v13941_v7 = vcombine.low %v21989_v11, %v21988_v58  ;;  %v7776_v50 = vshll.u32 %v19017_v22, 16  ;;  %v19563_v1 = vrot.slane %v7790_v29, 5 }
 0x491   : > { %15290 = vmatpush3.bf16.msra.mxu1 %v16192_v9  ;;  %v7773_v9 = vor.u32 %v7772_v60, %v19467_v47  ;;  %v7730_v20 = vrot.slane %v21990_v18, 5  ;;  %v21991_v60 = vshll.u32 %v19015_v44, 16  ;;  %v7796_v33 = vrot.slane %v7794_v63, 4  ;;  %v16195_v63 = vld [vmem:[#allocation3 + $0x170] sm:$0xff]  }
 0x492   : > { %15291 = vmatprep.subr.bf16.mxu1 %v16193_v24  ;;  %v7721_v15 = vsel %vm16548_vm4, %v19279_v6, %v19221_v54  ;;  %v7763_v59 = vor.u32 %v7762_v35, %v19313_v10  ;;  %v7783_v13 = vrot.slane %v7781_v42, 4  ;;  %v7745_v22 = vsel %vm16548_vm4, %v7740_v19, %v19281_v48 }
 0x493   : > { %v7754_v37 = vrot.slane %v21991_v60, 5  ;;  %v7731_v44 = vsel %vm16548_vm4, %v19284_v5, %v7730_v20  ;;  %v7774_v29 = vrot.slane %v7773_v9, 4  ;;  %v7805_v54 = vshrl.u32 %v7525_v38, 16  ;;  %v16196_v60 = vld [vmem:[#allocation3 + $0x178] sm:$0xff]  }
 0x494   : > { %15260 = vmatmul.mubr.bf16.gmra.mrb[8].mxu1 %v19255_v62  ;;  %v7786_v62 = vrot.slane %v7784_v12, 5  ;;  %v7808_v6 = vshll.u32 %v7525_v38, 16  ;;  %v7814_v10 = vshll.u32 %v19037_v16, 16  ;;  %v7818_v35 = vshrl.u32 %v19037_v16, 16 }
 0x495   : > { %15263 = vmatprep.mubr.bf16.mxu1 %v13941_v7  ;;  %15292 = vmatpush3.bf16.msra.mxu1 %v16193_v24  ;;  %v7755_v23 = vsel %vm16548_vm4, %v7750_v32, %v7754_v37  ;;  %v7528_v24 = vld [vmem:[#allocation2 + $0x9c] sm:$0xf]  ;;  %v7778_v42 = vrot.slane %v7776_v50, 5  ;;  %v7797_v5 = vor.u32 %v7796_v33, %v19563_v1  ;;  %v7838_v12 = vshll.u32 %v19053_v39, 16  ;;  %v16260_v7 = vld [vmem:[#allocation2 + $0x8c] sm:$0x1] }
 0x496   : > { %15293 = vmatprep.subr.bf16.mxu1 %v16194_v41  ;;  %v7842_v48 = vshrl.u32 %v19053_v39, 16  ;;  %v13942_v19 = vcombine.low %v7721_v15, %v7731_v44  ;;  %v13943_v58 = vcombine.low %v7745_v22, %v7755_v23  ;;  %v7764_v32 = vrot.slane %v7763_v59, 4 }
 0x497   : > { %v7787_v9 = vor.u32 %v7786_v62, %v7783_v13  ;;  %v7779_v11 = vsel %vm16548_vm4, %v7774_v29, %v7778_v42  ;;  %v7800_v18 = vshll.u32 %v16260_v7, 16  ;;  %v7829_v20 = vshrl.u32 %v7528_v24, 16  ;;  %v7531_v29 = vld [vmem:[#allocation2 + $0xa8] sm:$0xf] }
 0x498   : > { %v7832_v16 = vshll.u32 %v7528_v24, 16  ;;  %v7807_v37 = vrot.slane %v7805_v54, 4  ;;  %v7810_v33 = vrot.slane %v7808_v6, 5  ;;  %v19585_v50 = vrot.slane %v7814_v10, 5  ;;  %v19592_v54 = vld [vmem:[#allocation3 + $0x180] sm:$0xff]  }
 0x499   : > { %15294 = vmatpush3.bf16.msra.mxu1 %v16194_v41  ;;  %v7820_v38 = vrot.slane %v7818_v35, 4  ;;  %v7798_v39 = vrot.slane %v7797_v5, 4  ;;  %v19587_v15 = vrot.slane %v7838_v12, 5  ;;  %v7844_v59 = vrot.slane %v7842_v48, 4  ;;  %v16261_v35 = vld [vmem:[#allocation2 + $0xac] sm:$0xf] }
 0x49a   : > { %15295 = vmatprep.subr.bf16.mxu1 %v16195_v63  ;;  %v7769_v41 = vsel %vm16548_vm4, %v7764_v32, %v19467_v47  ;;  %v7788_v13 = vrot.slane %v7787_v9, 4  ;;  %v7802_v44 = vrot.slane %v7800_v18, 5  ;;  %v7831_v22 = vrot.slane %v7829_v20, 4  ;;  %v7534_v5 = vld [vmem:[#allocation2 + $0xb4] sm:$0xf] }
 0x49b   : > { %v13944_v62 = vcombine.low %v7769_v41, %v7779_v11  ;;  %v7834_v23 = vrot.slane %v7832_v16, 5  ;;  %v7811_v6 = vor.u32 %v7810_v33, %v7807_v37  ;;  %v7821_v10 = vor.u32 %v7820_v38, %v19585_v50  ;;  %v16263_v18 = vld [vmem:[#allocation2 + $0xa4] sm:$0x1] }
 0x49c   : > { %15264 = vmatmul.mubr.bf16.gmra.mrb[12].mxu1 %v13942_v19  ;;  %v7862_v24 = vshll.u32 %v16261_v35, 16  ;;  %v7866_v42 = vshrl.u32 %v16261_v35, 16  ;;  %v7803_v47 = vsel %vm16548_vm4, %v7798_v39, %v7802_v44  ;;  %v7886_v12 = vshll.u32 %v19080_v57, 16 }
 0x49d   : > { %15267 = vmatprep.mubr.bf16.mxu1 %v13943_v58  ;;  %15296 = vmatpush3.bf16.msra.mxu1 %v16195_v63  ;;  %v7845_v63 = vor.u32 %v7844_v59, %v19587_v15  ;;  %v7890_v48 = vshrl.u32 %v19080_v57, 16  ;;  %v7793_v19 = vsel %vm16548_vm4, %v7788_v13, %v19563_v1  ;;  %v16262_v58 = vld [vmem:[#allocation2 + $0x98] sm:$0x1]  ;;  %v7853_v9 = vshrl.u32 %v7531_v29, 16 }
 0x49e   : > { %15297 = vmatprep.subr.bf16.mxu1 %v16196_v60  ;;  %v7824_v32 = vshll.u32 %v16262_v58, 16  ;;  %v7856_v11 = vshll.u32 %v7531_v29, 16  ;;  %v7835_v7 = vor.u32 %v7834_v23, %v7831_v22  ;;  %v7848_v20 = vshll.u32 %v16263_v18, 16 }
 0x49f   : > { %v7877_v16 = vshrl.u32 %v7534_v5, 16  ;;  %v7880_v37 = vshll.u32 %v7534_v5, 16  ;;  %v13945_v33 = vcombine.low %v7793_v19, %v7803_v47  ;;  %v7822_v38 = vrot.slane %v7821_v10, 4  ;;  %v7537_v5 = vld [vmem:[#allocation2 + $0xc0] sm:$0xf] }
 0x4a0   : > { %v7864_v39 = vrot.slane %v7862_v24, 5  ;;  %v7868_v57 = vrot.slane %v7866_v42, 4  ;;  %v7812_v59 = vrot.slane %v7811_v6, 4  ;;  %v7846_v41 = vrot.slane %v7845_v63, 4  ;;  %v16264_v24 = vld [vmem:[#allocation2 + $0xc4] sm:$0xf] }
 0x4a1   : > { %15298 = vmatpush3.bf16.msra.mxu1 %v16196_v60  ;;  %v7888_v1 = vrot.slane %v7886_v12, 5  ;;  %v7892_v13 = vrot.slane %v7890_v48, 4  ;;  %v7826_v44 = vrot.slane %v7824_v32, 5  ;;  %v7855_v29 = vrot.slane %v7853_v9, 4  ;;  %v16265_v19 = vld [vmem:[#allocation2 + $0xb0] sm:$0x1] }
 0x4a2   : > { %15331 = vmatprep.subr.bf16.mxu1 %v19592_v54  ;;  %v7858_v60 = vrot.slane %v7856_v11, 5  ;;  %v7836_v22 = vrot.slane %v7835_v7, 4  ;;  %v7850_v23 = vrot.slane %v7848_v20, 5  ;;  %v7879_v35 = vrot.slane %v7877_v16, 4  ;;  %v16266_v16 = vld [vmem:[#allocation2 + $0xbc] sm:$0x1] }
 0x4a3   : > { %v7882_v58 = vrot.slane %v7880_v37, 5  ;;  %v7827_v47 = vsel %vm16548_vm4, %v7822_v38, %v7826_v44  ;;  %v7869_v10 = vor.u32 %v7868_v57, %v7864_v39  ;;  %v7910_v42 = vshll.u32 %v16264_v24, 16 }
 0x4a4   : > { %15268 = vmatmul.mubr.bf16.gmra.mrb[16].mxu1 %v13944_v62  ;;  %v7914_v62 = vshrl.u32 %v16264_v24, 16  ;;  %v7817_v6 = vsel %vm16548_vm4, %v7812_v59, %v19585_v50  ;;  %v7851_v63 = vsel %vm16548_vm4, %v7846_v41, %v7850_v23  ;;  %v7893_v12 = vor.u32 %v7892_v13, %v7888_v1  ;;  %v16268_v24 = vld [vmem:[#allocation2 + $0xc8] sm:$0x1] }
 0x4a5   : > { %15271 = vmatprep.mubr.bf16.mxu1 %v13945_v33  ;;  %v7859_v48 = vor.u32 %v7858_v60, %v7855_v29  ;;  %v7872_v32 = vshll.u32 %v16265_v19, 16  ;;  %v7901_v9 = vshrl.u32 %v7537_v5, 16  ;;  %v7904_v11 = vshll.u32 %v7537_v5, 16 }
 0x4a6   : > { %v13946_v7 = vcombine.low %v7817_v6, %v7827_v47  ;;  %v7841_v18 = vsel %vm16548_vm4, %v7836_v22, %v19587_v15  ;;  %v7883_v20 = vor.u32 %v7882_v58, %v7879_v35  ;;  %v7896_v37 = vshll.u32 %v16266_v16, 16  ;;  %v16267_v35 = vld [vmem:[#allocation2 + $0x10] sm:$0xf] }
 0x4a7   : > { %v13947_v33 = vcombine.low %v7841_v18, %v7851_v63  ;;  %v7870_v38 = vrot.slane %v7869_v10, 4  ;;  %v7912_v50 = vrot.slane %v7910_v42, 5  ;;  %v7916_v57 = vrot.slane %v7914_v62, 4  ;;  %v4992_v18 = vld [vmem:[#allocation2 + $0xcc] sm:$0x1] }
 0x4a8   : > { %v7894_v59 = vrot.slane %v7893_v12, 4  ;;  %v7860_v41 = vrot.slane %v7859_v48, 4  ;;  %v7874_v13 = vrot.slane %v7872_v32, 5  ;;  %v7903_v44 = vrot.slane %v7901_v9, 4  ;;  %v8245_v48 = vld [vmem:[#allocation2 + $0xc] sm:$0xe] }
 0x4a9   : > { %v7906_v29 = vrot.slane %v7904_v11, 5  ;;  %v7884_v60 = vrot.slane %v7883_v20, 4  ;;  %v7898_v23 = vrot.slane %v7896_v37, 5  ;;  %v7917_v15 = vor.u32 %v7916_v57, %v7912_v50  ;;  %v16269_v11 = vld [vmem:[#allocation2 + $0x1c] sm:$0xf] }
 0x4aa   : > { %v7875_v5 = vsel %vm16548_vm4, %v7870_v38, %v7874_v13  ;;  %v8311_v58 = vrot.slane %v16267_v35, 5  ;;  %v7865_v47 = vsel %vm16548_vm4, %v7860_v41, %v7864_v39  ;;  %v7920_v42 = vshll.u32 %v16268_v24, 16  ;;  %v9128_v57 = vld [vmem:[#allocation2 + $0x18] sm:$0xf] }
 0x4ab   : > { %v7899_v22 = vsel %vm16548_vm4, %v7894_v59, %v7898_v23  ;;  %v7907_v10 = vor.u32 %v7906_v29, %v7903_v44  ;;  %v13948_v62 = vcombine.low %v7865_v47, %v7875_v5  ;;  %v7889_v6 = vsel %vm16548_vm4, %v7884_v60, %v7888_v1  ;;  %v8246_v41 = vld [vmem:[#allocation2 + $0x18] sm:$0xe] }
 0x4ac   : > { %15272 = vmatmul.mubr.bf16.gmra.mrb[20].mxu1 %v13946_v7  ;;  %v13949_v63 = vcombine.low %v7889_v6, %v7899_v22  ;;  %v7918_v12 = vrot.slane %v7917_v15, 4  ;;  %v8313_v19 = vrot.slane %v8311_v58, 4  ;;  %v7922_v9 = vrot.slane %v7920_v42, 5  ;;  %v9131_v15 = vld [vmem:[#allocation2 + $0x24] sm:$0xf] }
 0x4ad   : > { %15275 = vmatprep.mubr.bf16.mxu1 %v13947_v33  ;;  %v7908_v32 = vrot.slane %v7907_v10, 4  ;;  %v8318_v7 = vrot.slane %v16269_v11, 5  ;;  %v8314_v39 = vrot.slane %v19154_v55, 5  ;;  %v4993_v20 = vsel %vm18251_vm10, 0, %v4992_v18 }
 0x4ae   : > { %v7923_v16 = vsel %vm16548_vm4, %v7918_v12, %v7922_v9  ;;  %4994 = vst [vmem:[#allocation2 + $0xcc] sm:$0x1] %v4993_v20  ;;  %v13959_v1 = vrot.slane %v8245_v48, 9  ;;  %v8321_v13 = vrot.slane %v19159_v3, 5  ;;  %v9177_v44 = vshrl.u32 %v9128_v57, 16  ;;  %v16198_v12 = vld [vmem:[#allocation3 + $0x188] sm:$0xff]  }
 0x4af   : > { %v8315_v37 = vsel %vm16862_vm7, %v8313_v19, %v8314_v39  ;;  %v7913_v33 = vsel %vm16548_vm4, %v7908_v32, %v7912_v50  ;;  %v8320_v38 = vrot.slane %v8318_v7, 4  ;;  %v9180_v29 = vshll.u32 %v9128_v57, 16  ;;  %v9137_v9 = vld [vmem:[#allocation2 + $0x3c] sm:$0xf] }
 0x4b0   : > { %v13950_v59 = vcombine.low %v7913_v33, %v7923_v16  ;;  %v8312_v55 = vsel %vm16862_vm7, %v13959_v1, %v8311_v58  ;;  %v13960_v60 = vrot.slane %v8246_v41, 9  ;;  %v9186_v50 = vshll.u32 %v19251_v27, 16  ;;  %v16199_v16 = vld [vmem:[#allocation3 + $0x190] sm:$0xff]  }
 0x4b1   : > { %v13975_v45 = vcombine.low %v8312_v55, %v8315_v37  ;;  %v8322_v23 = vsel %vm16862_vm7, %v8320_v38, %v8321_v13  ;;  %v9190_v5 = vshrl.u32 %v19251_v27, 16  ;;  %v9210_v22 = vshll.u32 %v19262_v56, 16  ;;  %v21993_v38 = vld [vmem:[#allocation37_spill] sm:$0xff]  ;;  %v21994_v55 = vld [vmem:[#allocation38_spill] sm:$0xff] }
 0x4b2   : > { %v9214_v35 = vshrl.u32 %v19262_v56, 16  ;;  %v8319_v3 = vsel %vm16862_vm7, %v13960_v60, %v8318_v7  ;;  %v9179_v47 = vrot.slane %v9177_v44, 4  ;;  %v9182_v10 = vrot.slane %v9180_v29, 5 }
 0x4b3   : > { %v13976_v58 = vcombine.low %v8319_v3, %v8322_v23  ;;  %v19642_v24 = vrot.slane %v9186_v50, 5  ;;  %v9192_v42 = vrot.slane %v9190_v5, 4  ;;  %v9204_v6 = vshll.u32 %v9131_v15, 16  ;;  %v16200_v23 = vld [vmem:[#allocation3 + $0x198] sm:$0xff]  }
 0x4b4   : > { %15276 = vmatmul.mubr.bf16.gmra.mrb[24].mxu1 %v13948_v62  ;;  %v9201_v62 = vshrl.u32 %v9131_v15, 16  ;;  %v19644_v48 = vrot.slane %v9210_v22, 5  ;;  %v9216_v27 = vrot.slane %v9214_v35, 4  ;;  %v9234_v19 = vshll.u32 %v19289_v17, 16  ;;  %v21996_v22 = vld [vmem:[#allocation39_spill] sm:$0xff] }
 0x4b5   : > { %15279 = vmatprep.mubr.bf16.mxu1 %v13949_v63  ;;  %v9134_v63 = vld [vmem:[#allocation2 + $0x30] sm:$0xf]  ;;  %v9238_v56 = vshrl.u32 %v19289_v17, 16  ;;  %v9183_v32 = vor.u32 %v9182_v10, %v9179_v47  ;;  %v21992_v11 = vcombine.low %v18956_v46, %v18960_v0  ;;  %v9193_v7 = vor.u32 %v9192_v42, %v19642_v24  ;;  %v21997_v10 = vld [vmem:[#allocation10_spill] sm:$0xff]  ;;  %v21998_v42 = vld [vmem:[#allocation11_spill] sm:$0xff] }
 0x4b6   : > { %v9203_v18 = vrot.slane %v9201_v62, 4  ;;  %v9206_v39 = vrot.slane %v9204_v6, 5  ;;  %v9225_v20 = vshrl.u32 %v9134_v63, 16  ;;  %v9217_v1 = vor.u32 %v9216_v27, %v19644_v48  ;;  %v21995_v0 = vld [vmem:[#allocation40_spill] sm:$0xff]  ;;  %v9140_v27 = vld [vmem:[#allocation2 + $0x48] sm:$0xf] }
 0x4b7   : > { %v9228_v37 = vshll.u32 %v9134_v63, 16  ;;  %v19654_v17 = vrot.slane %v9234_v19, 5  ;;  %v9240_v33 = vrot.slane %v9238_v56, 4  ;;  %v9196_v57 = vshll.u32 %v21993_v38, 16  ;;  %v22000_v19 = vld [vmem:[#allocation12_spill] sm:$0xff]  ;;  %v22001_v56 = vld [vmem:[#allocation13_spill] sm:$0xff] }
 0x4b8   : > { %v9220_v46 = vshll.u32 %v21994_v55, 16  ;;  %v9258_v41 = vshll.u32 %v21995_v0, 16  ;;  %v9184_v13 = vrot.slane %v9183_v32, 4  ;;  %v9194_v44 = vrot.slane %v9193_v7, 4 }
 0x4b9   : > { %v9207_v29 = vor.u32 %v9206_v39, %v9203_v18  ;;  %v9227_v60 = vrot.slane %v9225_v20, 4  ;;  %v9218_v50 = vrot.slane %v9217_v1, 4  ;;  %v9230_v5 = vrot.slane %v9228_v37, 5  ;;  %v9143_v18 = vld [vmem:[#allocation2 + $0x54] sm:$0xf]  ;;  %v16201_v39 = vld [vmem:[#allocation3 + $0x1a0] sm:$0xff]  }
 0x4ba   : > { %v9241_v15 = vor.u32 %v9240_v33, %v19654_v17  ;;  %v9244_v35 = vshll.u32 %v21996_v22, 16  ;;  %v9198_v3 = vrot.slane %v9196_v57, 5  ;;  %v21999_v62 = vcombine.low %v21997_v10, %v21998_v42  ;;  %v22006_v22 = vld [vmem:[#allocation44_spill] sm:$0xff]  ;;  %v22008_v10 = vld [vmem:[#allocation15_spill] sm:$0xff] }
 0x4bb   : > { %v9222_v6 = vrot.slane %v9220_v46, 5  ;;  %v19665_v63 = vrot.slane %v9258_v41, 5  ;;  %v22002_v32 = vcombine.low %v22000_v19, %v22001_v56  ;;  %v9208_v7 = vrot.slane %v9207_v29, 4  ;;  %v22010_v19 = vld [vmem:[#allocation17_spill] sm:$0xff]  ;;  %v22011_v56 = vld [vmem:[#allocation18_spill] sm:$0xff] }
 0x4bc   : > { %15280 = vmatmul.mubr.bf16.gmra.mrb[28].mxu1 %v13950_v59  ;;  %v9252_v59 = vshll.u32 %v9137_v9, 16  ;;  %v9231_v1 = vor.u32 %v9230_v5, %v9227_v60  ;;  %v9242_v37 = vrot.slane %v9241_v15, 4  ;;  %v9246_v33 = vrot.slane %v9244_v35, 5  ;;  %v16202_v60 = vld [vmem:[#allocation3 + $0x1a8] sm:$0xff]  }
 0x4bd   : > { %15299 = vmatprep.mubr.bf16.mxu1 %v13975_v45  ;;  %v9262_v45 = vshrl.u32 %v21995_v0, 16  ;;  %v9223_v20 = vsel %vm16548_vm4, %v9218_v50, %v9222_v6  ;;  %v9273_v57 = vshrl.u32 %v9140_v27, 16  ;;  %v9297_v46 = vshrl.u32 %v9143_v18, 16 }
 0x4be   : > { %v9254_v47 = vrot.slane %v9252_v59, 5  ;;  %v9300_v0 = vshll.u32 %v9143_v18, 16  ;;  %v9232_v5 = vrot.slane %v9231_v1, 4  ;;  %v9247_v15 = vsel %vm16548_vm4, %v9242_v37, %v9246_v33  ;;  %v22013_v18 = vld [vmem:[#allocation51_spill] sm:$0xff] }
 0x4bf   : > { %v9334_v1 = vshrl.u32 %v22013_v18, 16  ;;  %v16203_v37 = vld [vmem:[#allocation3 + $0x1b0] sm:$0xff]   ;;  %vm12888_vm10 = vcmask 1043459  }
 0x4c0   : > { %v9237_v33 = vsel %vm16548_vm4, %v9232_v5, %v19654_v17 }
 0x4c4   : > { %15300 = vmatmul.mubr.bf16.vlgmr.msra.gmra.mrb[0].mxu1 %v13976_v58 }
 0x4c5   : > { %15332 = vmatpush3.bf16.msra.mxu1 %v19592_v54  ;;  %15303 = vmatprep.mubr.bf16.mxu1 %v21992_v11  ;;  %v9249_v54 = vshrl.u32 %v9137_v9, 16  ;;  %v9189_v9 = vsel %vm16548_vm4, %v9184_v13, %v19642_v24  ;;  %v9199_v11 = vsel %vm16548_vm4, %v9194_v44, %v9198_v3  ;;  %v22004_v13 = vld [vmem:[#allocation48_spill] sm:$0xff]  ;;  %v9275_v3 = vrot.slane %v9273_v57, 4  ;;  %v22014_v57 = vld [vmem:[#allocation55_spill] sm:$0xff] }
 0x4c6   : > { %15333 = vmatprep.subr.bf16.mxu1 %v16198_v12  ;;  %v19680_v41 = vcombine.low %v9189_v9, %v9199_v11  ;;  %v9306_v44 = vshll.u32 %v22004_v13, 16  ;;  %v9310_v29 = vshrl.u32 %v22004_v13, 16 }
 0x4c7   : > { %v9251_v58 = vrot.slane %v9249_v54, 4  ;;  %v22003_v54 = vld [vmem:[#allocation41_spill] sm:$0xff] }
 0x4c8   : > { %v9282_v59 = vshll.u32 %v22003_v54, 16  ;;  %v9286_v55 = vshrl.u32 %v22003_v54, 16  ;;  %v19700_v9 = vrot.slane %v9306_v44, 5  ;;  %v9312_v11 = vrot.slane %v9310_v29, 4  ;;  %v9152_v29 = vld [vmem:[#allocation2 + $0x78] sm:$0xf] }
 0x4c9   : > { %15334 = vmatpush3.bf16.msra.mxu1 %v16198_v12  ;;  %v9264_v12 = vrot.slane %v9262_v45, 4  ;;  %v9255_v38 = vor.u32 %v9254_v47, %v9251_v58  ;;  %v9213_v45 = vsel %vm16548_vm4, %v9208_v7, %v19644_v48  ;;  %v22007_v48 = vld [vmem:[#allocation14_spill] sm:$0xff]  ;;  %v9358_v54 = vshrl.u32 %v22014_v57, 16 }
 0x4ca   : > { %15335 = vmatprep.subr.bf16.mxu1 %v16199_v16  ;;  %v19687_v50 = vcombine.low %v9213_v45, %v9223_v20  ;;  %v19692_v47 = vrot.slane %v9282_v59, 5  ;;  %v22009_v42 = vcombine.low %v22007_v48, %v22008_v10  ;;  %v9288_v6 = vrot.slane %v9286_v55, 4  ;;  %v9146_v7 = vld [vmem:[#allocation2 + $0x60] sm:$0xf]  ;;  %v22016_v55 = vld [vmem:[#allocation45_spill] sm:$0xff] }
 0x4cb   : > { %v9265_v24 = vor.u32 %v9264_v12, %v19665_v63  ;;  %v9256_v35 = vrot.slane %v9255_v38, 4  ;;  %v9299_v12 = vrot.slane %v9297_v46, 4  ;;  %v9330_v20 = vshll.u32 %v22013_v18, 16  ;;  %v22022_v18 = vld [vmem:[#allocation21_spill] sm:$0xff] }
 0x4cc   : > { %15304 = vmatmul.mubr.bf16.gmra.mrb[4].mxu1 %v21999_v62  ;;  %22005 = vst [vmem:[#allocation37_spill] sm:$0xff] %v19687_v50  ;;  %v9292_v46 = vshll.u32 %v22016_v55, 16  ;;  %v9289_v17 = vor.u32 %v9288_v6, %v19692_v47  ;;  %v9321_v44 = vshrl.u32 %v9146_v7, 16  ;;  %v9313_v5 = vor.u32 %v9312_v11, %v19700_v9  ;;  %v22021_v11 = vld [vmem:[#allocation49_spill] sm:$0xff] }
 0x4cd   : > { %15307 = vmatprep.mubr.bf16.mxu1 %v22002_v32  ;;  %15336 = vmatpush3.bf16.msra.mxu1 %v16199_v16  ;;  %v9276_v16 = vshll.u32 %v9140_v27, 16  ;;  %v9266_v62 = vrot.slane %v9265_v24, 4  ;;  %v9302_v27 = vrot.slane %v9300_v0, 5  ;;  %v22012_v32 = vcombine.low %v22010_v19, %v22011_v56  ;;  %v9149_v0 = vld [vmem:[#allocation2 + $0x6c] sm:$0xf] }
 0x4ce   : > { %15337 = vmatprep.subr.bf16.mxu1 %v16200_v23  ;;  %v9261_v59 = vsel %vm16548_vm4, %v9256_v35, %v19665_v63  ;;  %v16204_v63 = vld [vmem:[#allocation3 + $0x1b8] sm:$0xff]   ;;  %v9345_v35 = vshrl.u32 %v9149_v0, 16  ;;  %v9360_v48 = vrot.slane %v9358_v54, 4  ;;  %v9372_v6 = vshll.u32 %v9152_v29, 16 }
 0x4cf   : > { %v9278_v58 = vrot.slane %v9276_v16, 5  ;;  %v9354_v16 = vshll.u32 %v22014_v57, 16  ;;  %v9303_v13 = vor.u32 %v9302_v27, %v9299_v12  ;;  %v22018_v12 = vld [vmem:[#allocation20_spill] sm:$0xff]  ;;  %v9290_v56 = vrot.slane %v9289_v17, 4 }
 0x4d0   : > { %v9347_v55 = vrot.slane %v9345_v35, 4 }
 0x4d1   : > { %15338 = vmatpush3.bf16.msra.mxu1 %v16200_v23  ;;  %v9268_v23 = vshll.u32 %v22006_v22, 16  ;;  %v9279_v24 = vor.u32 %v9278_v58, %v9275_v3  ;;  %v19719_v22 = vrot.slane %v9330_v20, 5  ;;  %v9348_v3 = vshll.u32 %v9149_v0, 16  ;;  %v22023_v20 = vld [vmem:[#allocation23_spill] sm:$0xff] }
 0x4d2   : > { %15339 = vmatprep.subr.bf16.mxu1 %v16201_v39  ;;  %v19721_v58 = vrot.slane %v9354_v16, 5  ;;  %v22025_v16 = vld [vmem:[#allocation54_spill] sm:$0xff] }
 0x4d3   : > { %v9270_v38 = vrot.slane %v9268_v23, 5  ;;  %v9336_v23 = vrot.slane %v9334_v1, 4  ;;  %v19723_v10 = vrot.slane %v9279_v24, 4  ;;  %v22024_v1 = vcombine.low %v22022_v18, %v22023_v20  ;;  %v19737_v24 = vld [vmem:[#allocation3 + $0x1c0] sm:$0xff]  }
 0x4d4   : > { %15308 = vmatmul.mubr.bf16.gmra.mrb[8].mxu1 %v22009_v42  ;;  %v19725_v42 = vrot.slane %v9292_v46, 5  ;;  %v9340_v54 = vshll.u32 %v22025_v16, 16  ;;  %v9350_v46 = vrot.slane %v9348_v3, 5  ;;  %v9361_v0 = vor.u32 %v9360_v48, %v19721_v58  ;;  %v22029_v20 = vld [vmem:[#allocation25_spill] sm:$0xff] }
 0x4d5   : > { %15311 = vmatprep.mubr.bf16.mxu1 %v22012_v32  ;;  %15340 = vmatpush3.bf16.msra.mxu1 %v16201_v39  ;;  %v19709_v39 = vcombine.low %v9237_v33, %v9247_v15  ;;  %v9271_v45 = vsel %vm16548_vm4, %v9266_v62, %v9270_v38  ;;  %v9324_v15 = vshll.u32 %v9146_v7, 16  ;;  %v9369_v62 = vshrl.u32 %v9152_v29, 16 }
 0x4d6   : > { %15341 = vmatprep.subr.bf16.mxu1 %v16202_v60  ;;  %v19730_v19 = vcombine.low %v9261_v59, %v9271_v45  ;;  %v9304_v32 = vrot.slane %v9303_v13, 4  ;;  %v9316_v7 = vshll.u32 %v22021_v11, 16  ;;  %v9314_v33 = vrot.slane %v9313_v5, 4  ;;  %v9155_v45 = vld [vmem:[#allocation2 + $0x84] sm:$0xf] }
 0x4d7   : > { %22015 = vst [vmem:[#allocation38_spill] sm:$0xff] %v19709_v39  ;;  %v9323_v38 = vrot.slane %v9321_v44, 4  ;;  %v9326_v57 = vrot.slane %v9324_v15, 5  ;;  %v9337_v59 = vor.u32 %v9336_v23, %v19719_v22  ;;  %v9371_v17 = vrot.slane %v9369_v62, 4  ;;  %v9158_v62 = vld [vmem:[#allocation2 + $0x90] sm:$0xf] }
 0x4d8   : > { %22020 = vst [vmem:[#allocation40_spill] sm:$0xff] %v19730_v19  ;;  %v9374_v13 = vrot.slane %v9372_v6, 5  ;;  %v9378_v29 = vshll.u32 %v19370_v43, 16  ;;  %v9285_v44 = vsel %vm16548_vm4, %v19723_v10, %v19692_v47  ;;  %v9295_v5 = vsel %vm16548_vm4, %v9290_v56, %v19725_v42  ;;  %v22027_v56 = vld [vmem:[#allocation24_spill] sm:$0xff] }
 0x4d9   : > { %15342 = vmatpush3.bf16.msra.mxu1 %v16202_v60  ;;  %v22017_v60 = vld [vmem:[#allocation19_spill] sm:$0xff]  ;;  %v9309_v15 = vsel %vm16548_vm4, %v9304_v32, %v19700_v9  ;;  %v9318_v23 = vrot.slane %v9316_v7, 5  ;;  %v9327_v35 = vor.u32 %v9326_v57, %v9323_v38  ;;  %v9364_v3 = vshll.u32 %v19375_v8, 16 }
 0x4da   : > { %15343 = vmatprep.subr.bf16.mxu1 %v16203_v37  ;;  %v22019_v27 = vcombine.low %v22017_v60, %v22018_v12  ;;  %v9393_v48 = vshrl.u32 %v9155_v45, 16  ;;  %v9338_v10 = vrot.slane %v9337_v59, 4  ;;  %v9342_v6 = vrot.slane %v9340_v54, 5 }
 0x4db   : > { %v9319_v47 = vsel %vm16548_vm4, %v9314_v33, %v9318_v23  ;;  %v9351_v42 = vor.u32 %v9350_v46, %v9347_v55  ;;  %v9362_v60 = vrot.slane %v9361_v0, 4  ;;  %v9375_v12 = vor.u32 %v9374_v13, %v9371_v17  ;;  %v22032_v46 = vld [vmem:[#allocation64_spill] sm:$0xff] }
 0x4dc   : > { %15312 = vmatmul.mubr.bf16.gmra.mrb[12].mxu1 %v22019_v27  ;;  %v19757_v27 = vrot.slane %v9378_v29, 5  ;;  %v9402_v8 = vshll.u32 %v19394_v2, 16  ;;  %v9406_v11 = vshrl.u32 %v19394_v2, 16  ;;  %v9417_v7 = vshrl.u32 %v9158_v62, 16  ;;  %v22033_v29 = vld [vmem:[#allocation58_spill] sm:$0xff] }
 0x4dd   : > { %15315 = vmatprep.mubr.bf16.mxu1 %v22024_v1  ;;  %15344 = vmatpush3.bf16.msra.mxu1 %v16203_v37  ;;  %v9382_v37 = vshrl.u32 %v19370_v43, 16  ;;  %v9396_v43 = vshll.u32 %v9155_v45, 16  ;;  %v9420_v18 = vshll.u32 %v9158_v62, 16  ;;  %v22030_v1 = vld [vmem:[#allocation26_spill] sm:$0xff]  ;;  %v9328_v38 = vrot.slane %v9327_v35, 4 }
 0x4de   : > { %15345 = vmatprep.subr.bf16.mxu1 %v16204_v63  ;;  %v22031_v33 = vcombine.low %v22029_v20, %v22030_v1  ;;  %v9366_v57 = vrot.slane %v9364_v3, 5  ;;  %v9395_v16 = vrot.slane %v9393_v48, 4  ;;  %v9343_v59 = vsel %vm16548_vm4, %v9338_v10, %v9342_v6  ;;  %v9164_v1 = vld [vmem:[#allocation2 + $0xa8] sm:$0xf] }
 0x4df   : > { %v9384_v9 = vrot.slane %v9382_v37, 4  ;;  %v9398_v54 = vrot.slane %v9396_v43, 5  ;;  %v9352_v55 = vrot.slane %v9351_v42, 4  ;;  %v9426_v0 = vshll.u32 %v22032_v46, 16 }
 0x4e0   : > { %v9430_v45 = vshrl.u32 %v22032_v46, 16  ;;  %v9367_v2 = vsel %vm16548_vm4, %v9362_v60, %v9366_v57  ;;  %v19773_v17 = vrot.slane %v9375_v12, 4  ;;  %v9388_v37 = vshll.u32 %v22033_v29, 16 }
 0x4e1   : > { %15346 = vmatpush3.bf16.msra.mxu1 %v16204_v63  ;;  %v22026_v63 = vld [vmem:[#allocation22_spill] sm:$0xff]  ;;  %v9385_v13 = vor.u32 %v9384_v9, %v19757_v27  ;;  %v19777_v23 = vrot.slane %v9402_v8, 5  ;;  %v9408_v35 = vrot.slane %v9406_v11, 4  ;;  %v9419_v3 = vrot.slane %v9417_v7, 4  ;;  %v22040_v8 = vld [vmem:[#allocation28_spill] sm:$0xff] }
 0x4e2   : > { %15379 = vmatprep.subr.bf16.mxu1 %v19737_v24  ;;  %v22028_v32 = vcombine.low %v22026_v63, %v22027_v56  ;;  %v9422_v48 = vrot.slane %v9420_v18, 5  ;;  %v19779_v43 = vcombine.low %v9285_v44, %v9295_v5  ;;  %v19781_v62 = vcombine.low %v9309_v15, %v9319_v47  ;;  %v9161_v63 = vld [vmem:[#allocation2 + $0x9c] sm:$0xf]  ;;  %v22042_v18 = vld [vmem:[#allocation67_spill] sm:$0xff] }
 0x4e3   : > { %v9333_v10 = vsel %vm16548_vm4, %v9328_v38, %v19719_v22  ;;  %v9399_v6 = vor.u32 %v9398_v54, %v9395_v16  ;;  %v9357_v60 = vsel %vm16548_vm4, %v9352_v55, %v19721_v58  ;;  %v19791_v12 = vrot.slane %v9426_v0, 5  ;;  %v22038_v15 = vld [vmem:[#allocation61_spill] sm:$0xff]  ;;  %v22044_v38 = vld [vmem:[#allocation30_spill] sm:$0xff]  ;;  %v22046_v55 = vld [vmem:[#allocation68_spill] sm:$0xff] }
 0x4e4   : > { %15316 = vmatmul.mubr.bf16.gmra.mrb[16].mxu1 %v22028_v32  ;;  %22034 = vst [vmem:[#allocation39_spill] sm:$0xff] %v19779_v43  ;;  %22035 = vst [vmem:[#allocation10_spill] sm:$0xff] %v19781_v62  ;;  %v19786_v42 = vcombine.low %v9333_v10, %v9343_v59  ;;  %v9432_v9 = vrot.slane %v9430_v45, 4  ;;  %v19793_v56 = vcombine.low %v9357_v60, %v9367_v2  ;;  %v9386_v44 = vrot.slane %v9385_v13, 4  ;;  %v22039_v32 = vld [vmem:[#allocation27_spill] sm:$0xff] }
 0x4e5   : > { %15319 = vmatprep.mubr.bf16.mxu1 %v22031_v33  ;;  %v9390_v5 = vrot.slane %v9388_v37, 5  ;;  %v9412_v47 = vshll.u32 %v22038_v15, 16  ;;  %v22041_v22 = vcombine.low %v22039_v32, %v22040_v8  ;;  %v9381_v11 = vsel %vm16548_vm4, %v19773_v17, %v19757_v27  ;;  %v22043_v33 = vld [vmem:[#allocation29_spill] sm:$0xff]  ;;  %v9167_v10 = vld [vmem:[#allocation2 + $0xb4] sm:$0xf] }
 0x4e6   : > { %22036 = vst [vmem:[#allocation11_spill] sm:$0xff] %v19786_v42  ;;  %22037 = vst [vmem:[#allocation12_spill] sm:$0xff] %v19793_v56  ;;  %v9409_v58 = vor.u32 %v9408_v35, %v19777_v23  ;;  %v9423_v7 = vor.u32 %v9422_v48, %v9419_v3  ;;  %v9436_v20 = vshll.u32 %v22042_v18, 16  ;;  %v22045_v57 = vcombine.low %v22043_v33, %v22044_v38  ;;  %v22047_v18 = vld [vmem:[#allocation31_spill] sm:$0xff] }
 0x4e7   : > { %v19808_v16 = vrot.slane %v9399_v6, 4  ;;  %v9441_v54 = vshrl.u32 %v9161_v63, 16  ;;  %v9444_v59 = vshll.u32 %v9161_v63, 16  ;;  %v9450_v46 = vshll.u32 %v22046_v55, 16 }
 0x4e8   : > { %v9433_v0 = vor.u32 %v9432_v9, %v19791_v12  ;;  %v9454_v27 = vshrl.u32 %v22046_v55, 16  ;;  %v9474_v45 = vshll.u32 %v19445_v52, 16  ;;  %v9478_v2 = vshrl.u32 %v19445_v52, 16 }
 0x4e9   : > { %v9391_v17 = vsel %vm16548_vm4, %v9386_v44, %v9390_v5  ;;  %v19817_v13 = vrot.slane %v9412_v47, 5  ;;  %v9465_v29 = vshrl.u32 %v9164_v1, 16  ;;  %v9468_v37 = vshll.u32 %v9164_v1, 16  ;;  %v9170_v44 = vld [vmem:[#allocation2 + $0xc0] sm:$0xf] }
 0x4ea   : > { %v19819_v35 = vrot.slane %v9409_v58, 4  ;;  %v19821_v3 = vrot.slane %v9423_v7, 4  ;;  %v19823_v48 = vrot.slane %v9436_v20, 5  ;;  %v9498_v6 = vshll.u32 %v19457_v21, 16  ;;  %v22048_v20 = vld [vmem:[#allocation32_spill] sm:$0xff] }
 0x4eb   : > { %v19826_v60 = vrot.slane %v9441_v54, 4  ;;  %v19828_v9 = vrot.slane %v9444_v59, 5  ;;  %v19830_v52 = vrot.slane %v9450_v46, 5  ;;  %v9502_v63 = vshrl.u32 %v19457_v21, 16  ;;  %v22050_v54 = vld [vmem:[#allocation33_spill] sm:$0xff]  ;;  %v22051_v59 = vld [vmem:[#allocation34_spill] sm:$0xff] }
 0x4ec   : > { %15320 = vmatmul.mubr.bf16.gmra.mrb[20].mxu1 %v22041_v22  ;;  %v19833_v5 = vrot.slane %v9433_v0, 4  ;;  %v9456_v15 = vrot.slane %v9454_v27, 4  ;;  %v19835_v47 = vrot.slane %v9474_v45, 5  ;;  %v9480_v32 = vrot.slane %v9478_v2, 4  ;;  %v12746_v2 = vld [vmem:[%s21616_s5] sm:$0x3] }
 0x4ed   : > { %15323 = vmatprep.mubr.bf16.mxu1 %v22045_v57  ;;  %v19837_v8 = vrot.slane %v9465_v29, 4  ;;  %v19839_v22 = vrot.slane %v9468_v37, 5  ;;  %v9489_v58 = vshrl.u32 %v9167_v10, 16  ;;  %v9492_v7 = vshll.u32 %v9167_v10, 16  ;;  %v5048_v29 = vld [vmem:[#allocation2 + $0xd4] sm:$0x1]  ;;  %16006 = vmatprep.subr.msk.bf16.mxu0 %vm831_vm2, %v12746_v2 }
 0x4ee   : > { %v22049_v1 = vcombine.low %v22047_v18, %v22048_v20  ;;  %v19844_v33 = vrot.slane %v9498_v6, 5  ;;  %v9513_v21 = vshrl.u32 %v9170_v44, 16  ;;  %v9522_v38 = vshll.u32 %v19473_v28, 16  ;;  %v9173_v6 = vld [vmem:[#allocation2 + $0xcc] sm:$0xf] }
 0x4ef   : > { %v9526_v57 = vshrl.u32 %v19473_v28, 16  ;;  %v22052_v55 = vcombine.low %v22050_v54, %v22051_v59  ;;  %v19851_v46 = vcombine.low %v9381_v11, %v9391_v17  ;;  %v9504_v27 = vrot.slane %v9502_v63, 4  ;;  %v9174_v18 = vld [vmem:[#allocation2 + $0xd0] sm:$0xf]  ;;  %v16270_v17 = vld [vmem:[#allocation2 + $0xa4] sm:$0x1] }
 0x4f0   : > { %v9516_v45 = vshll.u32 %v9170_v44, 16  ;;  %v9457_v28 = vor.u32 %v9456_v15, %v19830_v52  ;;  %v9481_v37 = vor.u32 %v9480_v32, %v19835_v47  ;;  %v13015_v11 = vsel %vm831_vm2, %v12746_v2, 0 }
 0x4f1   : > { %22053 = vst [vmem:[#allocation13_spill] sm:$0xff] %v19851_v46  ;;  %v5049_v10 = vsel %vm18259_vm12, 0, %v5048_v29  ;;  %15476 = vmatpush3.bf16.msra.mxu0 %v13015_v11  ;;  %v9537_v63 = vshrl.u32 %v9173_v6, 16  ;;  %v9540_v44 = vshll.u32 %v9173_v6, 16  ;;  %v9546_v20 = vshll.u32 %v9174_v18, 16  ;;  %v16226_v46 = vld [vmem:[#allocation2 + $0xc0] sm:$0xff]  }
 0x4f2   : > { %5050 = vst [vmem:[#allocation2 + $0xd4] sm:$0x1] %v5049_v10  ;;  %v9491_v54 = vrot.slane %v9489_v58, 4  ;;  %v9494_v59 = vrot.slane %v9492_v7, 5  ;;  %v19866_v15 = vrot.slane %v9522_v38, 5  ;;  %v9528_v32 = vrot.slane %v9526_v57, 4 }
 0x4f3   : > { %v9542_v4 = vrot.slane %v9540_v44, 5  ;;  %v19868_v0 = vrot.slane %v9546_v20, 5  ;;  %v9460_v29 = vshll.u32 %v16270_v17, 16  ;;  %v9505_v61 = vor.u32 %v9504_v27, %v19844_v33  ;;  %v16271_v57 = vld [vmem:[#allocation2 + $0xb0] sm:$0x1] }
 0x4f4   : > { %15324 = vmatmul.mubr.bf16.gmra.mrb[24].mxu1 %v22049_v1  ;;  %v9550_v1 = vshrl.u32 %v9174_v18, 16  ;;  %v9515_v11 = vrot.slane %v9513_v21, 4  ;;  %v9518_v10 = vrot.slane %v9516_v45, 5  ;;  %v9415_v58 = vsel %vm16548_vm4, %v19819_v35, %v19817_v13  ;;  %v22055_v18 = vld [vmem:[#allocation35_spill] sm:$0xff] }
 0x4f5   : > { %15327 = vmatprep.mubr.bf16.mxu1 %v22052_v55  ;;  %v9539_v55 = vrot.slane %v9537_v63, 4  ;;  %v9447_v7 = vor.u32 %v19828_v9, %v19826_v60  ;;  %v9471_v38 = vor.u32 %v19839_v22, %v19837_v8  ;;  %v9484_v6 = vshll.u32 %v16271_v57, 16  ;;  %v22056_v63 = vld [vmem:[#allocation36_spill] sm:$0xff] }
 0x4f6   : > { %v9552_v2 = vrot.slane %v9550_v1, 4  ;;  %v22057_v44 = vcombine.low %v22055_v18, %v22056_v63  ;;  %v9458_v21 = vrot.slane %v9457_v28, 4  ;;  %v9495_v27 = vor.u32 %v9494_v59, %v9491_v54 }
 0x4f7   : > { %v9508_v45 = vshll.u32 %v19471_v31, 16  ;;  %v9529_v20 = vor.u32 %v9528_v32, %v19866_v15  ;;  %v9439_v13 = vsel %vm16548_vm4, %v19833_v5, %v19823_v48  ;;  %v9482_v35 = vrot.slane %v9481_v37, 4 }
 0x4f8   : > { %v9543_v60 = vor.u32 %v9542_v4, %v9539_v55  ;;  %v9553_v9 = vor.u32 %v9552_v2, %v19868_v0  ;;  %v9462_v8 = vrot.slane %v9460_v29, 5  ;;  %v9506_v22 = vrot.slane %v9505_v61, 4  ;;  %v16207_v55 = vld [vmem:[#allocation2 + $0x24] sm:$0xff]  }
 0x4f9   : > { %v9519_v1 = vor.u32 %v9518_v10, %v9515_v11  ;;  %v9532_v28 = vshll.u32 %v19496_v51, 16  ;;  %v9175_v54 = vld [vmem:[#allocation2 + $0xd4] sm:$0x1]  ;;  %v9448_v59 = vrot.slane %v9447_v7, 4  ;;  %v9472_v31 = vrot.slane %v9471_v38, 4  ;;  %v16209_v2 = vld [vmem:[#allocation3 + $0x1c8] sm:$0xff]  }
 0x4fa   : > { %v9486_v17 = vrot.slane %v9484_v6, 5  ;;  %v9556_v32 = vshll.u32 %v9175_v54, 16  ;;  %v9496_v57 = vrot.slane %v9495_v27, 4  ;;  %v9510_v18 = vrot.slane %v9508_v45, 5  ;;  %v16208_v7 = vld [vmem:[#allocation2 + $0x30] sm:$0xff]  }
 0x4fb   : > { %v9530_v48 = vrot.slane %v9529_v20, 4  ;;  %v9544_v5 = vrot.slane %v9543_v60, 4  ;;  %v9554_v37 = vrot.slane %v9553_v9, 4  ;;  %v9429_v51 = vsel %vm16548_vm4, %v19821_v3, %v19791_v12  ;;  %v19934_v45 = vld [vmem:[%s16507_s21 + $0x14] sm:$0x1]  ;;  %v14355_v20 = vld [vmem:[%s16507_s21 + $0x18] sm:$0xff]  }
 0x4fc   : > { %15328 = vmatmul.mubr.bf16.gmra.mrb[28].mxu1 %v22057_v44  ;;  %v9487_v4 = vsel %vm16548_vm4, %v9482_v35, %v9486_v17  ;;  %v9558_v61 = vrot.slane %v9556_v32, 5  ;;  %v9511_v29 = vsel %vm16548_vm4, %v9506_v22, %v9510_v18  ;;  %v9520_v11 = vrot.slane %v9519_v1, 4  ;;  %v19941_v35 = vld [vmem:[%s16507_s21 + $0x20] sm:$0x1]  ;;  %v14356_v54 = vld [vmem:[%s16507_s21 + $0x30] sm:$0xff]  }
 0x4fd   : > { %15347 = vmatprep.mubr.bf16.mxu1 %v16205_v25  ;;  %v9463_v25 = vsel %vm16548_vm4, %v9458_v21, %v9462_v8  ;;  %v9534_v10 = vrot.slane %v9532_v28, 5  ;;  %v22058_v38 = vsel %vm16548_vm4, %v19808_v16, %v19777_v23  ;;  %v19907_v63 = vcombine.low %v9429_v51, %v9439_v13  ;;  %v19949_v28 = vld [vmem:[%s16507_s21 + $0x2c] sm:$0x1] }
 0x4fe   : > { %v19905_v6 = vcombine.low %v22058_v38, %v9415_v58  ;;  %v9453_v12 = vsel %vm16548_vm4, %v9448_v59, %v19830_v52  ;;  %v9477_v3 = vsel %vm16548_vm4, %v9472_v31, %v19835_v47  ;;  %v9501_v16 = vsel %vm16548_vm4, %v9496_v57, %v19844_v33  ;;  %v14088_v33 = vld [vmem:[%s16507_s21 + $0xc] sm:$0xff]   ;;  %v19953_v59 = vld [vmem:[%s16507_s21 + $0x38] sm:$0x1] }
 0x4ff   : > { %22060 = vst [vmem:[#allocation48_spill] sm:$0xff] %v19907_v63  ;;  %v19915_v44 = vcombine.low %v9453_v12, %v9463_v25  ;;  %v19917_v23 = vcombine.low %v9477_v3, %v9487_v4  ;;  %v9535_v58 = vsel %vm16548_vm4, %v9530_v48, %v9534_v10  ;;  %v19925_v52 = vcombine.low %v9501_v16, %v9511_v29 }
 0x500   : > { %22059 = vst [vmem:[#allocation41_spill] sm:$0xff] %v19905_v6  ;;  %v9549_v47 = vsel %vm16548_vm4, %v9544_v5, %v19868_v0  ;;  %v9559_v21 = vsel %vm16548_vm4, %v9554_v37, %v9558_v61  ;;  %v10381_v27 = vlaneseq  ;;  %v9525_v13 = vsel %vm16548_vm4, %v9520_v11, %v19866_v15  ;;  %v14094_v0 = vld [vmem:[%s16507_s21 + $0x24] sm:$0xff]   ;;  %v16210_v5 = vld [vmem:[#allocation2 + $0x3c] sm:$0xff]   ;;  %v16215_v37 = vld [vmem:[#allocation3 + $0x1d8] sm:$0xff]  }
 0x501   : > { %22061 = vst [vmem:[#allocation44_spill] sm:$0xff] %v19915_v44  ;;  %22062 = vst [vmem:[#allocation14_spill] sm:$0xff] %v19917_v23  ;;  %v10819_v60 = vunpack.c.l.bf16 %v14088_v33  ;;  %v10820_v9 = vunpack.c.h.bf16 %v14088_v33  ;;  %v19944_v8 = vcombine.low %v9525_v13, %v9535_v58  ;;  %v14325_v22 = vunpack.c.l.bf16 %v14355_v20  ;;  %v14100_v58 = vld [vmem:[%s16507_s21 + $0x3c] sm:$0xff]  }
 0x502   : > { %22063 = vst [vmem:[#allocation15_spill] sm:$0xff] %v19925_v52  ;;  %v19946_v1 = vunpack.c.h.bf16 %v14355_v20  ;;  %v19955_v31 = vunpack.c.l.bf16 %v14094_v0  ;;  %v19957_v17 = vcombine.low %v9549_v47, %v9559_v21  ;;  %v19959_v26 = vunpack.c.l.bf16 %v14356_v54  ;;  %v14357_v47 = vld [vmem:[%s16507_s21 + $0x48] sm:$0xff]  }
 0x503   : > { %22064 = vst [vmem:[#allocation17_spill] sm:$0xff] %v19944_v8  ;;  %v19961_v15 = vunpack.c.h.bf16 %v14356_v54  ;;  %v19963_v32 = vunpack.c.h.bf16 %v14094_v0  ;;  %v19965_v25 = vshrl.u32 %v10381_v27, 7  ;;  %v10821_v57 = vunpack.c.l.bf16 %v19934_v45  ;;  %v19987_v27 = vld [vmem:[%s16507_s21 + $0x44] sm:$0x1]  ;;  %v16218_v45 = vld [vmem:[#allocation3 + $0x1e0] sm:$0xff]   ;;  %v16223_v52 = vld [vmem:[#allocation2 + $0xa8] sm:$0xff]  }
 0x504   : > { %15348 = vmatmul.mubr.bf16.vlgmr.msra.gmra.mrb[0].mxu1 %v16207_v55  ;;  %22065 = vst [vmem:[#allocation18_spill] sm:$0xff] %v19957_v17  ;;  %v10824_v18 = vunpack.c.l.bf16 %v19941_v35  ;;  %v16374_v48 = vmov 1983009808   ;;  %v10827_v61 = vunpack.c.l.bf16 %v19949_v28  ;;  %v10915_v51 = vcombine.high %v10819_v60, %v10819_v60  ;;  %22068 = vst [vmem:[#allocation45_spill] sm:$0xff] %v19987_v27  ;;  %v16214_v0 = vld [vmem:[#allocation2 + $0x60] sm:$0xff]  }
 0x505   : > { %15380 = vmatpush3.bf16.msra.mxu1 %v19737_v24  ;;  %15351 = vmatprep.mubr.bf16.mxu1 %v16208_v7  ;;  %v16212_v24 = vld [vmem:[#allocation3 + $0x1d0] sm:$0xff]   ;;  %22066 = vst [vmem:[#allocation51_spill] sm:$0xff] %v19965_v25  ;;  %v10917_v4 = vunpack.c.l.s4 %v16374_v48  ;;  %v10932_v29 = vcombine.high %v10820_v9, %v10820_v9  ;;  %v10956_v10 = vcombine.high %v14325_v22, %v14325_v22  ;;  %vm11574_vm2 = vcmask 1044484  }
 0x506   : > { %15381 = vmatprep.subr.bf16.mxu1 %v16209_v2  ;;  %v10973_v7 = vcombine.high %v19946_v1, %v19946_v1  ;;  %v10997_v38 = vcombine.high %v19955_v31, %v19955_v31  ;;  %v11014_v12 = vcombine.high %v19963_v32, %v19963_v32  ;;  %v11038_v3 = vcombine.high %v19959_v26, %v19959_v26  ;;  %vm11575_vm6 = vmor %vm20038_vm5, %vm11574_vm2 }
 0x507   : > { %v10918_v11 = vunpack.c.0.s8 %v10917_v4  ;;  %v11055_v16 = vcombine.high %v19961_v15, %v19961_v15  ;;  %vm11576_vm4 = vcmask 1046534   ;;  %v19989_v33 = vunpack.c.l.bf16 %v14357_v47 }
 0x508   : > { %v19991_v20 = vunpack.c.h.bf16 %v14357_v47  ;;  %v19993_v13 = vunpack.c.l.bf16 %v14100_v58  ;;  %v19995_v35 = vunpack.c.h.bf16 %v14100_v58  ;;  %vm20102_vm8 = vmor %vm11575_vm6, %vm11576_vm4  ;;  %vm12898_vm12 = vcmask 1047559  }
 0x509   : > { %15382 = vmatpush3.bf16.msra.mxu1 %v16209_v2  ;;  %v16211_v2 = vld [vmem:[#allocation2 + $0x48] sm:$0xff]   ;;  %v19984_v21 = vsub.s32 %v10918_v11, %v19965_v25  ;;  %22069 = vst [vmem:[#allocation19_spill] sm:$0xff] %v19989_v33  ;;  %v16221_v11 = vld [vmem:[#allocation3 + $0x1e8] sm:$0xff]  }
 0x50a   : > { %15383 = vmatprep.subr.bf16.mxu1 %v16212_v24  ;;  %22070 = vst [vmem:[#allocation20_spill] sm:$0xff] %v19991_v20  ;;  %22071 = vst [vmem:[#allocation49_spill] sm:$0xff] %v19993_v13 }
 0x50b   : > { %22067 = vst [vmem:[#allocation55_spill] sm:$0xff] %v19984_v21  ;;  %22072 = vst [vmem:[#allocation21_spill] sm:$0xff] %v19995_v35  ;;  %v20000_v28 = vrot.slane %v10915_v51, %v19984_v21  ;;  %v20003_v54 = vrot.slane %v10820_v9, %v19984_v21  ;;  %v20006_v48 = vrot.slane %v10932_v29, %v19984_v21 }
 0x50c   : > { %15352 = vmatmul.mubr.bf16.gmra.mrb[4].mxu1 %v16210_v5  ;;  %v20009_v4 = vrot.slane %v10821_v57, %v19984_v21  ;;  %v20012_v5 = vrot.slane %v14325_v22, %v19984_v21  ;;  %v16213_v22 = vld [vmem:[#allocation2 + $0x54] sm:$0xff]   ;;  %v20043_v55 = vrot.slane %v10824_v18, %v19984_v21  ;;  %v20047_v25 = vrot.slane %v19955_v31, %v19984_v21 }
 0x50d   : > { %15355 = vmatprep.mubr.bf16.mxu1 %v16211_v2  ;;  %15384 = vmatpush3.bf16.msra.mxu1 %v16212_v24  ;;  %v10922_v24 = vrot.slane %v10819_v60, %v19984_v21  ;;  %v20015_v2 = vrot.slane %v10956_v10, %v19984_v21  ;;  %v20019_v60 = vrot.slane %v19946_v1, %v19984_v21  ;;  %v11589_v1 = vrot.slane %v20003_v54, 7 }
 0x50e   : > { %15385 = vmatprep.subr.bf16.mxu1 %v16215_v37  ;;  %v10931_v9 = vcombine.high %v20000_v28, %v20000_v28  ;;  %v10947_v29 = vcombine.high %v20003_v54, %v20003_v54  ;;  %v10948_v57 = vcombine.high %v20006_v48, %v20006_v48  ;;  %v10971_v10 = vcombine.high %v20012_v5, %v20012_v5 }
 0x50f   : > { %v10930_v51 = vcombine.high %v10922_v24, %v10922_v24  ;;  %v20054_v58 = vrot.slane %v19963_v32, %v19984_v21  ;;  %v20059_v36 = vrot.slane %v11014_v12, %v19984_v21  ;;  %v20062_v18 = vrot.slane %v10827_v61, %v19984_v21  ;;  %v16224_v12 = vld [vmem:[#allocation3 + $0x1f0] sm:$0xff]  }
 0x510   : > { %v20066_v31 = vrot.slane %v19959_v26, %v19984_v21  ;;  %v14136_v61 = vrot.slane %v10922_v24, 9  ;;  %v22075_v24 = vunpack.c.l.bf16 %v19953_v59  ;;  %v11583_v26 = vrot.slane %v20000_v28, 7 }
 0x511   : > { %15386 = vmatpush3.bf16.msra.mxu1 %v16215_v37  ;;  %v20032_v37 = vrot.slane %v10973_v7, %v19984_v21  ;;  %v20050_v7 = vrot.slane %v10997_v38, %v19984_v21  ;;  %v20086_v38 = vrot.slane %v19961_v15, %v19984_v21  ;;  %v11580_v32 = vrot.slane %v10930_v51, 7 }
 0x512   : > { %15387 = vmatprep.subr.bf16.mxu1 %v16218_v45  ;;  %v20094_v47 = vrot.slane %v22075_v24, %v19984_v21  ;;  %v22076_v15 = vmov 0  ;;  %v11585_v24 = vrot.slane %v11583_v26, 2  ;;  %v11591_v53 = vrot.slane %v11589_v1, 2 }
 0x513   : > { %v22077_v15 = vsel %vm20102_vm8, 4294967295, %v22076_v15  ;;  %v20111_v28 = vsel %vm20102_vm8, %v14136_v61, %v11580_v32  ;;  %v11582_v51 = vrot.slane %v11580_v32, 2  ;;  %v11592_v34 = vrot.slane %v10947_v29, 7 }
 0x514   : > { %15356 = vmatmul.mubr.bf16.gmra.mrb[8].mxu1 %v16213_v22  ;;  %v20089_v22 = vrot.slane %v11055_v16, %v19984_v21  ;;  %22078 = vst [vmem:[#allocation23_spill] sm:$0xff] %v22077_v15  ;;  %v11586_v16 = vrot.slane %v10931_v9, 7  ;;  %v11595_v9 = vrot.slane %v20006_v48, 7  ;;  %v11598_v61 = vrot.slane %v10948_v57, 7 }
 0x515   : > { %15359 = vmatprep.mubr.bf16.mxu1 %v16214_v0  ;;  %15388 = vmatpush3.bf16.msra.mxu1 %v16218_v45  ;;  %v20080_v45 = vrot.slane %v11038_v3, %v19984_v21  ;;  %v16216_v3 = vld [vmem:[#allocation2 + $0x6c] sm:$0xff]   ;;  %v20116_v54 = vsel %vm20102_vm8, %v11582_v51, %v11583_v26  ;;  %v11601_v32 = vrot.slane %v20009_v4, 7  ;;  %v20129_v48 = vsel %vm20102_vm8, %v11591_v53, %v11592_v34  ;;  %v20133_v4 = vld [vmem:[#allocation3 + $0x200] sm:$0xff]  }
 0x516   : > { %15389 = vmatprep.subr.bf16.mxu1 %v16221_v11  ;;  %v16227_v0 = vld [vmem:[#allocation3 + $0x1f8] sm:$0xff]   ;;  %v11588_v49 = vrot.slane %v11586_v16, 2  ;;  %v11594_v29 = vrot.slane %v11592_v34, 2  ;;  %v11597_v14 = vrot.slane %v11595_v9, 2  ;;  %v11600_v26 = vrot.slane %v11598_v61, 2  ;;  %22079 = vst [vmem:[#allocation54_spill] sm:$0xff] %v20133_v4 }
 0x517   : > { %v11605_v51 = vrot.slane %v10971_v10, 7  ;;  %v11608_v57 = vrot.slane %v20015_v2, 7  ;;  %v11639_v30 = vrot.slane %v20054_v58, 7  ;;  %v11664_v8 = vrot.slane %v20086_v38, 7 }
 0x518   : > { %v20125_v59 = vsel %vm20102_vm8, %v11588_v49, %v11589_v1  ;;  %v20137_v49 = vsel %vm20102_vm8, %v11594_v29, %v11595_v9  ;;  %v20141_v53 = vsel %vm20102_vm8, %v11597_v14, %v11598_v61  ;;  %v20149_v10 = vsel %vm20102_vm8, %v11600_v26, %v11601_v32 }
 0x519   : > { %15390 = vmatpush3.bf16.msra.mxu1 %v16221_v11  ;;  %v20120_v11 = vsel %vm20102_vm8, %v11585_v24, %v11586_v16  ;;  %v14137_v16 = vrot.slane %v20012_v5, 9  ;;  %v11614_v5 = vrot.slane %v20019_v60, 7  ;;  %v22081_v14 = vcombine.high %v20019_v60, %v20019_v60 }
 0x51a   : > { %15391 = vmatprep.subr.bf16.mxu1 %v16224_v12  ;;  %v22082_v26 = vcombine.high %v20032_v37, %v20032_v37  ;;  %v11670_v23 = vrot.slane %v20089_v22, 7  ;;  %v14158_v44 = vrot.slane %v20141_v53, 9  ;;  %v14159_v63 = vrot.slane %v20149_v10, 9 }
 0x51b   : > { %v20153_v1 = vsel %vm20102_vm8, %v14137_v16, %v11605_v51  ;;  %v11616_v9 = vrot.slane %v11614_v5, 2  ;;  %v11617_v61 = vrot.slane %v22081_v14, 7 }
 0x51c   : > { %15360 = vmatmul.mubr.bf16.gmra.mrb[12].mxu1 %v16216_v3  ;;  %v11610_v3 = vrot.slane %v11608_v57, 2  ;;  %v11623_v16 = vrot.slane %v22082_v26, 7  ;;  %v11633_v26 = vrot.slane %v20050_v7, 7 }
 0x51d   : > { %15363 = vmatprep.mubr.bf16.mxu1 %v16217_v40  ;;  %15392 = vmatpush3.bf16.msra.mxu1 %v16224_v12  ;;  %v22080_v40 = vcombine.high %v20015_v2, %v20015_v2  ;;  %v11607_v12 = vrot.slane %v11605_v51, 2  ;;  %v11620_v2 = vrot.slane %v20032_v37, 7  ;;  %v11626_v51 = vrot.slane %v20043_v55, 7 }
 0x51e   : > { %15393 = vmatprep.subr.bf16.mxu1 %v16227_v0  ;;  %v14138_v37 = vrot.slane %v20047_v25, 9  ;;  %v22083_v55 = vcombine.high %v20047_v25, %v20047_v25 }
 0x51f   : > { %v11611_v34 = vrot.slane %v22080_v40, 7  ;;  %v20161_v29 = vsel %vm20102_vm8, %v11607_v12, %v11608_v57  ;;  %v16219_v40 = vld [vmem:[#allocation2 + $0x84] sm:$0xff]   ;;  %v11619_v57 = vrot.slane %v11617_v61, 2  ;;  %v16220_v12 = vld [vmem:[#allocation2 + $0x90] sm:$0xff]  }
 0x520   : > { %v11630_v14 = vrot.slane %v22083_v55, 7 }
 0x521   : > { %v11613_v24 = vrot.slane %v11611_v34, 2  ;;  %15394 = vmatpush3.bf16.msra.mxu1 %v16227_v0  ;;  %v20165_v32 = vsel %vm20102_vm8, %v11610_v3, %v11611_v34  ;;  %v20178_v0 = vsel %vm20102_vm8, %v11616_v9, %v11617_v61  ;;  %v11622_v34 = vrot.slane %v11620_v2, 2 }
 0x522   : > { %15427 = vmatprep.subr.bf16.mxu1 %v20133_v4  ;;  %v11625_v3 = vrot.slane %v11623_v16, 2  ;;  %v22084_v9 = vcombine.high %v20050_v7, %v20050_v7  ;;  %v14164_v15 = vrot.slane %v20178_v0, 9 }
 0x523   : > { %v20174_v60 = vsel %vm20102_vm8, %v11613_v24, %v11614_v5  ;;  %v20187_v5 = vsel %vm20102_vm8, %v11619_v57, %v11620_v2  ;;  %v20191_v24 = vsel %vm20102_vm8, %v11622_v34, %v11623_v16  ;;  %v11632_v2 = vrot.slane %v11630_v14, 2 }
 0x524   : > { %15364 = vmatmul.mubr.bf16.gmra.mrb[16].mxu1 %v16219_v40  ;;  %v11636_v61 = vrot.slane %v22084_v9, 7  ;;  %v20199_v25 = vsel %vm20102_vm8, %v11625_v3, %v11626_v51  ;;  %v20203_v40 = vsel %vm20102_vm8, %v14138_v37, %v11630_v14  ;;  %v11635_v57 = vrot.slane %v11633_v26, 2 }
 0x525   : > { %15367 = vmatprep.mubr.bf16.mxu1 %v16220_v12  ;;  %v11641_v16 = vrot.slane %v11639_v30, 2  ;;  %v22085_v34 = vcombine.high %v20054_v58, %v20054_v58  ;;  %v11645_v9 = vrot.slane %v20059_v36, 7  ;;  %v20211_v12 = vsel %vm20102_vm8, %v11632_v2, %v11633_v26 }
 0x526   : > { %v11638_v55 = vrot.slane %v11636_v61, 2  ;;  %v20215_v51 = vsel %vm20102_vm8, %v11635_v57, %v11636_v61  ;;  %v22086_v3 = vcombine.high %v20059_v36, %v20059_v36  ;;  %v11651_v14 = vrot.slane %v20062_v18, 7  ;;  %v16222_v18 = vld [vmem:[#allocation2 + $0x9c] sm:$0xff]  }
 0x527   : > { %v11642_v7 = vrot.slane %v22085_v34, 7  ;;  %v11647_v2 = vrot.slane %v11645_v9, 2  ;;  %v14139_v61 = vrot.slane %v20066_v31, 9  ;;  %v22088_v57 = vcombine.high %v20066_v31, %v20066_v31 }
 0x528   : > { %v11648_v37 = vrot.slane %v22086_v3, 7  ;;  %v20223_v58 = vsel %vm20102_vm8, %v11638_v55, %v11639_v30  ;;  %v11658_v3 = vrot.slane %v20080_v45, 7  ;;  %v14163_v6 = vrot.slane %v20174_v60, 9 }
 0x529   : > { %v20227_v34 = vsel %vm20102_vm8, %v11641_v16, %v11642_v7  ;;  %v11644_v26 = vrot.slane %v11642_v7, 2  ;;  %v11655_v36 = vrot.slane %v22088_v57, 7  ;;  %v22091_v16 = vcombine.high %v20080_v45, %v20080_v45 }
 0x52a   : > { %22087 = vst [vmem:[#allocation22_spill] sm:$0xff] %v20227_v34  ;;  %v11650_v17 = vrot.slane %v11648_v37, 2  ;;  %v20240_v55 = vsel %vm20102_vm8, %v11647_v2, %v11648_v37  ;;  %v11666_v2 = vrot.slane %v11664_v8, 2  ;;  %v22094_v45 = vcombine.high %v20086_v38, %v20086_v38 }
 0x52b   : > { %v20236_v30 = vsel %vm20102_vm8, %v11644_v26, %v11645_v9  ;;  %22090 = vst [vmem:[#allocation25_spill] sm:$0xff] %v20240_v55  ;;  %v11661_v7 = vrot.slane %v22091_v16, 7  ;;  %v20252_v57 = vsel %vm20102_vm8, %v14139_v61, %v11655_v36  ;;  %v11657_v9 = vrot.slane %v11655_v36, 2 }
 0x52c   : > { %22089 = vst [vmem:[#allocation24_spill] sm:$0xff] %v20236_v30  ;;  %v20248_v31 = vsel %vm20102_vm8, %v11650_v17, %v11651_v14  ;;  %22093 = vst [vmem:[#allocation64_spill] sm:$0xff] %v20252_v57  ;;  %v11660_v26 = vrot.slane %v11658_v3, 2  ;;  %15368 = vmatmul.mubr.bf16.gmra.mrb[20].mxu1 %v16222_v18  ;;  %v11667_v16 = vrot.slane %v22094_v45, 7  ;;  %v22097_v61 = vcombine.high %v20089_v22, %v20089_v22 }
 0x52d   : > { %22092 = vst [vmem:[#allocation26_spill] sm:$0xff] %v20248_v31  ;;  %v11663_v37 = vrot.slane %v11661_v7, 2  ;;  %15371 = vmatprep.mubr.bf16.mxu1 %v16223_v52  ;;  %v20260_v17 = vsel %vm20102_vm8, %v11657_v9, %v11658_v3  ;;  %v11676_v18 = vrot.slane %v20094_v47, 7  ;;  %v11672_v9 = vrot.slane %v11670_v23, 2 }
 0x52e   : > { %22095 = vst [vmem:[#allocation58_spill] sm:$0xff] %v20260_v17  ;;  %v20264_v14 = vsel %vm20102_vm8, %v11660_v26, %v11661_v7  ;;  %v11673_v36 = vrot.slane %v22097_v61, 7  ;;  %v20276_v52 = vsel %vm20102_vm8, %v11666_v2, %v11667_v16  ;;  %v11669_v3 = vrot.slane %v11667_v16, 2 }
 0x52f   : > { %22096 = vst [vmem:[#allocation61_spill] sm:$0xff] %v20264_v14  ;;  %v20272_v38 = vsel %vm20102_vm8, %v11663_v37, %v11664_v8  ;;  %22099 = vst [vmem:[#allocation28_spill] sm:$0xff] %v20276_v52  ;;  %v14152_v7 = vrot.slane %v20111_v28, 9  ;;  %v14153_v26 = vrot.slane %v20116_v54, 9  ;;  %v14154_v22 = vrot.slane %v20120_v11, 9 }
 0x530   : > { %22098 = vst [vmem:[#allocation27_spill] sm:$0xff] %v20272_v38  ;;  %v11675_v45 = vrot.slane %v11673_v36, 2  ;;  %v20283_v47 = vsel %vm20102_vm8, %v11669_v3, %v11670_v23  ;;  %v20287_v8 = vsel %vm20102_vm8, %v11672_v9, %v11673_v36  ;;  %v14155_v37 = vrot.slane %v20125_v59, 9  ;;  %v16225_v23 = vld [vmem:[#allocation2 + $0xb4] sm:$0xff]  }
 0x531   : > { %22100 = vst [vmem:[#allocation67_spill] sm:$0xff] %v20283_v47  ;;  %22101 = vst [vmem:[#allocation29_spill] sm:$0xff] %v20287_v8  ;;  %v14156_v2 = vrot.slane %v20129_v48, 9  ;;  %v14157_v61 = vrot.slane %v20137_v49, 9  ;;  %v14160_v3 = vrot.slane %v20153_v1, 9  ;;  %v14161_v36 = vrot.slane %v20161_v29, 9 }
 0x532   : > { %v20293_v16 = vsel %vm20102_vm8, %v11675_v45, %v11676_v18  ;;  %v14162_v9 = vrot.slane %v20165_v32, 9  ;;  %v14165_v18 = vrot.slane %v20187_v5, 9  ;;  %v14166_v45 = vrot.slane %v20191_v24, 9 }
 0x533   : > { %22102 = vst [vmem:[#allocation30_spill] sm:$0xff] %v20293_v16  ;;  %v14167_v56 = vrot.slane %v20199_v25, 9  ;;  %v14168_v20 = vrot.slane %v20203_v40, 9  ;;  %v14169_v33 = vrot.slane %v20211_v12, 9  ;;  %v14170_v27 = vrot.slane %v20215_v51, 9 }
 0x534   : > { %15372 = vmatmul.mubr.bf16.gmra.mrb[24].mxu1 %v16225_v23  ;;  %v14171_v42 = vrot.slane %v20223_v58, 9  ;;  %v14172_v35 = vrot.slane %v20227_v34, 9  ;;  %v14173_v21 = vrot.slane %v20236_v30, 9  ;;  %v14174_v62 = vrot.slane %v20240_v55, 9  ;;  %v16228_v34 = vld [vmem:[#allocation2 + $0xcc] sm:$0xff]  }
 0x535   : > { %15375 = vmatprep.mubr.bf16.mxu1 %v16226_v46  ;;  %v14175_v13 = vrot.slane %v20248_v31, 9  ;;  %v14176_v43 = vrot.slane %v20252_v57, 9  ;;  %v14177_v23 = vrot.slane %v20260_v17, 9  ;;  %v14178_v19 = vrot.slane %v20264_v14, 9 }
 0x536   : > { %v14179_v39 = vrot.slane %v20272_v38, 9  ;;  %v14180_v4 = vrot.slane %v20276_v52, 9  ;;  %v14181_v46 = vrot.slane %v20283_v47, 9  ;;  %v14182_v50 = vrot.slane %v20287_v8, 9 }
 0x537   : > { %v14183_v30 = vrot.slane %v20293_v16, 9  ;;  %v12490_v55 = vadd.f32 %v14152_v7, %v20111_v28  ;;  %v12491_v31 = vadd.f32 %v14153_v26, %v20116_v54  ;;  %v12492_v57 = vadd.f32 %v14154_v22, %v20120_v11 }
 0x538   : > { %v12493_v17 = vadd.f32 %v14155_v37, %v20125_v59  ;;  %v12494_v14 = vadd.f32 %v14156_v2, %v20129_v48  ;;  %v12495_v38 = vadd.f32 %v14157_v61, %v20137_v49  ;;  %v12496_v52 = vadd.f32 %v14158_v44, %v20141_v53 }
 0x539   : > { %v12497_v47 = vadd.f32 %v14159_v63, %v20149_v10  ;;  %v12498_v8 = vadd.f32 %v14160_v3, %v20153_v1  ;;  %v12499_v16 = vadd.f32 %v14161_v36, %v20161_v29  ;;  %v12500_v28 = vadd.f32 %v14162_v9, %v20165_v32  ;;  %v22105_v32 = vld [vmem:[#allocation25_spill] sm:$0xff]  ;;  %v20356_v9 = vld [vmem:[%s16507_s21 + $0x60] sm:$0xff]  }
 0x53a   : > { %v12501_v54 = vadd.f32 %v14163_v6, %v20174_v60  ;;  %v12502_v11 = vadd.f32 %v14164_v15, %v20178_v0  ;;  %v12503_v59 = vadd.f32 %v14165_v18, %v20187_v5  ;;  %v12504_v48 = vadd.f32 %v14166_v45, %v20191_v24  ;;  %v22103_v6 = vld [vmem:[#allocation22_spill] sm:$0xff]  ;;  %v22104_v15 = vld [vmem:[#allocation24_spill] sm:$0xff] }
 0x53b   : > { %v12505_v49 = vadd.f32 %v14167_v56, %v20199_v25  ;;  %v12506_v44 = vadd.f32 %v14168_v20, %v20203_v40  ;;  %v12507_v63 = vadd.f32 %v14169_v33, %v20211_v12  ;;  %v12508_v53 = vadd.f32 %v14170_v27, %v20215_v51  ;;  %v22106_v0 = vld [vmem:[#allocation26_spill] sm:$0xff]  ;;  %v22107_v56 = vld [vmem:[#allocation64_spill] sm:$0xff]  ;;  %v22109_v40 = vld [vmem:[#allocation61_spill] sm:$0xff] }
 0x53c   : > { %15376 = vmatmul.mubr.bf16.gmra.mrb[28].mxu1 %v16228_v34  ;;  %v12509_v10 = vadd.f32 %v14171_v42, %v20223_v58  ;;  %v12510_v1 = vadd.f32 %v14172_v35, %v22103_v6  ;;  %v12511_v29 = vadd.f32 %v14173_v21, %v22104_v15  ;;  %v12512_v60 = vadd.f32 %v14174_v62, %v22105_v32  ;;  %v22108_v25 = vld [vmem:[#allocation58_spill] sm:$0xff]  ;;  %v22110_v12 = vld [vmem:[#allocation27_spill] sm:$0xff]  ;;  %v22111_v51 = vld [vmem:[#allocation28_spill] sm:$0xff] }
 0x53d   : > { %15395 = vmatprep.mubr.bf16.mxu1 %v19680_v41  ;;  %v12513_v5 = vadd.f32 %v14175_v13, %v22106_v0  ;;  %v12514_v24 = vadd.f32 %v14176_v43, %v22107_v56  ;;  %v12515_v20 = vadd.f32 %v14177_v23, %v22108_v25  ;;  %v12516_v33 = vadd.f32 %v14178_v19, %v22109_v40  ;;  %v22112_v58 = vld [vmem:[#allocation67_spill] sm:$0xff]  ;;  %v22113_v34 = vld [vmem:[#allocation29_spill] sm:$0xff]  ;;  %v22114_v21 = vld [vmem:[#allocation30_spill] sm:$0xff] }
 0x53e   : > { %v12517_v27 = vadd.f32 %v14179_v39, %v22110_v12  ;;  %v12518_v42 = vadd.f32 %v14180_v4, %v22111_v51  ;;  %v12519_v41 = vadd.f32 %v14181_v46, %v22112_v58  ;;  %v12520_v35 = vadd.f32 %v14182_v50, %v22113_v34  ;;  %v16230_v19 = vld [vmem:[#allocation3 + $0x208] sm:$0xff]   ;;  %v16231_v46 = vld [vmem:[#allocation3 + $0x210] sm:$0xff]   ;;  %v16232_v0 = vld [vmem:[#allocation3 + $0x218] sm:$0xff]  }
 0x53f   : > { %v12521_v7 = vadd.f32 %v14183_v30, %v22114_v21  ;;  %v12618_v62 = vadd.f32 %v12498_v8, %v12490_v55  ;;  %v12619_v26 = vadd.f32 %v12499_v16, %v12491_v31  ;;  %v12620_v13 = vadd.f32 %v12500_v28, %v12492_v57  ;;  %v22115_v30 = vld [vmem:[#allocation37_spill] sm:$0xff]  ;;  %v22119_v34 = vld [vmem:[#allocation39_spill] sm:$0xff] }
 0x540   : > { %v12621_v22 = vadd.f32 %v12501_v54, %v12493_v17  ;;  %v12622_v43 = vadd.f32 %v12502_v11, %v12494_v14  ;;  %v12623_v37 = vadd.f32 %v12503_v59, %v12495_v38  ;;  %v12624_v2 = vadd.f32 %v12504_v48, %v12496_v52  ;;  %v22116_v14 = vld [vmem:[#allocation54_spill] sm:$0xff] }
 0x541   : > { %v12625_v61 = vadd.f32 %v12505_v49, %v12497_v47  ;;  %v12626_v3 = vadd.f32 %v12514_v24, %v12506_v44  ;;  %v12627_v39 = vadd.f32 %v12515_v20, %v12507_v63  ;;  %v12628_v36 = vadd.f32 %v12516_v33, %v12508_v53  ;;  %v22117_v38 = vld [vmem:[#allocation38_spill] sm:$0xff] }
 0x542   : > { %v12629_v4 = vadd.f32 %v12517_v27, %v12509_v10  ;;  %v12630_v18 = vadd.f32 %v12518_v42, %v12510_v1  ;;  %v12631_v45 = vadd.f32 %v12519_v41, %v12511_v29  ;;  %v12632_v50 = vadd.f32 %v12520_v35, %v12512_v60  ;;  %v22118_v27 = vld [vmem:[#allocation40_spill] sm:$0xff]  ;;  %v16233_v35 = vld [vmem:[#allocation3 + $0x220] sm:$0xff]  }
 0x543   : > { %v12633_v23 = vadd.f32 %v12521_v7, %v12513_v5  ;;  %v12682_v55 = vpack.c.bf16 %v12618_v62, %v12618_v62  ;;  %v12683_v31 = vpack.c.bf16 %v12619_v26, %v12619_v26  ;;  %v12684_v57 = vpack.c.bf16 %v12620_v13, %v12620_v13 }
 0x544   : > { %15396 = vmatmul.mubr.bf16.vlgmr.msra.gmra.mrb[0].mxu1 %v22115_v30  ;;  %v12685_v17 = vpack.c.bf16 %v12621_v22, %v12621_v22  ;;  %v12686_v52 = vpack.c.bf16 %v12622_v43, %v12622_v43  ;;  %v12687_v47 = vpack.c.bf16 %v12623_v37, %v12623_v37  ;;  %v12688_v8 = vpack.c.bf16 %v12624_v2, %v12624_v2  ;;  %v14105_v2 = vld [vmem:[%s16507_s21 + $0x50] sm:$0x1]  ;;  %v20379_v30 = vld [vmem:[%s16507_s21 + $0x68] sm:$0x1] }
 0x545   : > { %15428 = vmatpush3.bf16.msra.mxu1 %v22116_v14  ;;  %15399 = vmatprep.mubr.bf16.mxu1 %v22117_v38  ;;  %v20362_v16 = vunpack.c.l.bf16 %v20356_v9  ;;  %v12689_v28 = vpack.c.bf16 %v12625_v61, %v12625_v61  ;;  %v12690_v54 = vpack.c.bf16 %v12626_v3, %v12626_v3  ;;  %v12691_v11 = vpack.c.bf16 %v12627_v39, %v12627_v39  ;;  %v14106_v61 = vld [vmem:[%s16507_s21 + $0x54] sm:$0xff]   ;;  %v16234_v14 = vld [vmem:[#allocation3 + $0x228] sm:$0xff]  }
 0x546   : > { %15429 = vmatprep.subr.bf16.mxu1 %v16230_v19  ;;  %v12692_v59 = vpack.c.bf16 %v12628_v36, %v12628_v36  ;;  %v12693_v48 = vpack.c.bf16 %v12629_v4, %v12629_v4  ;;  %v12694_v49 = vpack.c.bf16 %v12630_v18, %v12630_v18  ;;  %v12695_v44 = vpack.c.bf16 %v12631_v45, %v12631_v45  ;;  %v20371_v4 = vld [vmem:[%s16507_s21 + $0x5c] sm:$0x1] }
 0x547   : > { %v12696_v63 = vpack.c.bf16 %v12632_v50, %v12632_v50  ;;  %v12697_v53 = vpack.c.bf16 %v12633_v23, %v12633_v23  ;;  %v12818_v10 = vunpack.c.l.b16 %v12682_v55  ;;  %v12819_v6 = vunpack.c.l.b16 %v12683_v31 }
 0x548   : > { %v12820_v1 = vunpack.c.l.b16 %v12684_v57  ;;  %v12821_v15 = vunpack.c.l.b16 %v12685_v17  ;;  %v12822_v29 = vunpack.c.l.b16 %v12686_v52  ;;  %v12823_v32 = vunpack.c.l.b16 %v12687_v47 }
 0x549   : > { %15430 = vmatpush3.bf16.msra.mxu1 %v16230_v19  ;;  %v12824_v60 = vunpack.c.l.b16 %v12688_v8  ;;  %v12825_v5 = vunpack.c.l.b16 %v12689_v28  ;;  %v12826_v56 = vunpack.c.l.b16 %v12690_v54  ;;  %v12827_v24 = vunpack.c.l.b16 %v12691_v11  ;;  %v22121_v11 = vld [vmem:[#allocation49_spill] sm:$0xff] }
 0x54a   : > { %15431 = vmatprep.subr.bf16.mxu1 %v16231_v46  ;;  %v12828_v25 = vunpack.c.l.b16 %v12692_v59  ;;  %v12829_v20 = vunpack.c.l.b16 %v12693_v48  ;;  %v12830_v40 = vunpack.c.l.b16 %v12694_v49  ;;  %v12831_v33 = vunpack.c.l.b16 %v12695_v44  ;;  %v22122_v48 = vld [vmem:[#allocation10_spill] sm:$0xff] }
 0x54b   : > { %v12832_v12 = vunpack.c.l.b16 %v12696_v63  ;;  %v12833_v51 = vunpack.c.l.b16 %v12697_v53  ;;  %v12882_v42 = vrot.slane %v12819_v6, 7  ;;  %v12885_v58 = vrot.slane %v12820_v1, 6  ;;  %v22123_v63 = vld [vmem:[#allocation55_spill] sm:$0xff] }
 0x54c   : > { %15400 = vmatmul.mubr.bf16.gmra.mrb[4].mxu1 %v22118_v27  ;;  %v12887_v41 = vrot.slane %v12821_v15, 5  ;;  %v12890_v21 = vrot.slane %v12822_v29, 4  ;;  %v12892_v7 = vrot.slane %v12823_v32, 3  ;;  %v12895_v62 = vrot.slane %v12824_v60, 2  ;;  %v22125_v1 = vld [vmem:[#allocation11_spill] sm:$0xff] }
 0x54d   : > { %15403 = vmatprep.mubr.bf16.mxu1 %v22119_v34  ;;  %15432 = vmatpush3.bf16.msra.mxu1 %v16231_v46  ;;  %v12897_v26 = vrot.slane %v12825_v5, 1  ;;  %v12884_v13 = vsel %vm12883_vm9, %v12882_v42, %v12818_v10  ;;  %v12900_v22 = vrot.slane %v12827_v24, 7  ;;  %v12902_v43 = vrot.slane %v12828_v25, 6  ;;  %v22124_v10 = vld [vmem:[#allocation21_spill] sm:$0xff]  ;;  %v22130_v34 = vld [vmem:[#allocation20_spill] sm:$0xff] }
 0x54e   : > { %15433 = vmatprep.subr.bf16.mxu1 %v16232_v0  ;;  %v12904_v37 = vrot.slane %v12829_v20, 5  ;;  %v12886_v19 = vsel %vm11572_vm1, %v12885_v58, %v12884_v13  ;;  %v12906_v3 = vrot.slane %v12830_v40, 4  ;;  %v12908_v39 = vrot.slane %v12831_v33, 3  ;;  %v22127_v25 = vld [vmem:[#allocation45_spill] sm:$0xff] }
 0x54f   : > { %v12910_v36 = vrot.slane %v12832_v12, 2  ;;  %v12889_v18 = vsel %vm12888_vm10, %v12887_v41, %v12886_v19  ;;  %v12901_v45 = vsel %vm12883_vm9, %v12900_v22, %v12826_v56  ;;  %v12912_v50 = vrot.slane %v12833_v51, 1  ;;  %v22129_v51 = vld [vmem:[#allocation19_spill] sm:$0xff]  ;;  %v16236_v22 = vld [vmem:[#allocation3 + $0x238] sm:$0xff]  }
 0x550   : > { %v20376_v23 = vunpack.c.h.bf16 %v20356_v9  ;;  %v12891_v55 = vsel %vm11574_vm2, %v12890_v21, %v12889_v18  ;;  %v12903_v31 = vsel %vm11572_vm1, %v12902_v43, %v12901_v45  ;;  %v10836_v57 = vunpack.c.l.bf16 %v14105_v2  ;;  %v20387_v9 = vld [vmem:[%s16507_s21 + $0x78] sm:$0xff]  }
 0x551   : > { %15434 = vmatpush3.bf16.msra.mxu1 %v16232_v0  ;;  %v10837_v17 = vunpack.c.l.bf16 %v14106_v61  ;;  %v12894_v38 = vsel %vm12893_vm11, %v12892_v7, %v12891_v55  ;;  %v12905_v52 = vsel %vm12888_vm10, %v12904_v37, %v12903_v31  ;;  %v10838_v47 = vunpack.c.h.bf16 %v14106_v61  ;;  %22120 = vst [vmem:[#allocation68_spill] sm:$0xff] %v20387_v9  ;;  %v16235_v0 = vld [vmem:[#allocation3 + $0x230] sm:$0xff]   ;;  %v22132_v55 = vld [vmem:[#allocation13_spill] sm:$0xff] }
 0x552   : > { %15435 = vmatprep.subr.bf16.mxu1 %v16233_v35  ;;  %v10839_v8 = vunpack.c.l.bf16 %v20371_v4  ;;  %v12896_v46 = vsel %vm11576_vm4, %v12895_v62, %v12894_v38  ;;  %v12907_v28 = vsel %vm11574_vm2, %v12906_v3, %v12905_v52  ;;  %v10842_v54 = vunpack.c.l.bf16 %v20379_v30  ;;  %v22131_v4 = vld [vmem:[#allocation12_spill] sm:$0xff] }
 0x553   : > { %v11079_v59 = vcombine.high %v22121_v11, %v22121_v11  ;;  %v12899_v49 = vsel %vm12898_vm12, %v12897_v26, %v12896_v46  ;;  %v12909_v44 = vsel %vm12893_vm11, %v12908_v39, %v12907_v28  ;;  %v11086_v53 = vrot.slane %v22121_v11, %v22123_v63 }
 0x554   : > { %15404 = vmatmul.mubr.bf16.gmra.mrb[8].mxu1 %v22122_v48  ;;  %v11096_v6 = vcombine.high %v22124_v10, %v22124_v10  ;;  %v12911_v15 = vsel %vm11576_vm4, %v12910_v36, %v12909_v44  ;;  %v20408_v32 = vrot.slane %v22124_v10, %v22123_v63  ;;  %v20411_v60 = vunpack.c.l.bf16 %v20387_v9 }
 0x555   : > { %15407 = vmatprep.mubr.bf16.mxu1 %v22125_v1  ;;  %15436 = vmatpush3.bf16.msra.mxu1 %v16233_v35  ;;  %v20404_v29 = vrot.slane %v11079_v59, %v22123_v63  ;;  %v12913_v5 = vsel %vm12898_vm12, %v12912_v50, %v12911_v15  ;;  %v11094_v56 = vcombine.high %v11086_v53, %v11086_v53  ;;  %v22128_v20 = vunpack.c.l.bf16 %v22127_v25 }
 0x556   : > { %22126 = vst [vmem:[#allocation31_spill] sm:$0xff] %v20411_v60  ;;  %15437 = vmatprep.subr.bf16.mxu1 %v16234_v14  ;;  %v20415_v24 = vrot.slane %v11096_v6, %v22123_v63  ;;  %v12998_v33 = vpack.c.b16 %v12913_v5, %v12899_v49  ;;  %v11111_v27 = vcombine.high %v20408_v32, %v20408_v32  ;;  %v14140_v13 = vrot.slane %v11086_v53, 9 }
 0x557   : > { %v20420_v40 = vrot.slane %v22128_v20, %v22123_v63  ;;  %v11095_v12 = vcombine.high %v20404_v29, %v20404_v29  ;;  %v11120_v42 = vcombine.high %v22129_v51, %v22129_v51  ;;  %v20432_v41 = vrot.slane %v22129_v51, %v22123_v63 }
 0x558   : > { %v11112_v58 = vcombine.high %v20415_v24, %v20415_v24  ;;  %v11137_v35 = vcombine.high %v22130_v34, %v22130_v34  ;;  %v20438_v21 = vrot.slane %v22130_v34, %v22123_v63  ;;  %15477 = vmatprep.mubr.msk.bf16.mxu0 %vm782_vm3, %v12998_v33  ;;  %v20445_v62 = vrot.slane %v10836_v57, %v22123_v63 }
 0x559   : > { %15438 = vmatpush3.bf16.msra.mxu1 %v16234_v14  ;;  %v20442_v7 = vrot.slane %v11120_v42, %v22123_v63  ;;  %v11161_v26 = vcombine.high %v10837_v17, %v10837_v17  ;;  %v11135_v43 = vcombine.high %v20432_v41, %v20432_v41  ;;  %v20455_v61 = vrot.slane %v10837_v17, %v22123_v63  ;;  %v22135_v42 = vld [vmem:[#allocation48_spill] sm:$0xff] }
 0x55a   : > { %15439 = vmatprep.subr.bf16.mxu1 %v16235_v0  ;;  %v20450_v37 = vrot.slane %v11137_v35, %v22123_v63  ;;  %v11152_v2 = vcombine.high %v20438_v21, %v20438_v21  ;;  %v11178_v39 = vcombine.high %v10838_v47, %v10838_v47  ;;  %v20463_v36 = vrot.slane %v10838_v47, %v22123_v63 }
 0x55b   : > { %v11136_v19 = vcombine.high %v20442_v7, %v20442_v7  ;;  %v20460_v3 = vrot.slane %v11161_v26, %v22123_v63  ;;  %v11176_v45 = vcombine.high %v20455_v61, %v20455_v61  ;;  %v20471_v50 = vrot.slane %v10839_v8, %v22123_v63 }
 0x55c   : > { %15408 = vmatmul.mubr.bf16.gmra.mrb[12].mxu1 %v22131_v4  ;;  %v11153_v18 = vcombine.high %v20450_v37, %v20450_v37  ;;  %v11202_v30 = vcombine.high %v20362_v16, %v20362_v16  ;;  %v20479_v57 = vrot.slane %v11178_v39, %v22123_v63  ;;  %v11193_v17 = vcombine.high %v20463_v36, %v20463_v36 }
 0x55d   : > { %15411 = vmatprep.mubr.bf16.mxu1 %v22132_v55  ;;  %15440 = vmatpush3.bf16.msra.mxu1 %v16235_v0  ;;  %v11177_v31 = vcombine.high %v20460_v3, %v20460_v3  ;;  %v11680_v14 = vrot.slane %v11094_v56, 7  ;;  %v20485_v38 = vrot.slane %v20362_v16, %v22123_v63  ;;  %v11219_v47 = vcombine.high %v20376_v23, %v20376_v23 }
 0x55e   : > { %15441 = vmatprep.subr.bf16.mxu1 %v16236_v22  ;;  %v20488_v52 = vrot.slane %v11202_v30, %v22123_v63  ;;  %v20494_v8 = vrot.slane %v20376_v23, %v22123_v63  ;;  %v11194_v46 = vcombine.high %v20479_v57, %v20479_v57  ;;  %v20499_v28 = vrot.slane %v10842_v54, %v22123_v63 }
 0x55f   : > { %v20503_v16 = vsel %vm20102_vm8, %v14140_v13, %v11680_v14  ;;  %v11682_v59 = vrot.slane %v11680_v14, 2  ;;  %v11217_v48 = vcombine.high %v20485_v38, %v20485_v38  ;;  %v20510_v23 = vrot.slane %v11219_v47, %v22123_v63 }
 0x560   : > { %v11218_v49 = vcombine.high %v20488_v52, %v20488_v52  ;;  %v11234_v44 = vcombine.high %v20494_v8, %v20494_v8  ;;  %v11683_v54 = vrot.slane %v20404_v29, 7  ;;  %v11686_v53 = vrot.slane %v11095_v12, 7  ;;  %v22134_v29 = vld [vmem:[#allocation41_spill] sm:$0xff] }
 0x561   : > { %15442 = vmatpush3.bf16.msra.mxu1 %v16236_v22  ;;  %v11689_v10 = vrot.slane %v20408_v32, 7  ;;  %v11692_v6 = vrot.slane %v11111_v27, 7  ;;  %v11235_v1 = vcombine.high %v20510_v23, %v20510_v23  ;;  %v11695_v15 = vrot.slane %v20415_v24, 7 }
 0x562   : > { %v11698_v0 = vrot.slane %v11112_v58, 7  ;;  %v11701_v5 = vrot.slane %v20420_v40, 7  ;;  %v20522_v56 = vsel %vm20102_vm8, %v11682_v59, %v11683_v54  ;;  %v11685_v25 = vrot.slane %v11683_v54, 2 }
 0x563   : > { %v11688_v20 = vrot.slane %v11686_v53, 2  ;;  %v11691_v33 = vrot.slane %v11689_v10, 2  ;;  %v11694_v12 = vrot.slane %v11692_v6, 2  ;;  %v11697_v32 = vrot.slane %v11695_v15, 2 }
 0x564   : > { %15412 = vmatmul.mubr.bf16.gmra.mrb[16].mxu1 %v22134_v29  ;;  %v11700_v27 = vrot.slane %v11698_v0, 2  ;;  %v14141_v51 = vrot.slane %v20432_v41, 9  ;;  %v20529_v24 = vsel %vm20102_vm8, %v11685_v25, %v11686_v53  ;;  %v11705_v34 = vrot.slane %v11135_v43, 7 }
 0x565   : > { %15415 = vmatprep.mubr.bf16.mxu1 %v22135_v42  ;;  %v20533_v40 = vsel %vm20102_vm8, %v11688_v20, %v11689_v10  ;;  %v20537_v58 = vsel %vm20102_vm8, %v11691_v33, %v11692_v6  ;;  %v20541_v35 = vsel %vm20102_vm8, %v11694_v12, %v11695_v15  ;;  %v20545_v41 = vsel %vm20102_vm8, %v11697_v32, %v11698_v0  ;;  %v22136_v15 = vld [vmem:[#allocation44_spill] sm:$0xff]  ;;  %v22137_v33 = vld [vmem:[#allocation14_spill] sm:$0xff] }
 0x566   : > { %v20549_v26 = vsel %vm20102_vm8, %v11700_v27, %v11701_v5  ;;  %v11708_v13 = vrot.slane %v20442_v7, 7  ;;  %v20554_v22 = vsel %vm20102_vm8, %v14141_v51, %v11705_v34  ;;  %v11707_v39 = vrot.slane %v11705_v34, 2 }
 0x567   : > { %v11711_v43 = vrot.slane %v11136_v19, 7  ;;  %v11714_v4 = vrot.slane %v20438_v21, 7  ;;  %v11717_v55 = vrot.slane %v11152_v2, 7  ;;  %v11720_v14 = vrot.slane %v20450_v37, 7 }
 0x568   : > { %v11710_v30 = vrot.slane %v11708_v13, 2  ;;  %v11723_v47 = vrot.slane %v11153_v18, 7  ;;  %v20560_v59 = vsel %vm20102_vm8, %v11707_v39, %v11708_v13  ;;  %v11726_v7 = vrot.slane %v20445_v62, 7 }
 0x569   : > { %v11713_v54 = vrot.slane %v11711_v43, 2  ;;  %v11716_v53 = vrot.slane %v11714_v4, 2  ;;  %v11719_v19 = vrot.slane %v11717_v55, 2  ;;  %v11722_v6 = vrot.slane %v11720_v14, 2 }
 0x56a   : > { %v20565_v10 = vsel %vm20102_vm8, %v11710_v30, %v11711_v43  ;;  %v11725_v21 = vrot.slane %v11723_v47, 2  ;;  %v14142_v18 = vrot.slane %v20455_v61, 9  ;;  %v11730_v62 = vrot.slane %v11176_v45, 7 }
 0x56b   : > { %v20569_v2 = vsel %vm20102_vm8, %v11713_v54, %v11714_v4  ;;  %v20573_v37 = vsel %vm20102_vm8, %v11716_v53, %v11717_v55  ;;  %v20582_v0 = vsel %vm20102_vm8, %v11719_v19, %v11720_v14  ;;  %v20586_v5 = vsel %vm20102_vm8, %v11722_v6, %v11723_v47 }
 0x56c   : > { %15416 = vmatmul.mubr.bf16.gmra.mrb[20].mxu1 %v22136_v15  ;;  %v20590_v25 = vsel %vm20102_vm8, %v11725_v21, %v11726_v7  ;;  %v11733_v20 = vrot.slane %v20460_v3, 7  ;;  %v20596_v61 = vsel %vm20102_vm8, %v14142_v18, %v11730_v62  ;;  %v11732_v45 = vrot.slane %v11730_v62, 2  ;;  %v22141_v7 = vld [vmem:[#allocation15_spill] sm:$0xff]  ;;  %v22142_v62 = vld [vmem:[#allocation17_spill] sm:$0xff] }
 0x56d   : > { %15419 = vmatprep.mubr.bf16.mxu1 %v22137_v33  ;;  %v11736_v29 = vrot.slane %v11177_v31, 7  ;;  %v11739_v12 = vrot.slane %v20463_v36, 7  ;;  %v11742_v27 = vrot.slane %v11193_v17, 7  ;;  %v11745_v51 = vrot.slane %v20479_v57, 7 }
 0x56e   : > { %v11735_v32 = vrot.slane %v11733_v20, 2  ;;  %v11748_v42 = vrot.slane %v11194_v46, 7  ;;  %v20611_v34 = vsel %vm20102_vm8, %v11732_v45, %v11733_v20  ;;  %v11751_v31 = vrot.slane %v20471_v50, 7 }
 0x56f   : > { %v11738_v13 = vrot.slane %v11736_v29, 2  ;;  %v11741_v3 = vrot.slane %v11739_v12, 2  ;;  %v11744_v36 = vrot.slane %v11742_v27, 2  ;;  %v11747_v17 = vrot.slane %v11745_v51, 2 }
 0x570   : > { %v20616_v39 = vsel %vm20102_vm8, %v11735_v32, %v11736_v29  ;;  %v11750_v43 = vrot.slane %v11748_v42, 2  ;;  %v14143_v46 = vrot.slane %v20485_v38, 9  ;;  %v11755_v50 = vrot.slane %v11217_v48, 7 }
 0x571   : > { %v20620_v4 = vsel %vm20102_vm8, %v11738_v13, %v11739_v12  ;;  %v20624_v57 = vsel %vm20102_vm8, %v11741_v3, %v11742_v27  ;;  %v20632_v30 = vsel %vm20102_vm8, %v11744_v36, %v11745_v51  ;;  %v20636_v55 = vsel %vm20102_vm8, %v11747_v17, %v11748_v42 }
 0x572   : > { %22138 = vst [vmem:[#allocation32_spill] sm:$0xff] %v20636_v55  ;;  %v20640_v14 = vsel %vm20102_vm8, %v11750_v43, %v11751_v31  ;;  %v11758_v47 = vrot.slane %v20488_v52, 7  ;;  %v20645_v54 = vsel %vm20102_vm8, %v14143_v46, %v11755_v50  ;;  %v11757_v38 = vrot.slane %v11755_v50, 2 }
 0x573   : > { %22139 = vst [vmem:[#allocation33_spill] sm:$0xff] %v20640_v14  ;;  %22140 = vst [vmem:[#allocation34_spill] sm:$0xff] %v20645_v54  ;;  %v11761_v48 = vrot.slane %v11218_v49, 7  ;;  %v11764_v53 = vrot.slane %v20494_v8, 7  ;;  %v11767_v6 = vrot.slane %v11234_v44, 7  ;;  %v11770_v21 = vrot.slane %v20510_v23, 7 }
 0x574   : > { %15420 = vmatmul.mubr.bf16.gmra.mrb[24].mxu1 %v22141_v7  ;;  %v11760_v19 = vrot.slane %v11758_v47, 2  ;;  %v11773_v18 = vrot.slane %v11235_v1, 7  ;;  %v20662_v52 = vsel %vm20102_vm8, %v11757_v38, %v11758_v47  ;;  %v11776_v20 = vrot.slane %v20499_v28, 7 }
 0x575   : > { %15423 = vmatprep.mubr.bf16.mxu1 %v22142_v62  ;;  %22143 = vst [vmem:[#allocation9_spill] sm:$0xff] %v20662_v52  ;;  %v11763_v49 = vrot.slane %v11761_v48, 2  ;;  %v11766_v15 = vrot.slane %v11764_v53, 2  ;;  %v11769_v44 = vrot.slane %v11767_v6, 2  ;;  %v11772_v33 = vrot.slane %v11770_v21, 2  ;;  %v22152_v62 = vld [vmem:[#allocation43_spill] sm:$0xff] }
 0x576   : > { %v20667_v8 = vsel %vm20102_vm8, %v11760_v19, %v11761_v48  ;;  %v11775_v45 = vrot.slane %v11773_v18, 2  ;;  %v14184_v29 = vrot.slane %v20503_v16, 9  ;;  %v14185_v12 = vrot.slane %v20522_v56, 9 }
 0x577   : > { %22144 = vst [vmem:[#allocation35_spill] sm:$0xff] %v20667_v8  ;;  %v20671_v23 = vsel %vm20102_vm8, %v11763_v49, %v11764_v53  ;;  %v20675_v1 = vsel %vm20102_vm8, %v11766_v15, %v11767_v6  ;;  %v20681_v28 = vsel %vm20102_vm8, %v11769_v44, %v11770_v21  ;;  %v20685_v32 = vsel %vm20102_vm8, %v11772_v33, %v11773_v18  ;;  %v22150_v53 = vld [vmem:[#allocation18_spill] sm:$0xff] }
 0x578   : > { %22145 = vst [vmem:[#allocation36_spill] sm:$0xff] %v20671_v23  ;;  %22146 = vst [vmem:[#allocation22_spill] sm:$0xff] %v20675_v1  ;;  %v20689_v27 = vsel %vm20102_vm8, %v11775_v45, %v11776_v20  ;;  %v14186_v51 = vrot.slane %v20529_v24, 9  ;;  %v14187_v42 = vrot.slane %v20533_v40, 9  ;;  %v14188_v13 = vrot.slane %v20537_v58, 9  ;;  %v22151_v18 = vld [vmem:[#allocation42_spill] sm:$0xff] }
 0x579   : > { %22147 = vst [vmem:[#allocation24_spill] sm:$0xff] %v20681_v28  ;;  %22148 = vst [vmem:[#allocation25_spill] sm:$0xff] %v20685_v32  ;;  %v14189_v3 = vrot.slane %v20541_v35, 9  ;;  %v14190_v31 = vrot.slane %v20545_v41, 9  ;;  %v14191_v36 = vrot.slane %v20549_v26, 9  ;;  %v14192_v17 = vrot.slane %v20554_v22, 9 }
 0x57a   : > { %22149 = vst [vmem:[#allocation26_spill] sm:$0xff] %v20689_v27  ;;  %v14193_v43 = vrot.slane %v20560_v59, 9  ;;  %v14194_v46 = vrot.slane %v20565_v10, 9  ;;  %v14195_v50 = vrot.slane %v20569_v2, 9  ;;  %v14196_v47 = vrot.slane %v20573_v37, 9 }
 0x57b   : > { %v14197_v38 = vrot.slane %v20582_v0, 9  ;;  %v14198_v48 = vrot.slane %v20586_v5, 9  ;;  %v14199_v7 = vrot.slane %v20590_v25, 9  ;;  %v14200_v19 = vrot.slane %v20596_v61, 9 }
 0x57c   : > { %15424 = vmatmul.mubr.bf16.gmra.mrb[28].mxu1 %v22150_v53  ;;  %v14201_v6 = vrot.slane %v20611_v34, 9  ;;  %v14202_v21 = vrot.slane %v20616_v39, 9  ;;  %v22153_v49 = vcombine.low %v22151_v18, %v22152_v62  ;;  %v14203_v15 = vrot.slane %v20620_v4, 9 }
 0x57d   : > { %v14204_v20 = vrot.slane %v20624_v57, 9  ;;  %v14205_v44 = vrot.slane %v20632_v30, 9  ;;  %v14206_v33 = vrot.slane %v20636_v55, 9  ;;  %v14207_v45 = vrot.slane %v20640_v14, 9 }
 0x57e   : > { %15443 = vmatprep.mubr.bf16.mxu1 %v22153_v49  ;;  %v14208_v53 = vrot.slane %v20645_v54, 9  ;;  %v14209_v11 = vrot.slane %v20662_v52, 9  ;;  %v14210_v60 = vrot.slane %v20667_v8, 9  ;;  %v14211_v63 = vrot.slane %v20671_v23, 9 }
 0x57f   : > { %v14212_v18 = vrot.slane %v20675_v1, 9  ;;  %v14213_v62 = vrot.slane %v20681_v28, 9  ;;  %v14214_v49 = vrot.slane %v20685_v32, 9  ;;  %v14215_v9 = vrot.slane %v20689_v27, 9 }
 0x580   : > { %v12522_v55 = vadd.f32 %v14184_v29, %v20503_v16  ;;  %v12523_v14 = vadd.f32 %v14185_v12, %v20522_v56  ;;  %v12524_v54 = vadd.f32 %v14186_v51, %v20529_v24  ;;  %v12525_v52 = vadd.f32 %v14187_v42, %v20533_v40  ;;  %v22154_v29 = vld [vmem:[#allocation46_spill] sm:$0xff]  ;;  %v22160_v42 = vld [vmem:[#allocation32_spill] sm:$0xff] }
 0x581   : > { %v12526_v8 = vadd.f32 %v14188_v13, %v20537_v58  ;;  %v12527_v23 = vadd.f32 %v14189_v3, %v20541_v35  ;;  %v12528_v1 = vadd.f32 %v14190_v31, %v20545_v41  ;;  %v12529_v28 = vadd.f32 %v14191_v36, %v20549_v26  ;;  %v22155_v35 = vld [vmem:[#allocation47_spill] sm:$0xff]  ;;  %v22161_v3 = vld [vmem:[#allocation33_spill] sm:$0xff]  ;;  %v22162_v31 = vld [vmem:[#allocation34_spill] sm:$0xff] }
 0x582   : > { %v12530_v32 = vadd.f32 %v14192_v17, %v20554_v22  ;;  %v12531_v27 = vadd.f32 %v14193_v43, %v20560_v59  ;;  %v12532_v16 = vadd.f32 %v14194_v46, %v20565_v10  ;;  %v12533_v56 = vadd.f32 %v14195_v50, %v20569_v2  ;;  %v22157_v10 = vld [vmem:[#allocation50_spill] sm:$0xff]  ;;  %v22158_v2 = vld [vmem:[#allocation52_spill] sm:$0xff]  ;;  %v22163_v36 = vld [vmem:[#allocation9_spill] sm:$0xff] }
 0x583   : > { %v12534_v24 = vadd.f32 %v14196_v47, %v20573_v37  ;;  %v12535_v40 = vadd.f32 %v14197_v38, %v20582_v0  ;;  %v12536_v58 = vadd.f32 %v14198_v48, %v20586_v5  ;;  %v22156_v12 = vcombine.low %v22154_v29, %v22155_v35  ;;  %v22164_v17 = vld [vmem:[#allocation35_spill] sm:$0xff]  ;;  %v22165_v43 = vld [vmem:[#allocation36_spill] sm:$0xff]  ;;  %v22166_v50 = vld [vmem:[#allocation22_spill] sm:$0xff] }
 0x584   : > { %v12537_v41 = vadd.f32 %v14199_v7, %v20590_v25  ;;  %v12538_v26 = vadd.f32 %v14200_v19, %v20596_v61  ;;  %v12539_v22 = vadd.f32 %v14201_v6, %v20611_v34  ;;  %v12540_v59 = vadd.f32 %v14202_v21, %v20616_v39  ;;  %v22167_v38 = vld [vmem:[#allocation24_spill] sm:$0xff]  ;;  %v22168_v48 = vld [vmem:[#allocation25_spill] sm:$0xff]  ;;  %v22169_v7 = vld [vmem:[#allocation26_spill] sm:$0xff] }
 0x585   : > { %15444 = vmatmul.mubr.bf16.vlgmr.msra.gmra.mrb[0].mxu1 %v22156_v12  ;;  %v22159_v51 = vcombine.low %v22157_v10, %v22158_v2  ;;  %v12541_v37 = vadd.f32 %v14203_v15, %v20620_v4  ;;  %v12542_v0 = vadd.f32 %v14204_v20, %v20624_v57  ;;  %v12543_v5 = vadd.f32 %v14205_v44, %v20632_v30  ;;  %v22171_v12 = vld [vmem:[#allocation56_spill] sm:$0xff] }
 0x586   : > { %v12544_v13 = vadd.f32 %v14206_v33, %v22160_v42  ;;  %v12545_v25 = vadd.f32 %v14207_v45, %v22161_v3  ;;  %v12546_v61 = vadd.f32 %v14208_v53, %v22162_v31  ;;  %v12547_v34 = vadd.f32 %v14209_v11, %v22163_v36 }
 0x587   : > { %15447 = vmatprep.mubr.bf16.mxu1 %v22159_v51  ;;  %v12548_v39 = vadd.f32 %v14210_v60, %v22164_v17  ;;  %v12549_v46 = vadd.f32 %v14211_v63, %v22165_v43  ;;  %v12550_v47 = vadd.f32 %v14212_v18, %v22166_v50  ;;  %v12551_v4 = vadd.f32 %v14213_v62, %v22167_v38  ;;  %v22170_v62 = vld [vmem:[#allocation53_spill] sm:$0xff]  ;;  %v22177_v38 = vld [vmem:[#allocation62_spill] sm:$0xff] }
 0x588   : > { %v12552_v57 = vadd.f32 %v14214_v49, %v22168_v48  ;;  %v12553_v30 = vadd.f32 %v14215_v9, %v22169_v7  ;;  %v12634_v19 = vadd.f32 %v12530_v32, %v12522_v55  ;;  %v12635_v6 = vadd.f32 %v12531_v27, %v12523_v14  ;;  %v22174_v32 = vld [vmem:[#allocation59_spill] sm:$0xff] }
 0x589   : > { %v12636_v21 = vadd.f32 %v12532_v16, %v12524_v54  ;;  %v12637_v15 = vadd.f32 %v12533_v56, %v12525_v52  ;;  %v12638_v20 = vadd.f32 %v12534_v24, %v12526_v8  ;;  %v12639_v44 = vadd.f32 %v12535_v40, %v12527_v23 }
 0x58a   : > { %v12640_v33 = vadd.f32 %v12536_v58, %v12528_v1  ;;  %v12641_v11 = vadd.f32 %v12537_v41, %v12529_v28  ;;  %v12642_v45 = vadd.f32 %v12546_v61, %v12538_v26  ;;  %v12643_v60 = vadd.f32 %v12547_v34, %v12539_v22  ;;  %v22173_v28 = vld [vmem:[#allocation57_spill] sm:$0xff] }
 0x58b   : > { %v12644_v53 = vadd.f32 %v12548_v39, %v12540_v59  ;;  %v12645_v63 = vadd.f32 %v12549_v46, %v12541_v37  ;;  %v12646_v29 = vadd.f32 %v12550_v47, %v12542_v0  ;;  %v12647_v18 = vadd.f32 %v12551_v4, %v12543_v5  ;;  %v22176_v47 = vld [vmem:[#allocation60_spill] sm:$0xff] }
 0x58c   : > { %v12648_v35 = vadd.f32 %v12552_v57, %v12544_v13  ;;  %v22172_v49 = vcombine.low %v22170_v62, %v22171_v12  ;;  %v12649_v9 = vadd.f32 %v12553_v30, %v12545_v25  ;;  %v12698_v55 = vpack.c.bf16 %v12634_v19, %v12634_v19  ;;  %v22179_v19 = vld [vmem:[#allocation63_spill] sm:$0xff]  ;;  %v14114_v12 = vld [vmem:[%s16507_s21 + $0x74] sm:$0x1] }
 0x58d   : > { %v12699_v14 = vpack.c.bf16 %v12635_v6, %v12635_v6  ;;  %v12700_v54 = vpack.c.bf16 %v12636_v21, %v12636_v21  ;;  %v12701_v52 = vpack.c.bf16 %v12637_v15, %v12637_v15  ;;  %v12702_v8 = vpack.c.bf16 %v12638_v20, %v12638_v20  ;;  %v22180_v6 = vld [vmem:[#allocation65_spill] sm:$0xff] }
 0x58e   : > { %15448 = vmatmul.mubr.bf16.gmra.mrb[4].mxu1 %v22172_v49  ;;  %v12703_v23 = vpack.c.bf16 %v12639_v44, %v12639_v44  ;;  %v12704_v1 = vpack.c.bf16 %v12640_v33, %v12640_v33  ;;  %v22175_v27 = vcombine.low %v22173_v28, %v22174_v32  ;;  %v12705_v16 = vpack.c.bf16 %v12641_v11, %v12641_v11  ;;  %v14360_v11 = vld [vmem:[%s16507_s21 + $0x90] sm:$0xff]   ;;  %v14120_v32 = vld [vmem:[%s16507_s21 + $0x8c] sm:$0x1] }
 0x58f   : > { %v12706_v56 = vpack.c.bf16 %v12642_v45, %v12642_v45  ;;  %v12707_v24 = vpack.c.bf16 %v12643_v60, %v12643_v60  ;;  %v12708_v40 = vpack.c.bf16 %v12644_v53, %v12644_v53  ;;  %v12709_v58 = vpack.c.bf16 %v12645_v63, %v12645_v63  ;;  %v22182_v49 = vld [vmem:[#allocation68_spill] sm:$0xff] }
 0x590   : > { %15451 = vmatprep.mubr.bf16.mxu1 %v22175_v27  ;;  %v12710_v41 = vpack.c.bf16 %v12646_v29, %v12646_v29  ;;  %v12711_v26 = vpack.c.bf16 %v12647_v18, %v12647_v18  ;;  %v12712_v22 = vpack.c.bf16 %v12648_v35, %v12648_v35  ;;  %v12713_v59 = vpack.c.bf16 %v12649_v9, %v12649_v9  ;;  %v14112_v29 = vld [vmem:[%s16507_s21 + $0x6c] sm:$0xff]   ;;  %v14123_v27 = vld [vmem:[%s16507_s21 + $0x98] sm:$0x1] }
 0x591   : > { %v12834_v10 = vunpack.c.l.b16 %v12698_v55  ;;  %v12835_v2 = vunpack.c.l.b16 %v12699_v14  ;;  %v12836_v51 = vunpack.c.l.b16 %v12700_v54  ;;  %v12837_v37 = vunpack.c.l.b16 %v12701_v52  ;;  %v14117_v55 = vld [vmem:[%s16507_s21 + $0x80] sm:$0x1]  ;;  %v14118_v52 = vld [vmem:[%s16507_s21 + $0x84] sm:$0xff]  }
 0x592   : > { %v12838_v0 = vunpack.c.l.b16 %v12702_v8  ;;  %v12839_v5 = vunpack.c.l.b16 %v12703_v23  ;;  %v12840_v42 = vunpack.c.l.b16 %v12704_v1  ;;  %v12841_v13 = vunpack.c.l.b16 %v12705_v16 }
 0x593   : > { %v12842_v3 = vunpack.c.l.b16 %v12706_v56  ;;  %v12843_v25 = vunpack.c.l.b16 %v12707_v24  ;;  %v12844_v31 = vunpack.c.l.b16 %v12708_v40  ;;  %v12845_v61 = vunpack.c.l.b16 %v12709_v58 }
 0x594   : > { %v12846_v36 = vunpack.c.l.b16 %v12710_v41  ;;  %v12847_v34 = vunpack.c.l.b16 %v12711_v26  ;;  %v12848_v17 = vunpack.c.l.b16 %v12712_v22  ;;  %v12849_v39 = vunpack.c.l.b16 %v12713_v59  ;;  %v22183_v59 = vld [vmem:[#allocation66_spill] sm:$0xff] }
 0x595   : > { %v12914_v43 = vrot.slane %v12835_v2, 7  ;;  %v12916_v46 = vrot.slane %v12836_v51, 6  ;;  %v12918_v50 = vrot.slane %v12837_v37, 5  ;;  %v22178_v4 = vcombine.low %v22176_v47, %v22177_v38  ;;  %v22190_v47 = vld [vmem:[#allocation31_spill] sm:$0xff] }
 0x596   : > { %v12920_v48 = vrot.slane %v12838_v0, 4  ;;  %v12922_v57 = vrot.slane %v12839_v5, 3  ;;  %v12924_v7 = vrot.slane %v12840_v42, 2  ;;  %v12926_v30 = vrot.slane %v12841_v13, 1  ;;  %v22186_v5 = vld [vmem:[#allocation70_spill] sm:$0xff]  ;;  %v22187_v42 = vld [vmem:[#allocation71_spill] sm:$0xff] }
 0x597   : > { %15452 = vmatmul.mubr.bf16.gmra.mrb[8].mxu1 %v22178_v4  ;;  %v22181_v21 = vcombine.low %v22179_v19, %v22180_v6  ;;  %v12915_v15 = vsel %vm12883_vm9, %v12914_v43, %v12834_v10  ;;  %v12928_v20 = vrot.slane %v12843_v25, 7  ;;  %v12930_v44 = vrot.slane %v12844_v31, 6  ;;  %v22184_v10 = vld [vmem:[#allocation69_spill] sm:$0xff] }
 0x598   : > { %v12932_v33 = vrot.slane %v12845_v61, 5  ;;  %v12917_v45 = vsel %vm11572_vm1, %v12916_v46, %v12915_v15  ;;  %v12934_v60 = vrot.slane %v12846_v36, 4  ;;  %v12936_v53 = vrot.slane %v12847_v34, 3  ;;  %v22189_v36 = vld [vmem:[#allocation55_spill] sm:$0xff] }
 0x599   : > { %15455 = vmatprep.mubr.bf16.mxu1 %v22181_v21  ;;  %v12938_v63 = vrot.slane %v12848_v17, 2  ;;  %v12919_v18 = vsel %vm12888_vm10, %v12918_v50, %v12917_v45  ;;  %v12929_v35 = vsel %vm12883_vm9, %v12928_v20, %v12842_v3  ;;  %v12940_v62 = vrot.slane %v12849_v39, 1 }
 0x59a   : > { %v14342_v9 = vunpack.c.h.bf16 %v22182_v49  ;;  %v12921_v14 = vsel %vm11574_vm2, %v12920_v48, %v12919_v18  ;;  %v12931_v54 = vsel %vm11572_vm1, %v12930_v44, %v12929_v35  ;;  %v14345_v8 = vunpack.c.l.bf16 %v14360_v11 }
 0x59b   : > { %v20787_v23 = vunpack.c.h.bf16 %v14360_v11  ;;  %v12923_v1 = vsel %vm12893_vm11, %v12922_v57, %v12921_v14  ;;  %v12933_v28 = vsel %vm12888_vm10, %v12932_v33, %v12931_v54  ;;  %v10843_v16 = vunpack.c.l.bf16 %v14112_v29 }
 0x59c   : > { %v10844_v56 = vunpack.c.h.bf16 %v14112_v29  ;;  %v12925_v24 = vsel %vm11576_vm4, %v12924_v7, %v12923_v1  ;;  %v12935_v40 = vsel %vm11574_vm2, %v12934_v60, %v12933_v28  ;;  %v10845_v58 = vunpack.c.l.bf16 %v14114_v12  ;;  %v22192_v29 = vld [vmem:[#allocation73_spill] sm:$0xff] }
 0x59d   : > { %v10848_v41 = vunpack.c.l.bf16 %v14117_v55  ;;  %v12927_v26 = vsel %vm12898_vm12, %v12926_v30, %v12925_v24  ;;  %v12937_v22 = vsel %vm12893_vm11, %v12936_v53, %v12935_v40  ;;  %v22185_v2 = vcombine.low %v22183_v59, %v22184_v10  ;;  %v22195_v55 = vld [vmem:[#allocation75_spill] sm:$0xff] }
 0x59e   : > { %v10849_v51 = vunpack.c.l.bf16 %v14118_v52  ;;  %v10850_v37 = vunpack.c.h.bf16 %v14118_v52  ;;  %v12939_v0 = vsel %vm11576_vm4, %v12938_v63, %v12937_v22  ;;  %v22188_v13 = vcombine.low %v22186_v5, %v22187_v42  ;;  %v22191_v63 = vld [vmem:[#allocation72_spill] sm:$0xff] }
 0x59f   : > { %15456 = vmatmul.mubr.bf16.gmra.mrb[12].mxu1 %v22185_v2  ;;  %v10851_v3 = vunpack.c.l.bf16 %v14120_v32  ;;  %v10854_v25 = vunpack.c.l.bf16 %v14123_v27  ;;  %v11243_v31 = vcombine.high %v10843_v16, %v10843_v16  ;;  %v12941_v61 = vsel %vm12898_vm12, %v12940_v62, %v12939_v0 }
 0x5a0   : > { %15459 = vmatprep.mubr.bf16.mxu1 %v22188_v13  ;;  %v11250_v34 = vrot.slane %v10843_v16, %v22189_v36  ;;  %v11260_v17 = vcombine.high %v10844_v56, %v10844_v56  ;;  %v20807_v39 = vrot.slane %v10844_v56, %v22189_v36  ;;  %v12999_v43 = vpack.c.b16 %v12941_v61, %v12927_v26 }
 0x5a1   : > { %v11257_v46 = vrot.slane %v11243_v31, %v22189_v36  ;;  %v20811_v50 = vrot.slane %v10845_v58, %v22189_v36  ;;  %v11284_v38 = vcombine.high %v22190_v47, %v22190_v47  ;;  %v20822_v7 = vrot.slane %v22190_v47, %v22189_v36  ;;  %v22198_v47 = vld [vmem:[#allocation76_spill] sm:$0xff] }
 0x5a2   : > { %v11258_v4 = vcombine.high %v11250_v34, %v11250_v34  ;;  %v20816_v48 = vrot.slane %v11260_v17, %v22189_v36  ;;  %v11275_v57 = vcombine.high %v20807_v39, %v20807_v39  ;;  %15478 = vmatmul.mubr.msk.bf16.vlgmr.msra.gmra.mrb[32].mxu0 %vm782_vm3, %v12999_v43  ;;  %v11301_v6 = vcombine.high %v14342_v9, %v14342_v9 }
 0x5a3   : > { %v11259_v30 = vcombine.high %v11257_v46, %v11257_v46  ;;  %v20826_v19 = vrot.slane %v11284_v38, %v22189_v36  ;;  %v20829_v21 = vrot.slane %v14342_v9, %v22189_v36  ;;  %v11299_v20 = vcombine.high %v20822_v7, %v20822_v7  ;;  %v22194_v9 = vld [vmem:[#allocation74_spill] sm:$0xff]  ;;  %v22199_v38 = vld [vmem:[#allocation77_spill] sm:$0xff] }
 0x5a4   : > { %v11276_v15 = vcombine.high %v20816_v48, %v20816_v48  ;;  %v20836_v44 = vrot.slane %v10848_v41, %v22189_v36  ;;  %v11325_v33 = vcombine.high %v10849_v51, %v10849_v51  ;;  %v20841_v45 = vrot.slane %v11301_v6, %v22189_v36  ;;  %v22201_v6 = vld [vmem:[#allocation78_spill] sm:$0xff] }
 0x5a5   : > { %v11300_v11 = vcombine.high %v20826_v19, %v20826_v19  ;;  %v11316_v60 = vcombine.high %v20829_v21, %v20829_v21  ;;  %v20846_v53 = vrot.slane %v10849_v51, %v22189_v36  ;;  %v22193_v18 = vcombine.low %v22191_v63, %v22192_v29 }
 0x5a6   : > { %v20852_v35 = vrot.slane %v11325_v33, %v22189_v36  ;;  %v11342_v62 = vcombine.high %v10850_v37, %v10850_v37  ;;  %v20855_v12 = vrot.slane %v10850_v37, %v22189_v36  ;;  %v20858_v49 = vrot.slane %v10851_v3, %v22189_v36  ;;  %v22202_v33 = vld [vmem:[#allocation79_spill] sm:$0xff] }
 0x5a7   : > { %15460 = vmatmul.mubr.bf16.gmra.mrb[16].mxu1 %v22193_v18  ;;  %v22196_v14 = vcombine.low %v22194_v9, %v22195_v55  ;;  %v11317_v54 = vcombine.high %v20841_v45, %v20841_v45  ;;  %v11340_v52 = vcombine.high %v20846_v53, %v20846_v53  ;;  %v11366_v1 = vcombine.high %v14345_v8, %v14345_v8 }
 0x5a8   : > { %v20868_v28 = vrot.slane %v14345_v8, %v22189_v36  ;;  %v11341_v32 = vcombine.high %v20852_v35, %v20852_v35  ;;  %v20873_v27 = vrot.slane %v11342_v62, %v22189_v36  ;;  %v11357_v16 = vcombine.high %v20855_v12, %v20855_v12 }
 0x5a9   : > { %15463 = vmatprep.mubr.bf16.mxu1 %v22196_v14  ;;  %v11383_v56 = vcombine.high %v20787_v23, %v20787_v23  ;;  %v20880_v24 = vrot.slane %v11366_v1, %v22189_v36  ;;  %v20886_v8 = vrot.slane %v20787_v23, %v22189_v36  ;;  %v20889_v58 = vrot.slane %v10854_v25, %v22189_v36 }
 0x5aa   : > { %v11381_v40 = vcombine.high %v20868_v28, %v20868_v28  ;;  %v11358_v41 = vcombine.high %v20873_v27, %v20873_v27  ;;  %v14144_v22 = vrot.slane %v11250_v34, 9  ;;  %v11780_v59 = vrot.slane %v11258_v4, 7 }
 0x5ab   : > { %v20894_v26 = vrot.slane %v11383_v56, %v22189_v36  ;;  %v11382_v10 = vcombine.high %v20880_v24, %v20880_v24  ;;  %v11398_v2 = vcombine.high %v20886_v8, %v20886_v8  ;;  %v11783_v51 = vrot.slane %v11257_v46, 7 }
 0x5ac   : > { %v11786_v23 = vrot.slane %v11259_v30, 7  ;;  %v20904_v5 = vsel %vm20102_vm8, %v14144_v22, %v11780_v59  ;;  %v11782_v42 = vrot.slane %v11780_v59, 2  ;;  %v11789_v13 = vrot.slane %v20807_v39, 7 }
 0x5ad   : > { %v11399_v37 = vcombine.high %v20894_v26, %v20894_v26  ;;  %v11785_v3 = vrot.slane %v11783_v51, 2  ;;  %v11792_v31 = vrot.slane %v11275_v57, 7  ;;  %v11795_v61 = vrot.slane %v20816_v48, 7 }
 0x5ae   : > { %v11788_v25 = vrot.slane %v11786_v23, 2  ;;  %v20910_v34 = vsel %vm20102_vm8, %v11782_v42, %v11783_v51  ;;  %v11791_v17 = vrot.slane %v11789_v13, 2  ;;  %v11798_v43 = vrot.slane %v11276_v15, 7 }
 0x5af   : > { %v11801_v46 = vrot.slane %v20811_v50, 7  ;;  %v22200_v4 = vcombine.low %v22198_v47, %v22199_v38  ;;  %v20918_v39 = vsel %vm20102_vm8, %v11785_v3, %v11786_v23  ;;  %v11794_v48 = vrot.slane %v11792_v31, 2 }
 0x5b0   : > { %v20922_v57 = vsel %vm20102_vm8, %v11788_v25, %v11789_v13  ;;  %v11797_v30 = vrot.slane %v11795_v61, 2  ;;  %v22203_v63 = vcombine.low %v22201_v6, %v22202_v33  ;;  %v20929_v50 = vsel %vm20102_vm8, %v11791_v17, %v11792_v31  ;;  %v22205_v17 = vld [vmem:[#allocation81_spill] sm:$0xff] }
 0x5b1   : > { %15464 = vmatmul.mubr.bf16.gmra.mrb[20].mxu1 %v22200_v4  ;;  %v11800_v15 = vrot.slane %v11798_v43, 2  ;;  %v14145_v29 = vrot.slane %v20822_v7, 9  ;;  %v11805_v18 = vrot.slane %v11299_v20, 7  ;;  %v20934_v62 = vsel %vm20102_vm8, %v11794_v48, %v11795_v61 }
 0x5b2   : > { %15467 = vmatprep.mubr.bf16.mxu1 %v22203_v63  ;;  %v20938_v9 = vsel %vm20102_vm8, %v11797_v30, %v11798_v43  ;;  %v11808_v55 = vrot.slane %v20826_v19, 7  ;;  %v11811_v14 = vrot.slane %v11300_v11, 7  ;;  %v11814_v20 = vrot.slane %v20829_v21, 7 }
 0x5b3   : > { %v20943_v1 = vsel %vm20102_vm8, %v11800_v15, %v11801_v46  ;;  %v20947_v56 = vsel %vm20102_vm8, %v14145_v29, %v11805_v18  ;;  %v11807_v7 = vrot.slane %v11805_v18, 2  ;;  %v11817_v51 = vrot.slane %v11316_v60, 7 }
 0x5b4   : > { %v11810_v22 = vrot.slane %v11808_v55, 2  ;;  %v11813_v59 = vrot.slane %v11811_v14, 2  ;;  %v11820_v23 = vrot.slane %v20841_v45, 7  ;;  %v11816_v11 = vrot.slane %v11814_v20, 2 }
 0x5b5   : > { %v20953_v19 = vsel %vm20102_vm8, %v11807_v7, %v11808_v55  ;;  %v11823_v42 = vrot.slane %v11317_v54, 7  ;;  %v11826_v13 = vrot.slane %v20836_v44, 7  ;;  %v11819_v25 = vrot.slane %v11817_v51, 2  ;;  %v22204_v54 = vld [vmem:[#allocation80_spill] sm:$0xff] }
 0x5b6   : > { %v20958_v3 = vsel %vm20102_vm8, %v11810_v22, %v11811_v14  ;;  %v20962_v21 = vsel %vm20102_vm8, %v11813_v59, %v11814_v20  ;;  %v11822_v60 = vrot.slane %v11820_v23, 2  ;;  %v20966_v45 = vsel %vm20102_vm8, %v11816_v11, %v11817_v51 }
 0x5b7   : > { %v11825_v31 = vrot.slane %v11823_v42, 2  ;;  %v14146_v61 = vrot.slane %v20846_v53, 9  ;;  %v11830_v44 = vrot.slane %v11340_v52, 7  ;;  %v22206_v43 = vcombine.low %v22204_v54, %v22205_v17  ;;  %v22207_v53 = vld [vmem:[#allocation82_spill] sm:$0xff]  ;;  %v22208_v52 = vld [vmem:[#allocation83_spill] sm:$0xff] }
 0x5b8   : > { %v20977_v46 = vsel %vm20102_vm8, %v11819_v25, %v11820_v23  ;;  %v20981_v47 = vsel %vm20102_vm8, %v11822_v60, %v11823_v42  ;;  %v11833_v38 = vrot.slane %v20852_v35, 7  ;;  %v11836_v4 = vrot.slane %v11341_v32, 7 }
 0x5b9   : > { %15468 = vmatmul.mubr.bf16.gmra.mrb[24].mxu1 %v22206_v43  ;;  %v22209_v48 = vcombine.low %v22207_v53, %v22208_v52  ;;  %v20992_v30 = vsel %vm20102_vm8, %v11825_v31, %v11826_v13  ;;  %v20996_v6 = vsel %vm20102_vm8, %v14146_v61, %v11830_v44  ;;  %v11832_v33 = vrot.slane %v11830_v44, 2 }
 0x5ba   : > { %v11839_v63 = vrot.slane %v20855_v12, 7  ;;  %v11835_v15 = vrot.slane %v11833_v38, 2  ;;  %v11838_v29 = vrot.slane %v11836_v4, 2  ;;  %v11842_v35 = vrot.slane %v11357_v16, 7 }
 0x5bb   : > { %15471 = vmatprep.mubr.bf16.mxu1 %v22209_v48  ;;  %v11845_v32 = vrot.slane %v20873_v27, 7  ;;  %v21005_v18 = vsel %vm20102_vm8, %v11832_v33, %v11833_v38  ;;  %v11848_v14 = vrot.slane %v11358_v41, 7  ;;  %v11851_v7 = vrot.slane %v20858_v49, 7 }
 0x5bc   : > { %v11841_v55 = vrot.slane %v11839_v63, 2  ;;  %v21013_v20 = vsel %vm20102_vm8, %v11835_v15, %v11836_v4  ;;  %v21017_v12 = vsel %vm20102_vm8, %v11838_v29, %v11839_v63  ;;  %v11844_v16 = vrot.slane %v11842_v35, 2 }
 0x5bd   : > { %22210 = vst [vmem:[#allocation64_spill] sm:$0xff] %v21017_v12  ;;  %v11847_v22 = vrot.slane %v11845_v32, 2  ;;  %v11850_v51 = vrot.slane %v11848_v14, 2  ;;  %v14147_v27 = vrot.slane %v20868_v28, 9  ;;  %v11855_v49 = vrot.slane %v11381_v40, 7 }
 0x5be   : > { %v21021_v59 = vsel %vm20102_vm8, %v11841_v55, %v11842_v35  ;;  %v21029_v41 = vsel %vm20102_vm8, %v11844_v16, %v11845_v32  ;;  %v11858_v11 = vrot.slane %v20880_v24, 7  ;;  %v11861_v42 = vrot.slane %v11382_v10, 7 }
 0x5bf   : > { %22211 = vst [vmem:[#allocation58_spill] sm:$0xff] %v21021_v59  ;;  %22212 = vst [vmem:[#allocation61_spill] sm:$0xff] %v21029_v41  ;;  %v21033_v23 = vsel %vm20102_vm8, %v11847_v22, %v11848_v14  ;;  %v21041_v13 = vsel %vm20102_vm8, %v11850_v51, %v11851_v7  ;;  %v21045_v28 = vsel %vm20102_vm8, %v14147_v27, %v11855_v49  ;;  %v11857_v40 = vrot.slane %v11855_v49, 2 }
 0x5c0   : > { %22213 = vst [vmem:[#allocation27_spill] sm:$0xff] %v21033_v23  ;;  %22214 = vst [vmem:[#allocation28_spill] sm:$0xff] %v21041_v13  ;;  %v11864_v25 = vrot.slane %v20886_v8, 7  ;;  %v11860_v60 = vrot.slane %v11858_v11, 2  ;;  %v11863_v31 = vrot.slane %v11861_v42, 2  ;;  %v11867_v61 = vrot.slane %v11398_v2, 7 }
 0x5c1   : > { %22215 = vst [vmem:[#allocation67_spill] sm:$0xff] %v21045_v28  ;;  %v11870_v24 = vrot.slane %v20894_v26, 7  ;;  %v21054_v10 = vsel %vm20102_vm8, %v11857_v40, %v11858_v11  ;;  %v11873_v54 = vrot.slane %v11399_v37, 7  ;;  %v11876_v17 = vrot.slane %v20889_v58, 7 }
 0x5c2   : > { %22216 = vst [vmem:[#allocation29_spill] sm:$0xff] %v21054_v10  ;;  %v11866_v44 = vrot.slane %v11864_v25, 2  ;;  %v21062_v43 = vsel %vm20102_vm8, %v11860_v60, %v11861_v42  ;;  %v21066_v8 = vsel %vm20102_vm8, %v11863_v31, %v11864_v25  ;;  %v11869_v2 = vrot.slane %v11867_v61, 2 }
 0x5c3   : > { %22217 = vst [vmem:[#allocation30_spill] sm:$0xff] %v21062_v43  ;;  %22218 = vst [vmem:[#allocation37_spill] sm:$0xff] %v21066_v8  ;;  %v11872_v38 = vrot.slane %v11870_v24, 2  ;;  %v11875_v53 = vrot.slane %v11873_v54, 2  ;;  %v14216_v26 = vrot.slane %v20904_v5, 9  ;;  %v14217_v37 = vrot.slane %v20910_v34, 9 }
 0x5c4   : > { %v21070_v4 = vsel %vm20102_vm8, %v11866_v44, %v11867_v61  ;;  %v11871_v58 = vsel %vm20102_vm8, %v11869_v2, %v11870_v24  ;;  %v14218_v48 = vrot.slane %v20918_v39, 9  ;;  %v14219_v33 = vrot.slane %v20922_v57, 9 }
 0x5c5   : > { %22219 = vst [vmem:[#allocation54_spill] sm:$0xff] %v21070_v4  ;;  %v11874_v52 = vsel %vm20102_vm8, %v11872_v38, %v11873_v54  ;;  %v11877_v63 = vsel %vm20102_vm8, %v11875_v53, %v11876_v17  ;;  %v14220_v15 = vrot.slane %v20929_v50, 9  ;;  %v14221_v29 = vrot.slane %v20934_v62, 9 }
 0x5c6   : > { %v14222_v35 = vrot.slane %v20938_v9, 9  ;;  %v14223_v32 = vrot.slane %v20943_v1, 9  ;;  %v14224_v55 = vrot.slane %v20947_v56, 9  ;;  %v14225_v14 = vrot.slane %v20953_v19, 9 }
 0x5c7   : > { %v14226_v7 = vrot.slane %v20958_v3, 9  ;;  %v14227_v16 = vrot.slane %v20962_v21, 9  ;;  %v14228_v22 = vrot.slane %v20966_v45, 9  ;;  %v14229_v51 = vrot.slane %v20977_v46, 9 }
 0x5c8   : > { %v14230_v27 = vrot.slane %v20981_v47, 9  ;;  %v14231_v49 = vrot.slane %v20992_v30, 9  ;;  %v14232_v11 = vrot.slane %v20996_v6, 9  ;;  %v14233_v42 = vrot.slane %v21005_v18, 9 }
 0x5c9   : > { %v14234_v40 = vrot.slane %v21013_v20, 9  ;;  %v14235_v25 = vrot.slane %v21017_v12, 9  ;;  %v14236_v60 = vrot.slane %v21021_v59, 9  ;;  %v14237_v31 = vrot.slane %v21029_v41, 9 }
 0x5ca   : > { %v14238_v61 = vrot.slane %v21033_v23, 9  ;;  %v14239_v24 = vrot.slane %v21041_v13, 9  ;;  %v14240_v44 = vrot.slane %v21045_v28, 9  ;;  %v14241_v54 = vrot.slane %v21054_v10, 9 }
 0x5cb   : > { %v14242_v17 = vrot.slane %v21062_v43, 9  ;;  %v14243_v2 = vrot.slane %v21066_v8, 9  ;;  %v14244_v38 = vrot.slane %v21070_v4, 9  ;;  %v14245_v53 = vrot.slane %v11871_v58, 9 }
 0x5cc   : > { %v14246_v0 = vrot.slane %v11874_v52, 9  ;;  %v14247_v36 = vrot.slane %v11877_v63, 9  ;;  %v12554_v59 = vadd.f32 %v14216_v26, %v20904_v5  ;;  %v12555_v41 = vadd.f32 %v14217_v37, %v20910_v34  ;;  %v22220_v26 = vld [vmem:[#allocation64_spill] sm:$0xff]  ;;  %v22221_v37 = vld [vmem:[#allocation58_spill] sm:$0xff] }
 0x5cd   : > { %v12556_v23 = vadd.f32 %v14218_v48, %v20918_v39  ;;  %v12557_v13 = vadd.f32 %v14219_v33, %v20922_v57  ;;  %v12558_v28 = vadd.f32 %v14220_v15, %v20929_v50  ;;  %v12559_v10 = vadd.f32 %v14221_v29, %v20934_v62  ;;  %v22222_v48 = vld [vmem:[#allocation61_spill] sm:$0xff]  ;;  %v22223_v33 = vld [vmem:[#allocation27_spill] sm:$0xff]  ;;  %v22224_v15 = vld [vmem:[#allocation28_spill] sm:$0xff] }
 0x5ce   : > { %v12560_v43 = vadd.f32 %v14222_v35, %v20938_v9  ;;  %v12561_v8 = vadd.f32 %v14223_v32, %v20943_v1  ;;  %v12562_v4 = vadd.f32 %v14224_v55, %v20947_v56  ;;  %v12563_v12 = vadd.f32 %v14225_v14, %v20953_v19  ;;  %v22225_v29 = vld [vmem:[#allocation67_spill] sm:$0xff]  ;;  %v22226_v35 = vld [vmem:[#allocation29_spill] sm:$0xff]  ;;  %v22227_v32 = vld [vmem:[#allocation30_spill] sm:$0xff] }
 0x5cf   : > { %v12564_v5 = vadd.f32 %v14226_v7, %v20958_v3  ;;  %v12565_v34 = vadd.f32 %v14227_v16, %v20962_v21  ;;  %v12566_v39 = vadd.f32 %v14228_v22, %v20966_v45  ;;  %v12567_v57 = vadd.f32 %v14229_v51, %v20977_v46  ;;  %v22228_v55 = vld [vmem:[#allocation37_spill] sm:$0xff]  ;;  %v22229_v14 = vld [vmem:[#allocation54_spill] sm:$0xff] }
 0x5d0   : > { %v12568_v50 = vadd.f32 %v14230_v27, %v20981_v47  ;;  %v12569_v62 = vadd.f32 %v14231_v49, %v20992_v30  ;;  %v12570_v9 = vadd.f32 %v14232_v11, %v20996_v6  ;;  %v12571_v1 = vadd.f32 %v14233_v42, %v21005_v18 }
 0x5d1   : > { %v12572_v56 = vadd.f32 %v14234_v40, %v21013_v20  ;;  %v12573_v19 = vadd.f32 %v14235_v25, %v22220_v26  ;;  %v12574_v3 = vadd.f32 %v14236_v60, %v22221_v37  ;;  %v12575_v21 = vadd.f32 %v14237_v31, %v22222_v48 }
 0x5d2   : > { %v12576_v45 = vadd.f32 %v14238_v61, %v22223_v33  ;;  %v12577_v46 = vadd.f32 %v14239_v24, %v22224_v15  ;;  %v12578_v47 = vadd.f32 %v14240_v44, %v22225_v29  ;;  %v12579_v30 = vadd.f32 %v14241_v54, %v22226_v35 }
 0x5d3   : > { %v12580_v6 = vadd.f32 %v14242_v17, %v22227_v32  ;;  %v12581_v18 = vadd.f32 %v14243_v2, %v22228_v55  ;;  %v12582_v20 = vadd.f32 %v14244_v38, %v22229_v14  ;;  %v12583_v7 = vadd.f32 %v14245_v53, %v11871_v58 }
 0x5d4   : > { %v12584_v16 = vadd.f32 %v14246_v0, %v11874_v52  ;;  %v12585_v22 = vadd.f32 %v14247_v36, %v11877_v63  ;;  %v12650_v51 = vadd.f32 %v12562_v4, %v12554_v59  ;;  %v12651_v27 = vadd.f32 %v12563_v12, %v12555_v41 }
 0x5d5   : > { %v12652_v49 = vadd.f32 %v12564_v5, %v12556_v23  ;;  %v12653_v11 = vadd.f32 %v12565_v34, %v12557_v13  ;;  %v12654_v42 = vadd.f32 %v12566_v39, %v12558_v28  ;;  %v12655_v40 = vadd.f32 %v12567_v57, %v12559_v10 }
 0x5d6   : > { %v12656_v25 = vadd.f32 %v12568_v50, %v12560_v43  ;;  %v12657_v60 = vadd.f32 %v12569_v62, %v12561_v8  ;;  %v12658_v31 = vadd.f32 %v12578_v47, %v12570_v9  ;;  %v12659_v61 = vadd.f32 %v12579_v30, %v12571_v1 }
 0x5d7   : > { %v12660_v24 = vadd.f32 %v12580_v6, %v12572_v56  ;;  %v12661_v44 = vadd.f32 %v12581_v18, %v12573_v19  ;;  %v12662_v54 = vadd.f32 %v12582_v20, %v12574_v3  ;;  %v12663_v17 = vadd.f32 %v12583_v7, %v12575_v21  ;;  %v14361_v18 = vld [vmem:[%s16507_s21 + $0xa8] sm:$0xff]  }
 0x5d8   : > { %v12664_v2 = vadd.f32 %v12584_v16, %v12576_v45  ;;  %v12665_v26 = vadd.f32 %v12585_v22, %v12577_v46  ;;  %v12714_v38 = vpack.c.bf16 %v12650_v51, %v12650_v51  ;;  %v12715_v58 = vpack.c.bf16 %v12651_v27, %v12651_v27  ;;  %v14124_v22 = vld [vmem:[%s16507_s21 + $0x9c] sm:$0xff]  }
 0x5d9   : > { %v12716_v0 = vpack.c.bf16 %v12652_v49, %v12652_v49  ;;  %v12717_v36 = vpack.c.bf16 %v12653_v11, %v12653_v11  ;;  %v12718_v59 = vpack.c.bf16 %v12654_v42, %v12654_v42  ;;  %v12719_v12 = vpack.c.bf16 %v12655_v40, %v12655_v40  ;;  %v14362_v51 = vld [vmem:[%s16507_s21 + $0xc0] sm:$0xff]  }
 0x5da   : > { %v12720_v41 = vpack.c.bf16 %v12656_v25, %v12656_v25  ;;  %v12721_v23 = vpack.c.bf16 %v12657_v60, %v12657_v60  ;;  %v12722_v13 = vpack.c.bf16 %v12658_v31, %v12658_v31  ;;  %v12723_v28 = vpack.c.bf16 %v12659_v61, %v12659_v61  ;;  %v14126_v60 = vld [vmem:[%s16507_s21 + $0xa4] sm:$0x1] }
 0x5db   : > { %v12724_v10 = vpack.c.bf16 %v12660_v24, %v12660_v24  ;;  %v12725_v43 = vpack.c.bf16 %v12661_v44, %v12661_v44  ;;  %v12726_v8 = vpack.c.bf16 %v12662_v54, %v12662_v54  ;;  %v12727_v4 = vpack.c.bf16 %v12663_v17, %v12663_v17  ;;  %v14129_v24 = vld [vmem:[%s16507_s21 + $0xb0] sm:$0x1]  ;;  %v14130_v17 = vld [vmem:[%s16507_s21 + $0xb4] sm:$0xff]  }
 0x5dc   : > { %v12728_v52 = vpack.c.bf16 %v12664_v2, %v12664_v2  ;;  %v12729_v63 = vpack.c.bf16 %v12665_v26, %v12665_v26  ;;  %v12850_v53 = vunpack.c.l.b16 %v12714_v38  ;;  %v12851_v5 = vunpack.c.l.b16 %v12715_v58  ;;  %v14132_v2 = vld [vmem:[%s16507_s21 + $0xbc] sm:$0x1] }
 0x5dd   : > { %v12852_v34 = vunpack.c.l.b16 %v12716_v0  ;;  %v12853_v39 = vunpack.c.l.b16 %v12717_v36  ;;  %v12854_v57 = vunpack.c.l.b16 %v12718_v59  ;;  %v12855_v50 = vunpack.c.l.b16 %v12719_v12 }
 0x5de   : > { %v12856_v62 = vunpack.c.l.b16 %v12720_v41  ;;  %v12857_v9 = vunpack.c.l.b16 %v12721_v23  ;;  %v12858_v1 = vunpack.c.l.b16 %v12722_v13  ;;  %v12859_v56 = vunpack.c.l.b16 %v12723_v28  ;;  %v14135_v23 = vld [vmem:[%s16507_s21 + $0xc8] sm:$0x1]  ;;  %s16306_s21 = sshll.u32 %s16376_s28, 4  ;;  %s16307_s21 = int_to_ptr.vmem [resolvable:$false] %s16306_s21 }
 0x5df   : > { %v12860_v19 = vunpack.c.l.b16 %v12724_v10  ;;  %v12861_v37 = vunpack.c.l.b16 %v12725_v43  ;;  %v12862_v3 = vunpack.c.l.b16 %v12726_v8  ;;  %v12863_v48 = vunpack.c.l.b16 %v12727_v4  ;;  %s16308_s20 = scalar_lea.vmem %s16307_s21, 2048  ;;  %p16309_p2 = scmp.lt.s32.totalorder %s21565_s8, %s16307_s21 }
 0x5e0   : > { %v12864_v21 = vunpack.c.l.b16 %v12728_v52  ;;  %v12865_v33 = vunpack.c.l.b16 %v12729_v63  ;;  %v12942_v45 = vrot.slane %v12851_v5, 7  ;;  %v12944_v15 = vrot.slane %v12852_v34, 6  ;;  %p16310_p3 = scmp.lt.s32.totalorder %s16308_s20, %s16302_s19 }
 0x5e1   : > { %v12946_v46 = vrot.slane %v12853_v39, 5  ;;  %v12948_v29 = vrot.slane %v12854_v57, 4  ;;  %v12950_v47 = vrot.slane %v12855_v50, 3  ;;  %v12952_v35 = vrot.slane %v12856_v62, 2 }
 0x5e2   : > { %v12943_v30 = vsel %vm12883_vm9, %v12942_v45, %v12850_v53  ;;  %v12956_v32 = vrot.slane %v12859_v56, 7  ;;  %v12958_v6 = vrot.slane %v12860_v19, 6  ;;  %v12960_v55 = vrot.slane %v12861_v37, 5  ;;  %v22230_v53 = vld [vmem:[#allocation55_spill] sm:$0xff]  ;;  %p16311_p4 = por %p16310_p3, %p16309_p2 }
 0x5e3   : > { %v12945_v14 = vsel %vm11572_vm1, %v12944_v15, %v12943_v30  ;;  %v12954_v20 = vrot.slane %v12857_v9, 1  ;;  %v12962_v7 = vrot.slane %v12862_v3, 4  ;;  %v12964_v16 = vrot.slane %v12863_v48, 3 }
 0x5e4   : > { %v12947_v27 = vsel %vm12888_vm10, %v12946_v46, %v12945_v14  ;;  %v12957_v49 = vsel %vm12883_vm9, %v12956_v32, %v12858_v1  ;;  %v12966_v11 = vrot.slane %v12864_v21, 2  ;;  %v12968_v42 = vrot.slane %v12865_v33, 1  ;;  %p16312_p7 = pnand %p16311_p4, %p16305_p12 }
 0x5e5   : > { %v12949_v40 = vsel %vm11574_vm2, %v12948_v29, %v12947_v27  ;;  %v12959_v25 = vsel %vm11572_vm1, %v12958_v6, %v12957_v49  ;;  %v14349_v31 = vunpack.c.l.bf16 %v14361_v18  ;;  %v14350_v61 = vunpack.c.h.bf16 %v14361_v18 }
 0x5e6   : > { %v12951_v44 = vsel %vm12893_vm11, %v12950_v47, %v12949_v40  ;;  %v12961_v54 = vsel %vm12888_vm10, %v12960_v55, %v12959_v25  ;;  %v14353_v26 = vunpack.c.l.bf16 %v14362_v51  ;;  %v10855_v38 = vunpack.c.l.bf16 %v14124_v22 }
 0x5e7   : > { %v12953_v58 = vsel %vm11576_vm4, %v12952_v35, %v12951_v44  ;;  %v12963_v0 = vsel %vm11574_vm2, %v12962_v7, %v12961_v54  ;;  %v14354_v36 = vunpack.c.h.bf16 %v14362_v51  ;;  %v10856_v59 = vunpack.c.h.bf16 %v14124_v22 }
 0x5e8   : > { %v12955_v12 = vsel %vm12898_vm12, %v12954_v20, %v12953_v58  ;;  %v12965_v41 = vsel %vm12893_vm11, %v12964_v16, %v12963_v0  ;;  %v10857_v13 = vunpack.c.l.bf16 %v14126_v60  ;;  %v10860_v28 = vunpack.c.l.bf16 %v14129_v24 }
 0x5e9   : > { %v12967_v10 = vsel %vm11576_vm4, %v12966_v11, %v12965_v41  ;;  %v10861_v43 = vunpack.c.l.bf16 %v14130_v17  ;;  %v10862_v8 = vunpack.c.h.bf16 %v14130_v17  ;;  %v10863_v4 = vunpack.c.l.bf16 %v14132_v2 }
 0x5ea   : > { %v12969_v52 = vsel %vm12898_vm12, %v12968_v42, %v12967_v10  ;;  %v11407_v63 = vcombine.high %v10855_v38, %v10855_v38  ;;  %v11414_v5 = vrot.slane %v10855_v38, %v22230_v53  ;;  %v11424_v34 = vcombine.high %v10856_v59, %v10856_v59 }
 0x5eb   : > { %v13000_v39 = vpack.c.b16 %v12969_v52, %v12955_v12  ;;  %v10866_v57 = vunpack.c.l.bf16 %v14135_v23  ;;  %v11431_v50 = vrot.slane %v10856_v59, %v22230_v53  ;;  %v11448_v62 = vcombine.high %v14349_v31, %v14349_v31 }
 0x5ec   : > { %v11421_v9 = vrot.slane %v11407_v63, %v22230_v53  ;;  %v11438_v1 = vrot.slane %v11424_v34, %v22230_v53  ;;  %v21163_v56 = vrot.slane %v10857_v13, %v22230_v53  ;;  %v21166_v19 = vrot.slane %v14349_v31, %v22230_v53 }
 0x5ed   : > { %15481 = vmatprep.mubr.msk.bf16.mxu0 %vm782_vm3, %v13000_v39  ;;  %v11422_v37 = vcombine.high %v11414_v5, %v11414_v5  ;;  %v21170_v3 = vrot.slane %v11448_v62, %v22230_v53  ;;  %v11465_v48 = vcombine.high %v14350_v61, %v14350_v61  ;;  %v21173_v21 = vrot.slane %v14350_v61, %v22230_v53 }
 0x5ee   : > { %v11423_v33 = vcombine.high %v11421_v9, %v11421_v9  ;;  %v11439_v45 = vcombine.high %v11431_v50, %v11431_v50  ;;  %v11440_v15 = vcombine.high %v11438_v1, %v11438_v1  ;;  %v11463_v46 = vcombine.high %v21166_v19, %v21166_v19 }
 0x5ef   : > { %v11464_v29 = vcombine.high %v21170_v3, %v21170_v3  ;;  %v21180_v47 = vrot.slane %v11465_v48, %v22230_v53  ;;  %v21183_v35 = vrot.slane %v10860_v28, %v22230_v53  ;;  %v11489_v30 = vcombine.high %v10861_v43, %v10861_v43 }
 0x5f0   : > { %v11480_v32 = vcombine.high %v21173_v21, %v21173_v21  ;;  %v21188_v6 = vrot.slane %v10861_v43, %v22230_v53  ;;  %v11506_v55 = vcombine.high %v10862_v8, %v10862_v8  ;;  %v21191_v18 = vrot.slane %v10862_v8, %v22230_v53 }
 0x5f1   : > { %v21194_v14 = vrot.slane %v11489_v30, %v22230_v53  ;;  %v21197_v20 = vrot.slane %v10863_v4, %v22230_v53  ;;  %v11530_v7 = vcombine.high %v14353_v26, %v14353_v26  ;;  %v21200_v16 = vrot.slane %v14353_v26, %v22230_v53 }
 0x5f2   : > { %v11481_v22 = vcombine.high %v21180_v47, %v21180_v47  ;;  %v11504_v51 = vcombine.high %v21188_v6, %v21188_v6  ;;  %v21207_v27 = vrot.slane %v11506_v55, %v22230_v53  ;;  %v11547_v49 = vcombine.high %v14354_v36, %v14354_v36 }
 0x5f3   : > { %v11505_v11 = vcombine.high %v21194_v14, %v21194_v14  ;;  %v11521_v42 = vcombine.high %v21191_v18, %v21191_v18  ;;  %v21214_v40 = vrot.slane %v11530_v7, %v22230_v53  ;;  %v21217_v25 = vrot.slane %v14354_v36, %v22230_v53 }
 0x5f4   : > { %v11522_v60 = vcombine.high %v21207_v27, %v21207_v27  ;;  %v11545_v31 = vcombine.high %v21200_v16, %v21200_v16  ;;  %v21224_v61 = vrot.slane %v11547_v49, %v22230_v53  ;;  %v21227_v24 = vrot.slane %v10866_v57, %v22230_v53 }
 0x5f5   : > { %v11546_v44 = vcombine.high %v21214_v40, %v21214_v40  ;;  %v14148_v54 = vrot.slane %v11414_v5, 9  ;;  %v11880_v17 = vrot.slane %v11422_v37, 7  ;;  %v11883_v2 = vrot.slane %v11421_v9, 7 }
 0x5f6   : > { %v11562_v26 = vcombine.high %v21217_v25, %v21217_v25  ;;  %v11886_v38 = vrot.slane %v11423_v33, 7  ;;  %v11889_v58 = vrot.slane %v11431_v50, 7  ;;  %v11892_v0 = vrot.slane %v11439_v45, 7 }
 0x5f7   : > { %v11563_v36 = vcombine.high %v21224_v61, %v21224_v61  ;;  %v11882_v59 = vrot.slane %v11880_v17, 2  ;;  %v11885_v12 = vrot.slane %v11883_v2, 2  ;;  %v11895_v41 = vrot.slane %v11438_v1, 7 }
 0x5f8   : > { %v11888_v23 = vrot.slane %v11886_v38, 2  ;;  %v11891_v13 = vrot.slane %v11889_v58, 2  ;;  %v11894_v28 = vrot.slane %v11892_v0, 2  ;;  %v11898_v10 = vrot.slane %v11440_v15, 7 }
 0x5f9   : > { %v21237_v8 = vsel %vm20102_vm8, %v14148_v54, %v11880_v17  ;;  %v21241_v4 = vsel %vm20102_vm8, %v11882_v59, %v11883_v2  ;;  %v11897_v52 = vrot.slane %v11895_v41, 2  ;;  %v11901_v63 = vrot.slane %v21163_v56, 7 }
 0x5fa   : > { %v21246_v53 = vsel %vm20102_vm8, %v11885_v12, %v11886_v38  ;;  %v21250_v5 = vsel %vm20102_vm8, %v11888_v23, %v11889_v58  ;;  %v21254_v34 = vsel %vm20102_vm8, %v11891_v13, %v11892_v0  ;;  %v11900_v39 = vrot.slane %v11898_v10, 2 }
 0x5fb   : > { %v21258_v57 = vsel %vm20102_vm8, %v11894_v28, %v11895_v41  ;;  %v14149_v50 = vrot.slane %v21166_v19, 9  ;;  %v11905_v62 = vrot.slane %v11463_v46, 7  ;;  %v11908_v9 = vrot.slane %v21170_v3, 7 }
 0x5fc   : > { %v21264_v1 = vsel %vm20102_vm8, %v11897_v52, %v11898_v10  ;;  %v11911_v56 = vrot.slane %v11464_v29, 7  ;;  %v11914_v37 = vrot.slane %v21173_v21, 7  ;;  %v11917_v48 = vrot.slane %v11480_v32, 7 }
 0x5fd   : > { %v21269_v33 = vsel %vm20102_vm8, %v11900_v39, %v11901_v63  ;;  %v11907_v45 = vrot.slane %v11905_v62, 2  ;;  %v11910_v15 = vrot.slane %v11908_v9, 2  ;;  %v11920_v30 = vrot.slane %v21180_v47, 7 }
 0x5fe   : > { %v11913_v19 = vrot.slane %v11911_v56, 2  ;;  %v11916_v46 = vrot.slane %v11914_v37, 2  ;;  %v11919_v55 = vrot.slane %v11917_v48, 2  ;;  %v11923_v3 = vrot.slane %v11481_v22, 7 }
 0x5ff   : > { %v21274_v7 = vsel %vm20102_vm8, %v14149_v50, %v11905_v62  ;;  %v21278_v21 = vsel %vm20102_vm8, %v11907_v45, %v11908_v9  ;;  %v11922_v29 = vrot.slane %v11920_v30, 2  ;;  %v11926_v32 = vrot.slane %v21183_v35, 7 }
 0x600   : > { %v21283_v49 = vsel %vm20102_vm8, %v11910_v15, %v11911_v56  ;;  %v21287_v47 = vsel %vm20102_vm8, %v11913_v19, %v11914_v37  ;;  %v21291_v22 = vsel %vm20102_vm8, %v11916_v46, %v11917_v48  ;;  %v11925_v54 = vrot.slane %v11923_v3, 2 }
 0x601   : > { %v21295_v17 = vsel %vm20102_vm8, %v11919_v55, %v11920_v30  ;;  %v14150_v2 = vrot.slane %v21188_v6, 9  ;;  %v11930_v35 = vrot.slane %v11504_v51, 7  ;;  %v11933_v38 = vrot.slane %v21194_v14, 7 }
 0x602   : > { %v21301_v58 = vsel %vm20102_vm8, %v11922_v29, %v11923_v3  ;;  %v11936_v0 = vrot.slane %v11505_v11, 7  ;;  %v11939_v59 = vrot.slane %v21191_v18, 7  ;;  %v11942_v12 = vrot.slane %v11521_v42, 7 }
 0x603   : > { %v21306_v41 = vsel %vm20102_vm8, %v11925_v54, %v11926_v32  ;;  %v11932_v23 = vrot.slane %v11930_v35, 2  ;;  %v11935_v13 = vrot.slane %v11933_v38, 2  ;;  %v11945_v28 = vrot.slane %v21207_v27, 7 }
 0x604   : > { %v11938_v6 = vrot.slane %v11936_v0, 2  ;;  %v11941_v51 = vrot.slane %v11939_v59, 2  ;;  %v11944_v10 = vrot.slane %v11942_v12, 2  ;;  %v11948_v14 = vrot.slane %v11522_v60, 7 }
 0x605   : > { %v21314_v11 = vsel %vm20102_vm8, %v14150_v2, %v11930_v35  ;;  %v21318_v18 = vsel %vm20102_vm8, %v11932_v23, %v11933_v38  ;;  %v11947_v42 = vrot.slane %v11945_v28, 2  ;;  %v11951_v52 = vrot.slane %v21197_v20, 7 }
 0x606   : > { %v21323_v63 = vsel %vm20102_vm8, %v11935_v13, %v11936_v0  ;;  %v21327_v39 = vsel %vm20102_vm8, %v11938_v6, %v11939_v59  ;;  %v21331_v27 = vsel %vm20102_vm8, %v11941_v51, %v11942_v12  ;;  %v11950_v60 = vrot.slane %v11948_v14, 2 }
 0x607   : > { %v21335_v50 = vsel %vm20102_vm8, %v11944_v10, %v11945_v28  ;;  %v14151_v62 = vrot.slane %v21200_v16, 9  ;;  %v11955_v20 = vrot.slane %v11545_v31, 7  ;;  %v11958_v9 = vrot.slane %v21214_v40, 7 }
 0x608   : > { %22232 = vst [vmem:[#allocation38_spill] sm:$0xff] %v21335_v50  ;;  %v21344_v56 = vsel %vm20102_vm8, %v11947_v42, %v11948_v14  ;;  %v11961_v37 = vrot.slane %v11546_v44, 7  ;;  %v11964_v48 = vrot.slane %v21217_v25, 7  ;;  %v11967_v45 = vrot.slane %v11562_v26, 7 }
 0x609   : > { %22233 = vst [vmem:[#allocation40_spill] sm:$0xff] %v21344_v56  ;;  %v21355_v16 = vsel %vm20102_vm8, %v11950_v60, %v11951_v52  ;;  %v11957_v31 = vrot.slane %v11955_v20, 2  ;;  %v11960_v15 = vrot.slane %v11958_v9, 2  ;;  %v11970_v30 = vrot.slane %v21224_v61, 7 }
 0x60a   : > { %22234 = vst [vmem:[#allocation39_spill] sm:$0xff] %v21355_v16  ;;  %v11963_v19 = vrot.slane %v11961_v37, 2  ;;  %v11966_v46 = vrot.slane %v11964_v48, 2  ;;  %v11969_v55 = vrot.slane %v11967_v45, 2  ;;  %v11973_v40 = vrot.slane %v11563_v36, 7 }
 0x60b   : > { %v21363_v44 = vsel %vm20102_vm8, %v14151_v62, %v11955_v20  ;;  %v21367_v25 = vsel %vm20102_vm8, %v11957_v31, %v11958_v9  ;;  %v11972_v26 = vrot.slane %v11970_v30, 2  ;;  %v11976_v3 = vrot.slane %v21227_v24, 7 }
 0x60c   : > { %22235 = vst [vmem:[#allocation49_spill] sm:$0xff] %v21363_v44  ;;  %22236 = vst [vmem:[#allocation10_spill] sm:$0xff] %v21367_v25  ;;  %v21372_v29 = vsel %vm20102_vm8, %v11960_v15, %v11961_v37  ;;  %v21376_v32 = vsel %vm20102_vm8, %v11963_v19, %v11964_v48  ;;  %v21380_v61 = vsel %vm20102_vm8, %v11966_v46, %v11967_v45  ;;  %v11975_v36 = vrot.slane %v11973_v40, 2 }
 0x60d   : > { %22237 = vst [vmem:[#allocation21_spill] sm:$0xff] %v21372_v29  ;;  %22238 = vst [vmem:[#allocation11_spill] sm:$0xff] %v21376_v32  ;;  %v21384_v54 = vsel %vm20102_vm8, %v11969_v55, %v11970_v30  ;;  %v21388_v24 = vsel %vm20102_vm8, %v11972_v26, %v11973_v40  ;;  %v14248_v2 = vrot.slane %v21237_v8, 9  ;;  %v14249_v35 = vrot.slane %v21241_v4, 9 }
 0x60e   : > { %22239 = vst [vmem:[#allocation45_spill] sm:$0xff] %v21380_v61  ;;  %22240 = vst [vmem:[#allocation19_spill] sm:$0xff] %v21384_v54  ;;  %v11977_v38 = vsel %vm20102_vm8, %v11975_v36, %v11976_v3  ;;  %v14250_v0 = vrot.slane %v21246_v53, 9  ;;  %v14251_v59 = vrot.slane %v21250_v5, 9  ;;  %v14252_v12 = vrot.slane %v21254_v34, 9 }
 0x60f   : > { %22241 = vst [vmem:[#allocation20_spill] sm:$0xff] %v21388_v24  ;;  %v14253_v23 = vrot.slane %v21258_v57, 9  ;;  %v14254_v13 = vrot.slane %v21264_v1, 9  ;;  %v14255_v28 = vrot.slane %v21269_v33, 9  ;;  %v14256_v6 = vrot.slane %v21274_v7, 9 }
 0x610   : > { %v14257_v51 = vrot.slane %v21278_v21, 9  ;;  %v14258_v10 = vrot.slane %v21283_v49, 9  ;;  %v14259_v43 = vrot.slane %v21287_v47, 9  ;;  %v14260_v14 = vrot.slane %v21291_v22, 9 }
 0x611   : > { %v14261_v42 = vrot.slane %v21295_v17, 9  ;;  %v14262_v52 = vrot.slane %v21301_v58, 9  ;;  %v14263_v60 = vrot.slane %v21306_v41, 9  ;;  %v14264_v62 = vrot.slane %v21314_v11, 9 }
 0x612   : > { %v14265_v20 = vrot.slane %v21318_v18, 9  ;;  %v14266_v9 = vrot.slane %v21323_v63, 9  ;;  %v14267_v37 = vrot.slane %v21327_v39, 9  ;;  %v14268_v48 = vrot.slane %v21331_v27, 9 }
 0x613   : > { %v14269_v45 = vrot.slane %v21335_v50, 9  ;;  %v14270_v31 = vrot.slane %v21344_v56, 9  ;;  %v14271_v15 = vrot.slane %v21355_v16, 9  ;;  %v14272_v30 = vrot.slane %v21363_v44, 9 }
 0x614   : > { %v14273_v19 = vrot.slane %v21367_v25, 9  ;;  %v14274_v46 = vrot.slane %v21372_v29, 9  ;;  %v14275_v55 = vrot.slane %v21376_v32, 9  ;;  %v14276_v40 = vrot.slane %v21380_v61, 9 }
 0x615   : > { %v14277_v26 = vrot.slane %v21384_v54, 9  ;;  %v14278_v3 = vrot.slane %v21388_v24, 9  ;;  %v14279_v36 = vrot.slane %v11977_v38, 9  ;;  %v12586_v50 = vadd.f32 %v14248_v2, %v21237_v8  ;;  %v22242_v2 = vld [vmem:[#allocation38_spill] sm:$0xff] }
 0x616   : > { %v12587_v56 = vadd.f32 %v14249_v35, %v21241_v4  ;;  %v12588_v16 = vadd.f32 %v14250_v0, %v21246_v53  ;;  %v12589_v44 = vadd.f32 %v14251_v59, %v21250_v5  ;;  %v12590_v25 = vadd.f32 %v14252_v12, %v21254_v34  ;;  %v22243_v35 = vld [vmem:[#allocation40_spill] sm:$0xff]  ;;  %v22244_v0 = vld [vmem:[#allocation39_spill] sm:$0xff]  ;;  %v22245_v59 = vld [vmem:[#allocation10_spill] sm:$0xff] }
 0x617   : > { %v12591_v29 = vadd.f32 %v14253_v23, %v21258_v57  ;;  %v12592_v32 = vadd.f32 %v14254_v13, %v21264_v1  ;;  %v12593_v61 = vadd.f32 %v14255_v28, %v21269_v33  ;;  %v12594_v54 = vadd.f32 %v14256_v6, %v21274_v7  ;;  %v22246_v12 = vld [vmem:[#allocation49_spill] sm:$0xff]  ;;  %v22248_v13 = vld [vmem:[#allocation11_spill] sm:$0xff] }
 0x618   : > { %v12595_v24 = vadd.f32 %v14257_v51, %v21278_v21  ;;  %v12596_v8 = vadd.f32 %v14258_v10, %v21283_v49  ;;  %v12597_v4 = vadd.f32 %v14259_v43, %v21287_v47  ;;  %v12598_v53 = vadd.f32 %v14260_v14, %v21291_v22  ;;  %v22247_v23 = vld [vmem:[#allocation21_spill] sm:$0xff]  ;;  %v22250_v6 = vld [vmem:[#allocation19_spill] sm:$0xff]  ;;  %v22251_v51 = vld [vmem:[#allocation20_spill] sm:$0xff] }
 0x619   : > { %v12599_v5 = vadd.f32 %v14261_v42, %v21295_v17  ;;  %v12600_v34 = vadd.f32 %v14262_v52, %v21301_v58  ;;  %v12601_v57 = vadd.f32 %v14263_v60, %v21306_v41  ;;  %v12602_v1 = vadd.f32 %v14264_v62, %v21314_v11  ;;  %v22249_v28 = vld [vmem:[#allocation45_spill] sm:$0xff] }
 0x61a   : > { %v12603_v33 = vadd.f32 %v14265_v20, %v21318_v18  ;;  %v12604_v7 = vadd.f32 %v14266_v9, %v21323_v63  ;;  %v12605_v21 = vadd.f32 %v14267_v37, %v21327_v39  ;;  %v12606_v49 = vadd.f32 %v14268_v48, %v21331_v27 }
 0x61b   : > { %v12607_v47 = vadd.f32 %v14269_v45, %v22242_v2  ;;  %v12608_v22 = vadd.f32 %v14270_v31, %v22243_v35  ;;  %v12609_v17 = vadd.f32 %v14271_v15, %v22244_v0  ;;  %v12611_v58 = vadd.f32 %v14273_v19, %v22245_v59 }
 0x61c   : > { %v12610_v41 = vadd.f32 %v14272_v30, %v22246_v12  ;;  %v12612_v11 = vadd.f32 %v14274_v46, %v22247_v23  ;;  %v12613_v18 = vadd.f32 %v14275_v55, %v22248_v13  ;;  %v12614_v63 = vadd.f32 %v14276_v40, %v22249_v28  ;;  %v9896_v28 = vld [vmem:[#allocation2 + $0xcc] sm:$0xe] }
 0x61d   : > { %v12615_v39 = vadd.f32 %v14277_v26, %v22250_v6  ;;  %v12616_v27 = vadd.f32 %v14278_v3, %v22251_v51  ;;  %v12617_v10 = vadd.f32 %v14279_v36, %v11977_v38  ;;  %v12667_v43 = vadd.f32 %v12595_v24, %v12587_v56 }
 0x61e   : > { %v12668_v14 = vadd.f32 %v12596_v8, %v12588_v16  ;;  %v12669_v42 = vadd.f32 %v12597_v4, %v12589_v44  ;;  %v12670_v52 = vadd.f32 %v12598_v53, %v12590_v25  ;;  %v12671_v60 = vadd.f32 %v12599_v5, %v12591_v29 }
 0x61f   : > { %v12666_v62 = vadd.f32 %v12594_v54, %v12586_v50  ;;  %v12672_v20 = vadd.f32 %v12600_v34, %v12592_v32  ;;  %v12673_v9 = vadd.f32 %v12601_v57, %v12593_v61  ;;  %v12675_v37 = vadd.f32 %v12611_v58, %v12603_v33 }
 0x620   : > { %v12674_v48 = vadd.f32 %v12610_v41, %v12602_v1  ;;  %v12676_v45 = vadd.f32 %v12612_v11, %v12604_v7  ;;  %v12677_v31 = vadd.f32 %v12613_v18, %v12605_v21  ;;  %v12678_v15 = vadd.f32 %v12614_v63, %v12606_v49 }
 0x621   : > { %v12679_v30 = vadd.f32 %v12615_v39, %v12607_v47  ;;  %v12680_v19 = vadd.f32 %v12616_v27, %v12608_v22  ;;  %v12681_v46 = vadd.f32 %v12617_v10, %v12609_v17  ;;  %v12731_v55 = vpack.c.bf16 %v12667_v43, %v12667_v43 }
 0x622   : > { %v12732_v40 = vpack.c.bf16 %v12668_v14, %v12668_v14  ;;  %v12733_v26 = vpack.c.bf16 %v12669_v42, %v12669_v42  ;;  %v12734_v38 = vpack.c.bf16 %v12670_v52, %v12670_v52  ;;  %v12735_v56 = vpack.c.bf16 %v12671_v60, %v12671_v60 }
 0x623   : > { %v12730_v16 = vpack.c.bf16 %v12666_v62, %v12666_v62  ;;  %v12736_v44 = vpack.c.bf16 %v12672_v20, %v12672_v20  ;;  %v12737_v25 = vpack.c.bf16 %v12673_v9, %v12673_v9  ;;  %v12739_v29 = vpack.c.bf16 %v12675_v37, %v12675_v37  ;;  %v16272_v62 = vld [vmem:[#allocation2 + $0xd0] sm:$0xf] }
 0x624   : > { %v12738_v50 = vpack.c.bf16 %v12674_v48, %v12674_v48  ;;  %v12740_v32 = vpack.c.bf16 %v12676_v45, %v12676_v45  ;;  %v12741_v61 = vpack.c.bf16 %v12677_v31, %v12677_v31  ;;  %v12742_v54 = vpack.c.bf16 %v12678_v15, %v12678_v15  ;;  %v16273_v45 = vld [vmem:[#allocation2 + $0xd4] sm:$0x1] }
 0x625   : > { %v12743_v24 = vpack.c.bf16 %v12679_v30, %v12679_v30  ;;  %v12744_v3 = vpack.c.bf16 %v12680_v19, %v12680_v19  ;;  %v12745_v36 = vpack.c.bf16 %v12681_v46, %v12681_v46  ;;  %v12867_v8 = vunpack.c.l.b16 %v12731_v55 }
 0x626   : > { %v12868_v4 = vunpack.c.l.b16 %v12732_v40  ;;  %v12869_v53 = vunpack.c.l.b16 %v12733_v26  ;;  %v12870_v5 = vunpack.c.l.b16 %v12734_v38  ;;  %v12871_v34 = vunpack.c.l.b16 %v12735_v56 }
 0x627   : > { %v12866_v57 = vunpack.c.l.b16 %v12730_v16  ;;  %v12872_v1 = vunpack.c.l.b16 %v12736_v44  ;;  %v12873_v33 = vunpack.c.l.b16 %v12737_v25  ;;  %v12875_v7 = vunpack.c.l.b16 %v12739_v29 }
 0x628   : > { %v12874_v21 = vunpack.c.l.b16 %v12738_v50  ;;  %v12876_v49 = vunpack.c.l.b16 %v12740_v32  ;;  %v12877_v2 = vunpack.c.l.b16 %v12741_v61  ;;  %v12878_v47 = vunpack.c.l.b16 %v12742_v54  ;;  %v22253_v61 = vld [vmem:[#allocation51_spill] sm:$0xff] }
 0x629   : > { %v12879_v35 = vunpack.c.l.b16 %v12743_v24  ;;  %v12880_v22 = vunpack.c.l.b16 %v12744_v3  ;;  %v12970_v0 = vrot.slane %v12867_v8, 7  ;;  %v12972_v17 = vrot.slane %v12868_v4, 6 }
 0x62a   : > { %v12881_v59 = vunpack.c.l.b16 %v12745_v36  ;;  %v12974_v58 = vrot.slane %v12869_v53, 5  ;;  %v12976_v12 = vrot.slane %v12870_v5, 4  ;;  %v12978_v41 = vrot.slane %v12871_v34, 3 }
 0x62b   : > { %v12971_v23 = vsel %vm12883_vm9, %v12970_v0, %v12866_v57  ;;  %v12980_v11 = vrot.slane %v12872_v1, 2  ;;  %v12984_v13 = vrot.slane %v12875_v7, 7  ;;  %v12986_v18 = vrot.slane %v12876_v49, 6 }
 0x62c   : > { %v12973_v63 = vsel %vm11572_vm1, %v12972_v17, %v12971_v23  ;;  %v12982_v6 = vrot.slane %v12873_v33, 1  ;;  %v12988_v39 = vrot.slane %v12877_v2, 5  ;;  %v12990_v51 = vrot.slane %v12878_v47, 4 }
 0x62d   : > { %v12975_v27 = vsel %vm12888_vm10, %v12974_v58, %v12973_v63  ;;  %v12985_v10 = vsel %vm12883_vm9, %v12984_v13, %v12874_v21  ;;  %v12992_v43 = vrot.slane %v12879_v35, 3  ;;  %v12994_v14 = vrot.slane %v12880_v22, 2 }
 0x62e   : > { %v12977_v42 = vsel %vm11574_vm2, %v12976_v12, %v12975_v27  ;;  %v12987_v52 = vsel %vm11572_vm1, %v12986_v18, %v12985_v10  ;;  %v14062_v60 = vrot.slane %v9896_v28, 9  ;;  %v10052_v20 = vrot.slane %v16272_v62, 5 }
 0x62f   : > { %v12979_v9 = vsel %vm12893_vm11, %v12978_v41, %v12977_v42  ;;  %v12989_v37 = vsel %vm12888_vm10, %v12988_v39, %v12987_v52  ;;  %v12996_v48 = vrot.slane %v12881_v59, 1  ;;  %v10055_v31 = vrot.slane %v16273_v45, 5 }
 0x630   : > { %v12981_v15 = vsel %vm11576_vm4, %v12980_v11, %v12979_v9  ;;  %v12991_v30 = vsel %vm11574_vm2, %v12990_v51, %v12989_v37  ;;  %v10053_v46 = vsel %vm16862_vm7, %v14062_v60, %v10052_v20  ;;  %v10054_v55 = vrot.slane %v10052_v20, 4 }
 0x631   : > { %v12983_v40 = vsel %vm12898_vm12, %v12982_v6, %v12981_v15  ;;  %v12993_v26 = vsel %vm12893_vm11, %v12992_v43, %v12991_v30  ;;  %v16375_v29 = vmov 1966171168   ;;  %v21491_v30 = vld [vmem:[%s21615_s4] ss:$0 sm:$0xff] }
 0x632   : > { %v12995_v38 = vsel %vm11576_vm4, %v12994_v14, %v12993_v26  ;;  %v10056_v56 = vsel %vm16862_vm7, %v10054_v55, %v10055_v31  ;;  %v10379_v50 = vunpack.c.l.s4 %v16375_v29 }
 0x633   : > { %v12997_v16 = vsel %vm12898_vm12, %v12996_v48, %v12995_v38  ;;  %v14078_v44 = vcombine.low %v10053_v46, %v10056_v56  ;;  %v21495_v56 = vcombine.high %v21491_v30, %v21491_v30 }
 0x634   : > { %v13001_v25 = vpack.c.b16 %v12997_v16, %v12983_v40  ;;  %v10380_v32 = vunpack.c.0.s8 %v10379_v50 }
 0x635   : > { %15472 = vmatmul.mubr.bf16.gmra.mrb[28].mxu1 %v14078_v44 }
 0x636   : > { %15482 = vmatmul.mubr.msk.bf16.gmra.mrb[36].mxu0 %vm782_vm3, %v13001_v25  ;;  %v21474_v54 = vsub.s32 %v10380_v32, %v22253_v61 }
 0x658   : > { %v15445_v24 = vpop.f32.mrb[0].mxu1 }
 0x659   : > { %v10398_v3 = vrot.slane %v15445_v24, %v21474_v54  ;;  %v10219_v36 = vpop.f32.mrb[1].mxu1 }
 0x65a   : > { %v10384_v8 = vrot.slane %v10219_v36, %v21474_v54  ;;  %v15446_v4 = vpop.f32.mrb[2].mxu1 }
 0x65b   : > { %v10636_v53 = vrot.slane %v10398_v3, 4  ;;  %v10405_v5 = vrot.slane %v15446_v4, %v21474_v54  ;;  %v10222_v34 = vpop.f32.mrb[3].mxu1 }
 0x65c   : > { %v10634_v57 = vrot.slane %v10384_v8, 4  ;;  %v10391_v1 = vrot.slane %v10222_v34, %v21474_v54 }
 0x65d   : > { %v10700_v33 = vadd.f32 %v10636_v53, %v10398_v3  ;;  %v10637_v7 = vrot.slane %v10405_v5, 4  ;;  %v21503_v3 = vld [vmem:[%s21617_s6] ss:$0 sm:$0xff] }
 0x65e   : > { %v10698_v21 = vadd.f32 %v10634_v57, %v10384_v8  ;;  %v10635_v49 = vrot.slane %v10391_v1, 4 }
 0x65f   : > { %v10701_v2 = vadd.f32 %v10637_v7, %v10405_v5 }
 0x660   : > { %v10730_v47 = vadd.f32 %v10700_v33, %v10698_v21  ;;  %v10699_v35 = vadd.f32 %v10635_v49, %v10391_v1 }
 0x661   : > { %v15449_v22 = vpop.f32.mrb[4].mxu1 }
 0x662   : > { %v10426_v0 = vrot.slane %v15449_v22, %v21474_v54  ;;  %v10235_v17 = vpop.f32.mrb[5].mxu1  ;;  %v10731_v59 = vadd.f32 %v10701_v2, %v10699_v35  ;;  %v10755_v5 = vadd.f32 %v21491_v30, %v10730_v47 }
 0x663   : > { %v10412_v58 = vrot.slane %v10235_v17, %v21474_v54  ;;  %v15450_v12 = vpop.f32.mrb[6].mxu1 }
 0x664   : > { %v10640_v41 = vrot.slane %v10426_v0, 4  ;;  %v10433_v23 = vrot.slane %v15450_v12, %v21474_v54  ;;  %v10238_v11 = vpop.f32.mrb[7].mxu1  ;;  %v10756_v34 = vadd.f32 %v21495_v56, %v10731_v59 }
 0x665   : > { %v10638_v13 = vrot.slane %v10412_v58, 4  ;;  %v10419_v18 = vrot.slane %v10238_v11, %v21474_v54 }
 0x666   : > { %v10704_v28 = vadd.f32 %v10640_v41, %v10426_v0  ;;  %v10641_v63 = vrot.slane %v10433_v23, 4 }
 0x667   : > { %v10702_v6 = vadd.f32 %v10638_v13, %v10412_v58  ;;  %v10639_v39 = vrot.slane %v10419_v18, 4 }
 0x668   : > { %v10705_v51 = vadd.f32 %v10641_v63, %v10433_v23 }
 0x669   : > { %v10732_v27 = vadd.f32 %v10704_v28, %v10702_v6  ;;  %v10703_v10 = vadd.f32 %v10639_v39, %v10419_v18 }
 0x66a   : > { %v15453_v43 = vpop.f32.mrb[8].mxu1 }
 0x66b   : > { %v10454_v14 = vrot.slane %v15453_v43, %v21474_v54  ;;  %v10251_v42 = vpop.f32.mrb[9].mxu1  ;;  %v10733_v52 = vadd.f32 %v10705_v51, %v10703_v10  ;;  %v10757_v0 = vadd.f32 %v21491_v30, %v10732_v27 }
 0x66c   : > { %v10440_v60 = vrot.slane %v10251_v42, %v21474_v54  ;;  %v15454_v62 = vpop.f32.mrb[10].mxu1 }
 0x66d   : > { %v10644_v20 = vrot.slane %v10454_v14, 4  ;;  %v10461_v9 = vrot.slane %v15454_v62, %v21474_v54  ;;  %v10254_v37 = vpop.f32.mrb[11].mxu1  ;;  %v10758_v47 = vadd.f32 %v21495_v56, %v10733_v52 }
 0x66e   : > { %v10642_v48 = vrot.slane %v10440_v60, 4  ;;  %v10447_v45 = vrot.slane %v10254_v37, %v21474_v54 }
 0x66f   : > { %v10708_v31 = vadd.f32 %v10644_v20, %v10454_v14  ;;  %v10645_v15 = vrot.slane %v10461_v9, 4 }
 0x670   : > { %v10706_v19 = vadd.f32 %v10642_v48, %v10440_v60  ;;  %v10643_v46 = vrot.slane %v10447_v45, 4 }
 0x671   : > { %v10709_v55 = vadd.f32 %v10645_v15, %v10461_v9 }
 0x672   : > { %v10734_v40 = vadd.f32 %v10708_v31, %v10706_v19  ;;  %v10707_v26 = vadd.f32 %v10643_v46, %v10447_v45  ;;  %v15457_v38 = vpop.f32.mrb[12].mxu1 }
 0x673   : > { %v10482_v16 = vrot.slane %v15457_v38, %v21474_v54  ;;  %v10267_v44 = vpop.f32.mrb[13].mxu1 }
 0x674   : > { %v10735_v25 = vadd.f32 %v10709_v55, %v10707_v26  ;;  %v10468_v29 = vrot.slane %v10267_v44, %v21474_v54  ;;  %v15458_v50 = vpop.f32.mrb[14].mxu1  ;;  %v10759_v36 = vadd.f32 %v21491_v30, %v10734_v40 }
 0x675   : > { %v10648_v32 = vrot.slane %v10482_v16, 4  ;;  %v10489_v61 = vrot.slane %v15458_v50, %v21474_v54  ;;  %v10270_v24 = vpop.f32.mrb[15].mxu1  ;;  %v15479_v53 = vpop.f32.mrb[32].mxu0 }
 0x676   : > { %v10646_v8 = vrot.slane %v10468_v29, 4  ;;  %v10475_v4 = vrot.slane %v10270_v24, %v21474_v54  ;;  %v13060_v33 = vadd.f32 %v15479_v53, %v21503_v3  ;;  %v13051_v7 = vpop.f32.mrb[33].mxu0  ;;  %v10760_v21 = vadd.f32 %v21495_v56, %v10735_v25 }
 0x677   : > { %v10712_v57 = vadd.f32 %v10648_v32, %v10482_v16  ;;  %v10649_v1 = vrot.slane %v10489_v61, 4  ;;  %v13052_v35 = vadd.f32 %v21503_v3, %v13051_v7  ;;  %v15480_v22 = vpop.f32.mrb[34].mxu0 }
 0x678   : > { %v10710_v49 = vadd.f32 %v10646_v8, %v10468_v29  ;;  %v10647_v2 = vrot.slane %v10475_v4, 4  ;;  %v13092_v59 = vcombine.high %v13060_v33, %v13060_v33  ;;  %v13063_v58 = vadd.f32 %v15480_v22, %v21503_v3  ;;  %v13054_v41 = vpop.f32.mrb[35].mxu0 }
 0x679   : > { %v10713_v17 = vadd.f32 %v10649_v1, %v10489_v61  ;;  %v13110_v12 = vadd.f32 %v13060_v33, %v10759_v36  ;;  %v13090_v13 = vcombine.high %v13052_v35, %v13052_v35  ;;  %v13106_v18 = vadd.f32 %v13052_v35, %v10755_v5 }
 0x67a   : > { %v10736_v23 = vadd.f32 %v10712_v57, %v10710_v49  ;;  %v15461_v11 = vpop.f32.mrb[16].mxu1  ;;  %v13055_v28 = vadd.f32 %v21503_v3, %v13054_v41  ;;  %v10711_v63 = vadd.f32 %v10647_v2, %v10475_v4  ;;  %v13093_v39 = vcombine.high %v13063_v58, %v13063_v58 }
 0x67b   : > { %v10283_v6 = vpop.f32.mrb[17].mxu1  ;;  %v13111_v51 = vadd.f32 %v13092_v59, %v10760_v21  ;;  %v10510_v10 = vrot.slane %v15461_v11, %v21474_v54  ;;  %v13107_v14 = vadd.f32 %v13090_v13, %v10756_v34 }
 0x67c   : > { %v10761_v27 = vadd.f32 %v21491_v30, %v10736_v23  ;;  %v15462_v43 = vpop.f32.mrb[18].mxu1  ;;  %v13091_v42 = vcombine.high %v13055_v28, %v13055_v28  ;;  %v13108_v52 = vadd.f32 %v13055_v28, %v10757_v0  ;;  %v10737_v60 = vadd.f32 %v10713_v17, %v10711_v63 }
 0x67d   : > { %v10286_v62 = vpop.f32.mrb[19].mxu1  ;;  %v13140_v20 = vcombine.low %v13110_v12, %v13111_v51  ;;  %v10652_v37 = vrot.slane %v10510_v10, 4  ;;  %v10496_v48 = vrot.slane %v10283_v6, %v21474_v54  ;;  %v13138_v45 = vcombine.low %v13106_v18, %v13107_v14 }
 0x67e   : > { %v13112_v9 = vadd.f32 %v13063_v58, %v10761_v27  ;;  %v13109_v31 = vadd.f32 %v13091_v42, %v10758_v47  ;;  %v10762_v15 = vadd.f32 %v21495_v56, %v10737_v60  ;;  %v10517_v19 = vrot.slane %v15462_v43, %v21474_v54 }
 0x67f   : > { %13156 = vst [vmem:[%s21524_s23 + $0x10] sm:$0xff] %v13140_v20  ;;  %v10716_v46 = vadd.f32 %v10652_v37, %v10510_v10  ;;  %v10650_v55 = vrot.slane %v10496_v48, 4  ;;  %v10503_v40 = vrot.slane %v10286_v62, %v21474_v54  ;;  %13154 = vst [vmem:[%s21524_s23] sm:$0xff] %v13138_v45 }
 0x680   : > { %v13139_v26 = vcombine.low %v13108_v52, %v13109_v31  ;;  %v13113_v38 = vadd.f32 %v13093_v39, %v10762_v15  ;;  %v10653_v16 = vrot.slane %v10517_v19, 4 }
 0x681   : > { %v10714_v44 = vadd.f32 %v10650_v55, %v10496_v48  ;;  %v10651_v25 = vrot.slane %v10503_v40, 4 }
 0x682   : > { %13155 = vst [vmem:[%s21524_s23 + $0x8] sm:$0xff] %v13139_v26  ;;  %v13141_v50 = vcombine.low %v13112_v9, %v13113_v38  ;;  %v10717_v32 = vadd.f32 %v10653_v16, %v10517_v19 }
 0x683   : > { %v10738_v61 = vadd.f32 %v10716_v46, %v10714_v44  ;;  %v10715_v24 = vadd.f32 %v10651_v25, %v10503_v40 }
 0x684   : > { %v15465_v29 = vpop.f32.mrb[20].mxu1  ;;  %13157 = vst [vmem:[%s21524_s23 + $0x18] sm:$0xff] %v13141_v50 }
 0x685   : > { %v10739_v36 = vadd.f32 %v10717_v32, %v10715_v24  ;;  %v10538_v8 = vrot.slane %v15465_v29, %v21474_v54  ;;  %v10299_v53 = vpop.f32.mrb[21].mxu1  ;;  %v10763_v20 = vadd.f32 %v21491_v30, %v10738_v61 }
 0x686   : > { %v10524_v5 = vrot.slane %v10299_v53, %v21474_v54  ;;  %v15466_v7 = vpop.f32.mrb[22].mxu1 }
 0x687   : > { %v10656_v4 = vrot.slane %v10538_v8, 4  ;;  %v10545_v21 = vrot.slane %v15466_v7, %v21474_v54  ;;  %v10302_v49 = vpop.f32.mrb[23].mxu1  ;;  %v10764_v45 = vadd.f32 %v21495_v56, %v10739_v36 }
 0x688   : > { %v10654_v57 = vrot.slane %v10524_v5, 4  ;;  %v10531_v2 = vrot.slane %v10302_v49, %v21474_v54 }
 0x689   : > { %v10720_v34 = vadd.f32 %v10656_v4, %v10538_v8  ;;  %v10657_v22 = vrot.slane %v10545_v21, 4 }
 0x68a   : > { %v10718_v1 = vadd.f32 %v10654_v57, %v10524_v5  ;;  %v10655_v17 = vrot.slane %v10531_v2, 4 }
 0x68b   : > { %v10721_v12 = vadd.f32 %v10657_v22, %v10545_v21 }
 0x68c   : > { %v10740_v33 = vadd.f32 %v10720_v34, %v10718_v1  ;;  %v15469_v35 = vpop.f32.mrb[24].mxu1  ;;  %v10719_v13 = vadd.f32 %v10655_v17, %v10531_v2 }
 0x68d   : > { %v10566_v0 = vrot.slane %v15469_v35, %v21474_v54  ;;  %v10315_v47 = vpop.f32.mrb[25].mxu1 }
 0x68e   : > { %v10552_v59 = vrot.slane %v10315_v47, %v21474_v54  ;;  %v15470_v58 = vpop.f32.mrb[26].mxu1  ;;  %v10741_v39 = vadd.f32 %v10721_v12, %v10719_v13  ;;  %v10765_v26 = vadd.f32 %v21491_v30, %v10740_v33 }
 0x68f   : > { %v10660_v41 = vrot.slane %v10566_v0, 4  ;;  %v10573_v23 = vrot.slane %v15470_v58, %v21474_v54  ;;  %v10318_v11 = vpop.f32.mrb[27].mxu1 }
 0x690   : > { %v10658_v18 = vrot.slane %v10552_v59, 4  ;;  %v10559_v28 = vrot.slane %v10318_v11, %v21474_v54  ;;  %v10766_v50 = vadd.f32 %v21495_v56, %v10741_v39 }
 0x691   : > { %v10724_v63 = vadd.f32 %v10660_v41, %v10566_v0  ;;  %v10661_v6 = vrot.slane %v10573_v23, 4 }
 0x692   : > { %v10722_v51 = vadd.f32 %v10658_v18, %v10552_v59  ;;  %v10659_v27 = vrot.slane %v10559_v28, 4 }
 0x693   : > { %v10725_v10 = vadd.f32 %v10661_v6, %v10573_v23 }
 0x694   : > { %v10742_v43 = vadd.f32 %v10724_v63, %v10722_v51  ;;  %v10723_v14 = vadd.f32 %v10659_v27, %v10559_v28 }
 0x696   : > { %v10743_v42 = vadd.f32 %v10725_v10, %v10723_v14  ;;  %v10767_v52 = vadd.f32 %v21491_v30, %v10742_v43 }
 0x698   : > { %v10768_v15 = vadd.f32 %v21495_v56, %v10743_v42 }
 0x708   : > { %v15473_v60 = vpop.f32.mrb[28].mxu1 }
 0x709   : > { %v15483_v62 = vpop.f32.mrb[36].mxu0  ;;  %v10594_v9 = vrot.slane %v15473_v60, %v21474_v54  ;;  %v10331_v37 = vpop.f32.mrb[29].mxu1 }
 0x70a   : > { %v13076_v48 = vadd.f32 %v15483_v62, %v21503_v3  ;;  %v13067_v31 = vpop.f32.mrb[37].mxu0  ;;  %v10580_v19 = vrot.slane %v10331_v37, %v21474_v54  ;;  %v15474_v46 = vpop.f32.mrb[30].mxu1 }
 0x70b   : > { %v13068_v55 = vadd.f32 %v21503_v3, %v13067_v31  ;;  %v15484_v40 = vpop.f32.mrb[38].mxu0  ;;  %v10664_v38 = vrot.slane %v10594_v9, 4  ;;  %v10601_v16 = vrot.slane %v15474_v46, %v21474_v54  ;;  %v10334_v44 = vpop.f32.mrb[31].mxu1 }
 0x70c   : > { %v13096_v25 = vcombine.high %v13076_v48, %v13076_v48  ;;  %v13118_v29 = vadd.f32 %v13076_v48, %v10767_v52  ;;  %v13070_v32 = vpop.f32.mrb[39].mxu0  ;;  %v10662_v61 = vrot.slane %v10580_v19, 4  ;;  %v10587_v7 = vrot.slane %v10334_v44, %v21474_v54 }
 0x70d   : > { %v13094_v24 = vcombine.high %v13068_v55, %v13068_v55  ;;  %v13114_v36 = vadd.f32 %v13068_v55, %v10763_v20  ;;  %v13071_v8 = vadd.f32 %v21503_v3, %v13070_v32  ;;  %v10728_v4 = vadd.f32 %v10664_v38, %v10594_v9 }
 0x70e   : > { %v13119_v53 = vadd.f32 %v13096_v25, %v10768_v15  ;;  %v10726_v5 = vadd.f32 %v10662_v61, %v10580_v19  ;;  %v10665_v34 = vrot.slane %v10601_v16, 4  ;;  %v10663_v0 = vrot.slane %v10587_v7, 4 }
 0x70f   : > { %v13115_v57 = vadd.f32 %v13094_v24, %v10764_v45  ;;  %v13095_v1 = vcombine.high %v13071_v8, %v13071_v8  ;;  %v13116_v33 = vadd.f32 %v13071_v8, %v10765_v26  ;;  %v13079_v47 = vadd.f32 %v15484_v40, %v21503_v3 }
 0x710   : > { %v13144_v21 = vcombine.low %v13118_v29, %v13119_v53  ;;  %v10744_v49 = vadd.f32 %v10728_v4, %v10726_v5  ;;  %v10729_v22 = vadd.f32 %v10665_v34, %v10601_v16  ;;  %v10727_v58 = vadd.f32 %v10663_v0, %v10587_v7 }
 0x711   : > { %v13142_v2 = vcombine.low %v13114_v36, %v13115_v57  ;;  %v13117_v35 = vadd.f32 %v13095_v1, %v10766_v50  ;;  %v13097_v41 = vcombine.high %v13079_v47, %v13079_v47 }
 0x712   : > { %13160 = vst [vmem:[%s21524_s23 + $0x30] sm:$0xff] %v13144_v21  ;;  %v10769_v17 = vadd.f32 %v21491_v30, %v10744_v49  ;;  %v10745_v12 = vadd.f32 %v10729_v22, %v10727_v58 }
 0x713   : > { %13158 = vst [vmem:[%s21524_s23 + $0x20] sm:$0xff] %v13142_v2  ;;  %v13143_v59 = vcombine.low %v13116_v33, %v13117_v35 }
 0x714   : > { %v13120_v54 = vadd.f32 %v13079_v47, %v10769_v17  ;;  %v10770_v23 = vadd.f32 %v21495_v56, %v10745_v12 }
 0x715   : > { %13159 = vst [vmem:[%s21524_s23 + $0x28] sm:$0xff] %v13143_v59 }
 0x716   : > { %v13121_v11 = vadd.f32 %v13097_v41, %v10770_v23 }
 0x718   : > { %v13145_v30 = vcombine.low %v13120_v54, %v13121_v11 }
 0x71a   : > { %13161 = vst [vmem:[%s21524_s23 + $0x38] sm:$0xff] %v13145_v30 }
 0x71b   : > { %16315 = shalt.err (!%p16312_p7)
}
 0x71c   : > { %s16316_s16 = scalar_lea.hbm %s21563_s17, 1024  ;;  %s16320_s22 = scalar_lea.hbm %s21618_s7, 2048 }
 0x71d   : > { %p16317_p8 = scmp.ne.s32.totalorder %s21563_s17, %s16316_s16  ;;  %p16321_p1 = scmp.lt.u32.totalorder %s21563_s17, %s21618_s7 }
 0x71e   : > { %p16322_p0 = scmp.lt.u32.totalorder %s16320_s22, %s16316_s16  ;;  %p16324_p6 = scmp.lt.u32.totalorder %s16316_s16, %s21563_s17 }
 0x71f   : > { %p16318_p11 = pnand %p16317_p8, %p22254_p9 }
 0x720   : > { %p16323_p5 = por %p16322_p0, %p16321_p1 }
 0x721   : > { %p16319_p13 = pneg %p16318_p11 }
 0x722   : > { %p16325_p10 = por %p16324_p6, %p16323_p5 }
 0x724   : > { %p16326_p12 = pnand %p16325_p10, %p16319_p13 }
 0x726   : > { %16329 = shalt.err (!%p16326_p12)
}
 0x727   : > { %s16377_s9 = smov 128   ;;  %s16378_s14 = smov 8  }
 0x728   : > { %16012 = dma.vmem_to_hbm [thread:$0]  (%p22254_p9), %s21565_s8, 1024, %s21563_s17, %s21570_s18, %s16377_s9, %s16377_s9, %s16378_s14  }
 0x729 PF: > { %p16024_p2 = scmp.ge.s32.totalorder %s16368_s27, 2  ;;  %s13191_s19 = sand.u32 1, %s16356_s24  }
 0x72a   : > { %p22255_p3 = scmp.ne.s32.totalorder %s21792_s12, 0  ;;  %s13192_s28 = scalar_lea.sflag [#allocation5], %s13191_s19 }
 0x72c   : > { %p16019_p4 = pnand %p16024_p2, %p22255_p3 }
 0x72e   : > { %16351 = dma.done.wait (!%p16019_p4), %s13192_s28, 1024  }
 0x72f   : > { %16353 = vsyncadd (!%p16019_p4), %s13192_s28, 4294966272  ;;  %p18_p7 = scmp.ge.s32.totalorder %s16444_s30, 4   ;;  %s22256_s24 = smov %s16360_s25 }
 0x730   : > { %s22257_s25 = smov %s16364_s26  ;;  %s22258_s26 = smov %s16455_s10 }
 0x731   : > { %s22259_s27 = smov %s16444_s30  ;;  %20 = sbr.rel (!%p18_p7) target bundleno = 4 (0x4), region = 93 }
 0x738   :  { %13197 = vsyncpa [#allocation4], 1 }
 0x739   :  { %13199 = vsyncpa [#allocation4 + $0x1], 1 }
 0x73a   :  { %13200 = vsyncpa [#allocation5], 1 }
 0x73b   :  { %13202 = vsyncpa [#allocation5 + $0x1], 1 }

</bundles_post_ra>
